<compile_context>
chip_gen: v5e
topology: v5e:2x2
jax: 0.10.0
libtpu: 0.0.40
codegen_flags: <defaults>
</compile_context>

<pallas_src>
import functools

import jax
import jax.numpy as jnp
from jax import lax
from jax.experimental import pallas as pl
from jax.experimental.pallas import tpu as pltpu

F32 = jnp.float32
BF16 = jnp.bfloat16
N_TIME = 1280


def _silu(x):
    return x * (1.0 / (1.0 + jnp.exp(-x)))


# ---------------------------------------------------------------------------
# Kernel 1: fused GroupNorm(32) + SiLU (NHWC rows, channels on the lanes)
# ---------------------------------------------------------------------------
def _gn_silu_kernel(x_ref, mask_ref, g_ref, b_ref, o_ref, *, eps):
    x = x_ref[0].astype(jnp.float32)                               # (HW, C)
    inv_hw = 1.0 / x.shape[0]
    chan_mean = jnp.sum(x, axis=0, keepdims=True) * inv_hw         # (1, C)
    chan_sqmean = jnp.sum(x * x, axis=0, keepdims=True) * inv_hw   # (1, C)
    # group-average broadcast back to every channel via a (1,C)@(C,C) matmul
    mean = jnp.dot(chan_mean, mask_ref[...], preferred_element_type=jnp.float32)
    sqmean = jnp.dot(chan_sqmean, mask_ref[...], preferred_element_type=jnp.float32)
    var = sqmean - mean * mean
    y = (x - mean) * lax.rsqrt(var + eps)
    y = y * g_ref[...] + b_ref[...]
    o_ref[0] = _silu(y).astype(o_ref.dtype)


def group_norm_silu(x, gamma, beta, *, num_groups=32, eps=1e-5, out_dtype=BF16):
    """x: (B, H, W, C) -> GroupNorm(num_groups) + SiLU, returned in out_dtype."""
    B, H, W, C = x.shape
    gc = C // num_groups
    HW = H * W
    gid = jnp.arange(C, dtype=jnp.int32) // gc
    mask = (gid[:, None] == gid[None, :]).astype(F32) / float(gc)  # (C, C)
    # TODO(synk): for large H*W, tile the HW axis and switch to a two-pass reduction.
    out = pl.pallas_call(
        functools.partial(_gn_silu_kernel, eps=eps),
        out_shape=jax.ShapeDtypeStruct((B, HW, C), out_dtype),
        grid=(B,),
        in_specs=[
            pl.BlockSpec((1, HW, C), lambda b: (b, 0, 0)),
            pl.BlockSpec((C, C), lambda b: (0, 0)),
            pl.BlockSpec((1, C), lambda b: (0, 0)),
            pl.BlockSpec((1, C), lambda b: (0, 0)),
        ],
        out_specs=pl.BlockSpec((1, HW, C), lambda b: (b, 0, 0)),
        compiler_params=pltpu.CompilerParams(dimension_semantics=("parallel",)),
    )(x.reshape(B, HW, C), mask,
      gamma.reshape(1, C).astype(F32), beta.reshape(1, C).astype(F32))
    return out.reshape(B, H, W, C)


# ---------------------------------------------------------------------------
# Kernel 2: 3x3 conv (padding=1), im2col-free, bias / time / residual fused
# ---------------------------------------------------------------------------
def _conv3x3_kernel(*refs, W, L, res_mode):
    if res_mode == "none":
        x_ref, w_ref, b_ref, o_ref = refs
    elif res_mode == "add":
        x_ref, w_ref, b_ref, r_ref, o_ref = refs
    else:  # "proj"
        x_ref, w_ref, b_ref, r_ref, rw_ref, rb_ref, o_ref = refs

    acc = jnp.zeros(o_ref.shape[1:], jnp.float32)                  # (L, Cout)
    for t in range(9):                                             # 3x3 taps
        dy, dx = divmod(t, 3)
        s = dy * (W + 2) + dx                                      # static shift
        xs = x_ref[0, s:s + L, :]                                  # (L, Cin) bf16
        acc = acc + jnp.dot(xs, w_ref[t], preferred_element_type=jnp.float32)
    acc = acc + b_ref[...]
    if res_mode == "add":
        acc = acc + r_ref[0]
    elif res_mode == "proj":
        r = r_ref[0].astype(jnp.bfloat16)
        acc = (acc + jnp.dot(r, rw_ref[...], preferred_element_type=jnp.float32)
               + rb_ref[...])
    o_ref[0] = acc.astype(o_ref.dtype)


def conv3x3(x, w9, bias, residual=None, res_w=None, res_b=None):
    """x: (B, H, W, Cin); w9: (9, Cin, Cout) tap-major HWIO; bias: (Cout,).

    residual (optional): (B, H, W, Cr) added in the epilogue; when res_w/res_b
    are given it is first projected by a fused 1x1 conv (Cr -> Cout)."""
    B, H, W, Cin = x.shape
    Cout = w9.shape[-1]
    P = (H + 2) * (W + 2)
    L = H * (W + 2) - 2          # band of flattened rows covering every output

    xflat = jnp.pad(x.astype(BF16), ((0, 0), (1, 1), (1, 1), (0, 0)))
    xflat = xflat.reshape(B, P, Cin)

    if residual is None:
        res_mode = "none"
    elif res_w is None:
        res_mode = "add"
    else:
        res_mode = "proj"

    in_specs = [
        pl.BlockSpec((1, P, Cin), lambda b: (b, 0, 0)),
        pl.BlockSpec((9, Cin, Cout), lambda b: (0, 0, 0)),
        pl.BlockSpec((1, Cout), lambda b: (0, 0)),
    ]
    args = [xflat, w9.astype(BF16), bias.reshape(1, Cout).astype(F32)]

    if res_mode != "none":
        Cr = residual.shape[-1]
        rband = jnp.pad(residual.astype(F32), ((0, 0), (0, 0), (0, 2), (0, 0)))
        rband = rband.reshape(B, H * (W + 2), Cr)[:, :L, :]
        in_specs.append(pl.BlockSpec((1, L, Cr), lambda b: (b, 0, 0)))
        args.append(rband)
    if res_mode == "proj":
        Cr = residual.shape[-1]
        in_specs.append(pl.BlockSpec((Cr, Cout), lambda b: (0, 0)))
        in_specs.append(pl.BlockSpec((1, Cout), lambda b: (0, 0)))
        args += [res_w.astype(BF16), res_b.reshape(1, Cout).astype(F32)]

    # TODO(synk): for Cout > ~512 or large H*W, add Cout / row tiling to the grid.
    band = pl.pallas_call(
        functools.partial(_conv3x3_kernel, W=W, L=L, res_mode=res_mode),
        out_shape=jax.ShapeDtypeStruct((B, L, Cout), F32),
        grid=(B,),
        in_specs=in_specs,
        out_specs=pl.BlockSpec((1, L, Cout), lambda b: (b, 0, 0)),
        compiler_params=pltpu.CompilerParams(dimension_semantics=("parallel",)),
    )(*args)

    band = jnp.pad(band, ((0, 0), (0, 2), (0, 0)))            # L -> H*(W+2)
    return band.reshape(B, H, W + 2, Cout)[:, :, :W, :]       # drop pad columns


# ---------------------------------------------------------------------------
# ResidualBlock forward
# ---------------------------------------------------------------------------
@jax.jit
def residual_block(params, feature, time):
    """feature: (B, Cin, H, W) f32, time: (1, 1280) f32 -> (B, Cout, H, W) f32."""
    x = jnp.transpose(feature, (0, 2, 3, 1))                  # NHWC once

    # tiny (1,1280) time path in plain JAX; folded into conv1's bias
    t = jax.nn.silu(time.astype(F32))
    t = jnp.dot(t, params["time_w"], preferred_element_type=F32) + params["time_b"]

    h = group_norm_silu(x, params["gn1_g"], params["gn1_b"])
    h = conv3x3(h, params["conv1_w"], params["conv1_b"] + t[0])
    h = group_norm_silu(h, params["gn2_g"], params["gn2_b"])
    out = conv3x3(h, params["conv2_w"], params["conv2_b"],
                  residual=x,
                  res_w=params.get("res_w"), res_b=params.get("res_b"))
    return jnp.transpose(out, (0, 3, 1, 2))


# ---------------------------------------------------------------------------
# Deterministic synthetic parameters (PyTorch layouts, pre-prepped for TPU)
# ---------------------------------------------------------------------------
def make_params(key, cin, cout, n_time=N_TIME):
    ks = iter(jax.random.split(key, 16))

    def rnd(shape, scale=0.05):
        return scale * jax.random.normal(next(ks), shape, F32)

    def conv_w(ci, co, k):
        w = rnd((co, ci, k, k))                          # PyTorch OIHW
        w = jnp.transpose(w, (2, 3, 1, 0))               # HWIO
        return w.reshape(k * k, ci, co).astype(BF16)     # tap-major, MXU-ready

    p = {
        "gn1_g": jnp.ones((cin,), F32), "gn1_b": rnd((cin,), 0.01),
        "conv1_w": conv_w(cin, cout, 3), "conv1_b": rnd((cout,), 0.01),
        "time_w": rnd((n_time, cout)), "time_b": rnd((cout,), 0.01),
        "gn2_g": jnp.ones((cout,), F32), "gn2_b": rnd((cout,), 0.01),
        "conv2_w": conv_w(cout, cout, 3), "conv2_b": rnd((cout,), 0.01),
    }
    if cin != cout:
        w = rnd((cout, cin, 1, 1)).reshape(cout, cin)
        p["res_w"] = jnp.transpose(w).astype(BF16)       # (cin, cout)
        p["res_b"] = rnd((cout,), 0.01)
    return p


@jax.jit
def reference_block(params, feature, time):
    """Plain-JAX/XLA reference using the same (bf16-rounded) weights."""
    B = feature.shape[0]

    def gn(x, g, b):
        xb = x.reshape(B, 32, -1)
        m = jnp.mean(xb, axis=-1, keepdims=True)
        v = jnp.mean((xb - m) ** 2, axis=-1, keepdims=True)
        xn = ((xb - m) / jnp.sqrt(v + 1e-5)).reshape(x.shape)
        return xn * g[None, :, None, None] + b[None, :, None, None]

    def conv(x, w9, bias):
        _, ci, co = w9.shape
        w = w9.astype(F32).reshape(3, 3, ci, co)
        y = lax.conv_general_dilated(
            x, w, window_strides=(1, 1), padding=[(1, 1), (1, 1)],
            dimension_numbers=("NCHW", "HWIO", "NCHW"))
        return y + bias[None, :, None, None]

    h = jax.nn.silu(gn(feature, params["gn1_g"], params["gn1_b"]))
    h = conv(h, params["conv1_w"], params["conv1_b"])
    t = jnp.dot(jax.nn.silu(time), params["time_w"]) + params["time_b"]
    m = h + t[0][None, :, None, None]
    m = jax.nn.silu(gn(m, params["gn2_g"], params["gn2_b"]))
    m = conv(m, params["conv2_w"], params["conv2_b"])
    if "res_w" in params:
        res = (jnp.einsum("bchw,cd->bdhw", feature, params["res_w"].astype(F32))
               + params["res_b"][None, :, None, None])
    else:
        res = feature
    return m + res


if __name__ == "__main__":
    key = jax.random.PRNGKey(0)
    kp1, kp2, kf, kt = jax.random.split(key, 4)
    B, H, W = 2, 16, 16
    feature = jax.random.normal(kf, (B, 64, H, W), F32)
    time = jax.random.normal(kt, (1, N_TIME), F32)

    # Case 1: in_channels != out_channels -> 1x1 residual projection fused into conv2
    p1 = make_params(kp1, 64, 128)
    out1 = jax.block_until_ready(residual_block(p1, feature, time))
    assert out1.shape == (B, 128, H, W), out1.shape
    ref1 = jax.block_until_ready(reference_block(p1, feature, time))
    err1 = float(jnp.max(jnp.abs(out1 - ref1)))
    scale1 = float(jnp.max(jnp.abs(ref1)))
    assert err1 <= 0.05 * (1.0 + scale1), (err1, scale1)

    # Case 2: in_channels == out_channels -> identity residual fused as a plain add
    p2 = make_params(kp2, 64, 64)
    out2 = jax.block_until_ready(residual_block(p2, feature, time))
    assert out2.shape == (B, 64, H, W), out2.shape
    ref2 = jax.block_until_ready(reference_block(p2, feature, time))
    err2 = float(jnp.max(jnp.abs(out2 - ref2)))
    scale2 = float(jnp.max(jnp.abs(ref2)))
    assert err2 <= 0.05 * (1.0 + scale2), (err2, scale2)

    assert bool(jnp.all(jnp.isfinite(out1))) and bool(jnp.all(jnp.isfinite(out2)))
    print("KERNEL_OK")
</pallas_src>

<mosaic_0001>
module attributes {stable_mosaic.version = 11 : i64} {
  func.func @_gn_silu_kernel(%arg0: i32, %arg1: memref<1x256x64xf32, #tpu.memory_space<vmem>>, %arg2: memref<64x64xf32, #tpu.memory_space<vmem>>, %arg3: memref<1x64xf32, #tpu.memory_space<vmem>>, %arg4: memref<1x64xf32, #tpu.memory_space<vmem>>, %arg5: memref<1x256x64xbf16, #tpu.memory_space<vmem>>) attributes {dimension_semantics = [#tpu.dimension_semantics<parallel>], iteration_bounds = array<i64: 2>, scalar_prefetch = 0 : i64, scratch_operands = 0 : i64, tpu.core_type = #tpu.core_type<tc>, window_params = [{transform_indices = @transform_0, window_bounds = array<i64: 1, 256, 64>}, {pipeline_mode = #tpu.pipeline_mode<synchronous>, transform_indices = @transform_1, window_bounds = array<i64: 64, 64>}, {pipeline_mode = #tpu.pipeline_mode<synchronous>, transform_indices = @transform_2, window_bounds = array<i64: 1, 64>}, {pipeline_mode = #tpu.pipeline_mode<synchronous>, transform_indices = @transform_3, window_bounds = array<i64: 1, 64>}, {transform_indices = @transform_4, window_bounds = array<i64: 1, 256, 64>}]} {
    %c0 = arith.constant 0 : index
    %c0_0 = arith.constant 0 : index
    %c0_1 = arith.constant 0 : index
    %0 = vector.load %arg1[%c0, %c0_0, %c0_1] : memref<1x256x64xf32, #tpu.memory_space<vmem>>, vector<1x256x64xf32>
    %1 = vector.shape_cast %0 : vector<1x256x64xf32> to vector<256x64xf32>
    %cst = arith.constant dense<0.000000e+00> : vector<64xf32>
    %2 = vector.multi_reduction <add>, %1, %cst [0] : vector<256x64xf32> to vector<64xf32>
    %3 = vector.shape_cast %2 : vector<64xf32> to vector<1x64xf32>
    %cst_2 = arith.constant 3.906250e-03 : f32
    %4 = vector.broadcast %cst_2 : f32 to vector<1x64xf32>
    %5 = arith.mulf %3, %4 : vector<1x64xf32>
    %6 = arith.mulf %1, %1 : vector<256x64xf32>
    %cst_3 = arith.constant dense<0.000000e+00> : vector<64xf32>
    %7 = vector.multi_reduction <add>, %6, %cst_3 [0] : vector<256x64xf32> to vector<64xf32>
    %8 = vector.shape_cast %7 : vector<64xf32> to vector<1x64xf32>
    %cst_4 = arith.constant 3.906250e-03 : f32
    %9 = vector.broadcast %cst_4 : f32 to vector<1x64xf32>
    %10 = arith.mulf %8, %9 : vector<1x64xf32>
    %c0_5 = arith.constant 0 : index
    %c0_6 = arith.constant 0 : index
    %11 = vector.load %arg2[%c0_5, %c0_6] : memref<64x64xf32, #tpu.memory_space<vmem>>, vector<64x64xf32>
    %cst_7 = arith.constant dense<0.000000e+00> : vector<1x64xf32>
    %12 = tpu.matmul %5, %11, %cst_7 {dimension_numbers = #tpu.dot_dimension_numbers<[1], [0], [0], [1], [0, 0, 1, 1], [], []>} : vector<1x64xf32>, vector<64x64xf32>, vector<1x64xf32> -> vector<1x64xf32>
    %c0_8 = arith.constant 0 : index
    %c0_9 = arith.constant 0 : index
    %13 = vector.load %arg2[%c0_8, %c0_9] : memref<64x64xf32, #tpu.memory_space<vmem>>, vector<64x64xf32>
    %cst_10 = arith.constant dense<0.000000e+00> : vector<1x64xf32>
    %14 = tpu.matmul %10, %13, %cst_10 {dimension_numbers = #tpu.dot_dimension_numbers<[1], [0], [0], [1], [0, 0, 1, 1], [], []>} : vector<1x64xf32>, vector<64x64xf32>, vector<1x64xf32> -> vector<1x64xf32>
    %15 = arith.mulf %12, %12 : vector<1x64xf32>
    %16 = arith.subf %14, %15 : vector<1x64xf32>
    %17 = vector.broadcast %12 : vector<1x64xf32> to vector<256x64xf32>
    %18 = arith.subf %1, %17 : vector<256x64xf32>
    %cst_11 = arith.constant 9.99999974E-6 : f32
    %19 = vector.broadcast %cst_11 : f32 to vector<1x64xf32>
    %20 = arith.addf %16, %19 : vector<1x64xf32>
    %21 = math.rsqrt %20 : vector<1x64xf32>
    %22 = vector.broadcast %21 : vector<1x64xf32> to vector<256x64xf32>
    %23 = arith.mulf %18, %22 : vector<256x64xf32>
    %c0_12 = arith.constant 0 : index
    %c0_13 = arith.constant 0 : index
    %24 = vector.load %arg3[%c0_12, %c0_13] : memref<1x64xf32, #tpu.memory_space<vmem>>, vector<1x64xf32>
    %25 = vector.broadcast %24 : vector<1x64xf32> to vector<256x64xf32>
    %26 = arith.mulf %23, %25 : vector<256x64xf32>
    %c0_14 = arith.constant 0 : index
    %c0_15 = arith.constant 0 : index
    %27 = vector.load %arg4[%c0_14, %c0_15] : memref<1x64xf32, #tpu.memory_space<vmem>>, vector<1x64xf32>
    %28 = vector.broadcast %27 : vector<1x64xf32> to vector<256x64xf32>
    %29 = arith.addf %26, %28 : vector<256x64xf32>
    %cst_16 = arith.constant 0.000000e+00 : f32
    %30 = vector.broadcast %cst_16 : f32 to vector<256x64xf32>
    %31 = arith.subf %30, %29 : vector<256x64xf32>
    %32 = math.exp %31 : vector<256x64xf32>
    %cst_17 = arith.constant 1.000000e+00 : f32
    %33 = vector.broadcast %cst_17 : f32 to vector<256x64xf32>
    %34 = arith.addf %33, %32 : vector<256x64xf32>
    %cst_18 = arith.constant 1.000000e+00 : f32
    %35 = vector.broadcast %cst_18 : f32 to vector<256x64xf32>
    %36 = arith.divf %35, %34 : vector<256x64xf32>
    %37 = arith.mulf %29, %36 : vector<256x64xf32>
    %38 = arith.truncf %37 : vector<256x64xf32> to vector<256x64xbf16>
    %c0_19 = arith.constant 0 : index
    %c0_20 = arith.constant 0 : index
    %c0_21 = arith.constant 0 : index
    %39 = vector.load %arg5[%c0_19, %c0_20, %c0_21] : memref<1x256x64xbf16, #tpu.memory_space<vmem>>, vector<1x256x64xbf16>
    %40 = vector.shape_cast %39 : vector<1x256x64xbf16> to vector<256x64xbf16>
    %41 = vector.shape_cast %38 : vector<256x64xbf16> to vector<1x256x64xbf16>
    tpu.vector_store %arg5[%c0_19, %c0_20, %c0_21], %41 {strides = array<i32>} : memref<1x256x64xbf16, #tpu.memory_space<vmem>>, vector<1x256x64xbf16>,
    return
  }
  func.func @transform_0(%arg0: i32) -> (i32, i32, i32) {
    %c0_i32 = arith.constant 0 : i32
    %c0_i32_0 = arith.constant 0 : i32
    %c0_i32_1 = arith.constant 0 : i32
    return %arg0, %c0_i32, %c0_i32_0 : i32, i32, i32
  }
  func.func @transform_1(%arg0: i32) -> (i32, i32) {
    %c0_i32 = arith.constant 0 : i32
    %c0_i32_0 = arith.constant 0 : i32
    %c0_i32_1 = arith.constant 0 : i32
    return %c0_i32, %c0_i32_0 : i32, i32
  }
  func.func @transform_2(%arg0: i32) -> (i32, i32) {
    %c0_i32 = arith.constant 0 : i32
    %c0_i32_0 = arith.constant 0 : i32
    %c0_i32_1 = arith.constant 0 : i32
    return %c0_i32, %c0_i32_0 : i32, i32
  }
  func.func @transform_3(%arg0: i32) -> (i32, i32) {
    %c0_i32 = arith.constant 0 : i32
    %c0_i32_0 = arith.constant 0 : i32
    %c0_i32_1 = arith.constant 0 : i32
    return %c0_i32, %c0_i32_0 : i32, i32
  }
  func.func @transform_4(%arg0: i32) -> (i32, i32, i32) {
    %c0_i32 = arith.constant 0 : i32
    %c0_i32_0 = arith.constant 0 : i32
    %c0_i32_1 = arith.constant 0 : i32
    return %arg0, %c0_i32, %c0_i32_0 : i32, i32, i32
  }
}

module attributes {stable_mosaic.version = 11 : i64} {
  func.func @_conv3x3_kernel(%arg0: i32, %arg1: memref<1x324x64xbf16, #tpu.memory_space<vmem>>, %arg2: memref<9x64x128xbf16, #tpu.memory_space<vmem>>, %arg3: memref<1x128xf32, #tpu.memory_space<vmem>>, %arg4: memref<1x286x128xf32, #tpu.memory_space<vmem>>) attributes {dimension_semantics = [#tpu.dimension_semantics<parallel>], iteration_bounds = array<i64: 2>, scalar_prefetch = 0 : i64, scratch_operands = 0 : i64, tpu.core_type = #tpu.core_type<tc>, window_params = [{transform_indices = @transform_0, window_bounds = array<i64: 1, 324, 64>}, {pipeline_mode = #tpu.pipeline_mode<synchronous>, transform_indices = @transform_1, window_bounds = array<i64: 9, 64, 128>}, {pipeline_mode = #tpu.pipeline_mode<synchronous>, transform_indices = @transform_2, window_bounds = array<i64: 1, 128>}, {transform_indices = @transform_3, window_bounds = array<i64: 1, 286, 128>}]} {
    %cst = arith.constant 0.000000e+00 : f32
    %0 = vector.broadcast %cst : f32 to vector<286x128xf32>
    %c0 = arith.constant 0 : index
    %c0_0 = arith.constant 0 : index
    %c0_1 = arith.constant 0 : index
    %1 = vector.load %arg1[%c0, %c0_0, %c0_1] : memref<1x324x64xbf16, #tpu.memory_space<vmem>>, vector<1x286x64xbf16>
    %2 = vector.shape_cast %1 : vector<1x286x64xbf16> to vector<286x64xbf16>
    %c0_2 = arith.constant 0 : index
    %c0_3 = arith.constant 0 : index
    %c0_4 = arith.constant 0 : index
    %3 = vector.load %arg2[%c0_2, %c0_3, %c0_4] : memref<9x64x128xbf16, #tpu.memory_space<vmem>>, vector<1x64x128xbf16>
    %4 = vector.shape_cast %3 : vector<1x64x128xbf16> to vector<64x128xbf16>
    %cst_5 = arith.constant dense<0.000000e+00> : vector<286x128xf32>
    %5 = tpu.matmul %2, %4, %cst_5 {dimension_numbers = #tpu.dot_dimension_numbers<[1], [0], [0], [1], [0, 0, 1, 1], [], []>} : vector<286x64xbf16>, vector<64x128xbf16>, vector<286x128xf32> -> vector<286x128xf32>
    %6 = arith.addf %0, %5 : vector<286x128xf32>
    %c0_6 = arith.constant 0 : index
    %c1 = arith.constant 1 : index
    %c0_7 = arith.constant 0 : index
    %7 = vector.load %arg1[%c0_6, %c1, %c0_7] : memref<1x324x64xbf16, #tpu.memory_space<vmem>>, vector<1x286x64xbf16>
    %8 = vector.shape_cast %7 : vector<1x286x64xbf16> to vector<286x64xbf16>
    %c1_8 = arith.constant 1 : index
    %c0_9 = arith.constant 0 : index
    %c0_10 = arith.constant 0 : index
    %9 = vector.load %arg2[%c1_8, %c0_9, %c0_10] : memref<9x64x128xbf16, #tpu.memory_space<vmem>>, vector<1x64x128xbf16>
    %10 = vector.shape_cast %9 : vector<1x64x128xbf16> to vector<64x128xbf16>
    %cst_11 = arith.constant dense<0.000000e+00> : vector<286x128xf32>
    %11 = tpu.matmul %8, %10, %cst_11 {dimension_numbers = #tpu.dot_dimension_numbers<[1], [0], [0], [1], [0, 0, 1, 1], [], []>} : vector<286x64xbf16>, vector<64x128xbf16>, vector<286x128xf32> -> vector<286x128xf32>
    %12 = arith.addf %6, %11 : vector<286x128xf32>
    %c0_12 = arith.constant 0 : index
    %c2 = arith.constant 2 : index
    %c0_13 = arith.constant 0 : index
    %13 = vector.load %arg1[%c0_12, %c2, %c0_13] : memref<1x324x64xbf16, #tpu.memory_space<vmem>>, vector<1x286x64xbf16>
    %14 = vector.shape_cast %13 : vector<1x286x64xbf16> to vector<286x64xbf16>
    %c2_14 = arith.constant 2 : index
    %c0_15 = arith.constant 0 : index
    %c0_16 = arith.constant 0 : index
    %15 = vector.load %arg2[%c2_14, %c0_15, %c0_16] : memref<9x64x128xbf16, #tpu.memory_space<vmem>>, vector<1x64x128xbf16>
    %16 = vector.shape_cast %15 : vector<1x64x128xbf16> to vector<64x128xbf16>
    %cst_17 = arith.constant dense<0.000000e+00> : vector<286x128xf32>
    %17 = tpu.matmul %14, %16, %cst_17 {dimension_numbers = #tpu.dot_dimension_numbers<[1], [0], [0], [1], [0, 0, 1, 1], [], []>} : vector<286x64xbf16>, vector<64x128xbf16>, vector<286x128xf32> -> vector<286x128xf32>
    %18 = arith.addf %12, %17 : vector<286x128xf32>
    %c0_18 = arith.constant 0 : index
    %c18 = arith.constant 18 : index
    %c0_19 = arith.constant 0 : index
    %19 = vector.load %arg1[%c0_18, %c18, %c0_19] : memref<1x324x64xbf16, #tpu.memory_space<vmem>>, vector<1x286x64xbf16>
    %20 = vector.shape_cast %19 : vector<1x286x64xbf16> to vector<286x64xbf16>
    %c3 = arith.constant 3 : index
    %c0_20 = arith.constant 0 : index
    %c0_21 = arith.constant 0 : index
    %21 = vector.load %arg2[%c3, %c0_20, %c0_21] : memref<9x64x128xbf16, #tpu.memory_space<vmem>>, vector<1x64x128xbf16>
    %22 = vector.shape_cast %21 : vector<1x64x128xbf16> to vector<64x128xbf16>
    %cst_22 = arith.constant dense<0.000000e+00> : vector<286x128xf32>
    %23 = tpu.matmul %20, %22, %cst_22 {dimension_numbers = #tpu.dot_dimension_numbers<[1], [0], [0], [1], [0, 0, 1, 1], [], []>} : vector<286x64xbf16>, vector<64x128xbf16>, vector<286x128xf32> -> vector<286x128xf32>
    %24 = arith.addf %18, %23 : vector<286x128xf32>
    %c0_23 = arith.constant 0 : index
    %c19 = arith.constant 19 : index
    %c0_24 = arith.constant 0 : index
    %25 = vector.load %arg1[%c0_23, %c19, %c0_24] : memref<1x324x64xbf16, #tpu.memory_space<vmem>>, vector<1x286x64xbf16>
    %26 = vector.shape_cast %25 : vector<1x286x64xbf16> to vector<286x64xbf16>
    %c4 = arith.constant 4 : index
    %c0_25 = arith.constant 0 : index
    %c0_26 = arith.constant 0 : index
    %27 = vector.load %arg2[%c4, %c0_25, %c0_26] : memref<9x64x128xbf16, #tpu.memory_space<vmem>>, vector<1x64x128xbf16>
    %28 = vector.shape_cast %27 : vector<1x64x128xbf16> to vector<64x128xbf16>
    %cst_27 = arith.constant dense<0.000000e+00> : vector<286x128xf32>
    %29 = tpu.matmul %26, %28, %cst_27 {dimension_numbers = #tpu.dot_dimension_numbers<[1], [0], [0], [1], [0, 0, 1, 1], [], []>} : vector<286x64xbf16>, vector<64x128xbf16>, vector<286x128xf32> -> vector<286x128xf32>
    %30 = arith.addf %24, %29 : vector<286x128xf32>
    %c0_28 = arith.constant 0 : index
    %c20 = arith.constant 20 : index
    %c0_29 = arith.constant 0 : index
    %31 = vector.load %arg1[%c0_28, %c20, %c0_29] : memref<1x324x64xbf16, #tpu.memory_space<vmem>>, vector<1x286x64xbf16>
    %32 = vector.shape_cast %31 : vector<1x286x64xbf16> to vector<286x64xbf16>
    %c5 = arith.constant 5 : index
    %c0_30 = arith.constant 0 : index
    %c0_31 = arith.constant 0 : index
    %33 = vector.load %arg2[%c5, %c0_30, %c0_31] : memref<9x64x128xbf16, #tpu.memory_space<vmem>>, vector<1x64x128xbf16>
    %34 = vector.shape_cast %33 : vector<1x64x128xbf16> to vector<64x128xbf16>
    %cst_32 = arith.constant dense<0.000000e+00> : vector<286x128xf32>
    %35 = tpu.matmul %32, %34, %cst_32 {dimension_numbers = #tpu.dot_dimension_numbers<[1], [0], [0], [1], [0, 0, 1, 1], [], []>} : vector<286x64xbf16>, vector<64x128xbf16>, vector<286x128xf32> -> vector<286x128xf32>
    %36 = arith.addf %30, %35 : vector<286x128xf32>
    %c0_33 = arith.constant 0 : index
    %c36 = arith.constant 36 : index
    %c0_34 = arith.constant 0 : index
    %37 = vector.load %arg1[%c0_33, %c36, %c0_34] : memref<1x324x64xbf16, #tpu.memory_space<vmem>>, vector<1x286x64xbf16>
    %38 = vector.shape_cast %37 : vector<1x286x64xbf16> to vector<286x64xbf16>
    %c6 = arith.constant 6 : index
    %c0_35 = arith.constant 0 : index
    %c0_36 = arith.constant 0 : index
    %39 = vector.load %arg2[%c6, %c0_35, %c0_36] : memref<9x64x128xbf16, #tpu.memory_space<vmem>>, vector<1x64x128xbf16>
    %40 = vector.shape_cast %39 : vector<1x64x128xbf16> to vector<64x128xbf16>
    %cst_37 = arith.constant dense<0.000000e+00> : vector<286x128xf32>
    %41 = tpu.matmul %38, %40, %cst_37 {dimension_numbers = #tpu.dot_dimension_numbers<[1], [0], [0], [1], [0, 0, 1, 1], [], []>} : vector<286x64xbf16>, vector<64x128xbf16>, vector<286x128xf32> -> vector<286x128xf32>
    %42 = arith.addf %36, %41 : vector<286x128xf32>
    %c0_38 = arith.constant 0 : index
    %c37 = arith.constant 37 : index
    %c0_39 = arith.constant 0 : index
    %43 = vector.load %arg1[%c0_38, %c37, %c0_39] : memref<1x324x64xbf16, #tpu.memory_space<vmem>>, vector<1x286x64xbf16>
    %44 = vector.shape_cast %43 : vector<1x286x64xbf16> to vector<286x64xbf16>
    %c7 = arith.constant 7 : index
    %c0_40 = arith.constant 0 : index
    %c0_41 = arith.constant 0 : index
    %45 = vector.load %arg2[%c7, %c0_40, %c0_41] : memref<9x64x128xbf16, #tpu.memory_space<vmem>>, vector<1x64x128xbf16>
    %46 = vector.shape_cast %45 : vector<1x64x128xbf16> to vector<64x128xbf16>
    %cst_42 = arith.constant dense<0.000000e+00> : vector<286x128xf32>
    %47 = tpu.matmul %44, %46, %cst_42 {dimension_numbers = #tpu.dot_dimension_numbers<[1], [0], [0], [1], [0, 0, 1, 1], [], []>} : vector<286x64xbf16>, vector<64x128xbf16>, vector<286x128xf32> -> vector<286x128xf32>
    %48 = arith.addf %42, %47 : vector<286x128xf32>
    %c0_43 = arith.constant 0 : index
    %c38 = arith.constant 38 : index
    %c0_44 = arith.constant 0 : index
    %49 = vector.load %arg1[%c0_43, %c38, %c0_44] : memref<1x324x64xbf16, #tpu.memory_space<vmem>>, vector<1x286x64xbf16>
    %50 = vector.shape_cast %49 : vector<1x286x64xbf16> to vector<286x64xbf16>
    %c8 = arith.constant 8 : index
    %c0_45 = arith.constant 0 : index
    %c0_46 = arith.constant 0 : index
    %51 = vector.load %arg2[%c8, %c0_45, %c0_46] : memref<9x64x128xbf16, #tpu.memory_space<vmem>>, vector<1x64x128xbf16>
    %52 = vector.shape_cast %51 : vector<1x64x128xbf16> to vector<64x128xbf16>
    %cst_47 = arith.constant dense<0.000000e+00> : vector<286x128xf32>
    %53 = tpu.matmul %50, %52, %cst_47 {dimension_numbers = #tpu.dot_dimension_numbers<[1], [0], [0], [1], [0, 0, 1, 1], [], []>} : vector<286x64xbf16>, vector<64x128xbf16>, vector<286x128xf32> -> vector<286x128xf32>
    %54 = arith.addf %48, %53 : vector<286x128xf32>
    %c0_48 = arith.constant 0 : index
    %c0_49 = arith.constant 0 : index
    %55 = vector.load %arg3[%c0_48, %c0_49] : memref<1x128xf32, #tpu.memory_space<vmem>>, vector<1x128xf32>
    %56 = vector.broadcast %55 : vector<1x128xf32> to vector<286x128xf32>
    %57 = arith.addf %54, %56 : vector<286x128xf32>
    %c0_50 = arith.constant 0 : index
    %c0_51 = arith.constant 0 : index
    %c0_52 = arith.constant 0 : index
    %58 = vector.load %arg4[%c0_50, %c0_51, %c0_52] : memref<1x286x128xf32, #tpu.memory_space<vmem>>, vector<1x286x128xf32>
    %59 = vector.shape_cast %58 : vector<1x286x128xf32> to vector<286x128xf32>
    %60 = vector.shape_cast %57 : vector<286x128xf32> to vector<1x286x128xf32>
    tpu.vector_store %arg4[%c0_50, %c0_51, %c0_52], %60 {strides = array<i32>} : memref<1x286x128xf32, #tpu.memory_space<vmem>>, vector<1x286x128xf32>,
    return
  }
  func.func @transform_0(%arg0: i32) -> (i32, i32, i32) {
    %c0_i32 = arith.constant 0 : i32
    %c0_i32_0 = arith.constant 0 : i32
    %c0_i32_1 = arith.constant 0 : i32
    return %arg0, %c0_i32, %c0_i32_0 : i32, i32, i32
  }
  func.func @transform_1(%arg0: i32) -> (i32, i32, i32) {
    %c0_i32 = arith.constant 0 : i32
    %c0_i32_0 = arith.constant 0 : i32
    %c0_i32_1 = arith.constant 0 : i32
    %c0_i32_2 = arith.constant 0 : i32
    return %c0_i32, %c0_i32_0, %c0_i32_1 : i32, i32, i32
  }
  func.func @transform_2(%arg0: i32) -> (i32, i32) {
    %c0_i32 = arith.constant 0 : i32
    %c0_i32_0 = arith.constant 0 : i32
    %c0_i32_1 = arith.constant 0 : i32
    return %c0_i32, %c0_i32_0 : i32, i32
  }
  func.func @transform_3(%arg0: i32) -> (i32, i32, i32) {
    %c0_i32 = arith.constant 0 : i32
    %c0_i32_0 = arith.constant 0 : i32
    %c0_i32_1 = arith.constant 0 : i32
    return %arg0, %c0_i32, %c0_i32_0 : i32, i32, i32
  }
}

module attributes {stable_mosaic.version = 11 : i64} {
  func.func @_gn_silu_kernel(%arg0: i32, %arg1: memref<1x256x128xf32, #tpu.memory_space<vmem>>, %arg2: memref<128x128xf32, #tpu.memory_space<vmem>>, %arg3: memref<1x128xf32, #tpu.memory_space<vmem>>, %arg4: memref<1x128xf32, #tpu.memory_space<vmem>>, %arg5: memref<1x256x128xbf16, #tpu.memory_space<vmem>>) attributes {dimension_semantics = [#tpu.dimension_semantics<parallel>], iteration_bounds = array<i64: 2>, scalar_prefetch = 0 : i64, scratch_operands = 0 : i64, tpu.core_type = #tpu.core_type<tc>, window_params = [{transform_indices = @transform_0, window_bounds = array<i64: 1, 256, 128>}, {pipeline_mode = #tpu.pipeline_mode<synchronous>, transform_indices = @transform_1, window_bounds = array<i64: 128, 128>}, {pipeline_mode = #tpu.pipeline_mode<synchronous>, transform_indices = @transform_2, window_bounds = array<i64: 1, 128>}, {pipeline_mode = #tpu.pipeline_mode<synchronous>, transform_indices = @transform_3, window_bounds = array<i64: 1, 128>}, {transform_indices = @transform_4, window_bounds = array<i64: 1, 256, 128>}]} {
    %c0 = arith.constant 0 : index
    %c0_0 = arith.constant 0 : index
    %c0_1 = arith.constant 0 : index
    %0 = vector.load %arg1[%c0, %c0_0, %c0_1] : memref<1x256x128xf32, #tpu.memory_space<vmem>>, vector<1x256x128xf32>
    %1 = vector.shape_cast %0 : vector<1x256x128xf32> to vector<256x128xf32>
    %cst = arith.constant dense<0.000000e+00> : vector<128xf32>
    %2 = vector.multi_reduction <add>, %1, %cst [0] : vector<256x128xf32> to vector<128xf32>
    %3 = vector.shape_cast %2 : vector<128xf32> to vector<1x128xf32>
    %cst_2 = arith.constant 3.906250e-03 : f32
    %4 = vector.broadcast %cst_2 : f32 to vector<1x128xf32>
    %5 = arith.mulf %3, %4 : vector<1x128xf32>
    %6 = arith.mulf %1, %1 : vector<256x128xf32>
    %cst_3 = arith.constant dense<0.000000e+00> : vector<128xf32>
    %7 = vector.multi_reduction <add>, %6, %cst_3 [0] : vector<256x128xf32> to vector<128xf32>
    %8 = vector.shape_cast %7 : vector<128xf32> to vector<1x128xf32>
    %cst_4 = arith.constant 3.906250e-03 : f32
    %9 = vector.broadcast %cst_4 : f32 to vector<1x128xf32>
    %10 = arith.mulf %8, %9 : vector<1x128xf32>
    %c0_5 = arith.constant 0 : index
    %c0_6 = arith.constant 0 : index
    %11 = vector.load %arg2[%c0_5, %c0_6] : memref<128x128xf32, #tpu.memory_space<vmem>>, vector<128x128xf32>
    %cst_7 = arith.constant dense<0.000000e+00> : vector<1x128xf32>
    %12 = tpu.matmul %5, %11, %cst_7 {dimension_numbers = #tpu.dot_dimension_numbers<[1], [0], [0], [1], [0, 0, 1, 1], [], []>} : vector<1x128xf32>, vector<128x128xf32>, vector<1x128xf32> -> vector<1x128xf32>
    %c0_8 = arith.constant 0 : index
    %c0_9 = arith.constant 0 : index
    %13 = vector.load %arg2[%c0_8, %c0_9] : memref<128x128xf32, #tpu.memory_space<vmem>>, vector<128x128xf32>
    %cst_10 = arith.constant dense<0.000000e+00> : vector<1x128xf32>
    %14 = tpu.matmul %10, %13, %cst_10 {dimension_numbers = #tpu.dot_dimension_numbers<[1], [0], [0], [1], [0, 0, 1, 1], [], []>} : vector<1x128xf32>, vector<128x128xf32>, vector<1x128xf32> -> vector<1x128xf32>
    %15 = arith.mulf %12, %12 : vector<1x128xf32>
    %16 = arith.subf %14, %15 : vector<1x128xf32>
    %17 = vector.broadcast %12 : vector<1x128xf32> to vector<256x128xf32>
    %18 = arith.subf %1, %17 : vector<256x128xf32>
    %cst_11 = arith.constant 9.99999974E-6 : f32
    %19 = vector.broadcast %cst_11 : f32 to vector<1x128xf32>
    %20 = arith.addf %16, %19 : vector<1x128xf32>
    %21 = math.rsqrt %20 : vector<1x128xf32>
    %22 = vector.broadcast %21 : vector<1x128xf32> to vector<256x128xf32>
    %23 = arith.mulf %18, %22 : vector<256x128xf32>
    %c0_12 = arith.constant 0 : index
    %c0_13 = arith.constant 0 : index
    %24 = vector.load %arg3[%c0_12, %c0_13] : memref<1x128xf32, #tpu.memory_space<vmem>>, vector<1x128xf32>
    %25 = vector.broadcast %24 : vector<1x128xf32> to vector<256x128xf32>
    %26 = arith.mulf %23, %25 : vector<256x128xf32>
    %c0_14 = arith.constant 0 : index
    %c0_15 = arith.constant 0 : index
    %27 = vector.load %arg4[%c0_14, %c0_15] : memref<1x128xf32, #tpu.memory_space<vmem>>, vector<1x128xf32>
    %28 = vector.broadcast %27 : vector<1x128xf32> to vector<256x128xf32>
    %29 = arith.addf %26, %28 : vector<256x128xf32>
    %cst_16 = arith.constant 0.000000e+00 : f32
    %30 = vector.broadcast %cst_16 : f32 to vector<256x128xf32>
    %31 = arith.subf %30, %29 : vector<256x128xf32>
    %32 = math.exp %31 : vector<256x128xf32>
    %cst_17 = arith.constant 1.000000e+00 : f32
    %33 = vector.broadcast %cst_17 : f32 to vector<256x128xf32>
    %34 = arith.addf %33, %32 : vector<256x128xf32>
    %cst_18 = arith.constant 1.000000e+00 : f32
    %35 = vector.broadcast %cst_18 : f32 to vector<256x128xf32>
    %36 = arith.divf %35, %34 : vector<256x128xf32>
    %37 = arith.mulf %29, %36 : vector<256x128xf32>
    %38 = arith.truncf %37 : vector<256x128xf32> to vector<256x128xbf16>
    %c0_19 = arith.constant 0 : index
    %c0_20 = arith.constant 0 : index
    %c0_21 = arith.constant 0 : index
    %39 = vector.load %arg5[%c0_19, %c0_20, %c0_21] : memref<1x256x128xbf16, #tpu.memory_space<vmem>>, vector<1x256x128xbf16>
    %40 = vector.shape_cast %39 : vector<1x256x128xbf16> to vector<256x128xbf16>
    %41 = vector.shape_cast %38 : vector<256x128xbf16> to vector<1x256x128xbf16>
    tpu.vector_store %arg5[%c0_19, %c0_20, %c0_21], %41 {strides = array<i32>} : memref<1x256x128xbf16, #tpu.memory_space<vmem>>, vector<1x256x128xbf16>,
    return
  }
  func.func @transform_0(%arg0: i32) -> (i32, i32, i32) {
    %c0_i32 = arith.constant 0 : i32
    %c0_i32_0 = arith.constant 0 : i32
    %c0_i32_1 = arith.constant 0 : i32
    return %arg0, %c0_i32, %c0_i32_0 : i32, i32, i32
  }
  func.func @transform_1(%arg0: i32) -> (i32, i32) {
    %c0_i32 = arith.constant 0 : i32
    %c0_i32_0 = arith.constant 0 : i32
    %c0_i32_1 = arith.constant 0 : i32
    return %c0_i32, %c0_i32_0 : i32, i32
  }
  func.func @transform_2(%arg0: i32) -> (i32, i32) {
    %c0_i32 = arith.constant 0 : i32
    %c0_i32_0 = arith.constant 0 : i32
    %c0_i32_1 = arith.constant 0 : i32
    return %c0_i32, %c0_i32_0 : i32, i32
  }
  func.func @transform_3(%arg0: i32) -> (i32, i32) {
    %c0_i32 = arith.constant 0 : i32
    %c0_i32_0 = arith.constant 0 : i32
    %c0_i32_1 = arith.constant 0 : i32
    return %c0_i32, %c0_i32_0 : i32, i32
  }
  func.func @transform_4(%arg0: i32) -> (i32, i32, i32) {
    %c0_i32 = arith.constant 0 : i32
    %c0_i32_0 = arith.constant 0 : i32
    %c0_i32_1 = arith.constant 0 : i32
    return %arg0, %c0_i32, %c0_i32_0 : i32, i32, i32
  }
}

module attributes {stable_mosaic.version = 11 : i64} {
  func.func @_conv3x3_kernel(%arg0: i32, %arg1: memref<1x324x128xbf16, #tpu.memory_space<vmem>>, %arg2: memref<9x128x128xbf16, #tpu.memory_space<vmem>>, %arg3: memref<1x128xf32, #tpu.memory_space<vmem>>, %arg4: memref<1x286x64xf32, #tpu.memory_space<vmem>>, %arg5: memref<64x128xbf16, #tpu.memory_space<vmem>>, %arg6: memref<1x128xf32, #tpu.memory_space<vmem>>, %arg7: memref<1x286x128xf32, #tpu.memory_space<vmem>>) attributes {dimension_semantics = [#tpu.dimension_semantics<parallel>], iteration_bounds = array<i64: 2>, scalar_prefetch = 0 : i64, scratch_operands = 0 : i64, tpu.core_type = #tpu.core_type<tc>, window_params = [{transform_indices = @transform_0, window_bounds = array<i64: 1, 324, 128>}, {pipeline_mode = #tpu.pipeline_mode<synchronous>, transform_indices = @transform_1, window_bounds = array<i64: 9, 128, 128>}, {pipeline_mode = #tpu.pipeline_mode<synchronous>, transform_indices = @transform_2, window_bounds = array<i64: 1, 128>}, {transform_indices = @transform_3, window_bounds = array<i64: 1, 286, 64>}, {pipeline_mode = #tpu.pipeline_mode<synchronous>, transform_indices = @transform_4, window_bounds = array<i64: 64, 128>}, {pipeline_mode = #tpu.pipeline_mode<synchronous>, transform_indices = @transform_5, window_bounds = array<i64: 1, 128>}, {transform_indices = @transform_6, window_bounds = array<i64: 1, 286, 128>}]} {
    %cst = arith.constant 0.000000e+00 : f32
    %0 = vector.broadcast %cst : f32 to vector<286x128xf32>
    %c0 = arith.constant 0 : index
    %c0_0 = arith.constant 0 : index
    %c0_1 = arith.constant 0 : index
    %1 = vector.load %arg1[%c0, %c0_0, %c0_1] : memref<1x324x128xbf16, #tpu.memory_space<vmem>>, vector<1x286x128xbf16>
    %2 = vector.shape_cast %1 : vector<1x286x128xbf16> to vector<286x128xbf16>
    %c0_2 = arith.constant 0 : index
    %c0_3 = arith.constant 0 : index
    %c0_4 = arith.constant 0 : index
    %3 = vector.load %arg2[%c0_2, %c0_3, %c0_4] : memref<9x128x128xbf16, #tpu.memory_space<vmem>>, vector<1x128x128xbf16>
    %4 = vector.shape_cast %3 : vector<1x128x128xbf16> to vector<128x128xbf16>
    %cst_5 = arith.constant dense<0.000000e+00> : vector<286x128xf32>
    %5 = tpu.matmul %2, %4, %cst_5 {dimension_numbers = #tpu.dot_dimension_numbers<[1], [0], [0], [1], [0, 0, 1, 1], [], []>} : vector<286x128xbf16>, vector<128x128xbf16>, vector<286x128xf32> -> vector<286x128xf32>
    %6 = arith.addf %0, %5 : vector<286x128xf32>
    %c0_6 = arith.constant 0 : index
    %c1 = arith.constant 1 : index
    %c0_7 = arith.constant 0 : index
    %7 = vector.load %arg1[%c0_6, %c1, %c0_7] : memref<1x324x128xbf16, #tpu.memory_space<vmem>>, vector<1x286x128xbf16>
    %8 = vector.shape_cast %7 : vector<1x286x128xbf16> to vector<286x128xbf16>
    %c1_8 = arith.constant 1 : index
    %c0_9 = arith.constant 0 : index
    %c0_10 = arith.constant 0 : index
    %9 = vector.load %arg2[%c1_8, %c0_9, %c0_10] : memref<9x128x128xbf16, #tpu.memory_space<vmem>>, vector<1x128x128xbf16>
    %10 = vector.shape_cast %9 : vector<1x128x128xbf16> to vector<128x128xbf16>
    %cst_11 = arith.constant dense<0.000000e+00> : vector<286x128xf32>
    %11 = tpu.matmul %8, %10, %cst_11 {dimension_numbers = #tpu.dot_dimension_numbers<[1], [0], [0], [1], [0, 0, 1, 1], [], []>} : vector<286x128xbf16>, vector<128x128xbf16>, vector<286x128xf32> -> vector<286x128xf32>
    %12 = arith.addf %6, %11 : vector<286x128xf32>
    %c0_12 = arith.constant 0 : index
    %c2 = arith.constant 2 : index
    %c0_13 = arith.constant 0 : index
    %13 = vector.load %arg1[%c0_12, %c2, %c0_13] : memref<1x324x128xbf16, #tpu.memory_space<vmem>>, vector<1x286x128xbf16>
    %14 = vector.shape_cast %13 : vector<1x286x128xbf16> to vector<286x128xbf16>
    %c2_14 = arith.constant 2 : index
    %c0_15 = arith.constant 0 : index
    %c0_16 = arith.constant 0 : index
    %15 = vector.load %arg2[%c2_14, %c0_15, %c0_16] : memref<9x128x128xbf16, #tpu.memory_space<vmem>>, vector<1x128x128xbf16>
    %16 = vector.shape_cast %15 : vector<1x128x128xbf16> to vector<128x128xbf16>
    %cst_17 = arith.constant dense<0.000000e+00> : vector<286x128xf32>
    %17 = tpu.matmul %14, %16, %cst_17 {dimension_numbers = #tpu.dot_dimension_numbers<[1], [0], [0], [1], [0, 0, 1, 1], [], []>} : vector<286x128xbf16>, vector<128x128xbf16>, vector<286x128xf32> -> vector<286x128xf32>
    %18 = arith.addf %12, %17 : vector<286x128xf32>
    %c0_18 = arith.constant 0 : index
    %c18 = arith.constant 18 : index
    %c0_19 = arith.constant 0 : index
    %19 = vector.load %arg1[%c0_18, %c18, %c0_19] : memref<1x324x128xbf16, #tpu.memory_space<vmem>>, vector<1x286x128xbf16>
    %20 = vector.shape_cast %19 : vector<1x286x128xbf16> to vector<286x128xbf16>
    %c3 = arith.constant 3 : index
    %c0_20 = arith.constant 0 : index
    %c0_21 = arith.constant 0 : index
    %21 = vector.load %arg2[%c3, %c0_20, %c0_21] : memref<9x128x128xbf16, #tpu.memory_space<vmem>>, vector<1x128x128xbf16>
    %22 = vector.shape_cast %21 : vector<1x128x128xbf16> to vector<128x128xbf16>
    %cst_22 = arith.constant dense<0.000000e+00> : vector<286x128xf32>
    %23 = tpu.matmul %20, %22, %cst_22 {dimension_numbers = #tpu.dot_dimension_numbers<[1], [0], [0], [1], [0, 0, 1, 1], [], []>} : vector<286x128xbf16>, vector<128x128xbf16>, vector<286x128xf32> -> vector<286x128xf32>
    %24 = arith.addf %18, %23 : vector<286x128xf32>
    %c0_23 = arith.constant 0 : index
    %c19 = arith.constant 19 : index
    %c0_24 = arith.constant 0 : index
    %25 = vector.load %arg1[%c0_23, %c19, %c0_24] : memref<1x324x128xbf16, #tpu.memory_space<vmem>>, vector<1x286x128xbf16>
    %26 = vector.shape_cast %25 : vector<1x286x128xbf16> to vector<286x128xbf16>
    %c4 = arith.constant 4 : index
    %c0_25 = arith.constant 0 : index
    %c0_26 = arith.constant 0 : index
    %27 = vector.load %arg2[%c4, %c0_25, %c0_26] : memref<9x128x128xbf16, #tpu.memory_space<vmem>>, vector<1x128x128xbf16>
    %28 = vector.shape_cast %27 : vector<1x128x128xbf16> to vector<128x128xbf16>
    %cst_27 = arith.constant dense<0.000000e+00> : vector<286x128xf32>
    %29 = tpu.matmul %26, %28, %cst_27 {dimension_numbers = #tpu.dot_dimension_numbers<[1], [0], [0], [1], [0, 0, 1, 1], [], []>} : vector<286x128xbf16>, vector<128x128xbf16>, vector<286x128xf32> -> vector<286x128xf32>
    %30 = arith.addf %24, %29 : vector<286x128xf32>
    %c0_28 = arith.constant 0 : index
    %c20 = arith.constant 20 : index
    %c0_29 = arith.constant 0 : index
    %31 = vector.load %arg1[%c0_28, %c20, %c0_29] : memref<1x324x128xbf16, #tpu.memory_space<vmem>>, vector<1x286x128xbf16>
    %32 = vector.shape_cast %31 : vector<1x286x128xbf16> to vector<286x128xbf16>
    %c5 = arith.constant 5 : index
    %c0_30 = arith.constant 0 : index
    %c0_31 = arith.constant 0 : index
    %33 = vector.load %arg2[%c5, %c0_30, %c0_31] : memref<9x128x128xbf16, #tpu.memory_space<vmem>>, vector<1x128x128xbf16>
    %34 = vector.shape_cast %33 : vector<1x128x128xbf16> to vector<128x128xbf16>
    %cst_32 = arith.constant dense<0.000000e+00> : vector<286x128xf32>
    %35 = tpu.matmul %32, %34, %cst_32 {dimension_numbers = #tpu.dot_dimension_numbers<[1], [0], [0], [1], [0, 0, 1, 1], [], []>} : vector<286x128xbf16>, vector<128x128xbf16>, vector<286x128xf32> -> vector<286x128xf32>
    %36 = arith.addf %30, %35 : vector<286x128xf32>
    %c0_33 = arith.constant 0 : index
    %c36 = arith.constant 36 : index
    %c0_34 = arith.constant 0 : index
    %37 = vector.load %arg1[%c0_33, %c36, %c0_34] : memref<1x324x128xbf16, #tpu.memory_space<vmem>>, vector<1x286x128xbf16>
    %38 = vector.shape_cast %37 : vector<1x286x128xbf16> to vector<286x128xbf16>
    %c6 = arith.constant 6 : index
    %c0_35 = arith.constant 0 : index
    %c0_36 = arith.constant 0 : index
    %39 = vector.load %arg2[%c6, %c0_35, %c0_36] : memref<9x128x128xbf16, #tpu.memory_space<vmem>>, vector<1x128x128xbf16>
    %40 = vector.shape_cast %39 : vector<1x128x128xbf16> to vector<128x128xbf16>
    %cst_37 = arith.constant dense<0.000000e+00> : vector<286x128xf32>
    %41 = tpu.matmul %38, %40, %cst_37 {dimension_numbers = #tpu.dot_dimension_numbers<[1], [0], [0], [1], [0, 0, 1, 1], [], []>} : vector<286x128xbf16>, vector<128x128xbf16>, vector<286x128xf32> -> vector<286x128xf32>
    %42 = arith.addf %36, %41 : vector<286x128xf32>
    %c0_38 = arith.constant 0 : index
    %c37 = arith.constant 37 : index
    %c0_39 = arith.constant 0 : index
    %43 = vector.load %arg1[%c0_38, %c37, %c0_39] : memref<1x324x128xbf16, #tpu.memory_space<vmem>>, vector<1x286x128xbf16>
    %44 = vector.shape_cast %43 : vector<1x286x128xbf16> to vector<286x128xbf16>
    %c7 = arith.constant 7 : index
    %c0_40 = arith.constant 0 : index
    %c0_41 = arith.constant 0 : index
    %45 = vector.load %arg2[%c7, %c0_40, %c0_41] : memref<9x128x128xbf16, #tpu.memory_space<vmem>>, vector<1x128x128xbf16>
    %46 = vector.shape_cast %45 : vector<1x128x128xbf16> to vector<128x128xbf16>
    %cst_42 = arith.constant dense<0.000000e+00> : vector<286x128xf32>
    %47 = tpu.matmul %44, %46, %cst_42 {dimension_numbers = #tpu.dot_dimension_numbers<[1], [0], [0], [1], [0, 0, 1, 1], [], []>} : vector<286x128xbf16>, vector<128x128xbf16>, vector<286x128xf32> -> vector<286x128xf32>
    %48 = arith.addf %42, %47 : vector<286x128xf32>
    %c0_43 = arith.constant 0 : index
    %c38 = arith.constant 38 : index
    %c0_44 = arith.constant 0 : index
    %49 = vector.load %arg1[%c0_43, %c38, %c0_44] : memref<1x324x128xbf16, #tpu.memory_space<vmem>>, vector<1x286x128xbf16>
    %50 = vector.shape_cast %49 : vector<1x286x128xbf16> to vector<286x128xbf16>
    %c8 = arith.constant 8 : index
    %c0_45 = arith.constant 0 : index
    %c0_46 = arith.constant 0 : index
    %51 = vector.load %arg2[%c8, %c0_45, %c0_46] : memref<9x128x128xbf16, #tpu.memory_space<vmem>>, vector<1x128x128xbf16>
    %52 = vector.shape_cast %51 : vector<1x128x128xbf16> to vector<128x128xbf16>
    %cst_47 = arith.constant dense<0.000000e+00> : vector<286x128xf32>
    %53 = tpu.matmul %50, %52, %cst_47 {dimension_numbers = #tpu.dot_dimension_numbers<[1], [0], [0], [1], [0, 0, 1, 1], [], []>} : vector<286x128xbf16>, vector<128x128xbf16>, vector<286x128xf32> -> vector<286x128xf32>
    %54 = arith.addf %48, %53 : vector<286x128xf32>
    %c0_48 = arith.constant 0 : index
    %c0_49 = arith.constant 0 : index
    %55 = vector.load %arg3[%c0_48, %c0_49] : memref<1x128xf32, #tpu.memory_space<vmem>>, vector<1x128xf32>
    %56 = vector.broadcast %55 : vector<1x128xf32> to vector<286x128xf32>
    %57 = arith.addf %54, %56 : vector<286x128xf32>
    %c0_50 = arith.constant 0 : index
    %c0_51 = arith.constant 0 : index
    %c0_52 = arith.constant 0 : index
    %58 = vector.load %arg4[%c0_50, %c0_51, %c0_52] : memref<1x286x64xf32, #tpu.memory_space<vmem>>, vector<1x286x64xf32>
    %59 = vector.shape_cast %58 : vector<1x286x64xf32> to vector<286x64xf32>
    %60 = arith.truncf %59 : vector<286x64xf32> to vector<286x64xbf16>
    %c0_53 = arith.constant 0 : index
    %c0_54 = arith.constant 0 : index
    %61 = vector.load %arg5[%c0_53, %c0_54] : memref<64x128xbf16, #tpu.memory_space<vmem>>, vector<64x128xbf16>
    %cst_55 = arith.constant dense<0.000000e+00> : vector<286x128xf32>
    %62 = tpu.matmul %60, %61, %cst_55 {dimension_numbers = #tpu.dot_dimension_numbers<[1], [0], [0], [1], [0, 0, 1, 1], [], []>} : vector<286x64xbf16>, vector<64x128xbf16>, vector<286x128xf32> -> vector<286x128xf32>
    %63 = arith.addf %57, %62 : vector<286x128xf32>
    %c0_56 = arith.constant 0 : index
    %c0_57 = arith.constant 0 : index
    %64 = vector.load %arg6[%c0_56, %c0_57] : memref<1x128xf32, #tpu.memory_space<vmem>>, vector<1x128xf32>
    %65 = vector.broadcast %64 : vector<1x128xf32> to vector<286x128xf32>
    %66 = arith.addf %63, %65 : vector<286x128xf32>
    %c0_58 = arith.constant 0 : index
    %c0_59 = arith.constant 0 : index
    %c0_60 = arith.constant 0 : index
    %67 = vector.load %arg7[%c0_58, %c0_59, %c0_60] : memref<1x286x128xf32, #tpu.memory_space<vmem>>, vector<1x286x128xf32>
    %68 = vector.shape_cast %67 : vector<1x286x128xf32> to vector<286x128xf32>
    %69 = vector.shape_cast %66 : vector<286x128xf32> to vector<1x286x128xf32>
    tpu.vector_store %arg7[%c0_58, %c0_59, %c0_60], %69 {strides = array<i32>} : memref<1x286x128xf32, #tpu.memory_space<vmem>>, vector<1x286x128xf32>,
    return
  }
  func.func @transform_0(%arg0: i32) -> (i32, i32, i32) {
    %c0_i32 = arith.constant 0 : i32
    %c0_i32_0 = arith.constant 0 : i32
    %c0_i32_1 = arith.constant 0 : i32
    return %arg0, %c0_i32, %c0_i32_0 : i32, i32, i32
  }
  func.func @transform_1(%arg0: i32) -> (i32, i32, i32) {
    %c0_i32 = arith.constant 0 : i32
    %c0_i32_0 = arith.constant 0 : i32
    %c0_i32_1 = arith.constant 0 : i32
    %c0_i32_2 = arith.constant 0 : i32
    return %c0_i32, %c0_i32_0, %c0_i32_1 : i32, i32, i32
  }
  func.func @transform_2(%arg0: i32) -> (i32, i32) {
    %c0_i32 = arith.constant 0 : i32
    %c0_i32_0 = arith.constant 0 : i32
    %c0_i32_1 = arith.constant 0 : i32
    return %c0_i32, %c0_i32_0 : i32, i32
  }
  func.func @transform_3(%arg0: i32) -> (i32, i32, i32) {
    %c0_i32 = arith.constant 0 : i32
    %c0_i32_0 = arith.constant 0 : i32
    %c0_i32_1 = arith.constant 0 : i32
    return %arg0, %c0_i32, %c0_i32_0 : i32, i32, i32
  }
  func.func @transform_4(%arg0: i32) -> (i32, i32) {
    %c0_i32 = arith.constant 0 : i32
    %c0_i32_0 = arith.constant 0 : i32
    %c0_i32_1 = arith.constant 0 : i32
    return %c0_i32, %c0_i32_0 : i32, i32
  }
  func.func @transform_5(%arg0: i32) -> (i32, i32) {
    %c0_i32 = arith.constant 0 : i32
    %c0_i32_0 = arith.constant 0 : i32
    %c0_i32_1 = arith.constant 0 : i32
    return %c0_i32, %c0_i32_0 : i32, i32
  }
  func.func @transform_6(%arg0: i32) -> (i32, i32, i32) {
    %c0_i32 = arith.constant 0 : i32
    %c0_i32_0 = arith.constant 0 : i32
    %c0_i32_1 = arith.constant 0 : i32
    return %arg0, %c0_i32, %c0_i32_0 : i32, i32, i32
  }
}

</mosaic_0001>

<bundles_post_ra>
// kernel: residual_block.4
= control target key start
LH: loop header
LB: loop body
LE: loop exit
PB: predicated region body
PF: predicated region fallthrough
CT: control target
= control target key end

     0   :  { %s1556_s15 = smov 0   ;;  %s3398_s0 = inlined_call_operand.vmem [shape: f32[2,256,64], index: 0, kind: input, shape index: {}]   ;;  %s3399_s1 = inlined_call_operand.vmem [shape: f32[64,64], index: 1, kind: input, shape index: {}]   ;;  %s3400_s2 = inlined_call_operand.vmem [shape: f32[1,64], index: 2, kind: input, shape index: {}]   ;;  %s3401_s3 = inlined_call_operand.vmem [shape: f32[1,64], index: 3, kind: input, shape index: {}]   ;;  %s3402_s4 = inlined_call_operand.vmem [shape: bf16[2,256,64], index: 4, kind: output, shape index: {}]  }
   0x1 LB: > { %s1368_s16 = sadd.s32 4294967295, %s1529_s15   ;;  %p1372_p0 = scmp.ge.s32.totalorder %s1529_s15, 1  ;;  %s1529_s15 = sphi %s1556_s15, %s14_s15  }
   0x2   : > { %p162_p1 = scmp.lt.s32.totalorder %s1529_s15, 3 }
   0x4   : > { %p163_p2 = pnand %p1372_p0, %p162_p1 }
   0x6   : > { %166 = sbr.rel (%p163_p2) target bundleno = 431 (0x1af), region = 36 }
   0xb   : > { %v410_v0 = vld [vmem:[%s3399_s1 + $0x38] sm:$0xff]  ;;  %v409_v1 = vld [vmem:[%s3399_s1 + $0x30] sm:$0xff]  ;;  %p188_p3 = scmp.lt.s32.totalorder %s1368_s16, 1  ;;  %v408_v2 = vld [vmem:[%s3399_s1 + $0x28] sm:$0xff]  ;;  %vm230_vm0 = vcmask 523264  }
   0xc   : > { %422 = vmatpush.msra.mxu0 %v410_v0  ;;  %445 = vmatpush.msra.mxu1 %v410_v0  ;;  %v407_v3 = vld [vmem:[%s3399_s1 + $0x20] sm:$0xff]  ;;  %v406_v4 = vld [vmem:[%s3399_s1 + $0x18] sm:$0xff]  ;;  %v405_v12 = vld [vmem:[%s3399_s1 + $0x10] sm:$0xff] }
   0xd   : > { %s3678_s16 = smov (!%p188_p3, %s1368_s16), 1  ;;  %v404_v16 = vld [vmem:[%s3399_s1 + $0x8] sm:$0xff]  ;;  %v403_v20 = vld [vmem:[%s3399_s1] sm:$0xff] }
   0xe   : > { %423 = vmatpush.msra.mxu0 %v409_v1  ;;  %446 = vmatpush.msra.mxu1 %v409_v1  ;;  %s1381_s25 = sshll.u32 %s3678_s16, 8  ;;  %s1382_s17 = sshll.u32 %s3678_s16, 7 }
   0xf   : > { %s1585_s30 = scalar_lea.vmem %s3398_s0, %s1381_s25  ;;  %s3132_s19 = scalar_lea.vmem %s3402_s4, %s1382_s17 }
  0x10   : > { %424 = vmatpush.msra.mxu0 %v408_v2  ;;  %447 = vmatpush.msra.mxu1 %v408_v2  ;;  %v1588_v5 = vld [vmem:[%s1585_s30] sm:$0xff]  ;;  %v1591_v6 = vld [vmem:[%s1585_s30 + $0x8] sm:$0xff]  ;;  %v1594_v7 = vld [vmem:[%s1585_s30 + $0x10] sm:$0xff] }
  0x11   : > { %v1597_v8 = vld [vmem:[%s1585_s30 + $0x18] sm:$0xff]  ;;  %v231_v9 = vsel %vm230_vm0, %v1588_v5, 0.0  ;;  %v232_v10 = vsel %vm230_vm0, %v1591_v6, 0.0  ;;  %v234_v11 = vsel %vm230_vm0, %v1594_v7, 0.0  ;;  %v1609_v13 = vld [vmem:[%s1585_s30 + $0x20] sm:$0xff]  ;;  %v1617_v17 = vld [vmem:[%s1585_s30 + $0x28] sm:$0xff]  ;;  %v301_v27 = vmul.f32 %v1588_v5, %v1588_v5 }
  0x12   : > { %425 = vmatpush.msra.mxu0 %v407_v3  ;;  %448 = vmatpush.msra.mxu1 %v407_v3  ;;  %v233_v14 = vadd.f32 %v232_v10, %v231_v9  ;;  %v236_v15 = vsel %vm230_vm0, %v1597_v8, 0.0  ;;  %v238_v19 = vsel %vm230_vm0, %v1609_v13, 0.0  ;;  %v1625_v21 = vld [vmem:[%s1585_s30 + $0x30] sm:$0xff]  ;;  %v240_v23 = vsel %vm230_vm0, %v1617_v17, 0.0  ;;  %v1630_v24 = vld [vmem:[%s1585_s30 + $0x38] sm:$0xff]  ;;  %v1637_v28 = vld [vmem:[%s1585_s30 + $0x40] sm:$0xff] }
  0x13   : > { %v242_v26 = vsel %vm230_vm0, %v1625_v21, 0.0  ;;  %v244_v30 = vsel %vm230_vm0, %v1630_v24, 0.0  ;;  %v302_v31 = vmul.f32 %v1591_v6, %v1591_v6  ;;  %v303_v32 = vmul.f32 %v1594_v7, %v1594_v7  ;;  %v1646_v33 = vld [vmem:[%s1585_s30 + $0x48] sm:$0xff]  ;;  %v1654_v38 = vld [vmem:[%s1585_s30 + $0x50] sm:$0xff]  ;;  %v1663_v44 = vld [vmem:[%s1585_s30 + $0x58] sm:$0xff] }
  0x14   : > { %426 = vmatpush.msra.mxu0 %v406_v4  ;;  %449 = vmatpush.msra.mxu1 %v406_v4  ;;  %v235_v18 = vadd.f32 %v234_v11, %v233_v14  ;;  %v246_v35 = vsel %vm230_vm0, %v1637_v28, 0.0  ;;  %v304_v36 = vmul.f32 %v1597_v8, %v1597_v8  ;;  %v333_v37 = vsel %vm230_vm0, %v301_v27, 0.0  ;;  %v1671_v50 = vld [vmem:[%s1585_s30 + $0x60] sm:$0xff]  ;;  %v1679_v56 = vld [vmem:[%s1585_s30 + $0x68] sm:$0xff]  ;;  %v1687_v62 = vld [vmem:[%s1585_s30 + $0x70] sm:$0xff] }
  0x15   : > { %v248_v40 = vsel %vm230_vm0, %v1646_v33, 0.0  ;;  %v305_v41 = vmul.f32 %v1609_v13, %v1609_v13  ;;  %v334_v42 = vsel %vm230_vm0, %v302_v31, 0.0  ;;  %v336_v43 = vsel %vm230_vm0, %v303_v32, 0.0  ;;  %v1695_v4 = vld [vmem:[%s1585_s30 + $0x78] sm:$0xff]  ;;  %v1719_v31 = vld [vmem:[%s1585_s30 + $0x90] sm:$0xff] }
  0x16   : > { %427 = vmatpush.msra.mxu0 %v405_v12  ;;  %450 = vmatpush.msra.mxu1 %v405_v12  ;;  %v237_v22 = vadd.f32 %v236_v15, %v235_v18  ;;  %v335_v46 = vadd.f32 %v334_v42, %v333_v37  ;;  %v250_v47 = vsel %vm230_vm0, %v1654_v38, 0.0  ;;  %v306_v48 = vmul.f32 %v1617_v17, %v1617_v17  ;;  %v1703_v15 = vld [vmem:[%s1585_s30 + $0x80] sm:$0xff] }
  0x17   : > { %v338_v49 = vsel %vm230_vm0, %v304_v36, 0.0  ;;  %v252_v53 = vsel %vm230_vm0, %v1663_v44, 0.0  ;;  %v307_v54 = vmul.f32 %v1625_v21, %v1625_v21  ;;  %v340_v55 = vsel %vm230_vm0, %v305_v41, 0.0 }
  0x18   : > { %428 = vmatpush.msra.mxu0 %v404_v16  ;;  %451 = vmatpush.msra.mxu1 %v404_v16  ;;  %v239_v25 = vadd.f32 %v238_v19, %v237_v22  ;;  %v337_v52 = vadd.f32 %v336_v43, %v335_v46  ;;  %v254_v59 = vsel %vm230_vm0, %v1671_v50, 0.0  ;;  %v308_v60 = vmul.f32 %v1630_v24, %v1630_v24  ;;  %v1735_v46 = vld [vmem:[%s1585_s30 + $0xa0] sm:$0xff] }
  0x19   : > { %v342_v61 = vsel %vm230_vm0, %v306_v48, 0.0  ;;  %v256_v1 = vsel %vm230_vm0, %v1679_v56, 0.0  ;;  %v309_v2 = vmul.f32 %v1637_v28, %v1637_v28  ;;  %v344_v3 = vsel %vm230_vm0, %v307_v54, 0.0 }
  0x1a   : > { %429 = vmatpush.msra.mxu0 %v403_v20  ;;  %452 = vmatpush.msra.mxu1 %v403_v20  ;;  %v241_v29 = vadd.f32 %v240_v23, %v239_v25  ;;  %v339_v58 = vadd.f32 %v338_v49, %v337_v52  ;;  %v258_v11 = vsel %vm230_vm0, %v1687_v62, 0.0  ;;  %v310_v12 = vmul.f32 %v1646_v33, %v1646_v33  ;;  %v1711_v23 = vld [vmem:[%s1585_s30 + $0x88] sm:$0xff] }
  0x1b   : > { %v346_v14 = vsel %vm230_vm0, %v308_v60, 0.0  ;;  %v260_v19 = vsel %vm230_vm0, %v1695_v4, 0.0  ;;  %v311_v20 = vmul.f32 %v1654_v38, %v1654_v38  ;;  %v348_v22 = vsel %vm230_vm0, %v309_v2, 0.0  ;;  %v1751_v60 = vld [vmem:[%s1585_s30 + $0xb0] sm:$0xff] }
  0x1c   : > { %v243_v34 = vadd.f32 %v242_v26, %v241_v29  ;;  %v341_v0 = vadd.f32 %v340_v55, %v339_v58  ;;  %v262_v27 = vsel %vm230_vm0, %v1703_v15, 0.0  ;;  %v312_v29 = vmul.f32 %v1663_v44, %v1663_v44 }
  0x1d   : > { %v313_v36 = vmul.f32 %v1671_v50, %v1671_v50  ;;  %v352_v37 = vsel %vm230_vm0, %v311_v20, 0.0  ;;  %v266_v42 = vsel %vm230_vm0, %v1719_v31, 0.0  ;;  %v314_v43 = vmul.f32 %v1679_v56, %v1679_v56 }
  0x1e   : > { %v245_v39 = vadd.f32 %v244_v30, %v243_v34  ;;  %v343_v10 = vadd.f32 %v342_v61, %v341_v0  ;;  %v350_v30 = vsel %vm230_vm0, %v310_v12, 0.0  ;;  %v316_v58 = vmul.f32 %v1695_v4, %v1695_v4 }
  0x1f   : > { %v356_v52 = vsel %vm230_vm0, %v313_v36, 0.0  ;;  %v318_v12 = vmul.f32 %v1711_v23, %v1711_v23 }
  0x20   : > { %v247_v45 = vadd.f32 %v246_v35, %v245_v39  ;;  %v345_v18 = vadd.f32 %v344_v3, %v343_v10  ;;  %v264_v35 = vsel %vm230_vm0, %v1711_v23, 0.0  ;;  %v1727_v39 = vld [vmem:[%s1585_s30 + $0x98] sm:$0xff] }
  0x21   : > { %v268_v49 = vsel %vm230_vm0, %v1727_v39, 0.0  ;;  %v1759_v3 = vld [vmem:[%s1585_s30 + $0xb8] sm:$0xff] }
  0x22   : > { %v249_v51 = vadd.f32 %v248_v40, %v247_v45  ;;  %v347_v26 = vadd.f32 %v346_v14, %v345_v18  ;;  %v354_v45 = vsel %vm230_vm0, %v312_v29, 0.0  ;;  %v362_v14 = vsel %vm230_vm0, %v316_v58, 0.0 }
  0x23   : > { %v276_v20 = vsel %vm230_vm0, %v1759_v3, 0.0  ;;  %v323_v58 = vmul.f32 %v1751_v60, %v1751_v60 }
  0x24   : > { %v251_v57 = vadd.f32 %v250_v47, %v249_v51  ;;  %v349_v34 = vadd.f32 %v348_v22, %v347_v26  ;;  %v315_v51 = vmul.f32 %v1687_v62, %v1687_v62  ;;  %v319_v22 = vmul.f32 %v1719_v31, %v1719_v31  ;;  %v1775_v26 = vld [vmem:[%s1585_s30 + $0xc8] sm:$0xff] }
  0x26   : > { %v253_v63 = vadd.f32 %v252_v53, %v251_v57  ;;  %v351_v41 = vadd.f32 %v350_v30, %v349_v34  ;;  %v1743_v53 = vld [vmem:[%s1585_s30 + $0xa8] sm:$0xff]  ;;  %v270_v57 = vsel %vm230_vm0, %v1735_v46, 0.0  ;;  %v360_v2 = vsel %vm230_vm0, %v315_v51, 0.0 }
  0x27   : > { %v272_v0 = vsel %vm230_vm0, %v1743_v53, 0.0  ;;  %v366_v34 = vsel %vm230_vm0, %v318_v12, 0.0 }
  0x28   : > { %v255_v9 = vadd.f32 %v254_v59, %v253_v63  ;;  %v353_v48 = vadd.f32 %v352_v37, %v351_v41  ;;  %v358_v59 = vsel %vm230_vm0, %v314_v43, 0.0  ;;  %v321_v41 = vmul.f32 %v1735_v46, %v1735_v46  ;;  %v1791_v43 = vld [vmem:[%s1585_s30 + $0xd8] sm:$0xff] }
  0x2a   : > { %v257_v16 = vadd.f32 %v256_v1, %v255_v9  ;;  %v355_v55 = vadd.f32 %v354_v45, %v353_v48  ;;  %v317_v1 = vmul.f32 %v1703_v15, %v1703_v15 }
  0x2c   : > { %v259_v25 = vadd.f32 %v258_v11, %v257_v16  ;;  %v357_v63 = vadd.f32 %v356_v52, %v355_v55  ;;  %v274_v11 = vsel %vm230_vm0, %v1751_v60, 0.0  ;;  %v1767_v16 = vld [vmem:[%s1585_s30 + $0xc0] sm:$0xff] }
  0x2d   : > { %v278_v30 = vsel %vm230_vm0, %v1767_v16, 0.0  ;;  %v1799_v52 = vld [vmem:[%s1585_s30 + $0xe0] sm:$0xff] }
  0x2e   : > { %v261_v32 = vadd.f32 %v260_v19, %v259_v25  ;;  %v359_v10 = vadd.f32 %v358_v59, %v357_v63  ;;  %v364_v25 = vsel %vm230_vm0, %v317_v1, 0.0  ;;  %v372_v59 = vsel %vm230_vm0, %v321_v41, 0.0 }
  0x2f   : > { %v286_v1 = vsel %vm230_vm0, %v1799_v52, 0.0 }
  0x30   : > { %v263_v40 = vadd.f32 %v262_v27, %v261_v32  ;;  %v361_v19 = vadd.f32 %v360_v2, %v359_v10  ;;  %v320_v32 = vmul.f32 %v1727_v39, %v1727_v39  ;;  %v324_v2 = vmul.f32 %v1759_v3, %v1759_v3  ;;  %v1815_v10 = vld [vmem:[%s1585_s30 + $0xf0] sm:$0xff] }
  0x32   : > { %v265_v47 = vadd.f32 %v264_v35, %v263_v40  ;;  %v363_v29 = vadd.f32 %v362_v14, %v361_v19  ;;  %v1783_v35 = vld [vmem:[%s1585_s30 + $0xd0] sm:$0xff]  ;;  %v280_v40 = vsel %vm230_vm0, %v1775_v26, 0.0  ;;  %v370_v51 = vsel %vm230_vm0, %v320_v32, 0.0 }
  0x33   : > { %v282_v48 = vsel %vm230_vm0, %v1783_v35, 0.0  ;;  %v376_v19 = vsel %vm230_vm0, %v323_v58, 0.0 }
  0x34   : > { %v267_v54 = vadd.f32 %v266_v42, %v265_v47  ;;  %v365_v37 = vadd.f32 %v364_v25, %v363_v29  ;;  %v368_v42 = vsel %vm230_vm0, %v319_v22, 0.0  ;;  %v326_v29 = vmul.f32 %v1775_v26, %v1775_v26 }
  0x36   : > { %v269_v61 = vadd.f32 %v268_v49, %v267_v54  ;;  %v367_v47 = vadd.f32 %v366_v34, %v365_v37  ;;  %v322_v49 = vmul.f32 %v1743_v53, %v1743_v53  ;;  %v327_v37 = vmul.f32 %v1783_v35, %v1783_v35 }
  0x38   : > { %v271_v9 = vadd.f32 %v270_v57, %v269_v61  ;;  %v369_v55 = vadd.f32 %v368_v42, %v367_v47  ;;  %v284_v57 = vsel %vm230_vm0, %v1791_v43, 0.0  ;;  %v1807_v61 = vld [vmem:[%s1585_s30 + $0xe8] sm:$0xff]  ;;  %v382_v47 = vsel %vm230_vm0, %v326_v29, 0.0 }
  0x39   : > { %v288_v14 = vsel %vm230_vm0, %v1807_v61, 0.0  ;;  %v330_v58 = vmul.f32 %v1807_v61, %v1807_v61 }
  0x3a   : > { %v273_v18 = vadd.f32 %v272_v0, %v271_v9  ;;  %v371_v0 = vadd.f32 %v370_v51, %v369_v55  ;;  %v374_v9 = vsel %vm230_vm0, %v322_v49, 0.0  ;;  %v329_v51 = vmul.f32 %v1799_v52, %v1799_v52 }
  0x3c   : > { %v275_v27 = vadd.f32 %v274_v11, %v273_v18  ;;  %v373_v12 = vadd.f32 %v372_v59, %v371_v0  ;;  %v325_v18 = vmul.f32 %v1767_v16, %v1767_v16 }
  0x3e   : > { %v277_v36 = vadd.f32 %v276_v20, %v275_v27  ;;  %v1823_v20 = vld [vmem:[%s1585_s30 + $0xf8] sm:$0xff]  ;;  %v375_v25 = vadd.f32 %v374_v9, %v373_v12  ;;  %v290_v27 = vsel %vm230_vm0, %v1815_v10, 0.0 }
  0x3f   : > { %v332_v12 = vmul.f32 %v1823_v20, %v1823_v20 }
  0x40   : > { %v279_v45 = vadd.f32 %v278_v30, %v277_v36  ;;  %v378_v30 = vsel %vm230_vm0, %v324_v2, 0.0  ;;  %v377_v34 = vadd.f32 %v376_v19, %v375_v25  ;;  %v292_v36 = vsel %vm230_vm0, %v1823_v20, 0.0 }
  0x41   : > { %v388_v2 = vsel %vm230_vm0, %v329_v51, 0.0  ;;  %v394_v29 = vsel %vm230_vm0, %v332_v12, 0.0 }
  0x42   : > { %v281_v54 = vadd.f32 %v280_v40, %v279_v45  ;;  %v380_v40 = vsel %vm230_vm0, %v325_v18, 0.0  ;;  %v379_v42 = vadd.f32 %v378_v30, %v377_v34  ;;  %v328_v45 = vmul.f32 %v1791_v43, %v1791_v43 }
  0x44   : > { %v283_v63 = vadd.f32 %v282_v48, %v281_v54  ;;  %v381_v49 = vadd.f32 %v380_v40, %v379_v42  ;;  %v384_v54 = vsel %vm230_vm0, %v327_v37, 0.0  ;;  %v386_v59 = vsel %vm230_vm0, %v328_v45, 0.0 }
  0x46   : > { %v285_v11 = vadd.f32 %v284_v57, %v283_v63  ;;  %v383_v57 = vadd.f32 %v382_v47, %v381_v49 }
  0x48   : > { %v287_v22 = vadd.f32 %v286_v1, %v285_v11  ;;  %v385_v0 = vadd.f32 %v384_v54, %v383_v57  ;;  %v331_v1 = vmul.f32 %v1815_v10, %v1815_v10 }
  0x4a   : > { %v289_v32 = vadd.f32 %v288_v14, %v287_v22  ;;  %v387_v11 = vadd.f32 %v386_v59, %v385_v0  ;;  %v390_v14 = vsel %vm230_vm0, %v330_v58, 0.0  ;;  %v392_v22 = vsel %vm230_vm0, %v331_v1, 0.0 }
  0x4c   : > { %v291_v41 = vadd.f32 %v290_v27, %v289_v32  ;;  %v389_v19 = vadd.f32 %v388_v2, %v387_v11 }
  0x4e   : > { %v293_v48 = vadd.f32 %v292_v36, %v291_v41  ;;  %v391_v27 = vadd.f32 %v390_v14, %v389_v19 }
  0x50   : > { %v294_v55 = vrot.slane %v293_v48, 4  ;;  %v393_v32 = vadd.f32 %v392_v22, %v391_v27 }
  0x52   : > { %v295_v63 = vadd.f32 %v294_v55, %v293_v48  ;;  %v395_v36 = vadd.f32 %v394_v29, %v393_v32 }
  0x54   : > { %v296_v9 = vrot.slane %v295_v63, 2  ;;  %v396_v37 = vrot.slane %v395_v36, 4 }
  0x56   : > { %v297_v18 = vadd.f32 %v296_v9, %v295_v63  ;;  %v397_v40 = vadd.f32 %v396_v37, %v395_v36 }
  0x58   : > { %v298_v25 = vrot.slane %v297_v18, 1  ;;  %v398_v41 = vrot.slane %v397_v40, 2 }
  0x5a   : > { %v299_v30 = vadd.f32 %v298_v25, %v297_v18  ;;  %v399_v42 = vadd.f32 %v398_v41, %v397_v40 }
  0x5c   : > { %v300_v34 = vmul.f32 0.00390625, %v299_v30  ;;  %v400_v45 = vrot.slane %v399_v42, 1 }
  0x5e   : > { %1377 = vmatmul.msk.f32.vlgmr.msra.gmra.mxu0 %vm230_vm0, %v300_v34  ;;  %v401_v47 = vadd.f32 %v400_v45, %v399_v42 }
  0x60   : > { %v402_v48 = vmul.f32 0.00390625, %v401_v47 }
  0x62   : > { %1378 = vmatmul.msk.f32.vlgmr.msra.gmra.mxu1 %vm230_vm0, %v402_v48 }
  0xdb   : > { %v431_v49 = vpop.f32.mrf.mxu0 }
  0xdc   : > { %v457_v51 = vmul.f32 %v431_v49, %v431_v49  ;;  %v1854_v2 = vperm.slane %v431_v49, 0 }
  0xde   : > { %v460_v11 = vsub.f32 %v1588_v5, %v1854_v2  ;;  %v461_v12 = vsub.f32 %v1591_v6, %v1854_v2  ;;  %v462_v14 = vsub.f32 %v1594_v7, %v1854_v2  ;;  %v463_v19 = vsub.f32 %v1597_v8, %v1854_v2 }
  0xdf   : > { %v454_v54 = vpop.f32.mrf.mxu1  ;;  %v464_v22 = vsub.f32 %v1609_v13, %v1854_v2  ;;  %v465_v25 = vsub.f32 %v1617_v17, %v1854_v2  ;;  %v466_v6 = vsub.f32 %v1625_v21, %v1854_v2  ;;  %v467_v7 = vsub.f32 %v1630_v24, %v1854_v2 }
  0xe0   : > { %v458_v55 = vsub.f32 %v454_v54, %v457_v51  ;;  %v468_v27 = vsub.f32 %v1637_v28, %v1854_v2  ;;  %v469_v8 = vsub.f32 %v1646_v33, %v1854_v2  ;;  %v470_v13 = vsub.f32 %v1654_v38, %v1854_v2 }
  0xe1   : > { %v471_v17 = vsub.f32 %v1663_v44, %v1854_v2  ;;  %v472_v29 = vsub.f32 %v1671_v50, %v1854_v2  ;;  %v473_v21 = vsub.f32 %v1679_v56, %v1854_v2  ;;  %v474_v24 = vsub.f32 %v1687_v62, %v1854_v2 }
  0xe2   : > { %v492_v57 = vadd.f32 1e-05, %v458_v55  ;;  %v475_v28 = vsub.f32 %v1695_v4, %v1854_v2  ;;  %v476_v33 = vsub.f32 %v1703_v15, %v1854_v2  ;;  %v477_v38 = vsub.f32 %v1711_v23, %v1854_v2 }
  0xe3   : > { %v478_v44 = vsub.f32 %v1719_v31, %v1854_v2  ;;  %v479_v50 = vsub.f32 %v1727_v39, %v1854_v2  ;;  %v480_v56 = vsub.f32 %v1735_v46, %v1854_v2  ;;  %v481_v62 = vsub.f32 %v1743_v53, %v1854_v2 }
  0xe4   : > { %1393 = vrsqrt.f32 %v492_v57  ;;  %vm499_vm2 = vweird.f32 %v492_v57  ;;  %v482_v4 = vsub.f32 %v1751_v60, %v1854_v2  ;;  %v483_v15 = vsub.f32 %v1759_v3, %v1854_v2 }
  0xe5   : > { %v484_v23 = vsub.f32 %v1767_v16, %v1854_v2  ;;  %v485_v31 = vsub.f32 %v1775_v26, %v1854_v2  ;;  %v486_v39 = vsub.f32 %v1783_v35, %v1854_v2  ;;  %v487_v46 = vsub.f32 %v1791_v43, %v1854_v2 }
  0xe6   : > { %v488_v53 = vsub.f32 %v1799_v52, %v1854_v2  ;;  %v489_v60 = vsub.f32 %v1807_v61, %v1854_v2  ;;  %v490_v3 = vsub.f32 %v1815_v10, %v1854_v2  ;;  %v491_v16 = vsub.f32 %v1823_v20, %v1854_v2  ;;  %v1929_v61 = vld [vmem:[%s3400_s2] ss:$0 sm:$0xff] }
  0xea   : > { %v1394_v58 = vpop.eup %1393 }
  0xeb   : > { %v494_v59 = vmul.f32 %v1394_v58, %v492_v57  ;;  %vm500_vm1 = vweird.f32 %v1394_v58 }
  0xec   : > { %vm1862_vm3 = vmor %vm499_vm2, %vm500_vm1 }
  0xed   : > { %v495_v63 = vmul.f32 %v1394_v58, %v494_v59 }
  0xef   : > { %v496_v0 = vmul.f32 0.5, %v495_v63 }
  0xf1   : > { %v497_v1 = vsub.f32 1.5, %v496_v0 }
  0xf3   : > { %v498_v9 = vmul.f32 %v1394_v58, %v497_v1 }
  0xf5   : > { %v502_v5 = vsel %vm1862_vm3, %v1394_v58, %v498_v9 }
  0xf6   : > { %v503_v30 = vperm.slane %v502_v5, 0 }
  0xf8   : > { %v504_v32 = vmul.f32 %v503_v30, %v460_v11  ;;  %v505_v26 = vmul.f32 %v503_v30, %v461_v12  ;;  %v506_v34 = vmul.f32 %v503_v30, %v462_v14  ;;  %v507_v36 = vmul.f32 %v503_v30, %v463_v19  ;;  %v1935_v12 = vld [vmem:[%s3401_s3] ss:$0 sm:$0xff] }
  0xf9   : > { %v508_v35 = vmul.f32 %v503_v30, %v464_v22  ;;  %v509_v37 = vmul.f32 %v503_v30, %v465_v25  ;;  %v510_v40 = vmul.f32 %v503_v30, %v466_v6  ;;  %v511_v43 = vmul.f32 %v503_v30, %v467_v7 }
  0xfa   : > { %v512_v41 = vmul.f32 %v503_v30, %v468_v27  ;;  %v513_v42 = vmul.f32 %v503_v30, %v469_v8  ;;  %v514_v52 = vmul.f32 %v503_v30, %v470_v13  ;;  %v515_v45 = vmul.f32 %v503_v30, %v471_v17 }
  0xfb   : > { %v516_v47 = vmul.f32 %v503_v30, %v472_v29  ;;  %v517_v10 = vmul.f32 %v503_v30, %v473_v21  ;;  %v518_v20 = vmul.f32 %v503_v30, %v474_v24  ;;  %v519_v48 = vmul.f32 %v503_v30, %v475_v28 }
  0xfc   : > { %v520_v49 = vmul.f32 %v503_v30, %v476_v33  ;;  %v521_v51 = vmul.f32 %v503_v30, %v477_v38  ;;  %v522_v54 = vmul.f32 %v503_v30, %v478_v44  ;;  %v523_v55 = vmul.f32 %v503_v30, %v479_v50 }
  0xfd   : > { %v524_v57 = vmul.f32 %v503_v30, %v480_v56  ;;  %v525_v58 = vmul.f32 %v503_v30, %v481_v62  ;;  %v526_v59 = vmul.f32 %v503_v30, %v482_v4  ;;  %v527_v63 = vmul.f32 %v503_v30, %v483_v15 }
  0xfe   : > { %v528_v0 = vmul.f32 %v503_v30, %v484_v23  ;;  %v529_v1 = vmul.f32 %v503_v30, %v485_v31  ;;  %v530_v2 = vmul.f32 %v503_v30, %v486_v39  ;;  %v531_v9 = vmul.f32 %v503_v30, %v487_v46 }
  0xff   : > { %v540_v11 = vmul.f32 %v1929_v61, %v504_v32  ;;  %v532_v14 = vmul.f32 %v503_v30, %v488_v53  ;;  %v533_v18 = vmul.f32 %v503_v30, %v489_v60  ;;  %v534_v19 = vmul.f32 %v503_v30, %v490_v3 }
 0x100   : > { %v541_v22 = vmul.f32 %v1929_v61, %v505_v26  ;;  %v535_v25 = vmul.f32 %v503_v30, %v491_v16  ;;  %v542_v5 = vmul.f32 %v1929_v61, %v506_v34  ;;  %v543_v6 = vmul.f32 %v1929_v61, %v507_v36 }
 0x101   : > { %v544_v7 = vmul.f32 %v1929_v61, %v508_v35  ;;  %v545_v27 = vmul.f32 %v1929_v61, %v509_v37  ;;  %v546_v8 = vmul.f32 %v1929_v61, %v510_v40  ;;  %v547_v13 = vmul.f32 %v1929_v61, %v511_v43 }
 0x102   : > { %v548_v17 = vmul.f32 %v1929_v61, %v512_v41  ;;  %v549_v29 = vmul.f32 %v1929_v61, %v513_v42  ;;  %v550_v21 = vmul.f32 %v1929_v61, %v514_v52  ;;  %v551_v24 = vmul.f32 %v1929_v61, %v515_v45 }
 0x103   : > { %v1949_v28 = vadd.f32 %v1935_v12, %v540_v11  ;;  %v552_v33 = vmul.f32 %v1929_v61, %v516_v47  ;;  %v553_v30 = vmul.f32 %v1929_v61, %v517_v10  ;;  %v554_v38 = vmul.f32 %v1929_v61, %v518_v20 }
 0x104   : > { %v1955_v44 = vadd.f32 %v1935_v12, %v541_v22  ;;  %v555_v50 = vmul.f32 %v1929_v61, %v519_v48  ;;  %v556_v56 = vmul.f32 %v1929_v61, %v520_v49  ;;  %v557_v62 = vmul.f32 %v1929_v61, %v521_v51 }
 0x105   : > { %3449 = vst [vmem:[#allocation2_spill] sm:$0xff] %v1949_v28  ;;  %v1961_v4 = vadd.f32 %v1935_v12, %v542_v5  ;;  %v558_v15 = vmul.f32 %v1929_v61, %v522_v54  ;;  %v559_v23 = vmul.f32 %v1929_v61, %v523_v55  ;;  %v1966_v31 = vmul.f32 %v1929_v61, %v524_v57 }
 0x106   : > { %3450 = vst [vmem:[#allocation3_spill] sm:$0xff] %v1955_v44  ;;  %v1969_v39 = vadd.f32 %v1935_v12, %v543_v6  ;;  %v1972_v46 = vmul.f32 %v1929_v61, %v525_v58  ;;  %v1975_v53 = vmul.f32 %v1929_v61, %v526_v59  ;;  %v1978_v60 = vadd.f32 %v1935_v12, %v544_v7 }
 0x107   : > { %3451 = vst [vmem:[#allocation4_spill] sm:$0xff] %v1961_v4  ;;  %v608_v3 = vsub.f32 0.0, %v1949_v28  ;;  %v1982_v16 = vmul.f32 %v1929_v61, %v527_v63  ;;  %v1985_v32 = vmul.f32 %v1929_v61, %v528_v0  ;;  %v1988_v26 = vadd.f32 %v1935_v12, %v545_v27 }
 0x108   : > { %3452 = vst [vmem:[#allocation5_spill] sm:$0xff] %v1969_v39  ;;  %v609_v34 = vsub.f32 0.0, %v1955_v44  ;;  %v1992_v36 = vmul.f32 %v1929_v61, %v529_v1  ;;  %v1995_v35 = vmul.f32 %v1929_v61, %v530_v2  ;;  %v1998_v37 = vadd.f32 %v1935_v12, %v546_v8 }
 0x109   : > { %3453 = vst [vmem:[#allocation6_spill] sm:$0xff] %v1978_v60  ;;  %v610_v40 = vsub.f32 0.0, %v1961_v4  ;;  %v2002_v43 = vmul.f32 %v1929_v61, %v531_v9  ;;  %v2005_v41 = vmul.f32 %v1929_v61, %v532_v14  ;;  %v2008_v42 = vadd.f32 %v1935_v12, %v547_v13 }
 0x10a   : > { %3454 = vst [vmem:[#allocation7_spill] sm:$0xff] %v1988_v26  ;;  %v611_v52 = vsub.f32 0.0, %v1969_v39  ;;  %v2012_v45 = vmul.f32 %v1929_v61, %v533_v18  ;;  %v2015_v47 = vadd.f32 %v1935_v12, %v548_v17  ;;  %v612_v10 = vsub.f32 0.0, %v1978_v60 }
 0x10b   : > { %3455 = vst [vmem:[#allocation8_spill] sm:$0xff] %v1998_v37  ;;  %v640_v20 = vmul.f32 1.442695, %v608_v3  ;;  %v2019_v48 = vmul.f32 %v1929_v61, %v534_v19  ;;  %v2022_v49 = vadd.f32 %v1935_v12, %v549_v29  ;;  %v613_v51 = vsub.f32 0.0, %v1988_v26 }
 0x10c   : > { %3456 = vst [vmem:[#allocation9_spill] sm:$0xff] %v2008_v42  ;;  %v642_v54 = vmul.f32 1.442695, %v609_v34  ;;  %v2026_v55 = vmul.f32 %v1929_v61, %v535_v25  ;;  %v2029_v57 = vadd.f32 %v1935_v12, %v550_v21  ;;  %v614_v58 = vsub.f32 0.0, %v1998_v37 }
 0x10d   : > { %3457 = vst [vmem:[#allocation10_spill] sm:$0xff] %v2015_v47  ;;  %v644_v59 = vmul.f32 1.442695, %v610_v40  ;;  %v2033_v63 = vadd.f32 %v1935_v12, %v551_v24  ;;  %v2036_v0 = vadd.f32 %v1935_v12, %v552_v33  ;;  %v615_v1 = vsub.f32 0.0, %v2008_v42 }
 0x10e   : > { %3458 = vst [vmem:[#allocation11_spill] sm:$0xff] %v2022_v49  ;;  %v646_v2 = vmul.f32 1.442695, %v611_v52  ;;  %v2040_v9 = vadd.f32 %v1935_v12, %v553_v30  ;;  %v616_v61 = vsub.f32 0.0, %v2015_v47  ;;  %1395 = vpow2.f32 %v640_v20 }
 0x10f   : > { %3459 = vst [vmem:[#allocation12_spill] sm:$0xff] %v2029_v57  ;;  %v648_v11 = vmul.f32 1.442695, %v612_v10  ;;  %v2044_v14 = vadd.f32 %v1935_v12, %v554_v38  ;;  %v617_v18 = vsub.f32 0.0, %v2022_v49  ;;  %1397 = vpow2.f32 %v642_v54 }
 0x110   : > { %3460 = vst [vmem:[#allocation13_spill] sm:$0xff] %v2033_v63  ;;  %v650_v19 = vmul.f32 1.442695, %v613_v51  ;;  %v2048_v22 = vadd.f32 %v1935_v12, %v555_v50  ;;  %v618_v25 = vsub.f32 0.0, %v2029_v57  ;;  %1399 = vpow2.f32 %v644_v59 }
 0x111   : > { %3461 = vst [vmem:[#allocation14_spill] sm:$0xff] %v2036_v0  ;;  %v652_v5 = vmul.f32 1.442695, %v614_v58  ;;  %v2052_v6 = vadd.f32 %v1935_v12, %v556_v56  ;;  %v619_v7 = vsub.f32 0.0, %v2033_v63  ;;  %1401 = vpow2.f32 %v646_v2 }
 0x112   : > { %3462 = vst [vmem:[#allocation15_spill] sm:$0xff] %v2040_v9  ;;  %v654_v27 = vmul.f32 1.442695, %v615_v1  ;;  %v2056_v8 = vadd.f32 %v1935_v12, %v557_v62  ;;  %v620_v13 = vsub.f32 0.0, %v2036_v0  ;;  %1403 = vpow2.f32 %v648_v11 }
 0x113   : > { %3463 = vst [vmem:[#allocation16_spill] sm:$0xff] %v2044_v14  ;;  %v656_v17 = vmul.f32 1.442695, %v616_v61  ;;  %v2060_v29 = vadd.f32 %v1935_v12, %v558_v15  ;;  %v621_v21 = vsub.f32 0.0, %v2040_v9  ;;  %1405 = vpow2.f32 %v650_v19 }
 0x114   : > { %3464 = vst [vmem:[#allocation17_spill] sm:$0xff] %v2048_v22  ;;  %v658_v24 = vmul.f32 1.442695, %v617_v18  ;;  %v2063_v33 = vpop.eup %1395  ;;  %v2066_v30 = vadd.f32 %v1935_v12, %v559_v23  ;;  %v622_v38 = vsub.f32 0.0, %v2044_v14  ;;  %1407 = vpow2.f32 %v652_v5 }
 0x115   : > { %3465 = vst [vmem:[#allocation18_spill] sm:$0xff] %v2052_v6  ;;  %v660_v50 = vmul.f32 1.442695, %v618_v25  ;;  %v2069_v56 = vpop.eup %1397  ;;  %v2073_v62 = vadd.f32 %v1935_v12, %v1966_v31  ;;  %v623_v15 = vsub.f32 0.0, %v2048_v22  ;;  %1409 = vpow2.f32 %v654_v27 }
 0x116   : > { %3466 = vst [vmem:[#allocation19_spill] sm:$0xff] %v2056_v8  ;;  %v662_v3 = vmul.f32 1.442695, %v619_v7  ;;  %v2076_v34 = vpop.eup %1399  ;;  %v2080_v23 = vadd.f32 %v1935_v12, %v1972_v46  ;;  %v624_v40 = vsub.f32 0.0, %v2052_v6  ;;  %1411 = vpow2.f32 %v656_v17 }
 0x117   : > { %3467 = vst [vmem:[#allocation20_spill] sm:$0xff] %v2060_v29  ;;  %v664_v52 = vmul.f32 1.442695, %v620_v13  ;;  %v2083_v10 = vpop.eup %1401  ;;  %v2087_v31 = vadd.f32 %v1935_v12, %v1975_v53  ;;  %v625_v20 = vsub.f32 0.0, %v2056_v8  ;;  %1413 = vpow2.f32 %v658_v24 }
 0x118   : > { %3468 = vst [vmem:[#allocation21_spill] sm:$0xff] %v2066_v30  ;;  %v666_v51 = vmul.f32 1.442695, %v621_v21  ;;  %v2090_v54 = vpop.eup %1403  ;;  %v2094_v46 = vadd.f32 %v1935_v12, %v1982_v16  ;;  %v626_v58 = vsub.f32 0.0, %v2060_v29  ;;  %1415 = vpow2.f32 %v660_v50 }
 0x119   : > { %3469 = vst [vmem:[#allocation22_spill] sm:$0xff] %v2073_v62  ;;  %v668_v59 = vmul.f32 1.442695, %v622_v38  ;;  %v2097_v1 = vpop.eup %1405  ;;  %v2101_v53 = vadd.f32 %v1935_v12, %v1985_v32  ;;  %v627_v2 = vsub.f32 0.0, %v2066_v30  ;;  %1417 = vpow2.f32 %v662_v3 }
 0x11a   : > { %3470 = vst [vmem:[#allocation23_spill] sm:$0xff] %v2080_v23  ;;  %v670_v61 = vmul.f32 1.442695, %v623_v15  ;;  %v2104_v11 = vpop.eup %1407  ;;  %v2108_v16 = vadd.f32 %v1935_v12, %v1992_v36  ;;  %v628_v18 = vsub.f32 0.0, %v2073_v62  ;;  %1419 = vpow2.f32 %v664_v52 }
 0x11b   : > { %3471 = vst [vmem:[#allocation24_spill] sm:$0xff] %v2087_v31  ;;  %v672_v19 = vmul.f32 1.442695, %v624_v40  ;;  %v2111_v25 = vpop.eup %1409  ;;  %v2115_v32 = vadd.f32 %v1935_v12, %v1995_v35  ;;  %v629_v5 = vsub.f32 0.0, %v2080_v23  ;;  %1421 = vpow2.f32 %v666_v51 }
 0x11c   : > { %3472 = vst [vmem:[#allocation25_spill] sm:$0xff] %v2094_v46  ;;  %v674_v7 = vmul.f32 1.442695, %v625_v20  ;;  %v2118_v27 = vpop.eup %1411  ;;  %v2122_v36 = vadd.f32 %v1935_v12, %v2002_v43  ;;  %v630_v13 = vsub.f32 0.0, %v2087_v31  ;;  %1423 = vpow2.f32 %v668_v59 }
 0x11d   : > { %3473 = vst [vmem:[#allocation26_spill] sm:$0xff] %v2101_v53  ;;  %v676_v17 = vmul.f32 1.442695, %v626_v58  ;;  %v2125_v21 = vpop.eup %1413  ;;  %v2129_v35 = vadd.f32 %v1935_v12, %v2005_v41  ;;  %v631_v24 = vsub.f32 0.0, %v2094_v46  ;;  %1425 = vpow2.f32 %v670_v61 }
 0x11e   : > { %3474 = vst [vmem:[#allocation27_spill] sm:$0xff] %v2108_v16  ;;  %v678_v38 = vmul.f32 1.442695, %v627_v2  ;;  %v2132_v50 = vpop.eup %1415  ;;  %v2136_v43 = vadd.f32 %v1935_v12, %v2012_v45  ;;  %v632_v15 = vsub.f32 0.0, %v2101_v53  ;;  %1427 = vpow2.f32 %v672_v19 }
 0x11f   : > { %3475 = vst [vmem:[#allocation28_spill] sm:$0xff] %v2115_v32  ;;  %v680_v3 = vmul.f32 1.442695, %v628_v18  ;;  %v2139_v40 = vpop.eup %1417  ;;  %v2143_v41 = vadd.f32 %v1935_v12, %v2019_v48  ;;  %v633_v52 = vsub.f32 0.0, %v2108_v16  ;;  %1429 = vpow2.f32 %v674_v7 }
 0x120   : > { %3476 = vst [vmem:[#allocation29_spill] sm:$0xff] %v2122_v36  ;;  %v682_v20 = vmul.f32 1.442695, %v629_v5  ;;  %v2146_v51 = vpop.eup %1419  ;;  %v2150_v45 = vadd.f32 %v1935_v12, %v2026_v55  ;;  %v634_v58 = vsub.f32 0.0, %v2115_v32  ;;  %1431 = vpow2.f32 %v676_v17 }
 0x121   : > { %3477 = vst [vmem:[#allocation30_spill] sm:$0xff] %v2129_v35  ;;  %v684_v59 = vmul.f32 1.442695, %v630_v13  ;;  %v2153_v2 = vpop.eup %1421  ;;  %v635_v61 = vsub.f32 0.0, %v2122_v36  ;;  %v636_v48 = vsub.f32 0.0, %v2129_v35  ;;  %1433 = vpow2.f32 %v678_v38 }
 0x122   : > { %3478 = vst [vmem:[#allocation31_spill] sm:$0xff] %v2136_v43  ;;  %v686_v18 = vmul.f32 1.442695, %v631_v24  ;;  %v2157_v19 = vpop.eup %1423  ;;  %v637_v5 = vsub.f32 0.0, %v2136_v43  ;;  %1435 = vpow2.f32 %v680_v3  ;;  %v688_v7 = vmul.f32 1.442695, %v632_v15 }
 0x123   : > { %3479 = vst [vmem:[#allocation32_spill] sm:$0xff] %v2143_v41  ;;  %v2161_v12 = vadd.f32 1.0, %v2063_v33  ;;  %v2163_v55 = vpop.eup %1425  ;;  %v638_v13 = vsub.f32 0.0, %v2143_v41  ;;  %1437 = vpow2.f32 %v682_v20  ;;  %v690_v17 = vmul.f32 1.442695, %v633_v52 }
 0x124   : > { %3480 = vst [vmem:[#allocation33_spill] sm:$0xff] %v2150_v45  ;;  %v2167_v36 = vadd.f32 1.0, %v2069_v56  ;;  %v2169_v38 = vpop.eup %1427  ;;  %v639_v24 = vsub.f32 0.0, %v2150_v45  ;;  %1439 = vpow2.f32 %v684_v59  ;;  %v692_v43 = vmul.f32 1.442695, %v634_v58 }
 0x125   : > { %v2172_v3 = vpop.eup %1429  ;;  %1441 = vpow2.f32 %v686_v18  ;;  %v694_v33 = vmul.f32 1.442695, %v635_v61  ;;  %v696_v15 = vmul.f32 1.442695, %v636_v48  ;;  %v698_v32 = vmul.f32 1.442695, %v637_v5 }
 0x126   : > { %v1432_v35 = vpop.eup %1431  ;;  %1443 = vpow2.f32 %v688_v7  ;;  %v2175_v20 = vadd.f32 1.0, %v2076_v34  ;;  %v747_v56 = vand.u32 2147483648, %v2161_v12  ;;  %v700_v41 = vmul.f32 1.442695, %v638_v13 }
 0x127   : > { %v1434_v52 = vpop.eup %1433  ;;  %1445 = vpow2.f32 %v690_v17  ;;  %v2179_v45 = vadd.f32 1.0, %v2083_v10  ;;  %v762_v58 = vand.u32 2147483648, %v2167_v36  ;;  %v702_v61 = vmul.f32 1.442695, %v639_v24 }
 0x128   : > { %v1436_v59 = vpop.eup %1435  ;;  %1447 = vpow2.f32 %v692_v43  ;;  %v2183_v48 = vadd.f32 1.0, %v2090_v54  ;;  %v2187_v5 = vadd.f32 1.0, %v2097_v1  ;;  %v2190_v7 = vadd.f32 1.0, %v2104_v11 }
 0x129   : > { %v1438_v34 = vpop.eup %1437  ;;  %1449 = vpow2.f32 %v694_v33  ;;  %v2194_v17 = vadd.f32 1.0, %v2111_v25  ;;  %v2197_v54 = vor.u32 1.1754944e-38, %v747_v56  ;;  %v777_v43 = vand.u32 2147483648, %v2175_v20 }
 0x12a   : > { %v1440_v13 = vpop.eup %1439  ;;  %1451 = vrcp.f32 %v2161_v12  ;;  %v2201_v33 = vadd.f32 1.0, %v2118_v27  ;;  %v2204_v1 = vor.u32 1.1754944e-38, %v762_v58  ;;  %v792_v11 = vand.u32 2147483648, %v2179_v45 }
 0x12b   : > { %v1442_v24 = vpop.eup %1441  ;;  %1453 = vrcp.f32 %v2167_v36  ;;  %v2208_v25 = vadd.f32 1.0, %v2125_v21  ;;  %v2211_v56 = vadd.f32 1.0, %v2132_v50  ;;  %v2215_v27 = vadd.f32 1.0, %v2139_v40 }
 0x12c   : > { %v1444_v10 = vpop.eup %1443  ;;  %1455 = vpow2.f32 %v696_v15  ;;  %v807_v53 = vand.u32 2147483648, %v2183_v48  ;;  %v2220_v15 = vadd.f32 1.0, %v2146_v51  ;;  %v2223_v21 = vor.u32 1.1754944e-38, %v777_v43 }
 0x12d   : > { %v1446_v16 = vpop.eup %1445  ;;  %1457 = vpow2.f32 %v698_v32  ;;  %v822_v50 = vand.u32 2147483648, %v2187_v5  ;;  %v2227_v32 = vadd.f32 1.0, %v2153_v2  ;;  %v2230_v40 = vor.u32 1.1754944e-38, %v792_v11 }
 0x12e   : > { %v1448_v46 = vpop.eup %1447  ;;  %1459 = vrcp.f32 %v2175_v20  ;;  %v2236_v51 = vadd.f32 1.0, %v2157_v19  ;;  %v2239_v43 = vadd.f32 1.0, %v2163_v55  ;;  %v2246_v62 = vadd.f32 1.0, %v2169_v38 }
 0x12f   : > { %v1450_v18 = vpop.eup %1449  ;;  %1461 = vrcp.f32 %v2179_v45  ;;  %v2248_v11 = vor.u32 1.1754944e-38, %v807_v53  ;;  %v837_v58 = vand.u32 2147483648, %v2190_v7  ;;  %v2253_v55 = vadd.f32 1.0, %v2172_v3 }
 0x130   : > { %v2233_v31 = vpop.eup %1451  ;;  %1463 = vrcp.f32 %v2183_v48  ;;  %v2255_v30 = vadd.f32 1.0, %v1432_v35  ;;  %v2257_v29 = vor.u32 1.1754944e-38, %v822_v50  ;;  %v2259_v8 = vadd.f32 1.0, %v1434_v52 }
 0x131   : > { %v2243_v2 = vpop.eup %1453  ;;  %1465 = vrcp.f32 %v2187_v5  ;;  %v852_v38 = vand.u32 2147483648, %v2194_v17  ;;  %v2265_v22 = vadd.f32 1.0, %v1436_v59  ;;  %v2274_v52 = vadd.f32 1.0, %v1438_v34 }
 0x132   : > { %v1456_v19 = vpop.eup %1455  ;;  %1467 = vpow2.f32 %v700_v41  ;;  %v737_v41 = vmul.f32 %v2233_v31, %v2161_v12  ;;  %v752_v35 = vmul.f32 %v2243_v2, %v2167_v36  ;;  %v2282_v53 = vadd.f32 1.0, %v1440_v13 }
 0x133   : > { %v1458_v23 = vpop.eup %1457  ;;  %1469 = vpow2.f32 %v702_v61  ;;  %3481 = vst [vmem:[#allocation34_spill] sm:$0xff] %v2265_v22  ;;  %v2276_v61 = vor.u32 1.1754944e-38, %v837_v58  ;;  %v2284_v14 = vadd.f32 1.0, %v1442_v24  ;;  %v867_v9 = vand.u32 2147483648, %v2201_v33 }
 0x134   : > { %v2263_v6 = vpop.eup %1459  ;;  %1471 = vrcp.f32 %v2190_v7  ;;  %3482 = vst [vmem:[#allocation35_spill] sm:$0xff] %v2274_v52  ;;  %v2290_v34 = vadd.f32 1.0, %v1444_v10  ;;  %v2292_v58 = vor.u32 1.1754944e-38, %v852_v38  ;;  %v882_v50 = vand.u32 2147483648, %v2208_v25 }
 0x135   : > { %v2272_v3 = vpop.eup %1461  ;;  %1473 = vrcp.f32 %v2194_v17  ;;  %3483 = vst [vmem:[#allocation36_spill] sm:$0xff] %v2282_v53  ;;  %v2296_v49 = vadd.f32 1.0, %v1446_v16  ;;  %v738_v13 = vsub.f32 1.0, %v737_v41  ;;  %v753_v24 = vsub.f32 1.0, %v752_v35 }
 0x136   : > { %v2280_v59 = vpop.eup %1463  ;;  %3484 = vst [vmem:[#allocation37_spill] sm:$0xff] %v2284_v14  ;;  %1475 = vrcp.f32 %v2201_v33  ;;  %v767_v47 = vmul.f32 %v2263_v6, %v2175_v20  ;;  %v2300_v37 = vadd.f32 1.0, %v1448_v46  ;;  %v782_v10 = vmul.f32 %v2272_v3, %v2179_v45 }
 0x137   : > { %v2288_v0 = vpop.eup %1465  ;;  %3485 = vst [vmem:[#allocation38_spill] sm:$0xff] %v2290_v34  ;;  %v797_v38 = vmul.f32 %v2280_v59, %v2183_v48  ;;  %v2309_v16 = vadd.f32 1.0, %v1450_v18  ;;  %vm741_vm4 = vweird.f32 %v2161_v12  ;;  %v2314_v35 = vor.u32 1.1754944e-38, %v867_v9 }
 0x138   : > { %v1468_v57 = vpop.eup %1467  ;;  %3486 = vst [vmem:[#allocation39_spill] sm:$0xff] %v2296_v49  ;;  %v812_v41 = vmul.f32 %v2288_v0, %v2187_v5  ;;  %1477 = vrcp.f32 %v2208_v25  ;;  %v2319_v60 = vadd.f32 1.0, %v1456_v19  ;;  %vm756_vm5 = vweird.f32 %v2167_v36 }
 0x139   : > { %v1470_v42 = vpop.eup %1469  ;;  %3487 = vst [vmem:[#allocation40_spill] sm:$0xff] %v2300_v37  ;;  %v2322_v63 = vor.u32 1.1754944e-38, %v882_v50  ;;  %1479 = vrcp.f32 %v2211_v56  ;;  %v2328_v4 = vadd.f32 1.0, %v1458_v23  ;;  %v739_v9 = vmul.f32 %v2233_v31, %v738_v13 }
 0x13a   : > { %v2307_v26 = vpop.eup %1471  ;;  %3488 = vst [vmem:[#allocation41_spill] sm:$0xff] %v2309_v16  ;;  %v754_v44 = vmul.f32 %v2243_v2, %v753_v24  ;;  %v768_v28 = vsub.f32 1.0, %v767_v47  ;;  %vm771_vm6 = vweird.f32 %v2175_v20  ;;  %v783_v19 = vsub.f32 1.0, %v782_v10 }
 0x13b   : > { %v2317_v46 = vpop.eup %1473  ;;  %3489 = vst [vmem:[#allocation42_spill] sm:$0xff] %v2319_v60  ;;  %v798_v60 = vsub.f32 1.0, %v797_v38  ;;  %v827_v50 = vmul.f32 %v2307_v26, %v2190_v7  ;;  %v897_v16 = vand.u32 2147483648, %v2211_v56  ;;  %v2336_v37 = vadd.f32 1.0, %v1468_v57 }
 0x13c   : > { %v2326_v39 = vpop.eup %1475  ;;  %3490 = vst [vmem:[#allocation43_spill] sm:$0xff] %v2328_v4  ;;  %vm786_vm7 = vweird.f32 %v2179_v45  ;;  %v813_v23 = vsub.f32 1.0, %v812_v41  ;;  %v842_v13 = vmul.f32 %v2317_v46, %v2194_v17  ;;  %v2342_v47 = vadd.f32 1.0, %v1470_v42 }
 0x13d   : > { %3491 = vst [vmem:[#allocation44_spill] sm:$0xff] %v2336_v37  ;;  %vm742_vm8 = vweird.f32 %v2233_v31  ;;  %v3493_v10 = vand.u32 2147483647, %v2161_v12  ;;  %v3496_v57 = vand.u32 2147483647, %v2167_v36  ;;  %vm801_vm11 = vweird.f32 %v2183_v48 }
 0x13e   : > { %3492 = vst [vmem:[#allocation45_spill] sm:$0xff] %v2342_v47  ;;  %v857_v42 = vmul.f32 %v2326_v39, %v2201_v33  ;;  %v912_v41 = vand.u32 2147483648, %v2215_v27  ;;  %v2361_v24 = vpop.eup %1477  ;;  %v755_v47 = vadd.f32 %v2243_v2, %v754_v44  ;;  %vm757_vm12 = vweird.f32 %v2243_v2  ;;  %vm2380_vm15 = vmor %vm741_vm4, %vm742_vm8 }
 0x13f   : > { %vm2347_vm9 = vcmp.eq.f32.partialorder %v3493_v10, 8.507059e+37  ;;  %vm2353_vm10 = vcmp.eq.f32.partialorder %v3496_v57, 8.507059e+37  ;;  %v740_v10 = vadd.f32 %v2233_v31, %v739_v9  ;;  %v769_v57 = vmul.f32 %v2263_v6, %v768_v28  ;;  %v2368_v37 = vpop.eup %1479  ;;  %vm2396_vm2 = vmor %vm756_vm5, %vm757_vm12 }
 0x140   : > { %vm816_vm13 = vweird.f32 %v2187_v5  ;;  %v784_v4 = vmul.f32 %v2272_v3, %v783_v19  ;;  %v799_v49 = vmul.f32 %v2280_v59, %v798_v60  ;;  %v828_v34 = vsub.f32 1.0, %v827_v50 }
 0x141   : > { %1481 = vrcp.f32 %v2215_v27  ;;  %vm772_vm14 = vweird.f32 %v2263_v6  ;;  %v814_v9 = vmul.f32 %v2288_v0, %v813_v23  ;;  %v843_v44 = vsub.f32 1.0, %v842_v13 }
 0x142   : > { %1483 = vrcp.f32 %v2220_v15  ;;  %vm787_vm0 = vweird.f32 %v2272_v3  ;;  %v858_v60 = vsub.f32 1.0, %v857_v42  ;;  %v872_v19 = vmul.f32 %v2361_v24, %v2208_v25  ;;  %vm2439_vm1 = vmor %vm771_vm6, %vm772_vm14 }
 0x143   : > { %1485 = vrcp.f32 %v2227_v32  ;;  %v744_v50 = vsel %vm2380_vm15, %v2233_v31, %v740_v10  ;;  %v770_v23 = vadd.f32 %v2263_v6, %v769_v57  ;;  %v3503_v13 = vand.u32 2147483647, %v2175_v20  ;;  %vm2454_vm6 = vmor %vm786_vm7, %vm787_vm0 }
 0x144   : > { %v3506_v14 = vand.u32 2147483647, %v2179_v45  ;;  %vm802_vm8 = vweird.f32 %v2280_v59  ;;  %v3509_v36 = vand.u32 2147483647, %v2183_v48  ;;  %v3512_v57 = vand.u32 2147483647, %v2187_v5 }
 0x145   : > { %vm2403_vm3 = vcmp.eq.f32.partialorder %v3503_v13, 8.507059e+37  ;;  %v759_v13 = vsel %vm2396_vm2, %v2243_v2, %v755_v47  ;;  %v800_v53 = vadd.f32 %v2280_v59, %v799_v49  ;;  %v829_v52 = vmul.f32 %v2307_v26, %v828_v34  ;;  %vm2479_vm7 = vmor %vm801_vm11, %vm802_vm8 }
 0x146   : > { %vm2409_vm4 = vcmp.eq.f32.partialorder %v3506_v14, 8.507059e+37  ;;  %vm2416_vm5 = vcmp.eq.f32.partialorder %v3509_v36, 8.507059e+37  ;;  %vm2422_vm12 = vcmp.eq.f32.partialorder %v3512_v57, 8.507059e+37  ;;  %v887_v14 = vmul.f32 %v2368_v37, %v2211_v56 }
 0x147   : > { %v785_v36 = vadd.f32 %v2272_v3, %v784_v4  ;;  %v815_v22 = vadd.f32 %v2288_v0, %v814_v9  ;;  %vm817_vm15 = vweird.f32 %v2288_v0  ;;  %v844_v2 = vmul.f32 %v2317_v46, %v843_v44  ;;  %v2448_v4 = vpop.eup %1481 }
 0x148   : > { %vm861_vm2 = vweird.f32 %v2201_v33  ;;  %1487 = vrcp.f32 %v2236_v51  ;;  %v859_v20 = vmul.f32 %v2326_v39, %v858_v60  ;;  %v873_v34 = vsub.f32 1.0, %v872_v19  ;;  %v2463_v44 = vpop.eup %1483 }
 0x149   : > { %v2459_v47 = vor.u32 1.1754944e-38, %v897_v16  ;;  %v2461_v9 = vor.u32 1.1754944e-38, %v912_v41  ;;  %v2468_v12 = vsel %vm2347_vm9, %v2197_v54, %v744_v50  ;;  %v2473_v45 = vsel %vm2353_vm10, %v2204_v1, %v759_v13  ;;  %v2496_v48 = vpop.eup %1485  ;;  %vm2511_vm10 = vmor %vm816_vm13, %vm817_vm15 }
 0x14a   : > { %vm832_vm14 = vweird.f32 %v2307_v26  ;;  %v3521_v41 = vand.u32 2147483647, %v2190_v7  ;;  %v3524_v18 = vand.u32 2147483647, %v2194_v17  ;;  %v888_v38 = vsub.f32 1.0, %v887_v14 }
 0x14b   : > { %v774_v60 = vsel %vm2439_vm1, %v2263_v6, %v770_v23  ;;  %v789_v19 = vsel %vm2454_vm6, %v2272_v3, %v785_v36  ;;  %v804_v50 = vsel %vm2479_vm7, %v2280_v59, %v800_v53  ;;  %v830_v13 = vadd.f32 %v2307_v26, %v829_v52 }
 0x14c   : > { %vm2486_vm0 = vcmp.eq.f32.partialorder %v3521_v41, 8.507059e+37  ;;  %vm2492_vm9 = vcmp.eq.f32.partialorder %v3524_v18, 8.507059e+37  ;;  %vm876_vm11 = vweird.f32 %v2208_v25  ;;  %v819_v6 = vsel %vm2511_vm10, %v2288_v0, %v815_v22 }
 0x14d   : > { %v845_v3 = vadd.f32 %v2317_v46, %v844_v2  ;;  %vm847_vm1 = vweird.f32 %v2317_v46  ;;  %vm862_vm8 = vweird.f32 %v2326_v39  ;;  %v3529_v5 = vand.u32 2147483647, %v2201_v33 }
 0x14e   : > { %vm891_vm15 = vweird.f32 %v2211_v56  ;;  %v860_v52 = vadd.f32 %v2326_v39, %v859_v20  ;;  %v874_v59 = vmul.f32 %v2361_v24, %v873_v34  ;;  %v902_v0 = vmul.f32 %v2448_v4, %v2215_v27  ;;  %v2535_v22 = vpop.eup %1487 }
 0x14f   : > { %vm2525_vm13 = vcmp.eq.f32.partialorder %v3529_v5, 8.507059e+37  ;;  %1489 = vrcp.f32 %v2239_v43  ;;  %vm3532_vm6 = vweird.f32 %v2190_v7  ;;  %v889_v36 = vmul.f32 %v2368_v37, %v888_v38 }
 0x150   : > { %vm2541_vm7 = vmor %vm3532_vm6, %vm832_vm14  ;;  %v917_v57 = vmul.f32 %v2463_v44, %v2220_v15  ;;  %v932_v2 = vmul.f32 %v2496_v48, %v2227_v32  ;;  %1491 = vrcp.f32 %v2246_v62  ;;  %v2554_v49 = vsel %vm2403_vm3, %v2223_v21, %v774_v60 }
 0x151   : > { %v2559_v7 = vsel %vm2409_vm4, %v2230_v40, %v789_v19  ;;  %v2564_v20 = vsel %vm2416_vm5, %v2248_v11, %v804_v50  ;;  %v2569_v34 = vsel %vm2422_vm12, %v2257_v29, %v819_v6  ;;  %vm3535_vm3 = vweird.f32 %v2194_v17  ;;  %vm2597_vm12 = vmor %vm861_vm2, %vm862_vm8 }
 0x152   : > { %vm2575_vm14 = vmor %vm3535_vm3, %vm847_vm1  ;;  %v3538_v40 = vand.u32 2147483647, %v2208_v25  ;;  %v834_v11 = vsel %vm2541_vm7, %v2307_v26, %v830_v13  ;;  %vm877_vm5 = vweird.f32 %v2361_v24  ;;  %v927_v17 = vand.u32 2147483648, %v2220_v15 }
 0x153   : > { %v849_v29 = vsel %vm2575_vm14, %v2317_v46, %v845_v3  ;;  %v875_v10 = vadd.f32 %v2361_v24, %v874_v59  ;;  %vm892_vm10 = vweird.f32 %v2368_v37  ;;  %v3543_v26 = vand.u32 2147483647, %v2211_v56  ;;  %vm2636_vm6 = vmor %vm876_vm11, %vm877_vm5 }
 0x154   : > { %vm2581_vm4 = vcmp.eq.f32.partialorder %v3538_v40, 8.507059e+37  ;;  %v903_v28 = vsub.f32 1.0, %v902_v0  ;;  %v947_v16 = vmul.f32 %v2535_v22, %v2236_v51  ;;  %v864_v33 = vsel %vm2597_vm12, %v2326_v39, %v860_v52 }
 0x155   : > { %vm2605_vm1 = vcmp.eq.f32.partialorder %v3543_v26, 8.507059e+37  ;;  %v890_v41 = vadd.f32 %v2368_v37, %v889_v36  ;;  %vm906_vm2 = vweird.f32 %v2215_v27  ;;  %v918_v18 = vsub.f32 1.0, %v917_v57  ;;  %v2616_v60 = vpop.eup %1489 }
 0x156   : > { %v933_v38 = vsub.f32 1.0, %v932_v2  ;;  %v2621_v19 = vsel %vm2486_vm0, %v2276_v61, %v834_v11  ;;  %v2626_v50 = vsel %vm2492_vm9, %v2292_v58, %v849_v29  ;;  %vm921_vm8 = vweird.f32 %v2220_v15  ;;  %v2630_v14 = vpop.eup %1491  ;;  %vm2658_vm9 = vmor %vm891_vm15, %vm892_vm10 }
 0x157   : > { %v925_v39 = vand.u32 2147483647, %v2220_v15  ;;  %v2640_v61 = vor.u32 1.1754944e-38, %v927_v17  ;;  %vm936_vm0 = vweird.f32 %v2227_v32  ;;  %v940_v58 = vand.u32 2147483647, %v2227_v32 }
 0x158   : > { %v942_v54 = vand.u32 2147483648, %v2227_v32  ;;  %1493 = vrcp.f32 %v2253_v55  ;;  %v2649_v1 = vsel %vm2525_vm13, %v2314_v35, %v864_v33  ;;  %v879_v25 = vsel %vm2636_vm6, %v2361_v24, %v875_v10 }
 0x159   : > { %v904_v3 = vmul.f32 %v2448_v4, %v903_v28  ;;  %v948_v5 = vsub.f32 1.0, %v947_v16  ;;  %v894_v35 = vsel %vm2658_vm9, %v2368_v37, %v890_v41  ;;  %v919_v53 = vmul.f32 %v2463_v44, %v918_v18  ;;  %v3563_v41 = vld [vmem:[#allocation34_spill] sm:$0xff] }
 0x15a   : > { %v934_v52 = vmul.f32 %v2496_v48, %v933_v38  ;;  %1495 = vrcp.f32 %v2255_v30  ;;  %v3550_v24 = vand.u32 2147483647, %v2215_v27  ;;  %v955_v59 = vand.u32 2147483647, %v2236_v51  ;;  %v3577_v27 = vld [vmem:[#allocation38_spill] sm:$0xff] }
 0x15b   : > { %v962_v0 = vmul.f32 %v2616_v60, %v2239_v43  ;;  %v977_v37 = vmul.f32 %v2630_v14, %v2246_v62  ;;  %1497 = vrcp.f32 %v2259_v8  ;;  %v2684_v23 = vsel %vm2581_vm4, %v2322_v63, %v879_v25 }
 0x15c   : > { %vm2671_vm11 = vcmp.eq.f32.partialorder %v3550_v24, 8.507059e+37  ;;  %vm907_vm13 = vweird.f32 %v2448_v4  ;;  %vm922_vm15 = vweird.f32 %v2463_v44  ;;  %vm2688_vm7 = vcmp.eq.f32.partialorder %v925_v39, 8.507059e+37 }
 0x15d   : > { %v957_v57 = vand.u32 2147483648, %v2236_v51  ;;  %v905_v2 = vadd.f32 %v2448_v4, %v904_v3  ;;  %vm2694_vm3 = vcmp.eq.f32.partialorder %v940_v58, 8.507059e+37  ;;  %v943_v40 = vor.u32 1.1754944e-38, %v942_v54  ;;  %vm2712_vm4 = vmor %vm906_vm2, %vm907_vm13 }
 0x15e   : > { %v949_v63 = vmul.f32 %v2535_v22, %v948_v5  ;;  %v972_v42 = vand.u32 2147483648, %v2239_v43  ;;  %v2700_v11 = vpop.eup %1493  ;;  %v2705_v29 = vsel %vm2605_vm1, %v2459_v47, %v894_v35  ;;  %v920_v17 = vadd.f32 %v2463_v44, %v919_v53  ;;  %vm2727_vm10 = vmor %vm921_vm8, %vm922_vm15  ;;  %v3566_v35 = vld [vmem:[#allocation35_spill] sm:$0xff] }
 0x15f   : > { %v935_v31 = vadd.f32 %v2496_v48, %v934_v52  ;;  %vm937_vm14 = vweird.f32 %v2496_v48  ;;  %vm951_vm5 = vweird.f32 %v2236_v51  ;;  %vm2717_vm12 = vcmp.eq.f32.partialorder %v955_v59, 8.507059e+37  ;;  %v3569_v52 = vld [vmem:[#allocation36_spill] sm:$0xff] }
 0x160   : > { %v963_v47 = vsub.f32 1.0, %v962_v0  ;;  %v978_v46 = vsub.f32 1.0, %v977_v37  ;;  %v2721_v28 = vpop.eup %1495  ;;  %vm952_vm1 = vweird.f32 %v2535_v22  ;;  %v958_v16 = vor.u32 1.1754944e-38, %v957_v57  ;;  %vm2744_vm8 = vmor %vm936_vm0, %vm937_vm14 }
 0x161   : > { %vm966_vm2 = vweird.f32 %v2239_v43  ;;  %v970_v33 = vand.u32 2147483647, %v2239_v43  ;;  %1499 = vrcp.f32 %v3563_v41  ;;  %v2735_v18 = vpop.eup %1497  ;;  %v909_v38 = vsel %vm2712_vm4, %v2448_v4, %v905_v2  ;;  %vm2775_vm6 = vmor %vm951_vm5, %vm952_vm1 }
 0x162   : > { %v950_v39 = vadd.f32 %v2535_v22, %v949_v63  ;;  %v2749_v13 = vor.u32 1.1754944e-38, %v972_v42  ;;  %v992_v58 = vmul.f32 %v2700_v11, %v2253_v55  ;;  %v924_v54 = vsel %vm2727_vm10, %v2463_v44, %v920_v17  ;;  %v3574_v17 = vld [vmem:[#allocation37_spill] sm:$0xff] }
 0x163   : > { %v939_v4 = vsel %vm2744_vm8, %v2496_v48, %v935_v31  ;;  %v985_v32 = vand.u32 2147483647, %v2246_v62  ;;  %v987_v25 = vand.u32 2147483648, %v2246_v62  ;;  %v964_v6 = vmul.f32 %v2616_v60, %v963_v47 }
 0x164   : > { %v979_v3 = vmul.f32 %v2630_v14, %v978_v46  ;;  %v1007_v5 = vmul.f32 %v2721_v28, %v2255_v30  ;;  %1501 = vrcp.f32 %v3566_v35  ;;  %v2769_v44 = vsel %vm2671_vm11, %v2461_v9, %v909_v38 }
 0x165   : > { %vm981_vm0 = vweird.f32 %v2246_v62  ;;  %v1022_v53 = vmul.f32 %v2735_v18, %v2259_v8  ;;  %1503 = vrcp.f32 %v3569_v52  ;;  %v2786_v9 = vsel %vm2688_vm7, %v2640_v61, %v924_v54 }
 0x166   : > { %v954_v51 = vsel %vm2775_vm6, %v2535_v22, %v950_v39  ;;  %vm967_vm9 = vweird.f32 %v2616_v60  ;;  %vm2792_vm11 = vcmp.eq.f32.partialorder %v970_v33, 8.507059e+37  ;;  %v993_v56 = vsub.f32 1.0, %v992_v58 }
 0x167   : > { %v2796_v59 = vpop.eup %1499  ;;  %v2800_v0 = vsel %vm2694_vm3, %v943_v40, %v939_v4  ;;  %vm2802_vm13 = vcmp.eq.f32.partialorder %v985_v32, 8.507059e+37  ;;  %v988_v37 = vor.u32 1.1754944e-38, %v987_v25  ;;  %v1000_v22 = vand.u32 2147483647, %v2253_v55  ;;  %vm2824_vm3 = vmor %vm966_vm2, %vm967_vm9 }
 0x168   : > { %v1002_v36 = vand.u32 2147483648, %v2253_v55  ;;  %v965_v57 = vadd.f32 %v2616_v60, %v964_v6  ;;  %v980_v2 = vadd.f32 %v2630_v14, %v979_v3  ;;  %vm982_vm15 = vweird.f32 %v2630_v14 }
 0x169   : > { %vm996_vm7 = vweird.f32 %v2253_v55  ;;  %v1008_v21 = vsub.f32 1.0, %v1007_v5  ;;  %v2814_v40 = vsel %vm2717_vm12, %v958_v16, %v954_v51  ;;  %v1015_v63 = vand.u32 2147483647, %v2255_v30  ;;  %vm2840_vm4 = vmor %vm981_vm0, %vm982_vm15 }
 0x16a   : > { %v1023_v42 = vsub.f32 1.0, %v1022_v53  ;;  %1505 = vrcp.f32 %v3574_v17  ;;  %v2818_v31 = vpop.eup %1501  ;;  %v994_v47 = vmul.f32 %v2700_v11, %v993_v56  ;;  %vm1011_vm14 = vweird.f32 %v2255_v30 }
 0x16b   : > { %v1017_v26 = vand.u32 2147483648, %v2255_v30  ;;  %v1037_v46 = vmul.f32 %v2796_v59, %v3563_v41  ;;  %1507 = vrcp.f32 %v3577_v27  ;;  %v2834_v16 = vpop.eup %1503  ;;  %vm997_vm5 = vweird.f32 %v2700_v11 }
 0x16c   : > { %v1003_v33 = vor.u32 1.1754944e-38, %v1002_v36  ;;  %v1030_v38 = vand.u32 2147483647, %v2259_v8  ;;  %v1032_v15 = vand.u32 2147483648, %v2259_v8  ;;  %v969_v39 = vsel %vm2824_vm3, %v2616_v60, %v965_v57  ;;  %v3582_v60 = vld [vmem:[#allocation39_spill] sm:$0xff]  ;;  %vm2896_vm0 = vmor %vm996_vm7, %vm997_vm5 }
 0x16d   : > { %v984_v58 = vsel %vm2840_vm4, %v2630_v14, %v980_v2  ;;  %vm2853_vm12 = vcmp.eq.f32.partialorder %v1000_v22, 8.507059e+37  ;;  %v1009_v54 = vmul.f32 %v2721_v28, %v1008_v21  ;;  %vm1026_vm10 = vweird.f32 %v2259_v8 }
 0x16e   : > { %v1024_v4 = vmul.f32 %v2735_v18, %v1023_v42  ;;  %v1047_v32 = vand.u32 2147483648, %v3563_v41  ;;  %v1052_v25 = vmul.f32 %v2818_v31, %v3566_v35  ;;  %1509 = vrcp.f32 %v3582_v60 }
 0x16f   : > { %v995_v6 = vadd.f32 %v2700_v11, %v994_v47  ;;  %vm2865_vm1 = vcmp.eq.f32.partialorder %v1015_v63, 8.507059e+37  ;;  %v1018_v3 = vor.u32 1.1754944e-38, %v1017_v26  ;;  %v1038_v5 = vsub.f32 1.0, %v1037_v46 }
 0x170   : > { %v1067_v48 = vmul.f32 %v2834_v16, %v3569_v52  ;;  %v2871_v53 = vpop.eup %1505  ;;  %v2876_v51 = vsel %vm2792_vm11, %v2749_v13, %v969_v39  ;;  %vm1012_vm2 = vweird.f32 %v2721_v28  ;;  %vm2879_vm8 = vcmp.eq.f32.partialorder %v1030_v38, 8.507059e+37  ;;  %v3591_v38 = vld [vmem:[#allocation40_spill] sm:$0xff] }
 0x171   : > { %v1033_v22 = vor.u32 1.1754944e-38, %v1032_v15  ;;  %v2883_v36 = vpop.eup %1507  ;;  %v2887_v57 = vsel %vm2802_vm13, %v988_v37, %v984_v58  ;;  %v1010_v2 = vadd.f32 %v2721_v28, %v1009_v54  ;;  %vm1041_vm6 = vweird.f32 %v3563_v41  ;;  %vm2913_vm11 = vmor %vm1011_vm14, %vm1012_vm2 }
 0x172   : > { %v1045_v13 = vand.u32 2147483647, %v3563_v41  ;;  %v1025_v21 = vadd.f32 %v2735_v18, %v1024_v4  ;;  %vm1027_vm9 = vweird.f32 %v2735_v18  ;;  %v1048_v61 = vor.u32 1.1754944e-38, %v1047_v32 }
 0x173   : > { %v1053_v37 = vsub.f32 1.0, %v1052_v25  ;;  %v999_v63 = vsel %vm2896_vm0, %v2700_v11, %v995_v6  ;;  %v1039_v42 = vmul.f32 %v2796_v59, %v1038_v5  ;;  %v1060_v10 = vand.u32 2147483647, %v3566_v35  ;;  %vm2928_vm13 = vmor %vm1026_vm10, %vm1027_vm9 }
 0x174   : > { %v1068_v47 = vsub.f32 1.0, %v1067_v48  ;;  %v2907_v55 = vpop.eup %1509  ;;  %v1062_v46 = vand.u32 2147483648, %v3566_v35  ;;  %v1082_v11 = vmul.f32 %v2871_v53, %v3574_v17  ;;  %v1097_v43 = vmul.f32 %v2883_v36, %v3577_v27 }
 0x175   : > { %1511 = vrcp.f32 %v3591_v38  ;;  %v1014_v15 = vsel %vm2913_vm11, %v2721_v28, %v1010_v2  ;;  %vm2932_vm15 = vcmp.eq.f32.partialorder %v1045_v13, 8.507059e+37  ;;  %vm1056_vm7 = vweird.f32 %v3566_v35 }
 0x176   : > { %v1075_v58 = vand.u32 2147483647, %v3569_v52  ;;  %v1077_v54 = vand.u32 2147483648, %v3569_v52  ;;  %v2941_v4 = vsel %vm2853_vm12, %v1003_v33, %v999_v63  ;;  %v1029_v8 = vsel %vm2928_vm13, %v2735_v18, %v1025_v21 }
 0x177   : > { %vm1042_vm3 = vweird.f32 %v2796_v59  ;;  %v1054_v28 = vmul.f32 %v2818_v31, %v1053_v37  ;;  %v1040_v32 = vadd.f32 %v2796_v59, %v1039_v42  ;;  %v1069_v25 = vmul.f32 %v2834_v16, %v1068_v47 }
 0x178   : > { %vm1071_vm14 = vweird.f32 %v3569_v52  ;;  %v1112_v6 = vmul.f32 %v2907_v55, %v3582_v60  ;;  %v2955_v33 = vsel %vm2865_vm1, %v1018_v3, %v1014_v15  ;;  %vm2957_vm4 = vcmp.eq.f32.partialorder %v1060_v10, 8.507059e+37  ;;  %vm2977_vm1 = vmor %vm1041_vm6, %vm1042_vm3 }
 0x179   : > { %v1063_v18 = vor.u32 1.1754944e-38, %v1062_v46  ;;  %v1083_v5 = vsub.f32 1.0, %v1082_v11  ;;  %v1098_v48 = vsub.f32 1.0, %v1097_v43  ;;  %v2963_v2 = vsel %vm2879_vm8, %v1033_v22, %v1029_v8  ;;  %v3602_v46 = vld [vmem:[#allocation41_spill] sm:$0xff] }
 0x17a   : > { %vm1057_vm5 = vweird.f32 %v2818_v31  ;;  %vm2966_vm12 = vcmp.eq.f32.partialorder %v1075_v58, 8.507059e+37  ;;  %v1078_v14 = vor.u32 1.1754944e-38, %v1077_v54  ;;  %vm1086_vm10 = vweird.f32 %v3574_v17 }
 0x17b   : > { %v2971_v3 = vpop.eup %1511  ;;  %v1055_v56 = vadd.f32 %v2818_v31, %v1054_v28  ;;  %v1090_v22 = vand.u32 2147483647, %v3574_v17  ;;  %v1092_v21 = vand.u32 2147483648, %v3574_v17  ;;  %v1105_v37 = vand.u32 2147483647, %v3577_v27  ;;  %vm2998_vm8 = vmor %vm1056_vm7, %vm1057_vm5 }
 0x17c   : > { %v1044_v63 = vsel %vm2977_vm1, %v2796_v59, %v1040_v32  ;;  %v1070_v42 = vadd.f32 %v2834_v16, %v1069_v25  ;;  %vm1072_vm2 = vweird.f32 %v2834_v16  ;;  %v1113_v41 = vsub.f32 1.0, %v1112_v6 }
 0x17d   : > { %v1084_v10 = vmul.f32 %v2871_v53, %v1083_v5  ;;  %v1099_v47 = vmul.f32 %v2883_v36, %v1098_v48  ;;  %v1107_v26 = vand.u32 2147483648, %v3577_v27  ;;  %1513 = vrcp.f32 %v3602_v46  ;;  %vm3016_vm0 = vmor %vm1071_vm14, %vm1072_vm2 }
 0x17e   : > { %vm1101_vm6 = vweird.f32 %v3577_v27  ;;  %v1120_v59 = vand.u32 2147483647, %v3582_v60  ;;  %v1122_v43 = vand.u32 2147483648, %v3582_v60  ;;  %v1127_v15 = vmul.f32 %v2971_v3, %v3591_v38 }
 0x17f   : > { %v3009_v30 = vsel %vm2932_vm15, %v1048_v61, %v1044_v63  ;;  %v1059_v35 = vsel %vm2998_vm8, %v2818_v31, %v1055_v56  ;;  %vm3020_vm9 = vcmp.eq.f32.partialorder %v1090_v22, 8.507059e+37  ;;  %v1093_v8 = vor.u32 1.1754944e-38, %v1092_v21  ;;  %v3615_v22 = vld [vmem:[#allocation42_spill] sm:$0xff] }
 0x180   : > { %v1074_v61 = vsel %vm3016_vm0, %v2834_v16, %v1070_v42  ;;  %vm1087_vm11 = vweird.f32 %v2871_v53  ;;  %vm3028_vm13 = vcmp.eq.f32.partialorder %v1105_v37, 8.507059e+37  ;;  %v1114_v52 = vmul.f32 %v2907_v55, %v1113_v41  ;;  %v3619_v42 = vld [vmem:[#allocation44_spill] sm:$0xff] }
 0x181   : > { %vm1116_vm15 = vweird.f32 %v3582_v60  ;;  %v1085_v31 = vadd.f32 %v2871_v53, %v1084_v10  ;;  %v1100_v28 = vadd.f32 %v2883_v36, %v1099_v47  ;;  %vm1102_vm7 = vweird.f32 %v2883_v36  ;;  %vm3053_vm14 = vmor %vm1086_vm10, %vm1087_vm11  ;;  %v3620_v47 = vld [vmem:[#allocation45_spill] sm:$0xff] }
 0x182   : > { %v1108_v32 = vor.u32 1.1754944e-38, %v1107_v26  ;;  %v3039_v16 = vsel %vm2957_vm4, %v1063_v18, %v1059_v35  ;;  %vm3041_vm3 = vcmp.eq.f32.partialorder %v1120_v59, 8.507059e+37  ;;  %v1123_v6 = vor.u32 1.1754944e-38, %v1122_v43  ;;  %vm3062_vm4 = vmor %vm1101_vm6, %vm1102_vm7  ;;  %v3621_v26 = vld [vmem:[#allocation2_spill] sm:$0xff]  ;;  %v3624_v43 = vld [vmem:[#allocation3_spill] sm:$0xff] }
 0x183   : > { %v1128_v5 = vsub.f32 1.0, %v1127_v15  ;;  %v3045_v48 = vpop.eup %1513  ;;  %v3049_v24 = vsel %vm2966_vm12, %v1078_v14, %v1074_v61  ;;  %v1135_v62 = vand.u32 2147483647, %v3591_v38  ;;  %v1137_v18 = vand.u32 2147483648, %v3591_v38  ;;  %v3618_v14 = vld [vmem:[#allocation43_spill] sm:$0xff]  ;;  %v3627_v61 = vld [vmem:[#allocation4_spill] sm:$0xff] }
 0x184   : > { %1515 = vrcp.f32 %v3615_v22  ;;  %v1115_v13 = vadd.f32 %v2907_v55, %v1114_v52  ;;  %vm1117_vm5 = vweird.f32 %v2907_v55  ;;  %vm1131_vm12 = vweird.f32 %v3591_v38 }
 0x185   : > { %v1152_v17 = vand.u32 2147483648, %v3602_v46  ;;  %1517 = vrcp.f32 %v3618_v14  ;;  %v1089_v37 = vsel %vm3053_vm14, %v2871_v53, %v1085_v31  ;;  %v1104_v27 = vsel %vm3062_vm4, %v2883_v36, %v1100_v28  ;;  %vm3087_vm10 = vmor %vm1116_vm15, %vm1117_vm5 }
 0x186   : > { %v1167_v63 = vand.u32 2147483648, %v3615_v22  ;;  %1519 = vrcp.f32 %v3619_v42  ;;  %v1129_v41 = vmul.f32 %v2971_v3, %v1128_v5  ;;  %v1142_v10 = vmul.f32 %v3045_v48, %v3602_v46 }
 0x187   : > { %1521 = vrcp.f32 %v3620_v47  ;;  %v1216_v11 = vmul.f32 %v2468_v12, %v3621_v26  ;;  %vm1132_vm1 = vweird.f32 %v2971_v3  ;;  %v1138_v36 = vor.u32 1.1754944e-38, %v1137_v18  ;;  %v3629_v18 = vld [vmem:[#allocation6_spill] sm:$0xff]  ;;  %v3634_v26 = vld [vmem:[#allocation9_spill] sm:$0xff] }
 0x188   : > { %v1150_v59 = vand.u32 2147483647, %v3602_v46  ;;  %v1217_v15 = vmul.f32 %v2473_v45, %v3624_v43  ;;  %v3098_v35 = vsel %vm3020_vm9, %v1093_v8, %v1089_v37  ;;  %v1119_v12 = vsel %vm3087_vm10, %v2907_v55, %v1115_v13  ;;  %v3628_v55 = vld [vmem:[#allocation5_spill] sm:$0xff]  ;;  %vm3153_vm6 = vmor %vm1131_vm12, %vm1132_vm1  ;;  %v3635_v43 = vld [vmem:[#allocation10_spill] sm:$0xff] }
 0x189   : > { %vm3103_vm2 = vcmp.eq.f32.partialorder %v1135_v62, 8.507059e+37  ;;  %v3107_v58 = vor.u32 1.1754944e-38, %v1152_v17  ;;  %v1218_v52 = vmul.f32 %v2554_v49, %v3627_v61  ;;  %v3115_v45 = vsel %vm3028_vm13, %v1108_v32, %v1104_v27  ;;  %v3630_v32 = vld [vmem:[#allocation7_spill] sm:$0xff] }
 0x18a   : > { %v3111_v31 = vpop.eup %1515  ;;  %v1165_v54 = vand.u32 2147483647, %v3615_v22  ;;  %v3118_v8 = vor.u32 1.1754944e-38, %v1167_v63  ;;  %v1219_v28 = vmul.f32 %v2559_v7, %v3628_v55  ;;  %v1130_v56 = vadd.f32 %v2971_v3, %v1129_v41  ;;  %v3631_v41 = vld [vmem:[#allocation8_spill] sm:$0xff] }
 0x18b   : > { %v3122_v5 = vpop.eup %1517  ;;  %v1143_v62 = vsub.f32 1.0, %v1142_v10  ;;  %v1220_v49 = vmul.f32 %v2564_v20, %v3629_v18  ;;  %v1248_v21 = vpack.c.bf16 %v1216_v11, %v1216_v11  ;;  %v3136_v39 = vsel %vm3041_vm3, %v1123_v6, %v1119_v12 }
 0x18c   : > { %v3127_v13 = vpop.eup %1519  ;;  %v1180_v7 = vand.u32 2147483647, %v3618_v14  ;;  %v1221_v17 = vmul.f32 %v2569_v34, %v3630_v32  ;;  %v1249_v37 = vpack.c.bf16 %v1217_v15, %v1217_v15  ;;  %vm1147_vm8 = vweird.f32 %v3045_v48 }
 0x18d   : > { %v3141_v27 = vpop.eup %1521  ;;  %v1157_v20 = vmul.f32 %v3111_v31, %v3615_v22  ;;  %v1182_v63 = vand.u32 2147483648, %v3618_v14  ;;  %v1222_v25 = vmul.f32 %v2621_v19, %v3631_v41  ;;  %v1250_v6 = vpack.c.bf16 %v1218_v52, %v1218_v52  ;;  %v3636_v52 = vld [vmem:[#allocation11_spill] sm:$0xff] }
 0x18e   : > { %v1172_v10 = vmul.f32 %v3122_v5, %v3618_v14  ;;  %v1223_v11 = vmul.f32 %v2626_v50, %v3634_v26  ;;  %v1251_v53 = vpack.c.bf16 %v1219_v28, %v1219_v28  ;;  %vm1280_vm0 = vcmask 519168   ;;  %v3640_v41 = vld [vmem:[#allocation15_spill] sm:$0xff] }
 0x18f   : > { %v1134_v19 = vsel %vm3153_vm6, %v2971_v3, %v1130_v56  ;;  %vm1146_vm9 = vweird.f32 %v3602_v46  ;;  %v1187_v38 = vmul.f32 %v3127_v13, %v3619_v42  ;;  %v1224_v15 = vmul.f32 %v2649_v1, %v3635_v43  ;;  %1281 = vst.msk [vmem:[%s3132_s19] sm:$0xf] %vm1280_vm0, %v1248_v21  ;;  %v3637_v1 = vld [vmem:[#allocation12_spill] sm:$0xff] }
 0x190   : > { %v1252_v12 = vpack.c.bf16 %v1220_v49, %v1220_v49  ;;  %v1144_v50 = vmul.f32 %v3045_v48, %v1143_v62  ;;  %v1202_v61 = vmul.f32 %v3141_v27, %v3620_v47  ;;  %v1225_v3 = vmul.f32 %v2684_v23, %v3636_v52  ;;  %1282 = vst.msk [vmem:[%s3132_s19 + $0x4] sm:$0xf] %vm1280_vm0, %v1249_v37  ;;  %v3638_v23 = vld [vmem:[#allocation13_spill] sm:$0xff]  ;;  %v3639_v37 = vld [vmem:[#allocation14_spill] sm:$0xff]  ;;  %vm3241_vm5 = vmor %vm1146_vm9, %vm1147_vm8 }
 0x191   : > { %v1253_v55 = vpack.c.bf16 %v1221_v17, %v1221_v17  ;;  %v1158_v28 = vsub.f32 1.0, %v1157_v20  ;;  %v1195_v56 = vand.u32 2147483647, %v3619_v42  ;;  %v1226_v18 = vmul.f32 %v2705_v29, %v3637_v1  ;;  %1283 = vst.msk [vmem:[%s3132_s19 + $0x8] sm:$0xf] %vm1280_vm0, %v1250_v6  ;;  %v3652_v52 = vld [vmem:[#allocation19_spill] sm:$0xff] }
 0x192   : > { %v1254_v49 = vpack.c.bf16 %v1222_v25, %v1222_v25  ;;  %v3185_v62 = vsel %vm3103_vm2, %v1138_v36, %v1134_v19  ;;  %v1173_v21 = vsub.f32 1.0, %v1172_v10  ;;  %v1227_v32 = vmul.f32 %v2769_v44, %v3638_v23  ;;  %1284 = vst.msk [vmem:[%s3132_s19 + $0xc] sm:$0xf] %vm1280_vm0, %v1251_v53  ;;  %v3644_v19 = vld [vmem:[#allocation17_spill] sm:$0xff]  ;;  %v3655_v1 = vld [vmem:[#allocation20_spill] sm:$0xff] }
 0x193   : > { %v1255_v17 = vpack.c.bf16 %v1223_v11, %v1223_v11  ;;  %vm1161_vm11 = vweird.f32 %v3615_v22  ;;  %vm1162_vm13 = vweird.f32 %v3111_v31  ;;  %v1188_v29 = vsub.f32 1.0, %v1187_v38  ;;  %1285 = vst.msk [vmem:[%s3132_s19 + $0x10] sm:$0xf] %vm1280_vm0, %v1252_v12 }
 0x194   : > { %v1228_v20 = vmul.f32 %v2786_v9, %v3639_v37  ;;  %v1256_v60 = vpack.c.bf16 %v1224_v15, %v1224_v15  ;;  %v3198_v36 = vadd.f32 %v3045_v48, %v1144_v50  ;;  %vm1176_vm15 = vweird.f32 %v3618_v14  ;;  %1286 = vst.msk [vmem:[%s3132_s19 + $0x14] sm:$0xf] %vm1280_vm0, %v1253_v55  ;;  %v3641_v9 = vld [vmem:[#allocation16_spill] sm:$0xff]  ;;  %v3647_v15 = vld [vmem:[#allocation18_spill] sm:$0xff]  ;;  %vm3286_vm8 = vmor %vm1161_vm11, %vm1162_vm13 }
 0x195   : > { %v1203_v44 = vsub.f32 1.0, %v1202_v61  ;;  %v1229_v25 = vmul.f32 %v2800_v0, %v3640_v41  ;;  %v1257_v6 = vpack.c.bf16 %v1225_v3, %v1225_v3  ;;  %v1159_v34 = vmul.f32 %v3111_v31, %v1158_v28  ;;  %1287 = vst.msk [vmem:[%s3132_s19 + $0x18] sm:$0xf] %vm1280_vm0, %v1254_v49  ;;  %v3660_v37 = vld [vmem:[#allocation23_spill] sm:$0xff] }
 0x196   : > { %v3206_v10 = vor.u32 1.1754944e-38, %v1182_v63  ;;  %vm1191_vm7 = vweird.f32 %v3619_v42  ;;  %v1230_v26 = vmul.f32 %v2814_v40, %v3641_v9  ;;  %v1258_v11 = vpack.c.bf16 %v1226_v18, %v1226_v18  ;;  %1288 = vst.msk [vmem:[%s3132_s19 + $0x1c] sm:$0xf] %vm1280_vm0, %v1255_v17 }
 0x197   : > { %vm3215_vm3 = vcmp.eq.f32.partialorder %v1150_v59, 8.507059e+37  ;;  %v1174_v53 = vmul.f32 %v3122_v5, %v1173_v21  ;;  %v1197_v63 = vand.u32 2147483648, %v3619_v42  ;;  %v1231_v38 = vmul.f32 %v2876_v51, %v3644_v19  ;;  %1289 = vst.msk [vmem:[%s3132_s19 + $0x20] sm:$0xf] %vm1280_vm0, %v1256_v60  ;;  %v3656_v21 = vld [vmem:[#allocation21_spill] sm:$0xff]  ;;  %v3671_v19 = vld [vmem:[#allocation28_spill] sm:$0xff] }
 0x198   : > { %v1259_v43 = vpack.c.bf16 %v1227_v32, %v1227_v32  ;;  %vm3227_vm14 = vcmp.eq.f32.partialorder %v1165_v54, 8.507059e+37  ;;  %v1189_v59 = vmul.f32 %v3127_v13, %v1188_v29  ;;  %vm1206_vm4 = vweird.f32 %v3620_v47  ;;  %1290 = vst.msk [vmem:[%s3132_s19 + $0x24] sm:$0xf] %vm1280_vm0, %v1257_v6  ;;  %v3666_v6 = vld [vmem:[#allocation25_spill] sm:$0xff]  ;;  %v3675_v54 = vld [vmem:[#allocation32_spill] sm:$0xff] }
 0x199   : > { %v1232_v12 = vmul.f32 %v2887_v57, %v3647_v15  ;;  %v1260_v50 = vpack.c.bf16 %v1228_v20, %v1228_v20  ;;  %vm3247_vm12 = vcmp.eq.f32.partialorder %v1180_v7, 8.507059e+37  ;;  %v1204_v57 = vmul.f32 %v3141_v27, %v1203_v44  ;;  %1291 = vst.msk [vmem:[%s3132_s19 + $0x28] sm:$0xf] %vm1280_vm0, %v1258_v11  ;;  %v3663_v44 = vld [vmem:[#allocation24_spill] sm:$0xff] }
 0x19a   : > { %v1210_v61 = vand.u32 2147483647, %v3620_v47  ;;  %v1233_v3 = vmul.f32 %v2941_v4, %v3652_v52  ;;  %v1261_v55 = vpack.c.bf16 %v1229_v25, %v1229_v25  ;;  %v1149_v46 = vsel %vm3241_vm5, %v3045_v48, %v3198_v36  ;;  %1292 = vst.msk [vmem:[%s3132_s19 + $0x2c] sm:$0xf] %vm1280_vm0, %v1259_v43  ;;  %v3676_v52 = vld [vmem:[#allocation33_spill] sm:$0xff] }
 0x19b   : > { %v1160_v7 = vadd.f32 %v3111_v31, %v1159_v34  ;;  %vm3262_vm10 = vcmp.eq.f32.partialorder %v1195_v56, 8.507059e+37  ;;  %v1234_v18 = vmul.f32 %v2955_v33, %v3655_v1  ;;  %v1262_v49 = vpack.c.bf16 %v1230_v26, %v1230_v26  ;;  %v3657_v33 = vld [vmem:[#allocation22_spill] sm:$0xff]  ;;  %1293 = vst.msk [vmem:[%s3132_s19 + $0x30] sm:$0xf] %vm1280_vm0, %v1260_v50 }
 0x19c   : > { %v1175_v4 = vadd.f32 %v3122_v5, %v1174_v53  ;;  %vm1177_vm1 = vweird.f32 %v3122_v5  ;;  %v1235_v48 = vmul.f32 %v2963_v2, %v3656_v21  ;;  %v1263_v23 = vpack.c.bf16 %v1231_v38, %v1231_v38  ;;  %1294 = vst.msk [vmem:[%s3132_s19 + $0x34] sm:$0xf] %vm1280_vm0, %v1261_v55 }
 0x19d   : > { %v1190_v56 = vadd.f32 %v3127_v13, %v1189_v59  ;;  %vm1192_vm2 = vweird.f32 %v3127_v13  ;;  %v1236_v32 = vmul.f32 %v3009_v30, %v3657_v33  ;;  %v1264_v17 = vpack.c.bf16 %v1232_v12, %v1232_v12  ;;  %vm3303_vm9 = vmor %vm1176_vm15, %vm1177_vm1  ;;  %1295 = vst.msk [vmem:[%s3132_s19 + $0x38] sm:$0xf] %vm1280_vm0, %v1262_v49  ;;  %v3673_v59 = vld [vmem:[#allocation30_spill] sm:$0xff]  ;;  %v3674_v12 = vld [vmem:[#allocation31_spill] sm:$0xff] }
 0x19e   : > { %v1205_v29 = vadd.f32 %v3141_v27, %v1204_v57  ;;  %vm1207_vm6 = vweird.f32 %v3141_v27  ;;  %v1237_v20 = vmul.f32 %v3039_v16, %v3660_v37  ;;  %v1265_v30 = vpack.c.bf16 %v1233_v3, %v1233_v3  ;;  %vm3319_vm11 = vmor %vm1191_vm7, %vm1192_vm2  ;;  %1296 = vst.msk [vmem:[%s3132_s19 + $0x3c] sm:$0xf] %vm1280_vm0, %v1263_v23 }
 0x19f   : > { %v1164_v60 = vsel %vm3286_vm8, %v3111_v31, %v1160_v7  ;;  %v1212_v36 = vand.u32 2147483648, %v3620_v47  ;;  %v1238_v16 = vmul.f32 %v3049_v24, %v3663_v44  ;;  %v1266_v41 = vpack.c.bf16 %v1234_v18, %v1234_v18  ;;  %vm3337_vm13 = vmor %vm1206_vm4, %vm1207_vm6  ;;  %1297 = vst.msk [vmem:[%s3132_s19 + $0x40] sm:$0xf] %vm1280_vm0, %v1264_v17  ;;  %v3670_v47 = vld [vmem:[#allocation27_spill] sm:$0xff] }
 0x1a0   : > { %v1179_v31 = vsel %vm3303_vm9, %v3122_v5, %v1175_v4  ;;  %v1198_v25 = vor.u32 1.1754944e-38, %v1197_v63  ;;  %v1239_v24 = vmul.f32 %v3098_v35, %v3666_v6  ;;  %v1267_v34 = vpack.c.bf16 %v1235_v48, %v1235_v48  ;;  %v3669_v35 = vld [vmem:[#allocation26_spill] sm:$0xff]  ;;  %1298 = vst.msk [vmem:[%s3132_s19 + $0x44] sm:$0xf] %vm1280_vm0, %v1265_v30 }
 0x1a1   : > { %v1154_v5 = vsel %vm3215_vm3, %v3107_v58, %v1149_v46  ;;  %v1194_v42 = vsel %vm3319_vm11, %v3127_v13, %v1190_v56  ;;  %v1240_v26 = vmul.f32 %v3115_v45, %v3669_v35  ;;  %v1268_v11 = vpack.c.bf16 %v1236_v32, %v1236_v32  ;;  %1299 = vst.msk [vmem:[%s3132_s19 + $0x48] sm:$0xf] %vm1280_vm0, %v1266_v41 }
 0x1a2   : > { %v1169_v58 = vsel %vm3227_vm14, %v3118_v8, %v1164_v60  ;;  %v1209_v13 = vsel %vm3337_vm13, %v3141_v27, %v1205_v29  ;;  %v1241_v0 = vmul.f32 %v3136_v39, %v3670_v47  ;;  %v1269_v53 = vpack.c.bf16 %v1237_v20, %v1237_v20  ;;  %v3672_v27 = vld [vmem:[#allocation29_spill] sm:$0xff]  ;;  %1300 = vst.msk [vmem:[%s3132_s19 + $0x4c] sm:$0xf] %vm1280_vm0, %v1267_v34 }
 0x1a3   : > { %v1184_v45 = vsel %vm3247_vm12, %v3206_v10, %v1179_v31  ;;  %v1213_v63 = vor.u32 1.1754944e-38, %v1212_v36  ;;  %v1242_v8 = vmul.f32 %v3185_v62, %v3671_v19  ;;  %v1270_v38 = vpack.c.bf16 %v1238_v16, %v1238_v16  ;;  %1301 = vst.msk [vmem:[%s3132_s19 + $0x50] sm:$0xf] %vm1280_vm0, %v1268_v11 }
 0x1a4   : > { %v1199_v39 = vsel %vm3262_vm10, %v1198_v25, %v1194_v42  ;;  %vm1211_vm15 = vcmp.eq.f32.partialorder %v1210_v61, 8.507059e+37  ;;  %v1243_v43 = vmul.f32 %v1154_v5, %v3672_v27  ;;  %v1271_v40 = vpack.c.bf16 %v1239_v24, %v1239_v24  ;;  %1302 = vst.msk [vmem:[%s3132_s19 + $0x54] sm:$0xf] %vm1280_vm0, %v1269_v53 }
 0x1a5   : > { %v1214_v10 = vsel %vm1211_vm15, %v1213_v63, %v1209_v13  ;;  %v1244_v15 = vmul.f32 %v1169_v58, %v3673_v59  ;;  %v1272_v62 = vpack.c.bf16 %v1240_v26, %v1240_v26  ;;  %v1245_v50 = vmul.f32 %v1184_v45, %v3674_v12  ;;  %1303 = vst.msk [vmem:[%s3132_s19 + $0x58] sm:$0xf] %vm1280_vm0, %v1270_v38 }
 0x1a6   : > { %v1273_v51 = vpack.c.bf16 %v1241_v0, %v1241_v0  ;;  %v1246_v57 = vmul.f32 %v1199_v39, %v3675_v54  ;;  %v1274_v61 = vpack.c.bf16 %v1242_v8, %v1242_v8  ;;  %v1247_v3 = vmul.f32 %v1214_v10, %v3676_v52  ;;  %1304 = vst.msk [vmem:[%s3132_s19 + $0x5c] sm:$0xf] %vm1280_vm0, %v1271_v40 }
 0x1a7   : > { %v1275_v55 = vpack.c.bf16 %v1243_v43, %v1243_v43  ;;  %v1276_v46 = vpack.c.bf16 %v1244_v15, %v1244_v15  ;;  %1305 = vst.msk [vmem:[%s3132_s19 + $0x60] sm:$0xf] %vm1280_vm0, %v1272_v62  ;;  %v1277_v7 = vpack.c.bf16 %v1245_v50, %v1245_v50 }
 0x1a8   : > { %1306 = vst.msk [vmem:[%s3132_s19 + $0x64] sm:$0xf] %vm1280_vm0, %v1273_v51  ;;  %v1278_v28 = vpack.c.bf16 %v1246_v57, %v1246_v57  ;;  %v1279_v1 = vpack.c.bf16 %v1247_v3, %v1247_v3 }
 0x1a9   : > { %1307 = vst.msk [vmem:[%s3132_s19 + $0x68] sm:$0xf] %vm1280_vm0, %v1274_v61 }
 0x1aa   : > { %1308 = vst.msk [vmem:[%s3132_s19 + $0x6c] sm:$0xf] %vm1280_vm0, %v1275_v55 }
 0x1ab   : > { %1309 = vst.msk [vmem:[%s3132_s19 + $0x70] sm:$0xf] %vm1280_vm0, %v1276_v46 }
 0x1ac   : > { %1310 = vst.msk [vmem:[%s3132_s19 + $0x74] sm:$0xf] %vm1280_vm0, %v1277_v7 }
 0x1ad   : > { %1311 = vst.msk [vmem:[%s3132_s19 + $0x78] sm:$0xf] %vm1280_vm0, %v1278_v28 }
 0x1ae   : > { %1312 = vst.msk [vmem:[%s3132_s19 + $0x7c] sm:$0xf] %vm1280_vm0, %v1279_v1 }
 0x1af PF: > { %s14_s15 = sadd.s32 1, %s1529_s15  }
 0x1b0   : > { %p11_p4 = scmp.ge.s32.totalorder %s14_s15, 4  }
 0x1b2   :  { %13 = sbr.rel (!%p11_p4) target bundleno = 1 (0x1), region = 66 }

// kernel: residual_block.6
= control target key start
LH: loop header
LB: loop body
LE: loop exit
PB: predicated region body
PF: predicated region fallthrough
CT: control target
= control target key end

     0   :  { %s1585_s15 = smov 0   ;;  %s3320_s0 = inlined_call_operand.vmem [shape: f32[2,256,128], index: 0, kind: input, shape index: {}]   ;;  %s3321_s1 = inlined_call_operand.vmem [shape: f32[128,128], index: 1, kind: input, shape index: {}]   ;;  %s3322_s2 = inlined_call_operand.vmem [shape: f32[1,128], index: 2, kind: input, shape index: {}]   ;;  %s3323_s3 = inlined_call_operand.vmem [shape: f32[1,128], index: 3, kind: input, shape index: {}]   ;;  %s3324_s4 = inlined_call_operand.vmem [shape: bf16[2,256,128], index: 4, kind: output, shape index: {}]  }
   0x1 LB: > { %s1304_s16 = sadd.s32 4294967295, %s1558_s15   ;;  %p1308_p0 = scmp.ge.s32.totalorder %s1558_s15, 1  ;;  %s1558_s15 = sphi %s1585_s15, %s14_s15  }
   0x2   : > { %p162_p1 = scmp.lt.s32.totalorder %s1558_s15, 3 }
   0x4   : > { %p163_p2 = pnand %p1308_p0, %p162_p1 }
   0x6   : > { %166 = sbr.rel (%p163_p2) target bundleno = 425 (0x1a9), region = 36 }
   0xb   : > { %v353_v0 = vld [vmem:[%s3321_s1 + $0x78] sm:$0xff]  ;;  %v352_v1 = vld [vmem:[%s3321_s1 + $0x70] sm:$0xff]  ;;  %p188_p3 = scmp.lt.s32.totalorder %s1304_s16, 1  ;;  %v351_v2 = vld [vmem:[%s3321_s1 + $0x68] sm:$0xff] }
   0xc   : > { %354 = vmatpush.msra.mxu0 %v353_v0  ;;  %374 = vmatpush.msra.mxu1 %v353_v0  ;;  %v350_v3 = vld [vmem:[%s3321_s1 + $0x60] sm:$0xff]  ;;  %v349_v4 = vld [vmem:[%s3321_s1 + $0x58] sm:$0xff]  ;;  %v348_v9 = vld [vmem:[%s3321_s1 + $0x50] sm:$0xff] }
   0xd   : > { %s3601_s16 = smov (!%p188_p3, %s1304_s16), 1  ;;  %v347_v12 = vld [vmem:[%s3321_s1 + $0x48] sm:$0xff]  ;;  %v346_v17 = vld [vmem:[%s3321_s1 + $0x40] sm:$0xff]  ;;  %v345_v21 = vld [vmem:[%s3321_s1 + $0x38] sm:$0xff] }
   0xe   : > { %355 = vmatpush.msra.mxu0 %v352_v1  ;;  %375 = vmatpush.msra.mxu1 %v352_v1  ;;  %s1315_s25 = sshll.u32 %s3601_s16, 8  ;;  %v344_v26 = vld [vmem:[%s3321_s1 + $0x30] sm:$0xff]  ;;  %v343_v31 = vld [vmem:[%s3321_s1 + $0x28] sm:$0xff]  ;;  %v342_v36 = vld [vmem:[%s3321_s1 + $0x20] sm:$0xff]  ;;  %s1316_s7 = sshll.u32 %s3601_s16, 7 }
   0xf   : > { %s1614_s30 = scalar_lea.vmem %s3320_s0, %s1315_s25  ;;  %v341_v41 = vld [vmem:[%s3321_s1 + $0x18] sm:$0xff]  ;;  %v340_v46 = vld [vmem:[%s3321_s1 + $0x10] sm:$0xff]  ;;  %v339_v51 = vld [vmem:[%s3321_s1 + $0x8] sm:$0xff]  ;;  %s3227_s9 = scalar_lea.vmem %s3324_s4, %s1316_s7 }
  0x10   : > { %356 = vmatpush.msra.mxu0 %v351_v2  ;;  %376 = vmatpush.msra.mxu1 %v351_v2  ;;  %v1617_v5 = vld [vmem:[%s1614_s30] sm:$0xff]  ;;  %v1620_v6 = vld [vmem:[%s1614_s30 + $0x8] sm:$0xff]  ;;  %v1623_v7 = vld [vmem:[%s1614_s30 + $0x10] sm:$0xff] }
  0x11   : > { %v230_v8 = vadd.f32 %v1620_v6, %v1617_v5  ;;  %v1631_v10 = vld [vmem:[%s1614_s30 + $0x18] sm:$0xff]  ;;  %v1638_v13 = vld [vmem:[%s1614_s30 + $0x20] sm:$0xff]  ;;  %v268_v14 = vmul.f32 %v1617_v5, %v1617_v5  ;;  %v269_v15 = vmul.f32 %v1620_v6, %v1620_v6  ;;  %v1649_v18 = vld [vmem:[%s1614_s30 + $0x28] sm:$0xff]  ;;  %v270_v19 = vmul.f32 %v1623_v7, %v1623_v7 }
  0x12   : > { %357 = vmatpush.msra.mxu0 %v350_v3  ;;  %377 = vmatpush.msra.mxu1 %v350_v3  ;;  %v1658_v22 = vld [vmem:[%s1614_s30 + $0x30] sm:$0xff]  ;;  %v271_v23 = vmul.f32 %v1631_v10, %v1631_v10  ;;  %v1667_v27 = vld [vmem:[%s1614_s30 + $0x38] sm:$0xff]  ;;  %v272_v28 = vmul.f32 %v1638_v13, %v1638_v13  ;;  %v1676_v32 = vld [vmem:[%s1614_s30 + $0x40] sm:$0xff]  ;;  %v273_v33 = vmul.f32 %v1649_v18, %v1649_v18 }
  0x13   : > { %v231_v11 = vadd.f32 %v230_v8, %v1623_v7  ;;  %v300_v24 = vadd.f32 %v269_v15, %v268_v14  ;;  %v1685_v37 = vld [vmem:[%s1614_s30 + $0x48] sm:$0xff]  ;;  %v274_v38 = vmul.f32 %v1658_v22, %v1658_v22  ;;  %v1694_v42 = vld [vmem:[%s1614_s30 + $0x50] sm:$0xff]  ;;  %v275_v43 = vmul.f32 %v1667_v27, %v1667_v27  ;;  %v1703_v47 = vld [vmem:[%s1614_s30 + $0x58] sm:$0xff] }
  0x14   : > { %358 = vmatpush.msra.mxu0 %v349_v4  ;;  %378 = vmatpush.msra.mxu1 %v349_v4  ;;  %v276_v48 = vmul.f32 %v1676_v32, %v1676_v32  ;;  %v1712_v52 = vld [vmem:[%s1614_s30 + $0x60] sm:$0xff]  ;;  %v277_v53 = vmul.f32 %v1685_v37, %v1685_v37  ;;  %v1721_v57 = vld [vmem:[%s1614_s30 + $0x68] sm:$0xff]  ;;  %v278_v58 = vmul.f32 %v1694_v42, %v1694_v42  ;;  %v1727_v61 = vld [vmem:[%s1614_s30 + $0x70] sm:$0xff] }
  0x15   : > { %v232_v16 = vadd.f32 %v231_v11, %v1631_v10  ;;  %v301_v29 = vadd.f32 %v300_v24, %v270_v19  ;;  %v338_v56 = vld [vmem:[%s3321_s1] sm:$0xff]  ;;  %v279_v62 = vmul.f32 %v1703_v47, %v1703_v47  ;;  %v1733_v1 = vld [vmem:[%s1614_s30 + $0x78] sm:$0xff]  ;;  %v280_v2 = vmul.f32 %v1712_v52, %v1712_v52  ;;  %v1745_v14 = vld [vmem:[%s1614_s30 + $0x88] sm:$0xff] }
  0x16   : > { %359 = vmatpush.msra.mxu0 %v348_v9  ;;  %379 = vmatpush.msra.mxu1 %v348_v9  ;;  %v1739_v8 = vld [vmem:[%s1614_s30 + $0x80] sm:$0xff]  ;;  %v281_v9 = vmul.f32 %v1721_v57, %v1721_v57  ;;  %v282_v15 = vmul.f32 %v1727_v61, %v1727_v61  ;;  %v1751_v19 = vld [vmem:[%s1614_s30 + $0x90] sm:$0xff]  ;;  %v1757_v24 = vld [vmem:[%s1614_s30 + $0x98] sm:$0xff] }
  0x17   : > { %v233_v20 = vadd.f32 %v232_v16, %v1638_v13  ;;  %v302_v34 = vadd.f32 %v301_v29, %v271_v23  ;;  %v1763_v29 = vld [vmem:[%s1614_s30 + $0xa0] sm:$0xff] }
  0x18   : > { %360 = vmatpush.msra.mxu0 %v347_v12  ;;  %380 = vmatpush.msra.mxu1 %v347_v12 }
  0x19   : > { %v234_v25 = vadd.f32 %v233_v20, %v1649_v18  ;;  %v303_v39 = vadd.f32 %v302_v34, %v272_v28  ;;  %v283_v20 = vmul.f32 %v1733_v1, %v1733_v1  ;;  %v1769_v34 = vld [vmem:[%s1614_s30 + $0xa8] sm:$0xff] }
  0x1a   : > { %361 = vmatpush.msra.mxu0 %v346_v17  ;;  %381 = vmatpush.msra.mxu1 %v346_v17 }
  0x1b   : > { %v235_v30 = vadd.f32 %v234_v25, %v1658_v22  ;;  %v304_v44 = vadd.f32 %v303_v39, %v273_v33  ;;  %v284_v25 = vmul.f32 %v1739_v8, %v1739_v8  ;;  %v1775_v39 = vld [vmem:[%s1614_s30 + $0xb0] sm:$0xff] }
  0x1c   : > { %362 = vmatpush.msra.mxu0 %v345_v21  ;;  %382 = vmatpush.msra.mxu1 %v345_v21 }
  0x1d   : > { %v236_v35 = vadd.f32 %v235_v30, %v1667_v27  ;;  %v305_v49 = vadd.f32 %v304_v44, %v274_v38  ;;  %v285_v30 = vmul.f32 %v1745_v14, %v1745_v14  ;;  %v1781_v44 = vld [vmem:[%s1614_s30 + $0xb8] sm:$0xff] }
  0x1e   : > { %363 = vmatpush.msra.mxu0 %v344_v26  ;;  %383 = vmatpush.msra.mxu1 %v344_v26 }
  0x1f   : > { %v237_v40 = vadd.f32 %v236_v35, %v1676_v32  ;;  %v306_v54 = vadd.f32 %v305_v49, %v275_v43  ;;  %v286_v35 = vmul.f32 %v1751_v19, %v1751_v19  ;;  %v1787_v49 = vld [vmem:[%s1614_s30 + $0xc0] sm:$0xff] }
  0x20   : > { %364 = vmatpush.msra.mxu0 %v343_v31  ;;  %384 = vmatpush.msra.mxu1 %v343_v31 }
  0x21   : > { %v238_v45 = vadd.f32 %v237_v40, %v1685_v37  ;;  %v307_v59 = vadd.f32 %v306_v54, %v276_v48  ;;  %v287_v40 = vmul.f32 %v1757_v24, %v1757_v24  ;;  %v1793_v54 = vld [vmem:[%s1614_s30 + $0xc8] sm:$0xff] }
  0x22   : > { %365 = vmatpush.msra.mxu0 %v342_v36  ;;  %385 = vmatpush.msra.mxu1 %v342_v36 }
  0x23   : > { %v239_v50 = vadd.f32 %v238_v45, %v1694_v42  ;;  %v308_v63 = vadd.f32 %v307_v59, %v277_v53  ;;  %v288_v45 = vmul.f32 %v1763_v29, %v1763_v29  ;;  %v1799_v59 = vld [vmem:[%s1614_s30 + $0xd0] sm:$0xff] }
  0x24   : > { %366 = vmatpush.msra.mxu0 %v341_v41  ;;  %386 = vmatpush.msra.mxu1 %v341_v41 }
  0x25   : > { %v240_v55 = vadd.f32 %v239_v50, %v1703_v47  ;;  %v309_v3 = vadd.f32 %v308_v63, %v278_v58  ;;  %v289_v50 = vmul.f32 %v1769_v34, %v1769_v34 }
  0x26   : > { %367 = vmatpush.msra.mxu0 %v340_v46  ;;  %387 = vmatpush.msra.mxu1 %v340_v46 }
  0x27   : > { %v241_v60 = vadd.f32 %v240_v55, %v1712_v52  ;;  %v310_v11 = vadd.f32 %v309_v3, %v279_v62  ;;  %v290_v55 = vmul.f32 %v1775_v39, %v1775_v39 }
  0x28   : > { %368 = vmatpush.msra.mxu0 %v339_v51  ;;  %388 = vmatpush.msra.mxu1 %v339_v51 }
  0x29   : > { %v242_v0 = vadd.f32 %v241_v60, %v1721_v57  ;;  %v311_v16 = vadd.f32 %v310_v11, %v280_v2  ;;  %v291_v60 = vmul.f32 %v1781_v44, %v1781_v44  ;;  %v292_v2 = vmul.f32 %v1787_v49, %v1787_v49 }
  0x2a   : > { %369 = vmatpush.msra.mxu0 %v338_v56  ;;  %389 = vmatpush.msra.mxu1 %v338_v56  ;;  %v293_v11 = vmul.f32 %v1793_v54, %v1793_v54 }
  0x2b   : > { %v243_v4 = vadd.f32 %v242_v0, %v1727_v61  ;;  %v312_v21 = vadd.f32 %v311_v16, %v281_v9  ;;  %v1805_v0 = vld [vmem:[%s1614_s30 + $0xd8] sm:$0xff]  ;;  %v1811_v9 = vld [vmem:[%s1614_s30 + $0xe0] sm:$0xff]  ;;  %v1817_v16 = vld [vmem:[%s1614_s30 + $0xe8] sm:$0xff] }
  0x2d   : > { %v244_v12 = vadd.f32 %v243_v4, %v1733_v1  ;;  %v313_v26 = vadd.f32 %v312_v21, %v282_v15 }
  0x2f   : > { %v245_v17 = vadd.f32 %v244_v12, %v1739_v8  ;;  %v314_v31 = vadd.f32 %v313_v26, %v283_v20 }
  0x31   : > { %v246_v23 = vadd.f32 %v245_v17, %v1745_v14  ;;  %v315_v36 = vadd.f32 %v314_v31, %v284_v25  ;;  %v294_v17 = vmul.f32 %v1799_v59, %v1799_v59  ;;  %v295_v25 = vmul.f32 %v1805_v0, %v1805_v0 }
  0x32   : > { %v296_v31 = vmul.f32 %v1811_v9, %v1811_v9 }
  0x33   : > { %v247_v28 = vadd.f32 %v246_v23, %v1751_v19  ;;  %v316_v41 = vadd.f32 %v315_v36, %v285_v30  ;;  %v1823_v23 = vld [vmem:[%s1614_s30 + $0xf0] sm:$0xff]  ;;  %v1829_v30 = vld [vmem:[%s1614_s30 + $0xf8] sm:$0xff]  ;;  %v297_v36 = vmul.f32 %v1817_v16, %v1817_v16 }
  0x35   : > { %v248_v33 = vadd.f32 %v247_v28, %v1757_v24  ;;  %v317_v46 = vadd.f32 %v316_v41, %v286_v35  ;;  %v298_v41 = vmul.f32 %v1823_v23, %v1823_v23 }
  0x37   : > { %v249_v38 = vadd.f32 %v248_v33, %v1763_v29  ;;  %v318_v51 = vadd.f32 %v317_v46, %v287_v40  ;;  %v299_v46 = vmul.f32 %v1829_v30, %v1829_v30 }
  0x39   : > { %v250_v43 = vadd.f32 %v249_v38, %v1769_v34  ;;  %v319_v56 = vadd.f32 %v318_v51, %v288_v45 }
  0x3b   : > { %v251_v48 = vadd.f32 %v250_v43, %v1775_v39  ;;  %v320_v62 = vadd.f32 %v319_v56, %v289_v50 }
  0x3d   : > { %v252_v53 = vadd.f32 %v251_v48, %v1781_v44  ;;  %v321_v3 = vadd.f32 %v320_v62, %v290_v55 }
  0x3f   : > { %v253_v58 = vadd.f32 %v252_v53, %v1787_v49  ;;  %v322_v12 = vadd.f32 %v321_v3, %v291_v60 }
  0x41   : > { %v254_v63 = vadd.f32 %v253_v58, %v1793_v54  ;;  %v323_v20 = vadd.f32 %v322_v12, %v292_v2 }
  0x43   : > { %v255_v4 = vadd.f32 %v254_v63, %v1799_v59  ;;  %v324_v26 = vadd.f32 %v323_v20, %v293_v11 }
  0x45   : > { %v256_v15 = vadd.f32 %v255_v4, %v1805_v0  ;;  %v325_v33 = vadd.f32 %v324_v26, %v294_v17 }
  0x47   : > { %v257_v21 = vadd.f32 %v256_v15, %v1811_v9  ;;  %v326_v38 = vadd.f32 %v325_v33, %v295_v25 }
  0x49   : > { %v258_v28 = vadd.f32 %v257_v21, %v1817_v16  ;;  %v327_v43 = vadd.f32 %v326_v38, %v296_v31 }
  0x4b   : > { %v259_v35 = vadd.f32 %v258_v28, %v1823_v23  ;;  %v328_v48 = vadd.f32 %v327_v43, %v297_v36 }
  0x4d   : > { %v260_v40 = vadd.f32 %v259_v35, %v1829_v30  ;;  %v329_v51 = vadd.f32 %v328_v48, %v298_v41 }
  0x4f   : > { %v261_v45 = vrot.slane %v260_v40, 4  ;;  %v330_v55 = vadd.f32 %v329_v51, %v299_v46 }
  0x51   : > { %v262_v50 = vadd.f32 %v261_v45, %v260_v40  ;;  %v331_v58 = vrot.slane %v330_v55, 4 }
  0x53   : > { %v263_v53 = vrot.slane %v262_v50, 2  ;;  %v332_v62 = vadd.f32 %v331_v58, %v330_v55 }
  0x55   : > { %v264_v56 = vadd.f32 %v263_v53, %v262_v50  ;;  %v333_v2 = vrot.slane %v332_v62, 2 }
  0x57   : > { %v265_v60 = vrot.slane %v264_v56, 1  ;;  %v334_v4 = vadd.f32 %v333_v2, %v332_v62 }
  0x59   : > { %v266_v63 = vadd.f32 %v265_v60, %v264_v56  ;;  %v335_v11 = vrot.slane %v334_v4, 1 }
  0x5b   : > { %v267_v3 = vmul.f32 0.00390625, %v266_v63  ;;  %v336_v12 = vadd.f32 %v335_v11, %v334_v4 }
  0x5d   : > { %370 = vmatmul.f32.vlgmr.msra.gmra.mxu0 %v267_v3  ;;  %v337_v15 = vmul.f32 0.00390625, %v336_v12 }
  0x5f   : > { %390 = vmatmul.f32.vlgmr.msra.gmra.mxu1 %v337_v15 }
  0xda   : > { %v371_v17 = vpop.f32.mrf.mxu0 }
  0xdb   : > { %v394_v20 = vmul.f32 %v371_v17, %v371_v17  ;;  %v1841_v38 = vperm.slane %v371_v17, 0 }
  0xdc   : > { %v391_v21 = vpop.f32.mrf.mxu1 }
  0xdd   : > { %v395_v25 = vsub.f32 %v391_v21, %v394_v20  ;;  %v397_v41 = vsub.f32 %v1617_v5, %v1841_v38  ;;  %v398_v43 = vsub.f32 %v1620_v6, %v1841_v38  ;;  %v399_v45 = vsub.f32 %v1623_v7, %v1841_v38 }
  0xde   : > { %v400_v46 = vsub.f32 %v1631_v10, %v1841_v38  ;;  %v401_v50 = vsub.f32 %v1638_v13, %v1841_v38  ;;  %v402_v51 = vsub.f32 %v1649_v18, %v1841_v38  ;;  %v403_v5 = vsub.f32 %v1658_v22, %v1841_v38 }
  0xdf   : > { %v429_v26 = vadd.f32 1e-05, %v395_v25  ;;  %v404_v7 = vsub.f32 %v1667_v27, %v1841_v38  ;;  %v405_v10 = vsub.f32 %v1676_v32, %v1841_v38  ;;  %v406_v53 = vsub.f32 %v1685_v37, %v1841_v38 }
  0xe0   : > { %v407_v13 = vsub.f32 %v1694_v42, %v1841_v38  ;;  %v408_v18 = vsub.f32 %v1703_v47, %v1841_v38  ;;  %v409_v22 = vsub.f32 %v1712_v52, %v1841_v38  ;;  %v410_v55 = vsub.f32 %v1721_v57, %v1841_v38 }
  0xe1   : > { %1422 = vrsqrt.f32 %v429_v26  ;;  %vm436_vm1 = vweird.f32 %v429_v26  ;;  %v411_v27 = vsub.f32 %v1727_v61, %v1841_v38  ;;  %v412_v32 = vsub.f32 %v1733_v1, %v1841_v38 }
  0xe2   : > { %v413_v37 = vsub.f32 %v1739_v8, %v1841_v38  ;;  %v414_v42 = vsub.f32 %v1745_v14, %v1841_v38  ;;  %v415_v47 = vsub.f32 %v1751_v19, %v1841_v38  ;;  %v416_v52 = vsub.f32 %v1757_v24, %v1841_v38 }
  0xe3   : > { %v417_v57 = vsub.f32 %v1763_v29, %v1841_v38  ;;  %v418_v61 = vsub.f32 %v1769_v34, %v1841_v38  ;;  %v419_v1 = vsub.f32 %v1775_v39, %v1841_v38  ;;  %v420_v8 = vsub.f32 %v1781_v44, %v1841_v38 }
  0xe4   : > { %v421_v14 = vsub.f32 %v1787_v49, %v1841_v38  ;;  %v422_v19 = vsub.f32 %v1793_v54, %v1841_v38  ;;  %v423_v24 = vsub.f32 %v1799_v59, %v1841_v38  ;;  %v424_v29 = vsub.f32 %v1805_v0, %v1841_v38 }
  0xe5   : > { %v425_v34 = vsub.f32 %v1811_v9, %v1841_v38  ;;  %v426_v39 = vsub.f32 %v1817_v16, %v1841_v38  ;;  %v427_v44 = vsub.f32 %v1823_v23, %v1841_v38  ;;  %v428_v49 = vsub.f32 %v1829_v30, %v1841_v38  ;;  %v1916_v23 = vld [vmem:[%s3322_s2] ss:$0 sm:$0xff] }
  0xe7   : > { %v1423_v28 = vpop.eup %1422 }
  0xe8   : > { %v431_v31 = vmul.f32 %v1423_v28, %v429_v26  ;;  %vm437_vm0 = vweird.f32 %v1423_v28 }
  0xe9   : > { %vm1851_vm2 = vmor %vm436_vm1, %vm437_vm0 }
  0xea   : > { %v432_v33 = vmul.f32 %v1423_v28, %v431_v31 }
  0xec   : > { %v433_v35 = vmul.f32 0.5, %v432_v33 }
  0xee   : > { %v434_v36 = vsub.f32 1.5, %v433_v35 }
  0xf0   : > { %v435_v40 = vmul.f32 %v1423_v28, %v434_v36 }
  0xf2   : > { %v439_v6 = vsel %vm1851_vm2, %v1423_v28, %v435_v40 }
  0xf3   : > { %v440_v56 = vperm.slane %v439_v6, 0 }
  0xf5   : > { %v441_v58 = vmul.f32 %v440_v56, %v397_v41  ;;  %v442_v54 = vmul.f32 %v440_v56, %v398_v43  ;;  %v443_v60 = vmul.f32 %v440_v56, %v399_v45  ;;  %v444_v62 = vmul.f32 %v440_v56, %v400_v46  ;;  %v1922_v45 = vld [vmem:[%s3323_s3] ss:$0 sm:$0xff] }
  0xf6   : > { %v445_v59 = vmul.f32 %v440_v56, %v401_v50  ;;  %v446_v63 = vmul.f32 %v440_v56, %v402_v51  ;;  %v447_v2 = vmul.f32 %v440_v56, %v403_v5  ;;  %v448_v0 = vmul.f32 %v440_v56, %v404_v7 }
  0xf7   : > { %v449_v3 = vmul.f32 %v440_v56, %v405_v10  ;;  %v450_v4 = vmul.f32 %v440_v56, %v406_v53  ;;  %v451_v9 = vmul.f32 %v440_v56, %v407_v13  ;;  %v452_v11 = vmul.f32 %v440_v56, %v408_v18 }
  0xf8   : > { %v453_v12 = vmul.f32 %v440_v56, %v409_v22  ;;  %v454_v16 = vmul.f32 %v440_v56, %v410_v55  ;;  %v455_v30 = vmul.f32 %v440_v56, %v411_v27  ;;  %v456_v15 = vmul.f32 %v440_v56, %v412_v32 }
  0xf9   : > { %v457_v17 = vmul.f32 %v440_v56, %v413_v37  ;;  %v458_v20 = vmul.f32 %v440_v56, %v414_v42  ;;  %v459_v21 = vmul.f32 %v440_v56, %v415_v47  ;;  %v460_v25 = vmul.f32 %v440_v56, %v416_v52 }
  0xfa   : > { %v461_v26 = vmul.f32 %v440_v56, %v417_v57  ;;  %v462_v28 = vmul.f32 %v440_v56, %v418_v61  ;;  %v463_v31 = vmul.f32 %v440_v56, %v419_v1  ;;  %v464_v33 = vmul.f32 %v440_v56, %v420_v8 }
  0xfb   : > { %v465_v35 = vmul.f32 %v440_v56, %v421_v14  ;;  %v466_v36 = vmul.f32 %v440_v56, %v422_v19  ;;  %v467_v38 = vmul.f32 %v440_v56, %v423_v24  ;;  %v468_v40 = vmul.f32 %v440_v56, %v424_v29 }
  0xfc   : > { %v469_v41 = vmul.f32 %v440_v56, %v425_v34  ;;  %v477_v43 = vmul.f32 %v1916_v23, %v441_v58  ;;  %v470_v46 = vmul.f32 %v440_v56, %v426_v39  ;;  %v471_v48 = vmul.f32 %v440_v56, %v427_v44 }
  0xfd   : > { %v472_v50 = vmul.f32 %v440_v56, %v428_v49  ;;  %v478_v51 = vmul.f32 %v1916_v23, %v442_v54  ;;  %v479_v5 = vmul.f32 %v1916_v23, %v443_v60  ;;  %v480_v6 = vmul.f32 %v1916_v23, %v444_v62 }
  0xfe   : > { %v481_v7 = vmul.f32 %v1916_v23, %v445_v59  ;;  %v482_v10 = vmul.f32 %v1916_v23, %v446_v63  ;;  %v483_v53 = vmul.f32 %v1916_v23, %v447_v2  ;;  %v484_v13 = vmul.f32 %v1916_v23, %v448_v0 }
  0xff   : > { %v485_v18 = vmul.f32 %v1916_v23, %v449_v3  ;;  %v486_v22 = vmul.f32 %v1916_v23, %v450_v4  ;;  %v487_v55 = vmul.f32 %v1916_v23, %v451_v9  ;;  %v488_v27 = vmul.f32 %v1916_v23, %v452_v11 }
 0x100   : > { %v489_v32 = vmul.f32 %v1916_v23, %v453_v12  ;;  %v1937_v37 = vadd.f32 %v1922_v45, %v477_v43  ;;  %v490_v42 = vmul.f32 %v1916_v23, %v454_v16  ;;  %v491_v56 = vmul.f32 %v1916_v23, %v455_v30 }
 0x101   : > { %v492_v47 = vmul.f32 %v1916_v23, %v456_v15  ;;  %v1943_v52 = vadd.f32 %v1922_v45, %v478_v51  ;;  %v493_v57 = vmul.f32 %v1916_v23, %v457_v17  ;;  %v494_v61 = vmul.f32 %v1916_v23, %v458_v20 }
 0x102   : > { %3370 = vst [vmem:[#allocation2_spill] sm:$0xff] %v1937_v37  ;;  %v495_v1 = vmul.f32 %v1916_v23, %v459_v21  ;;  %v1949_v8 = vadd.f32 %v1922_v45, %v479_v5  ;;  %v496_v14 = vmul.f32 %v1916_v23, %v460_v25  ;;  %v497_v19 = vmul.f32 %v1916_v23, %v461_v26 }
 0x103   : > { %3371 = vst [vmem:[#allocation3_spill] sm:$0xff] %v1943_v52  ;;  %v1954_v24 = vmul.f32 %v1916_v23, %v462_v28  ;;  %v1957_v29 = vadd.f32 %v1922_v45, %v480_v6  ;;  %v1960_v34 = vmul.f32 %v1916_v23, %v463_v31  ;;  %v1963_v39 = vmul.f32 %v1916_v23, %v464_v33 }
 0x104   : > { %3372 = vst [vmem:[#allocation4_spill] sm:$0xff] %v1949_v8  ;;  %v1966_v44 = vadd.f32 %v1922_v45, %v481_v7  ;;  %v545_v49 = vsub.f32 0.0, %v1937_v37  ;;  %v1970_v58 = vmul.f32 %v1916_v23, %v465_v35  ;;  %v1973_v54 = vmul.f32 %v1916_v23, %v466_v36 }
 0x105   : > { %3373 = vst [vmem:[#allocation5_spill] sm:$0xff] %v1957_v29  ;;  %v1976_v60 = vadd.f32 %v1922_v45, %v482_v10  ;;  %v546_v62 = vsub.f32 0.0, %v1943_v52  ;;  %v1980_v59 = vmul.f32 %v1916_v23, %v467_v38  ;;  %v1983_v63 = vmul.f32 %v1916_v23, %v468_v40 }
 0x106   : > { %3374 = vst [vmem:[#allocation6_spill] sm:$0xff] %v1966_v44  ;;  %v1986_v2 = vadd.f32 %v1922_v45, %v483_v53  ;;  %v547_v0 = vsub.f32 0.0, %v1949_v8  ;;  %v1990_v3 = vmul.f32 %v1916_v23, %v469_v41  ;;  %v1993_v4 = vmul.f32 %v1916_v23, %v470_v46 }
 0x107   : > { %3375 = vst [vmem:[#allocation7_spill] sm:$0xff] %v1976_v60  ;;  %v1996_v9 = vadd.f32 %v1922_v45, %v484_v13  ;;  %v548_v11 = vsub.f32 0.0, %v1957_v29  ;;  %v2000_v12 = vmul.f32 %v1916_v23, %v471_v48  ;;  %v2003_v16 = vadd.f32 %v1922_v45, %v485_v18 }
 0x108   : > { %3376 = vst [vmem:[#allocation8_spill] sm:$0xff] %v1986_v2  ;;  %v549_v30 = vsub.f32 0.0, %v1966_v44  ;;  %v577_v15 = vmul.f32 1.442695, %v545_v49  ;;  %v2007_v17 = vmul.f32 %v1916_v23, %v472_v50  ;;  %v2010_v20 = vadd.f32 %v1922_v45, %v486_v22 }
 0x109   : > { %3377 = vst [vmem:[#allocation9_spill] sm:$0xff] %v1996_v9  ;;  %v550_v21 = vsub.f32 0.0, %v1976_v60  ;;  %v579_v25 = vmul.f32 1.442695, %v546_v62  ;;  %v2014_v26 = vadd.f32 %v1922_v45, %v487_v55  ;;  %v2017_v28 = vadd.f32 %v1922_v45, %v488_v27 }
 0x10a   : > { %3378 = vst [vmem:[#allocation10_spill] sm:$0xff] %v2003_v16  ;;  %v551_v31 = vsub.f32 0.0, %v1986_v2  ;;  %v581_v33 = vmul.f32 1.442695, %v547_v0  ;;  %v2021_v35 = vadd.f32 %v1922_v45, %v489_v32  ;;  %v2024_v23 = vadd.f32 %v1922_v45, %v490_v42 }
 0x10b   : > { %3379 = vst [vmem:[#allocation11_spill] sm:$0xff] %v2010_v20  ;;  %v552_v36 = vsub.f32 0.0, %v1996_v9  ;;  %v583_v38 = vmul.f32 1.442695, %v548_v11  ;;  %v2028_v40 = vadd.f32 %v1922_v45, %v491_v56  ;;  %v553_v41 = vsub.f32 0.0, %v2003_v16 }
 0x10c   : > { %3380 = vst [vmem:[#allocation12_spill] sm:$0xff] %v2014_v26  ;;  %1424 = vpow2.f32 %v577_v15  ;;  %v585_v43 = vmul.f32 1.442695, %v549_v30  ;;  %v2032_v46 = vadd.f32 %v1922_v45, %v492_v47  ;;  %v554_v48 = vsub.f32 0.0, %v2010_v20 }
 0x10d   : > { %3381 = vst [vmem:[#allocation13_spill] sm:$0xff] %v2017_v28  ;;  %1426 = vpow2.f32 %v579_v25  ;;  %v587_v50 = vmul.f32 1.442695, %v550_v21  ;;  %v2036_v51 = vadd.f32 %v1922_v45, %v493_v57  ;;  %v555_v5 = vsub.f32 0.0, %v2014_v26 }
 0x10e   : > { %3382 = vst [vmem:[#allocation14_spill] sm:$0xff] %v2021_v35  ;;  %1428 = vpow2.f32 %v581_v33  ;;  %v589_v6 = vmul.f32 1.442695, %v551_v31  ;;  %v2040_v7 = vadd.f32 %v1922_v45, %v494_v61  ;;  %v556_v10 = vsub.f32 0.0, %v2017_v28 }
 0x10f   : > { %3383 = vst [vmem:[#allocation15_spill] sm:$0xff] %v2024_v23  ;;  %1430 = vpow2.f32 %v583_v38  ;;  %v591_v53 = vmul.f32 1.442695, %v552_v36  ;;  %v2044_v13 = vadd.f32 %v1922_v45, %v495_v1  ;;  %v557_v18 = vsub.f32 0.0, %v2021_v35 }
 0x110   : > { %3384 = vst [vmem:[#allocation16_spill] sm:$0xff] %v2028_v40  ;;  %1432 = vpow2.f32 %v585_v43  ;;  %v593_v22 = vmul.f32 1.442695, %v553_v41  ;;  %v2048_v55 = vadd.f32 %v1922_v45, %v496_v14  ;;  %v558_v27 = vsub.f32 0.0, %v2024_v23 }
 0x111   : > { %3385 = vst [vmem:[#allocation17_spill] sm:$0xff] %v2032_v46  ;;  %1434 = vpow2.f32 %v587_v50  ;;  %v595_v32 = vmul.f32 1.442695, %v554_v48  ;;  %v2054_v56 = vadd.f32 %v1922_v45, %v497_v19  ;;  %v559_v47 = vsub.f32 0.0, %v2028_v40 }
 0x112   : > { %3386 = vst [vmem:[#allocation18_spill] sm:$0xff] %v2036_v51  ;;  %v2051_v42 = vpop.eup %1424  ;;  %1436 = vpow2.f32 %v589_v6  ;;  %v597_v57 = vmul.f32 1.442695, %v555_v5  ;;  %v2061_v1 = vadd.f32 %v1922_v45, %v1954_v24  ;;  %v560_v14 = vsub.f32 0.0, %v2032_v46 }
 0x113   : > { %3387 = vst [vmem:[#allocation19_spill] sm:$0xff] %v2040_v7  ;;  %v2057_v61 = vpop.eup %1426  ;;  %1438 = vpow2.f32 %v591_v53  ;;  %v599_v49 = vmul.f32 1.442695, %v556_v10  ;;  %v2068_v19 = vadd.f32 %v1922_v45, %v1960_v34  ;;  %v561_v0 = vsub.f32 0.0, %v2036_v51 }
 0x114   : > { %3388 = vst [vmem:[#allocation20_spill] sm:$0xff] %v2044_v13  ;;  %v2064_v62 = vpop.eup %1428  ;;  %1440 = vpow2.f32 %v593_v22  ;;  %v601_v11 = vmul.f32 1.442695, %v557_v18  ;;  %v2075_v24 = vadd.f32 %v1922_v45, %v1963_v39  ;;  %v562_v15 = vsub.f32 0.0, %v2040_v7 }
 0x115   : > { %3389 = vst [vmem:[#allocation21_spill] sm:$0xff] %v2048_v55  ;;  %v2071_v30 = vpop.eup %1430  ;;  %1442 = vpow2.f32 %v595_v32  ;;  %v603_v21 = vmul.f32 1.442695, %v558_v27  ;;  %v2082_v34 = vadd.f32 %v1922_v45, %v1970_v58  ;;  %v563_v31 = vsub.f32 0.0, %v2044_v13 }
 0x116   : > { %3390 = vst [vmem:[#allocation22_spill] sm:$0xff] %v2054_v56  ;;  %v2078_v25 = vpop.eup %1432  ;;  %1444 = vpow2.f32 %v597_v57  ;;  %v605_v33 = vmul.f32 1.442695, %v559_v47  ;;  %v2089_v39 = vadd.f32 %v1922_v45, %v1973_v54  ;;  %v564_v38 = vsub.f32 0.0, %v2048_v55 }
 0x117   : > { %3391 = vst [vmem:[#allocation23_spill] sm:$0xff] %v2061_v1  ;;  %v2085_v36 = vpop.eup %1434  ;;  %1446 = vpow2.f32 %v599_v49  ;;  %v607_v41 = vmul.f32 1.442695, %v560_v14  ;;  %v2096_v58 = vadd.f32 %v1922_v45, %v1980_v59  ;;  %v565_v48 = vsub.f32 0.0, %v2054_v56 }
 0x118   : > { %3392 = vst [vmem:[#allocation24_spill] sm:$0xff] %v2068_v19  ;;  %v2092_v43 = vpop.eup %1436  ;;  %1448 = vpow2.f32 %v601_v11  ;;  %v609_v50 = vmul.f32 1.442695, %v561_v0  ;;  %v2103_v54 = vadd.f32 %v1922_v45, %v1983_v63  ;;  %v566_v6 = vsub.f32 0.0, %v2061_v1 }
 0x119   : > { %3393 = vst [vmem:[#allocation25_spill] sm:$0xff] %v2075_v24  ;;  %v2099_v5 = vpop.eup %1438  ;;  %1450 = vpow2.f32 %v603_v21  ;;  %v611_v10 = vmul.f32 1.442695, %v562_v15  ;;  %v2110_v59 = vadd.f32 %v1922_v45, %v1990_v3  ;;  %v567_v18 = vsub.f32 0.0, %v2068_v19 }
 0x11a   : > { %3394 = vst [vmem:[#allocation26_spill] sm:$0xff] %v2082_v34  ;;  %v2106_v53 = vpop.eup %1440  ;;  %1452 = vpow2.f32 %v605_v33  ;;  %v613_v22 = vmul.f32 1.442695, %v563_v31  ;;  %v2117_v63 = vadd.f32 %v1922_v45, %v1993_v4  ;;  %v568_v32 = vsub.f32 0.0, %v2075_v24 }
 0x11b   : > { %3395 = vst [vmem:[#allocation27_spill] sm:$0xff] %v2089_v39  ;;  %v2113_v27 = vpop.eup %1442  ;;  %1454 = vpow2.f32 %v607_v41  ;;  %v615_v47 = vmul.f32 1.442695, %v564_v38  ;;  %v2124_v3 = vadd.f32 %v1922_v45, %v2000_v12  ;;  %v569_v14 = vsub.f32 0.0, %v2082_v34 }
 0x11c   : > { %3396 = vst [vmem:[#allocation28_spill] sm:$0xff] %v2096_v58  ;;  %v2120_v57 = vpop.eup %1444  ;;  %1456 = vpow2.f32 %v609_v50  ;;  %v617_v49 = vmul.f32 1.442695, %v565_v48  ;;  %v2131_v4 = vadd.f32 %v1922_v45, %v2007_v17  ;;  %v570_v11 = vsub.f32 0.0, %v2089_v39 }
 0x11d   : > { %3397 = vst [vmem:[#allocation29_spill] sm:$0xff] %v2103_v54  ;;  %v2127_v0 = vpop.eup %1446  ;;  %1458 = vpow2.f32 %v611_v10  ;;  %v619_v15 = vmul.f32 1.442695, %v566_v6  ;;  %v571_v31 = vsub.f32 0.0, %v2096_v58  ;;  %v572_v12 = vsub.f32 0.0, %v2103_v54 }
 0x11e   : > { %3398 = vst [vmem:[#allocation30_spill] sm:$0xff] %v2110_v59  ;;  %v2134_v21 = vpop.eup %1448  ;;  %1460 = vpow2.f32 %v613_v22  ;;  %v621_v33 = vmul.f32 1.442695, %v567_v18  ;;  %v573_v41 = vsub.f32 0.0, %v2110_v59  ;;  %v574_v48 = vsub.f32 0.0, %v2117_v63 }
 0x11f   : > { %3399 = vst [vmem:[#allocation31_spill] sm:$0xff] %v2117_v63  ;;  %v2138_v38 = vpop.eup %1450  ;;  %1462 = vpow2.f32 %v615_v47  ;;  %v623_v45 = vmul.f32 1.442695, %v568_v32  ;;  %v575_v50 = vsub.f32 0.0, %v2124_v3  ;;  %v625_v6 = vmul.f32 1.442695, %v569_v14 }
 0x120   : > { %3400 = vst [vmem:[#allocation32_spill] sm:$0xff] %v2124_v3  ;;  %v2142_v17 = vpop.eup %1452  ;;  %1464 = vpow2.f32 %v617_v49  ;;  %v2146_v10 = vadd.f32 1.0, %v2051_v42  ;;  %v576_v18 = vsub.f32 0.0, %v2131_v4  ;;  %v627_v22 = vmul.f32 1.442695, %v570_v11 }
 0x121   : > { %3401 = vst [vmem:[#allocation33_spill] sm:$0xff] %v2131_v4  ;;  %v2148_v54 = vpop.eup %1454  ;;  %1466 = vpow2.f32 %v619_v15  ;;  %v2152_v59 = vadd.f32 1.0, %v2057_v61  ;;  %v629_v32 = vmul.f32 1.442695, %v571_v31  ;;  %v631_v49 = vmul.f32 1.442695, %v572_v12 }
 0x122   : > { %v2154_v47 = vpop.eup %1456  ;;  %1468 = vpow2.f32 %v621_v33  ;;  %v633_v14 = vmul.f32 1.442695, %v573_v41  ;;  %v2157_v42 = vadd.f32 1.0, %v2064_v62  ;;  %v635_v58 = vmul.f32 1.442695, %v574_v48 }
 0x123   : > { %v1459_v63 = vpop.eup %1458  ;;  %1470 = vpow2.f32 %v623_v45  ;;  %v637_v4 = vmul.f32 1.442695, %v575_v50  ;;  %v684_v11 = vand.u32 2147483648, %v2146_v10  ;;  %v639_v61 = vmul.f32 1.442695, %v576_v18 }
 0x124   : > { %v1461_v3 = vpop.eup %1460  ;;  %1472 = vpow2.f32 %v625_v6  ;;  %v2161_v39 = vadd.f32 1.0, %v2071_v30  ;;  %v699_v31 = vand.u32 2147483648, %v2152_v59  ;;  %v2165_v12 = vadd.f32 1.0, %v2078_v25 }
 0x125   : > { %v1463_v15 = vpop.eup %1462  ;;  %1474 = vpow2.f32 %v627_v22  ;;  %v2168_v62 = vadd.f32 1.0, %v2085_v36  ;;  %v2172_v45 = vadd.f32 1.0, %v2092_v43  ;;  %v714_v50 = vand.u32 2147483648, %v2157_v42 }
 0x126   : > { %v1465_v33 = vpop.eup %1464  ;;  %1476 = vpow2.f32 %v629_v32  ;;  %v2177_v18 = vadd.f32 1.0, %v2099_v5  ;;  %v2180_v25 = vadd.f32 1.0, %v2106_v53  ;;  %v2182_v36 = vor.u32 1.1754944e-38, %v684_v11 }
 0x127   : > { %v1467_v48 = vpop.eup %1466  ;;  %1478 = vpow2.f32 %v631_v49  ;;  %v2185_v32 = vor.u32 1.1754944e-38, %v699_v31  ;;  %v729_v49 = vand.u32 2147483648, %v2161_v39  ;;  %v2193_v5 = vadd.f32 1.0, %v2120_v57 }
 0x128   : > { %v1469_v6 = vpop.eup %1468  ;;  %1480 = vpow2.f32 %v633_v14  ;;  %v2190_v14 = vadd.f32 1.0, %v2113_v27  ;;  %v2198_v41 = vadd.f32 1.0, %v2127_v0  ;;  %v2201_v31 = vor.u32 1.1754944e-38, %v714_v50 }
 0x129   : > { %v1471_v22 = vpop.eup %1470  ;;  %1482 = vrcp.f32 %v2146_v10  ;;  %v744_v43 = vand.u32 2147483648, %v2165_v12  ;;  %v2205_v27 = vadd.f32 1.0, %v2134_v21  ;;  %v2208_v57 = vadd.f32 1.0, %v2138_v38 }
 0x12a   : > { %v1473_v30 = vpop.eup %1472  ;;  %1484 = vrcp.f32 %v2152_v59  ;;  %v759_v53 = vand.u32 2147483648, %v2168_v62  ;;  %v2212_v0 = vadd.f32 1.0, %v2142_v17  ;;  %v2215_v50 = vor.u32 1.1754944e-38, %v729_v49 }
 0x12b   : > { %v1475_v11 = vpop.eup %1474  ;;  %1486 = vrcp.f32 %v2157_v42  ;;  %v774_v38 = vand.u32 2147483648, %v2172_v45  ;;  %v2226_v17 = vadd.f32 1.0, %v2154_v47  ;;  %v2228_v55 = vadd.f32 1.0, %v1459_v63 }
 0x12c   : > { %v1477_v34 = vpop.eup %1476  ;;  %1488 = vpow2.f32 %v635_v58  ;;  %v2219_v58 = vadd.f32 1.0, %v2148_v54  ;;  %v2231_v49 = vor.u32 1.1754944e-38, %v744_v43  ;;  %v2238_v54 = vor.u32 1.1754944e-38, %v759_v53 }
 0x12d   : > { %v1479_v24 = vpop.eup %1478  ;;  %1490 = vrcp.f32 %v2161_v39  ;;  %v789_v21 = vand.u32 2147483648, %v2177_v18  ;;  %v2243_v47 = vadd.f32 1.0, %v1463_v15  ;;  %v2245_v63 = vadd.f32 1.0, %v1465_v33 }
 0x12e   : > { %v1481_v1 = vpop.eup %1480  ;;  %1492 = vpow2.f32 %v637_v4  ;;  %v2235_v4 = vadd.f32 1.0, %v1461_v3  ;;  %v2248_v51 = vadd.f32 1.0, %v1467_v48  ;;  %v2251_v3 = vor.u32 1.1754944e-38, %v774_v38 }
 0x12f   : > { %v2223_v56 = vpop.eup %1482  ;;  %1494 = vrcp.f32 %v2165_v12  ;;  %v2256_v40 = vadd.f32 1.0, %v1469_v6  ;;  %v2262_v48 = vadd.f32 1.0, %v1471_v22  ;;  %v2268_v43 = vor.u32 1.1754944e-38, %v789_v21 }
 0x130   : > { %v2233_v19 = vpop.eup %1484  ;;  %1496 = vrcp.f32 %v2168_v62  ;;  %3402 = vst [vmem:[#allocation34_spill] sm:$0xff] %v2248_v51  ;;  %v674_v15 = vmul.f32 %v2223_v56, %v2146_v10  ;;  %v2272_v23 = vadd.f32 1.0, %v1473_v30  ;;  %v819_v28 = vand.u32 2147483648, %v2190_v14 }
 0x131   : > { %v2241_v13 = vpop.eup %1486  ;;  %1498 = vpow2.f32 %v639_v61  ;;  %3403 = vst [vmem:[#allocation35_spill] sm:$0xff] %v2256_v40  ;;  %v804_v61 = vand.u32 2147483648, %v2180_v25  ;;  %v689_v38 = vmul.f32 %v2233_v19, %v2152_v59  ;;  %v2279_v26 = vadd.f32 1.0, %v1475_v11 }
 0x132   : > { %v1489_v7 = vpop.eup %1488  ;;  %1500 = vrcp.f32 %v2172_v45  ;;  %3404 = vst [vmem:[#allocation36_spill] sm:$0xff] %v2262_v48  ;;  %v704_v53 = vmul.f32 %v2241_v13, %v2157_v42  ;;  %v2281_v20 = vadd.f32 1.0, %v1477_v34  ;;  %v2286_v30 = vadd.f32 1.0, %v1479_v24 }
 0x133   : > { %v2254_v46 = vpop.eup %1490  ;;  %1502 = vrcp.f32 %v2177_v18  ;;  %3405 = vst [vmem:[#allocation37_spill] sm:$0xff] %v2272_v23  ;;  %v675_v2 = vsub.f32 1.0, %v674_v15  ;;  %v2288_v60 = vor.u32 1.1754944e-38, %v804_v61  ;;  %v2293_v44 = vadd.f32 1.0, %v1481_v1 }
 0x134   : > { %v1493_v33 = vpop.eup %1492  ;;  %1504 = vrcp.f32 %v2180_v25  ;;  %3406 = vst [vmem:[#allocation38_spill] sm:$0xff] %v2279_v26  ;;  %v719_v21 = vmul.f32 %v2254_v46, %v2161_v39  ;;  %vm678_vm3 = vweird.f32 %v2146_v10  ;;  %v690_v34 = vsub.f32 1.0, %v689_v38 }
 0x135   : > { %v2270_v6 = vpop.eup %1494  ;;  %3407 = vst [vmem:[#allocation39_spill] sm:$0xff] %v2281_v20  ;;  %1506 = vrcp.f32 %v2190_v14  ;;  %v705_v11 = vsub.f32 1.0, %v704_v53  ;;  %v834_v29 = vand.u32 2147483648, %v2193_v5  ;;  %vm693_vm4 = vweird.f32 %v2152_v59 }
 0x136   : > { %v2277_v22 = vpop.eup %1496  ;;  %3408 = vst [vmem:[#allocation40_spill] sm:$0xff] %v2286_v30  ;;  %v734_v24 = vmul.f32 %v2270_v6, %v2165_v12  ;;  %v2304_v61 = vor.u32 1.1754944e-38, %v819_v28  ;;  %1508 = vrcp.f32 %v2193_v5  ;;  %v2307_v1 = vadd.f32 1.0, %v1489_v7 }
 0x137   : > { %v1499_v9 = vpop.eup %1498  ;;  %3409 = vst [vmem:[#allocation41_spill] sm:$0xff] %v2293_v44  ;;  %v749_v15 = vmul.f32 %v2277_v22, %v2168_v62  ;;  %v2309_v38 = vadd.f32 1.0, %v1493_v33  ;;  %vm708_vm5 = vweird.f32 %v2157_v42  ;;  %v720_v53 = vsub.f32 1.0, %v719_v21 }
 0x138   : > { %v2291_v35 = vpop.eup %1500  ;;  %3410 = vst [vmem:[#allocation42_spill] sm:$0xff] %v2307_v1  ;;  %v2315_v37 = vadd.f32 1.0, %v1499_v9  ;;  %v676_v44 = vmul.f32 %v2223_v56, %v675_v2  ;;  %v691_v7 = vmul.f32 %v2233_v19, %v690_v34  ;;  %v706_v33 = vmul.f32 %v2241_v13, %v705_v11 }
 0x139   : > { %v2297_v8 = vpop.eup %1502  ;;  %3411 = vst [vmem:[#allocation43_spill] sm:$0xff] %v2309_v38  ;;  %v764_v28 = vmul.f32 %v2291_v35, %v2172_v45  ;;  %vm723_vm6 = vweird.f32 %v2161_v39  ;;  %v2326_v16 = vor.u32 1.1754944e-38, %v834_v29  ;;  %vm679_vm7 = vweird.f32 %v2223_v56 }
 0x13a   : > { %v2313_v52 = vpop.eup %1504  ;;  %3412 = vst [vmem:[#allocation44_spill] sm:$0xff] %v2315_v37  ;;  %v779_v21 = vmul.f32 %v2297_v8, %v2177_v18  ;;  %v3413_v2 = vand.u32 2147483647, %v2146_v10  ;;  %v735_v34 = vsub.f32 1.0, %v734_v24  ;;  %v750_v30 = vsub.f32 1.0, %v749_v15  ;;  %vm2376_vm0 = vmor %vm678_vm3, %vm679_vm7 }
 0x13b   : > { %v2328_v9 = vpop.eup %1506  ;;  %v849_v11 = vand.u32 2147483648, %v2198_v41  ;;  %vm694_vm9 = vweird.f32 %v2233_v19  ;;  %v3416_v38 = vand.u32 2147483647, %v2152_v59  ;;  %v3419_v1 = vand.u32 2147483647, %v2157_v42 }
 0x13c   : > { %vm2333_vm8 = vcmp.eq.f32.partialorder %v3413_v2, 8.507059e+37  ;;  %v721_v2 = vmul.f32 %v2254_v46, %v720_v53  ;;  %vm738_vm12 = vweird.f32 %v2165_v12  ;;  %v794_v24 = vmul.f32 %v2313_v52, %v2180_v25  ;;  %v2356_v15 = vpop.eup %1508  ;;  %vm2390_vm2 = vmor %vm693_vm4, %vm694_vm9 }
 0x13d   : > { %vm2341_vm10 = vcmp.eq.f32.partialorder %v3416_v38, 8.507059e+37  ;;  %vm2347_vm11 = vcmp.eq.f32.partialorder %v3419_v1, 8.507059e+37  ;;  %1510 = vrcp.f32 %v2198_v41  ;;  %v677_v38 = vadd.f32 %v2223_v56, %v676_v44 }
 0x13e   : > { %vm709_vm13 = vweird.f32 %v2241_v13  ;;  %vm753_vm14 = vweird.f32 %v2168_v62  ;;  %v765_v1 = vsub.f32 1.0, %v764_v28  ;;  %1512 = vrcp.f32 %v2205_v27 }
 0x13f   : > { %v692_v53 = vadd.f32 %v2233_v19, %v691_v7  ;;  %v707_v26 = vadd.f32 %v2241_v13, %v706_v33  ;;  %v3422_v23 = vand.u32 2147483647, %v2161_v39  ;;  %v780_v40 = vsub.f32 1.0, %v779_v21  ;;  %vm2406_vm4 = vmor %vm708_vm5, %vm709_vm13 }
 0x140   : > { %v809_v44 = vmul.f32 %v2328_v9, %v2190_v14  ;;  %v736_v7 = vmul.f32 %v2270_v6, %v735_v34  ;;  %v751_v33 = vmul.f32 %v2277_v22, %v750_v30  ;;  %vm768_vm1 = vweird.f32 %v2172_v45 }
 0x141   : > { %vm2366_vm15 = vcmp.eq.f32.partialorder %v3422_v23, 8.507059e+37  ;;  %v2383_v23 = vor.u32 1.1754944e-38, %v849_v11  ;;  %1514 = vrcp.f32 %v2208_v57  ;;  %v722_v21 = vadd.f32 %v2254_v46, %v721_v2 }
 0x142   : > { %vm724_vm3 = vweird.f32 %v2254_v46  ;;  %v795_v30 = vsub.f32 1.0, %v794_v24  ;;  %v824_v34 = vmul.f32 %v2356_v15, %v2193_v5  ;;  %v681_v11 = vsel %vm2376_vm0, %v2223_v56, %v677_v38 }
 0x143   : > { %3427 = vst [vmem:[#allocation45_spill] sm:$0xff] %v2383_v23  ;;  %vm739_vm9 = vweird.f32 %v2270_v6  ;;  %vm754_vm7 = vweird.f32 %v2277_v22  ;;  %v766_v2 = vmul.f32 %v2291_v35, %v765_v1  ;;  %v2413_v24 = vpop.eup %1510  ;;  %v696_v56 = vsel %vm2390_vm2, %v2233_v19, %v692_v53  ;;  %vm2441_vm2 = vmor %vm723_vm6, %vm724_vm3 }
 0x144   : > { %v711_v42 = vsel %vm2406_vm4, %v2241_v13, %v707_v26  ;;  %v3432_v38 = vand.u32 2147483647, %v2165_v12  ;;  %v3435_v51 = vand.u32 2147483647, %v2168_v62  ;;  %v781_v23 = vmul.f32 %v2297_v8, %v780_v40  ;;  %v2435_v53 = vpop.eup %1512 }
 0x145   : > { %vm798_vm0 = vweird.f32 %v2180_v25  ;;  %v810_v19 = vsub.f32 1.0, %v809_v44  ;;  %v752_v13 = vadd.f32 %v2277_v22, %v751_v33  ;;  %vm769_vm4 = vweird.f32 %v2291_v35 }
 0x146   : > { %vm2423_vm5 = vcmp.eq.f32.partialorder %v3432_v38, 8.507059e+37  ;;  %vm2429_vm13 = vcmp.eq.f32.partialorder %v3435_v51, 8.507059e+37  ;;  %v737_v51 = vadd.f32 %v2270_v6, %v736_v7  ;;  %1516 = vrcp.f32 %v2212_v0 }
 0x147   : > { %v2452_v40 = vsel %vm2333_vm8, %v2182_v36, %v681_v11  ;;  %v726_v39 = vsel %vm2441_vm2, %v2254_v46, %v722_v21  ;;  %v3440_v44 = vand.u32 2147483647, %v2172_v45  ;;  %v3443_v7 = vand.u32 2147483647, %v2177_v18  ;;  %v2471_v11 = vpop.eup %1514  ;;  %vm2487_vm2 = vmor %vm738_vm12, %vm739_vm9 }
 0x148   : > { %v796_v37 = vmul.f32 %v2313_v52, %v795_v30  ;;  %v825_v36 = vsub.f32 1.0, %v824_v34  ;;  %v2476_v46 = vsel %vm2341_vm10, %v2185_v32, %v696_v56  ;;  %v2481_v21 = vsel %vm2347_vm11, %v2201_v31, %v711_v42  ;;  %vm2497_vm10 = vmor %vm753_vm14, %vm754_vm7 }
 0x149   : > { %vm2459_vm6 = vcmp.eq.f32.partialorder %v3440_v44, 8.507059e+37  ;;  %vm2465_vm3 = vcmp.eq.f32.partialorder %v3443_v7, 8.507059e+37  ;;  %v767_v34 = vadd.f32 %v2291_v35, %v766_v2  ;;  %vm784_vm8 = vweird.f32 %v2297_v8  ;;  %vm2530_vm14 = vmor %vm768_vm1, %vm769_vm4 }
 0x14a   : > { %v782_v32 = vadd.f32 %v2297_v8, %v781_v23  ;;  %v3450_v12 = vand.u32 2147483647, %v2180_v25  ;;  %v811_v29 = vmul.f32 %v2328_v9, %v810_v19  ;;  %vm828_vm12 = vweird.f32 %v2193_v5 }
 0x14b   : > { %v839_v59 = vmul.f32 %v2413_v24, %v2198_v41  ;;  %v854_v62 = vmul.f32 %v2435_v53, %v2205_v27  ;;  %v2517_v23 = vsel %vm2366_vm15, %v2215_v50, %v726_v39  ;;  %v741_v2 = vsel %vm2487_vm2, %v2270_v6, %v737_v51 }
 0x14c   : > { %vm2504_vm11 = vcmp.eq.f32.partialorder %v3450_v12, 8.507059e+37  ;;  %v756_v56 = vsel %vm2497_vm10, %v2277_v22, %v752_v13  ;;  %1518 = vrcp.f32 %v2219_v58  ;;  %v797_v50 = vadd.f32 %v2313_v52, %v796_v37  ;;  %v2545_v45 = vpop.eup %1516 }
 0x14d   : > { %vm799_vm15 = vweird.f32 %v2313_v52  ;;  %v3455_v48 = vand.u32 2147483647, %v2190_v14  ;;  %v826_v22 = vmul.f32 %v2356_v15, %v825_v36  ;;  %v869_v38 = vmul.f32 %v2471_v11, %v2208_v57 }
 0x14e   : > { %v771_v19 = vsel %vm2530_vm14, %v2291_v35, %v767_v34  ;;  %vm3458_vm1 = vweird.f32 %v2177_v18  ;;  %vm814_vm4 = vweird.f32 %v2328_v9  ;;  %v864_v51 = vand.u32 2147483648, %v2205_v27 }
 0x14f   : > { %vm2538_vm7 = vcmp.eq.f32.partialorder %v3455_v48, 8.507059e+37  ;;  %vm2554_vm9 = vmor %vm3458_vm1, %vm784_vm8  ;;  %1520 = vrcp.f32 %v2226_v17  ;;  %v812_v35 = vadd.f32 %v2328_v9, %v811_v29  ;;  %v3461_v39 = vand.u32 2147483647, %v2193_v5 }
 0x150   : > { %v786_v13 = vsel %vm2554_vm9, %v2297_v8, %v782_v32  ;;  %v840_v44 = vsub.f32 1.0, %v839_v59  ;;  %v855_v7 = vsub.f32 1.0, %v854_v62  ;;  %v2574_v37 = vsel %vm2423_vm5, %v2231_v49, %v741_v2  ;;  %vm2585_vm8 = vmor %vm798_vm0, %vm799_vm15 }
 0x151   : > { %vm2567_vm2 = vcmp.eq.f32.partialorder %v3461_v39, 8.507059e+37  ;;  %v2579_v36 = vsel %vm2429_vm13, %v2238_v54, %v756_v56  ;;  %vm829_vm10 = vweird.f32 %v2356_v15  ;;  %vm843_vm14 = vweird.f32 %v2198_v41 }
 0x152   : > { %v862_v49 = vand.u32 2147483647, %v2205_v27  ;;  %v801_v28 = vsel %vm2585_vm8, %v2313_v52, %v797_v50  ;;  %v827_v54 = vadd.f32 %v2356_v15, %v826_v22  ;;  %v870_v1 = vsub.f32 1.0, %v869_v38  ;;  %v2598_v30 = vpop.eup %1518 }
 0x153   : > { %v884_v25 = vmul.f32 %v2545_v45, %v2212_v0  ;;  %v2603_v34 = vsel %vm2459_vm6, %v2251_v3, %v771_v19  ;;  %v2608_v20 = vsel %vm2465_vm3, %v2268_v43, %v786_v13  ;;  %vm3466_vm5 = vweird.f32 %v2190_v14  ;;  %vm2637_vm3 = vmor %vm828_vm12, %vm829_vm10 }
 0x154   : > { %vm2614_vm13 = vmor %vm3466_vm5, %vm814_vm4  ;;  %vm858_vm0 = vweird.f32 %v2205_v27  ;;  %1522 = vrcp.f32 %v2228_v55  ;;  %v841_v10 = vmul.f32 %v2413_v24, %v840_v44  ;;  %v856_v43 = vmul.f32 %v2435_v53, %v855_v7 }
 0x155   : > { %v816_v3 = vsel %vm2614_vm13, %v2328_v9, %v812_v35  ;;  %v865_v33 = vor.u32 1.1754944e-38, %v864_v51  ;;  %vm873_vm6 = vweird.f32 %v2208_v57  ;;  %v2626_v14 = vpop.eup %1520  ;;  %v2631_v32 = vsel %vm2504_vm11, %v2288_v60, %v801_v28 }
 0x156   : > { %v877_v12 = vand.u32 2147483647, %v2208_v57  ;;  %v879_v29 = vand.u32 2147483648, %v2208_v57  ;;  %1524 = vrcp.f32 %v2235_v4  ;;  %v831_v31 = vsel %vm2637_vm3, %v2356_v15, %v827_v54 }
 0x157   : > { %v3471_v60 = vand.u32 2147483647, %v2198_v41  ;;  %vm2653_vm12 = vcmp.eq.f32.partialorder %v862_v49, 8.507059e+37  ;;  %v871_v62 = vmul.f32 %v2471_v11, %v870_v1  ;;  %v885_v2 = vsub.f32 1.0, %v884_v25 }
 0x158   : > { %v899_v56 = vmul.f32 %v2598_v30, %v2219_v58  ;;  %v2663_v15 = vsel %vm2538_vm7, %v2304_v61, %v816_v3  ;;  %vm844_vm15 = vweird.f32 %v2413_v24  ;;  %vm859_vm1 = vweird.f32 %v2435_v53 }
 0x159   : > { %vm2649_vm11 = vcmp.eq.f32.partialorder %v3471_v60, 8.507059e+37  ;;  %v892_v42 = vand.u32 2147483647, %v2212_v0  ;;  %v842_v50 = vadd.f32 %v2413_v24, %v841_v10  ;;  %v857_v48 = vadd.f32 %v2435_v53, %v856_v43  ;;  %vm2687_vm9 = vmor %vm843_vm14, %vm844_vm15  ;;  %v3486_v43 = vld [vmem:[#allocation45_spill] sm:$0xff] }
 0x15a   : > { %v914_v22 = vmul.f32 %v2626_v14, %v2226_v17  ;;  %1526 = vrcp.f32 %v2243_v47  ;;  %v2673_v38 = vpop.eup %1522  ;;  %v2678_v61 = vsel %vm2567_vm2, %v2326_v16, %v831_v31  ;;  %vm2680_vm7 = vcmp.eq.f32.partialorder %v877_v12, 8.507059e+37  ;;  %vm2700_vm2 = vmor %vm858_vm0, %vm859_vm1 }
 0x15b   : > { %v880_v19 = vor.u32 1.1754944e-38, %v879_v29  ;;  %v894_v26 = vand.u32 2147483648, %v2212_v0  ;;  %v872_v13 = vadd.f32 %v2471_v11, %v871_v62  ;;  %vm874_vm4 = vweird.f32 %v2471_v11  ;;  %v3489_v62 = vld [vmem:[#allocation34_spill] sm:$0xff] }
 0x15c   : > { %v886_v16 = vmul.f32 %v2545_v45, %v885_v2  ;;  %v900_v35 = vsub.f32 1.0, %v899_v56  ;;  %v2694_v39 = vpop.eup %1524  ;;  %vm888_vm8 = vweird.f32 %v2212_v0  ;;  %v907_v41 = vand.u32 2147483647, %v2219_v58  ;;  %vm2725_vm5 = vmor %vm873_vm6, %vm874_vm4 }
 0x15d   : > { %v909_v44 = vand.u32 2147483648, %v2219_v58  ;;  %1528 = vrcp.f32 %v2245_v63  ;;  %v846_v7 = vsel %vm2687_vm9, %v2413_v24, %v842_v50  ;;  %v861_v27 = vsel %vm2700_vm2, %v2435_v53, %v857_v48 }
 0x15e   : > { %vm2714_vm10 = vcmp.eq.f32.partialorder %v892_v42, 8.507059e+37  ;;  %vm903_vm14 = vweird.f32 %v2219_v58  ;;  %v915_v49 = vsub.f32 1.0, %v914_v22  ;;  %v929_v28 = vmul.f32 %v2673_v38, %v2228_v55 }
 0x15f   : > { %vm889_vm13 = vweird.f32 %v2545_v45  ;;  %v895_v53 = vor.u32 1.1754944e-38, %v894_v26  ;;  %v922_v54 = vand.u32 2147483647, %v2226_v17  ;;  %v924_v1 = vand.u32 2147483648, %v2226_v17  ;;  %v3494_v26 = vld [vmem:[#allocation35_spill] sm:$0xff] }
 0x160   : > { %v2732_v25 = vpop.eup %1526  ;;  %v876_v52 = vsel %vm2725_vm5, %v2471_v11, %v872_v13  ;;  %v887_v3 = vadd.f32 %v2545_v45, %v886_v16  ;;  %v901_v57 = vmul.f32 %v2598_v30, %v900_v35  ;;  %v944_v10 = vmul.f32 %v2694_v39, %v2235_v4 }
 0x161   : > { %v2744_v9 = vsel %vm2649_vm11, %v3486_v43, %v846_v7  ;;  %v2748_v12 = vsel %vm2653_vm12, %v865_v33, %v861_v27  ;;  %v910_v29 = vor.u32 1.1754944e-38, %v909_v44  ;;  %vm918_vm0 = vweird.f32 %v2226_v17  ;;  %vm2768_vm11 = vmor %vm888_vm8, %vm889_vm13 }
 0x162   : > { %vm904_vm6 = vweird.f32 %v2598_v30  ;;  %vm2752_vm3 = vcmp.eq.f32.partialorder %v907_v41, 8.507059e+37  ;;  %v916_v31 = vmul.f32 %v2626_v14, %v915_v49  ;;  %v930_v60 = vsub.f32 1.0, %v929_v28  ;;  %v3499_v49 = vld [vmem:[#allocation36_spill] sm:$0xff]  ;;  %v3528_v28 = vld [vmem:[#allocation41_spill] sm:$0xff] }
 0x163   : > { %1530 = vrcp.f32 %v3489_v62  ;;  %v2758_v59 = vpop.eup %1528  ;;  %v2762_v33 = vsel %vm2680_vm7, %v880_v19, %v876_v52  ;;  %v925_v2 = vor.u32 1.1754944e-38, %v924_v1  ;;  %v939_v56 = vand.u32 2147483648, %v2228_v55  ;;  %vm2801_vm7 = vmor %vm903_vm14, %vm904_vm6  ;;  %v3519_v52 = vld [vmem:[#allocation40_spill] sm:$0xff] }
 0x164   : > { %v959_v42 = vmul.f32 %v2732_v25, %v2243_v47  ;;  %v891_v50 = vsel %vm2768_vm11, %v2545_v45, %v887_v3  ;;  %v902_v48 = vadd.f32 %v2598_v30, %v901_v57  ;;  %vm2779_vm12 = vcmp.eq.f32.partialorder %v922_v54, 8.507059e+37 }
 0x165   : > { %v937_v0 = vand.u32 2147483647, %v2228_v55  ;;  %v945_v6 = vsub.f32 1.0, %v944_v10  ;;  %vm919_vm15 = vweird.f32 %v2626_v14  ;;  %vm933_vm1 = vweird.f32 %v2228_v55 }
 0x166   : > { %v954_v19 = vand.u32 2147483648, %v2235_v4  ;;  %1532 = vrcp.f32 %v3494_v26  ;;  %v917_v51 = vadd.f32 %v2626_v14, %v916_v31  ;;  %v931_v45 = vmul.f32 %v2673_v38, %v930_v60  ;;  %vm2822_vm8 = vmor %vm918_vm0, %vm919_vm15  ;;  %v3504_v31 = vld [vmem:[#allocation37_spill] sm:$0xff] }
 0x167   : > { %v952_v13 = vand.u32 2147483647, %v2235_v4  ;;  %v974_v16 = vmul.f32 %v2758_v59, %v2245_v63  ;;  %v2795_v35 = vsel %vm2714_vm10, %v895_v53, %v891_v50  ;;  %v940_v41 = vor.u32 1.1754944e-38, %v939_v56 }
 0x168   : > { %vm948_vm9 = vweird.f32 %v2235_v4  ;;  %v960_v44 = vsub.f32 1.0, %v959_v42  ;;  %v906_v27 = vsel %vm2801_vm7, %v2598_v30, %v902_v48  ;;  %vm934_vm4 = vweird.f32 %v2673_v38 }
 0x169   : > { %v2806_v7 = vpop.eup %1530  ;;  %vm2812_vm2 = vcmp.eq.f32.partialorder %v937_v0, 8.507059e+37  ;;  %v946_v58 = vmul.f32 %v2694_v39, %v945_v6  ;;  %1534 = vrcp.f32 %v3499_v49  ;;  %v955_v24 = vor.u32 1.1754944e-38, %v954_v19  ;;  %vm2861_vm13 = vmor %vm933_vm1, %vm934_vm4  ;;  %v3509_v0 = vld [vmem:[#allocation38_spill] sm:$0xff] }
 0x16a   : > { %vm963_vm10 = vweird.f32 %v2243_v47  ;;  %v967_v30 = vand.u32 2147483647, %v2243_v47  ;;  %v969_v53 = vand.u32 2147483648, %v2243_v47  ;;  %v921_v54 = vsel %vm2822_vm8, %v2626_v14, %v917_v51 }
 0x16b   : > { %v932_v1 = vadd.f32 %v2673_v38, %v931_v45  ;;  %vm2833_vm14 = vcmp.eq.f32.partialorder %v952_v13, 8.507059e+37  ;;  %v975_v17 = vsub.f32 1.0, %v974_v16  ;;  %v989_v3 = vmul.f32 %v2806_v7, %v3489_v62 }
 0x16c   : > { %v2839_v57 = vpop.eup %1532  ;;  %v2843_v10 = vsel %vm2752_vm3, %v910_v29, %v906_v27  ;;  %v961_v43 = vmul.f32 %v2732_v25, %v960_v44  ;;  %v984_v14 = vand.u32 2147483648, %v2245_v63  ;;  %1536 = vrcp.f32 %v3504_v31  ;;  %v3514_v44 = vld [vmem:[#allocation39_spill] sm:$0xff] }
 0x16d   : > { %v947_v60 = vadd.f32 %v2694_v39, %v946_v58  ;;  %vm949_vm5 = vweird.f32 %v2694_v39  ;;  %v982_v5 = vand.u32 2147483647, %v2245_v63  ;;  %v1004_v56 = vmul.f32 %v2839_v57, %v3494_v26 }
 0x16e   : > { %v2855_v11 = vsel %vm2779_vm12, %v925_v2, %v921_v54  ;;  %vm964_vm0 = vweird.f32 %v2732_v25  ;;  %vm2866_vm6 = vcmp.eq.f32.partialorder %v967_v30, 8.507059e+37  ;;  %v970_v50 = vor.u32 1.1754944e-38, %v969_v53  ;;  %vm2880_vm11 = vmor %vm948_vm9, %vm949_vm5 }
 0x16f   : > { %vm978_vm3 = vweird.f32 %v2245_v63  ;;  %v2871_v48 = vpop.eup %1534  ;;  %v936_v2 = vsel %vm2861_vm13, %v2673_v38, %v932_v1  ;;  %v976_v55 = vmul.f32 %v2758_v59, %v975_v17  ;;  %v990_v22 = vsub.f32 1.0, %v989_v3  ;;  %vm2910_vm7 = vmor %vm963_vm10, %vm964_vm0 }
 0x170   : > { %1538 = vrcp.f32 %v3509_v0  ;;  %v962_v19 = vadd.f32 %v2732_v25, %v961_v43  ;;  %v985_v51 = vor.u32 1.1754944e-38, %v984_v14  ;;  %v999_v45 = vand.u32 2147483648, %v3489_v62 }
 0x171   : > { %v1019_v13 = vmul.f32 %v2871_v48, %v3499_v49  ;;  %v951_v38 = vsel %vm2880_vm11, %v2694_v39, %v947_v60  ;;  %vm2891_vm12 = vcmp.eq.f32.partialorder %v982_v5, 8.507059e+37  ;;  %v997_v4 = vand.u32 2147483647, %v3489_v62 }
 0x172   : > { %v1005_v18 = vsub.f32 1.0, %v1004_v56  ;;  %1540 = vrcp.f32 %v3514_v44  ;;  %v2897_v27 = vpop.eup %1536  ;;  %v2901_v58 = vsel %vm2812_vm2, %v940_v41, %v936_v2  ;;  %vm979_vm15 = vweird.f32 %v2758_v59 }
 0x173   : > { %vm993_vm1 = vweird.f32 %v3489_v62  ;;  %v1014_v39 = vand.u32 2147483648, %v3494_v26  ;;  %v977_v30 = vadd.f32 %v2758_v59, %v976_v55  ;;  %v991_v8 = vmul.f32 %v2806_v7, %v990_v22  ;;  %vm2941_vm8 = vmor %vm978_vm3, %vm979_vm15 }
 0x174   : > { %vm1008_vm9 = vweird.f32 %v3494_v26  ;;  %v1012_v41 = vand.u32 2147483647, %v3494_v26  ;;  %v1020_v53 = vsub.f32 1.0, %v1019_v13  ;;  %v2920_v54 = vsel %vm2833_vm14, %v955_v24, %v951_v38  ;;  %v3531_v26 = vld [vmem:[#allocation42_spill] sm:$0xff] }
 0x175   : > { %v966_v47 = vsel %vm2910_vm7, %v2732_v25, %v962_v19  ;;  %v1000_v1 = vor.u32 1.1754944e-38, %v999_v45  ;;  %v1034_v17 = vmul.f32 %v2897_v27, %v3504_v31  ;;  %vm2929_vm4 = vcmp.eq.f32.partialorder %v997_v4, 8.507059e+37 }
 0x176   : > { %v2927_v3 = vpop.eup %1538  ;;  %v1006_v14 = vmul.f32 %v2839_v57, %v1005_v18  ;;  %vm1023_vm2 = vweird.f32 %v3499_v49  ;;  %v1027_v24 = vand.u32 2147483647, %v3499_v49  ;;  %1542 = vrcp.f32 %v3519_v52 }
 0x177   : > { %vm994_vm10 = vweird.f32 %v2806_v7  ;;  %v1015_v60 = vor.u32 1.1754944e-38, %v1014_v39  ;;  %v1029_v5 = vand.u32 2147483648, %v3499_v49  ;;  %v1049_v56 = vmul.f32 %v2927_v3, %v3509_v0 }
 0x178   : > { %v2949_v29 = vpop.eup %1540  ;;  %v2953_v2 = vsel %vm2866_vm6, %v970_v50, %v966_v47  ;;  %v981_v63 = vsel %vm2941_vm8, %v2758_v59, %v977_v30  ;;  %v992_v55 = vadd.f32 %v2806_v7, %v991_v8  ;;  %vm2959_vm14 = vcmp.eq.f32.partialorder %v1012_v41, 8.507059e+37  ;;  %vm2982_vm0 = vmor %vm993_vm1, %vm994_vm10 }
 0x179   : > { %v1021_v6 = vmul.f32 %v2871_v48, %v1020_v53  ;;  %vm1009_vm5 = vweird.f32 %v2839_v57  ;;  %v1035_v19 = vsub.f32 1.0, %v1034_v17  ;;  %v1042_v45 = vand.u32 2147483647, %v3504_v31 }
 0x17a   : > { %v1064_v42 = vmul.f32 %v2949_v29, %v3514_v44  ;;  %v1007_v50 = vadd.f32 %v2839_v57, %v1006_v14  ;;  %vm2969_vm13 = vcmp.eq.f32.partialorder %v1027_v24, 8.507059e+37  ;;  %v1044_v13 = vand.u32 2147483648, %v3504_v31  ;;  %vm3001_vm11 = vmor %vm1008_vm9, %vm1009_vm5 }
 0x17b   : > { %v1050_v38 = vsub.f32 1.0, %v1049_v56  ;;  %v2976_v4 = vsel %vm2891_vm12, %v985_v51, %v981_v63  ;;  %vm1024_vm6 = vweird.f32 %v2871_v48  ;;  %v1030_v39 = vor.u32 1.1754944e-38, %v1029_v5 }
 0x17c   : > { %vm1038_vm3 = vweird.f32 %v3504_v31  ;;  %1544 = vrcp.f32 %v3528_v28  ;;  %v2989_v30 = vpop.eup %1542  ;;  %v996_v51 = vsel %vm2982_vm0, %v2806_v7, %v992_v55  ;;  %v1022_v16 = vadd.f32 %v2871_v48, %v1021_v6  ;;  %vm3022_vm15 = vmor %vm1023_vm2, %vm1024_vm6  ;;  %v3538_v6 = vld [vmem:[#allocation43_spill] sm:$0xff] }
 0x17d   : > { %v1057_v62 = vand.u32 2147483647, %v3509_v0  ;;  %v1059_v8 = vand.u32 2147483648, %v3509_v0  ;;  %v1036_v53 = vmul.f32 %v2897_v27, %v1035_v19  ;;  %vm1053_vm12 = vweird.f32 %v3509_v0 }
 0x17e   : > { %v1065_v47 = vsub.f32 1.0, %v1064_v42  ;;  %v1079_v7 = vmul.f32 %v2989_v30, %v3519_v52  ;;  %v1011_v17 = vsel %vm3001_vm11, %v2839_v57, %v1007_v50  ;;  %v1045_v14 = vor.u32 1.1754944e-38, %v1044_v13 }
 0x17f   : > { %v1051_v24 = vmul.f32 %v2927_v3, %v1050_v38  ;;  %1546 = vrcp.f32 %v3531_v26  ;;  %v3016_v25 = vsel %vm2929_vm4, %v1000_v1, %v996_v51  ;;  %vm3026_vm1 = vcmp.eq.f32.partialorder %v1042_v45, 8.507059e+37 }
 0x180   : > { %vm1068_vm7 = vweird.f32 %v3514_v44  ;;  %v1072_v57 = vand.u32 2147483647, %v3514_v44  ;;  %v1074_v43 = vand.u32 2147483648, %v3514_v44  ;;  %v1080_v1 = vsub.f32 1.0, %v1079_v7 }
 0x181   : > { %v1026_v63 = vsel %vm3022_vm15, %v2871_v48, %v1022_v16  ;;  %vm1039_vm9 = vweird.f32 %v2897_v27  ;;  %vm3037_vm4 = vcmp.eq.f32.partialorder %v1057_v62, 8.507059e+37  ;;  %v1060_v55 = vor.u32 1.1754944e-38, %v1059_v8 }
 0x182   : > { %1548 = vrcp.f32 %v3538_v6  ;;  %v3042_v19 = vpop.eup %1544  ;;  %v3046_v45 = vsel %vm2959_vm14, %v1015_v60, %v1011_v17  ;;  %v1037_v42 = vadd.f32 %v2897_v27, %v1036_v53  ;;  %v1066_v50 = vmul.f32 %v2949_v29, %v1065_v47  ;;  %vm3073_vm5 = vmor %vm1038_vm3, %vm1039_vm9  ;;  %v3543_v53 = vld [vmem:[#allocation44_spill] sm:$0xff]  ;;  %v3558_v17 = vld [vmem:[#allocation2_spill] sm:$0xff] }
 0x183   : > { %vm1083_vm2 = vweird.f32 %v3519_v52  ;;  %v1087_v48 = vand.u32 2147483647, %v3519_v52  ;;  %v1052_v13 = vadd.f32 %v2927_v3, %v1051_v24  ;;  %vm1054_vm8 = vweird.f32 %v2927_v3 }
 0x184   : > { %v1089_v38 = vand.u32 2147483648, %v3519_v52  ;;  %v1094_v18 = vmul.f32 %v3042_v19, %v3528_v28  ;;  %v3059_v60 = vsel %vm2969_vm13, %v1030_v39, %v1026_v63  ;;  %vm1069_vm10 = vweird.f32 %v2949_v29  ;;  %vm3087_vm13 = vmor %vm1053_vm12, %vm1054_vm8 }
 0x185   : > { %vm3062_vm14 = vcmp.eq.f32.partialorder %v1072_v57, 8.507059e+37  ;;  %v1075_v51 = vor.u32 1.1754944e-38, %v1074_v43  ;;  %v1081_v16 = vmul.f32 %v2989_v30, %v1080_v1  ;;  %v3067_v62 = vpop.eup %1546  ;;  %v1102_v39 = vand.u32 2147483647, %v3528_v28  ;;  %vm3117_vm11 = vmor %vm1068_vm7, %vm1069_vm10 }
 0x186   : > { %v1095_v59 = vsub.f32 1.0, %v1094_v18  ;;  %v1104_v41 = vand.u32 2147483648, %v3528_v28  ;;  %1550 = vrcp.f32 %v3543_v53  ;;  %v1041_v47 = vsel %vm3073_vm5, %v2897_v27, %v1037_v42 }
 0x187   : > { %v1067_v7 = vadd.f32 %v2949_v29, %v1066_v50  ;;  %vm3092_vm0 = vcmp.eq.f32.partialorder %v1087_v48, 8.507059e+37  ;;  %v1109_v24 = vmul.f32 %v3067_v62, %v3531_v26  ;;  %v1056_v27 = vsel %vm3087_vm13, %v2927_v3, %v1052_v13  ;;  %v3572_v50 = vld [vmem:[#allocation10_spill] sm:$0xff] }
 0x188   : > { %v3098_v5 = vpop.eup %1548  ;;  %v1090_v0 = vor.u32 1.1754944e-38, %v1089_v38  ;;  %v1096_v57 = vmul.f32 %v3042_v19, %v1095_v59  ;;  %vm1098_vm6 = vweird.f32 %v3528_v28  ;;  %v1082_v43 = vadd.f32 %v2989_v30, %v1081_v16 }
 0x189   : > { %vm1084_vm3 = vweird.f32 %v2989_v30  ;;  %v1110_v1 = vsub.f32 1.0, %v1109_v24  ;;  %v1124_v63 = vmul.f32 %v3098_v5, %v3538_v6  ;;  %v3111_v42 = vsel %vm3026_vm1, %v1045_v14, %v1041_v47 }
 0x18a   : > { %vm3121_vm12 = vcmp.eq.f32.partialorder %v1102_v39, 8.507059e+37  ;;  %v1105_v48 = vor.u32 1.1754944e-38, %v1104_v41  ;;  %v1119_v13 = vand.u32 2147483648, %v3531_v26  ;;  %v3128_v56 = vsel %vm3037_vm4, %v1060_v55, %v1056_v27  ;;  %vm3139_vm1 = vmor %vm1083_vm2, %vm1084_vm3 }
 0x18b   : > { %v1071_v14 = vsel %vm3117_vm11, %v2949_v29, %v1067_v7  ;;  %vm1113_vm15 = vweird.f32 %v3531_v26  ;;  %v1134_v44 = vand.u32 2147483648, %v3538_v6  ;;  %v1097_v49 = vadd.f32 %v3042_v19, %v1096_v57 }
 0x18c   : > { %v3135_v38 = vpop.eup %1550  ;;  %vm1099_vm7 = vweird.f32 %v3042_v19  ;;  %v1117_v55 = vand.u32 2147483647, %v3531_v26  ;;  %v1125_v16 = vsub.f32 1.0, %v1124_v63  ;;  %v1086_v29 = vsel %vm3139_vm1, %v2989_v30, %v1082_v43 }
 0x18d   : > { %v1111_v8 = vmul.f32 %v3067_v62, %v1110_v1  ;;  %v1139_v52 = vmul.f32 %v3135_v38, %v3543_v53  ;;  %v1149_v59 = vand.u32 2147483648, %v3543_v53  ;;  %v3155_v39 = vsel %vm3062_vm14, %v1075_v51, %v1071_v14  ;;  %vm3161_vm4 = vmor %vm1098_vm6, %vm1099_vm7 }
 0x18e   : > { %v1120_v41 = vor.u32 1.1754944e-38, %v1119_v13  ;;  %vm1128_vm9 = vweird.f32 %v3538_v6  ;;  %v1132_v47 = vand.u32 2147483647, %v3538_v6  ;;  %vm1114_vm2 = vweird.f32 %v3067_v62  ;;  %v3562_v13 = vld [vmem:[#allocation4_spill] sm:$0xff] }
 0x18f   : > { %v1135_v31 = vor.u32 1.1754944e-38, %v1134_v44  ;;  %v1140_v7 = vsub.f32 1.0, %v1139_v52  ;;  %vm1143_vm8 = vweird.f32 %v3543_v53  ;;  %v1147_v22 = vand.u32 2147483647, %v3543_v53  ;;  %v3563_v44 = vld [vmem:[#allocation5_spill] sm:$0xff] }
 0x190   : > { %v3170_v51 = vsel %vm3092_vm0, %v1090_v0, %v1086_v29  ;;  %v1101_v28 = vsel %vm3161_vm4, %v3042_v19, %v1097_v49  ;;  %v1126_v24 = vmul.f32 %v3098_v5, %v1125_v16  ;;  %vm1129_vm10 = vweird.f32 %v3098_v5  ;;  %v3561_v19 = vld [vmem:[#allocation3_spill] sm:$0xff]  ;;  %v3564_v49 = vld [vmem:[#allocation6_spill] sm:$0xff]  ;;  %vm3214_vm0 = vmor %vm1113_vm15, %vm1114_vm2 }
 0x191   : > { %v1112_v27 = vadd.f32 %v3067_v62, %v1111_v8  ;;  %vm3178_vm14 = vcmp.eq.f32.partialorder %v1117_v55, 8.507059e+37  ;;  %v1141_v43 = vmul.f32 %v3135_v38, %v1140_v7  ;;  %v1150_v1 = vor.u32 1.1754944e-38, %v1149_v59  ;;  %v3567_v29 = vld [vmem:[#allocation7_spill] sm:$0xff]  ;;  %v3575_v7 = vld [vmem:[#allocation13_spill] sm:$0xff]  ;;  %vm3245_vm3 = vmor %vm1128_vm9, %vm1129_vm10 }
 0x192   : > { %v1153_v0 = vmul.f32 %v2452_v40, %v3558_v17  ;;  %vm3186_vm5 = vcmp.eq.f32.partialorder %v1132_v47, 8.507059e+37  ;;  %v1154_v3 = vmul.f32 %v2476_v46, %v3561_v19  ;;  %v1155_v14 = vmul.f32 %v2481_v21, %v3562_v13  ;;  %v3568_v46 = vld [vmem:[#allocation8_spill] sm:$0xff]  ;;  %v3569_v21 = vld [vmem:[#allocation9_spill] sm:$0xff]  ;;  %v3585_v13 = vld [vmem:[#allocation19_spill] sm:$0xff] }
 0x193   : > { %v1156_v18 = vmul.f32 %v2517_v23, %v3563_v44  ;;  %v1157_v55 = vmul.f32 %v2574_v37, %v3564_v49  ;;  %v1106_v40 = vsel %vm3121_vm12, %v1105_v48, %v1101_v28  ;;  %vm3200_vm13 = vcmp.eq.f32.partialorder %v1147_v22, 8.507059e+37  ;;  %v3573_v48 = vld [vmem:[#allocation11_spill] sm:$0xff]  ;;  %v3574_v47 = vld [vmem:[#allocation12_spill] sm:$0xff]  ;;  %v3576_v22 = vld [vmem:[#allocation14_spill] sm:$0xff] }
 0x194   : > { %v1158_v8 = vmul.f32 %v2579_v36, %v3567_v29  ;;  %v1159_v52 = vmul.f32 %v2603_v34, %v3568_v46  ;;  %v1160_v59 = vmul.f32 %v2608_v20, %v3569_v21  ;;  %v1127_v37 = vadd.f32 %v3098_v5, %v1126_v24  ;;  %v3577_v28 = vld [vmem:[#allocation15_spill] sm:$0xff]  ;;  %v3586_v44 = vld [vmem:[#allocation20_spill] sm:$0xff]  ;;  %v3591_v21 = vld [vmem:[#allocation25_spill] sm:$0xff] }
 0x195   : > { %vm1144_vm6 = vweird.f32 %v3135_v38  ;;  %v1161_v36 = vmul.f32 %v2631_v32, %v3572_v50  ;;  %v1162_v34 = vmul.f32 %v2663_v15, %v3573_v48  ;;  %v1116_v20 = vsel %vm3214_vm0, %v3067_v62, %v1112_v27  ;;  %v3581_v27 = vld [vmem:[#allocation17_spill] sm:$0xff]  ;;  %v3593_v23 = vld [vmem:[#allocation27_spill] sm:$0xff]  ;;  %v3596_v16 = vld [vmem:[#allocation30_spill] sm:$0xff] }
 0x196   : > { %v1142_v26 = vadd.f32 %v3135_v38, %v1141_v43  ;;  %v1163_v30 = vmul.f32 %v2678_v61, %v3574_v47  ;;  %v1164_v32 = vmul.f32 %v2744_v9, %v3575_v7  ;;  %v1165_v15 = vmul.f32 %v2748_v12, %v3576_v22  ;;  %v3580_v61 = vld [vmem:[#allocation16_spill] sm:$0xff]  ;;  %vm3260_vm11 = vmor %vm1143_vm8, %vm1144_vm6 }
 0x197   : > { %v1166_v24 = vmul.f32 %v2762_v33, %v3577_v28  ;;  %v1320_v17 = vpack.c.bf16 %v1154_v3, %v1153_v0  ;;  %v1325_v19 = vpack.c.bf16 %v1156_v18, %v1155_v14  ;;  %v1167_v9 = vmul.f32 %v2795_v35, %v3580_v61  ;;  %v3584_v3 = vld [vmem:[#allocation18_spill] sm:$0xff]  ;;  %v3587_v18 = vld [vmem:[#allocation21_spill] sm:$0xff] }
 0x198   : > { %v1168_v12 = vmul.f32 %v2843_v10, %v3581_v27  ;;  %v1330_v43 = vpack.c.bf16 %v1158_v8, %v1157_v55  ;;  %v1335_v33 = vpack.c.bf16 %v1160_v59, %v1159_v52  ;;  %v1131_v0 = vsel %vm3245_vm3, %v3098_v5, %v1127_v37  ;;  %v3589_v8 = vld [vmem:[#allocation23_spill] sm:$0xff]  ;;  %v3590_v52 = vld [vmem:[#allocation24_spill] sm:$0xff]  ;;  %v3592_v59 = vld [vmem:[#allocation26_spill] sm:$0xff] }
 0x199   : > { %v1169_v35 = vmul.f32 %v2855_v11, %v3584_v3  ;;  %v1170_v10 = vmul.f32 %v2901_v58, %v3585_v13  ;;  %1321 = vst [vmem:[%s3227_s9] sm:$0xff] %v1320_v17   ;;  %v1340_v14 = vpack.c.bf16 %v1162_v34, %v1161_v36  ;;  %v1146_v5 = vsel %vm3260_vm11, %v3135_v38, %v1142_v26  ;;  %v3588_v58 = vld [vmem:[#allocation22_spill] sm:$0xff]  ;;  %v3598_v34 = vld [vmem:[#allocation32_spill] sm:$0xff] }
 0x19a   : > { %v1171_v53 = vmul.f32 %v2920_v54, %v3586_v44  ;;  %v1172_v49 = vmul.f32 %v2953_v2, %v3587_v18  ;;  %1397 = vst [vmem:[%s3227_s9 + $0x8] sm:$0xff] %v1325_v19   ;;  %v1345_v55 = vpack.c.bf16 %v1164_v32, %v1163_v30  ;;  %v1121_v11 = vsel %vm3178_vm14, %v1120_v41, %v1116_v20 }
 0x19b   : > { %v1173_v29 = vmul.f32 %v2976_v4, %v3588_v58  ;;  %v1174_v46 = vmul.f32 %v3016_v25, %v3589_v8  ;;  %1398 = vst [vmem:[%s3227_s9 + $0x10] sm:$0xff] %v1330_v43   ;;  %v1350_v38 = vpack.c.bf16 %v1166_v24, %v1165_v15  ;;  %v1136_v54 = vsel %vm3186_vm5, %v1135_v31, %v1131_v0 }
 0x19c   : > { %v1175_v2 = vmul.f32 %v3046_v45, %v3590_v52  ;;  %v1176_v57 = vmul.f32 %v3059_v60, %v3591_v21  ;;  %1399 = vst [vmem:[%s3227_s9 + $0x18] sm:$0xff] %v1335_v33   ;;  %v1355_v41 = vpack.c.bf16 %v1168_v12, %v1167_v9  ;;  %v1151_v4 = vsel %vm3200_vm13, %v1150_v1, %v1146_v5  ;;  %v3594_v45 = vld [vmem:[#allocation28_spill] sm:$0xff]  ;;  %v3595_v60 = vld [vmem:[#allocation29_spill] sm:$0xff] }
 0x19d   : > { %v1177_v25 = vmul.f32 %v3111_v42, %v3592_v59  ;;  %v1178_v31 = vmul.f32 %v3128_v56, %v3593_v23  ;;  %1400 = vst [vmem:[%s3227_s9 + $0x20] sm:$0xff] %v1340_v14   ;;  %v1360_v63 = vpack.c.bf16 %v1170_v10, %v1169_v35  ;;  %v1179_v37 = vmul.f32 %v3155_v39, %v3594_v45  ;;  %v3597_v42 = vld [vmem:[#allocation31_spill] sm:$0xff]  ;;  %v3599_v39 = vld [vmem:[#allocation33_spill] sm:$0xff] }
 0x19e   : > { %v1180_v50 = vmul.f32 %v3170_v51, %v3595_v60  ;;  %1401 = vst [vmem:[%s3227_s9 + $0x28] sm:$0xff] %v1345_v55   ;;  %v1365_v1 = vpack.c.bf16 %v1172_v49, %v1171_v53  ;;  %v1181_v36 = vmul.f32 %v1106_v40, %v3596_v16  ;;  %v1182_v48 = vmul.f32 %v1121_v11, %v3597_v42 }
 0x19f   : > { %1402 = vst [vmem:[%s3227_s9 + $0x30] sm:$0xff] %v1350_v38   ;;  %v1370_v56 = vpack.c.bf16 %v1174_v46, %v1173_v29  ;;  %v1183_v20 = vmul.f32 %v1136_v54, %v3598_v34  ;;  %v1184_v26 = vmul.f32 %v1151_v4, %v3599_v39  ;;  %v1375_v47 = vpack.c.bf16 %v1176_v57, %v1175_v2 }
 0x1a0   : > { %1403 = vst [vmem:[%s3227_s9 + $0x38] sm:$0xff] %v1355_v41   ;;  %v1380_v51 = vpack.c.bf16 %v1178_v31, %v1177_v25  ;;  %v1385_v30 = vpack.c.bf16 %v1180_v50, %v1179_v37  ;;  %v1390_v40 = vpack.c.bf16 %v1182_v48, %v1181_v36 }
 0x1a1   : > { %1404 = vst [vmem:[%s3227_s9 + $0x40] sm:$0xff] %v1360_v63   ;;  %v1395_v7 = vpack.c.bf16 %v1184_v26, %v1183_v20 }
 0x1a2   : > { %1405 = vst [vmem:[%s3227_s9 + $0x48] sm:$0xff] %v1365_v1  }
 0x1a3   : > { %1406 = vst [vmem:[%s3227_s9 + $0x50] sm:$0xff] %v1370_v56  }
 0x1a4   : > { %1407 = vst [vmem:[%s3227_s9 + $0x58] sm:$0xff] %v1375_v47  }
 0x1a5   : > { %1408 = vst [vmem:[%s3227_s9 + $0x60] sm:$0xff] %v1380_v51  }
 0x1a6   : > { %1409 = vst [vmem:[%s3227_s9 + $0x68] sm:$0xff] %v1385_v30  }
 0x1a7   : > { %1410 = vst [vmem:[%s3227_s9 + $0x70] sm:$0xff] %v1390_v40  }
 0x1a8   : > { %1411 = vst [vmem:[%s3227_s9 + $0x78] sm:$0xff] %v1395_v7  }
 0x1a9 PF: > { %s14_s15 = sadd.s32 1, %s1558_s15  }
 0x1aa   : > { %p11_p4 = scmp.ge.s32.totalorder %s14_s15, 4  }
 0x1ac   :  { %13 = sbr.rel (!%p11_p4) target bundleno = 1 (0x1), region = 66 }

// kernel: residual_block.5
= control target key start
LH: loop header
LB: loop body
LE: loop exit
PB: predicated region body
PF: predicated region fallthrough
CT: control target
= control target key end

     0   :  { %s4247_s12 = smov 0   ;;  %s5395_s0 = inlined_call_operand.vmem [shape: bf16[2,324,64], index: 0, kind: input, shape index: {}]   ;;  %s5396_s1 = inlined_call_operand.vmem [shape: bf16[9,64,128], index: 1, kind: input, shape index: {}]   ;;  %s5397_s2 = inlined_call_operand.vmem [shape: f32[1,128], index: 2, kind: input, shape index: {}]   ;;  %s5398_s3 = inlined_call_operand.vmem [shape: f32[2,286,128], index: 3, kind: output, shape index: {}]  }
   0x1 LB: > { %s3410_s13 = sadd.s32 4294967295, %s4225_s12   ;;  %p3414_p0 = scmp.ge.s32.totalorder %s4225_s12, 1  ;;  %s4225_s12 = sphi %s4247_s12, %s13_s12  }
   0x2   : > { %p137_p1 = scmp.lt.s32.totalorder %s4225_s12, 3 }
   0x4   : > { %p138_p2 = pnand %p3414_p0, %p137_p1 }
   0x6   : > { %141 = sbr.rel (%p138_p2) target bundleno = 816 (0x330), region = 32 }
   0xb   : > { %v4084_v0 = vld [vmem:[%s5396_s1 + $0x38] sm:$0xff]  ;;  %p161_p3 = scmp.lt.s32.totalorder %s3410_s13, 1  ;;  %v4083_v1 = vld [vmem:[%s5396_s1 + $0x30] sm:$0xff]  ;;  %v4082_v2 = vld [vmem:[%s5396_s1 + $0x28] sm:$0xff]  ;;  %vm316_vm0 = vsmask.f32 7424 }
   0xc   : > { %4172 = vmatpush.bf16.msra.mxu1 %v4084_v0  ;;  %4173 = vmatpush.bf16.msra.mxu2 %v4084_v0  ;;  %v4081_v13 = vld [vmem:[%s5396_s1 + $0x20] sm:$0xff]  ;;  %v4088_v21 = vld [vmem:[%s5396_s1 + $0x58] sm:$0xff]  ;;  %vm484_vm1 = vcmask 523264   ;;  %v4087_v35 = vld [vmem:[%s5396_s1 + $0x50] sm:$0xff]  ;;  %vm814_vm2 = vcmask 1046528   ;;  %vm1978_vm5 = vcmask 1045504  }
   0xd   : > { %s5422_s13 = smov (!%p161_p3, %s3410_s13), 1  ;;  %543 = vmatpush.bf16.msra.mxu0 %v4084_v0  ;;  %4174 = vmatpush.bf16.msra.mxu3 %v4084_v0  ;;  %v4080_v25 = vld [vmem:[%s5396_s1 + $0x18] sm:$0xff]  ;;  %v4079_v37 = vld [vmem:[%s5396_s1 + $0x10] sm:$0xff]  ;;  %v4086_v48 = vld [vmem:[%s5396_s1 + $0x48] sm:$0xff]  ;;  %vm1585_vm3 = vsmask.f32 6400 }
   0xe   : > { %s4184_s18 = smul.u32 164, %s5422_s13  ;;  %v4131_v26 = vld [vmem:[%s5396_s1 + $0x98] sm:$0xff]  ;;  %v4130_v38 = vld [vmem:[%s5396_s1 + $0x90] sm:$0xff]  ;;  %v4078_v51 = vld [vmem:[%s5396_s1 + $0x8] sm:$0xff]  ;;  %vm2631_vm4 = vsmask.f32 5376 }
   0xf   : > { %v4110_v44 = vld [vmem:[%s5396_s1 + $0x78] sm:$0xff]  ;;  %v4109_v55 = vld [vmem:[%s5396_s1 + $0x70] sm:$0xff]  ;;  %vm3028_vm6 = vcmask 1044480   ;;  %s4185_s17 = smul.u32 288, %s5422_s13 }
  0x10   : > { %4175 = vmatpush.bf16.msra.mxu1 %v4083_v1  ;;  %4176 = vmatpush.bf16.msra.mxu2 %v4083_v1  ;;  %s4270_s23 = scalar_lea.vmem %s5395_s0, %s4184_s18 }
  0x11   : > { %544 = vmatpush.bf16.msra.mxu0 %v4083_v1  ;;  %v4273_v3 = vld [vmem:[%s4270_s23 + $0x28] sm:$0xff]  ;;  %v4276_v4 = vld [vmem:[%s4270_s23 + $0x30] sm:$0xff]  ;;  %4177 = vmatpush.bf16.msra.mxu3 %v4083_v1  ;;  %v4282_v6 = vld [vmem:[%s4270_s23 + $0x58] sm:$0xff]  ;;  %s5122_s22 = scalar_lea.vmem %s5398_s3, %s4185_s17 }
  0x12   : > { %v4279_v5 = vld [vmem:[%s4270_s23 + $0x50] sm:$0xff]  ;;  %v4285_v7 = vld [vmem:[%s4270_s23] sm:$0xff]   ;;  %v4288_v8 = vld [vmem:[%s4270_s23 + $0x8] sm:$0xff]  ;;  %v357_v9 = vshll.u32 %v4273_v3, 16  ;;  %v361_v10 = vshrl.u32 %v4273_v3, 16  ;;  %v365_v11 = vshll.u32 %v4276_v4, 16 }
  0x13   : > { %v397_v12 = vshll.u32 %v4279_v5, 16  ;;  %v401_v14 = vshrl.u32 %v4279_v5, 16  ;;  %v405_v15 = vshll.u32 %v4282_v6, 16  ;;  %v318_v16 = vshrl.u32 %v4285_v7, 16  ;;  %v4075_v30 = vld [vmem:[%s4270_s23 + $0x78] sm:$0xff]  ;;  %v4321_v31 = vld [vmem:[%s4270_s23 + $0x80] sm:$0xff] }
  0x14   : > { %4178 = vmatpush.bf16.msra.mxu1 %v4082_v2  ;;  %4179 = vmatpush.bf16.msra.mxu2 %v4082_v2  ;;  %v320_v17 = vshll.u32 %v4285_v7, 16  ;;  %v4301_v18 = vrot.slane %v357_v9, 1  ;;  %v4303_v19 = vrot.slane %v365_v11, 1  ;;  %v325_v22 = vshll.u32 %v4288_v8, 16  ;;  %v4339_v39 = vld [vmem:[%s4270_s23 + $0x38] sm:$0xff]  ;;  %v4344_v43 = vld [vmem:[%s4270_s23 + $0x60] sm:$0xff] }
  0x15   : > { %545 = vmatpush.bf16.msra.mxu0 %v4082_v2  ;;  %v4305_v20 = vrot.slane %v397_v12, 1  ;;  %4180 = vmatpush.bf16.msra.mxu3 %v4082_v2  ;;  %v407_v23 = vrot.slane %v405_v15, 1  ;;  %v437_v40 = vshll.u32 %v4075_v30, 16  ;;  %v441_v41 = vshrl.u32 %v4075_v30, 16  ;;  %v4350_v45 = vld [vmem:[%s4270_s23 + $0x10] sm:$0xff]  ;;  %v4358_v49 = vld [vmem:[%s4270_s23 + $0x88] sm:$0xff]  }
  0x16   : > { %v322_v24 = vrot.slane %v320_v17, 1  ;;  %v363_v27 = vor.u32 %v361_v10, %v4301_v18  ;;  %v327_v29 = vrot.slane %v325_v22, 1  ;;  %v445_v42 = vshll.u32 %v4321_v31, 16  ;;  %v4361_v50 = vld [vmem:[%s4270_s23 + $0x88] sm:$0xf]  }
  0x17   : > { %v403_v28 = vor.u32 %v401_v14, %v4305_v20  ;;  %v4352_v46 = vrot.slane %v437_v40, 1  ;;  %v369_v52 = vshrl.u32 %v4276_v4, 16  ;;  %v373_v53 = vshll.u32 %v4339_v39, 16  ;;  %v4380_v1 = vld [vmem:[%s4270_s23 + $0x48] sm:$0xff] }
  0x18   : > { %4181 = vmatpush.bf16.msra.mxu1 %v4081_v13  ;;  %4182 = vmatpush.bf16.msra.mxu2 %v4081_v13  ;;  %v323_v32 = vor.u32 %v322_v24, %v318_v16  ;;  %v368_v33 = vsel %vm316_vm0, %v363_v27, %v4303_v19  ;;  %v447_v47 = vrot.slane %v445_v42, 1  ;;  %v409_v56 = vshrl.u32 %v4282_v6, 16  ;;  %v4391_v16 = vld [vmem:[%s4270_s23 + $0x40] sm:$0xff]  ;;  %v4394_v17 = vld [vmem:[%s4270_s23 + $0x68] sm:$0xff]  ;;  %v4408_v27 = vld [vmem:[%s4270_s23 + $0x18] sm:$0xff] }
  0x19   : > { %546 = vmatpush.bf16.msra.mxu0 %v4081_v13  ;;  %v408_v34 = vsel %vm316_vm0, %v403_v28, %v407_v23  ;;  %4183 = vmatpush.bf16.msra.mxu3 %v4081_v13  ;;  %v443_v54 = vor.u32 %v441_v41, %v4352_v46  ;;  %v413_v57 = vshll.u32 %v4344_v43, 16  ;;  %v329_v58 = vshrl.u32 %v4288_v8, 16  ;;  %v4108_v24 = vld [vmem:[%s5396_s1 + $0x68] sm:$0xff] }
  0x1a   : > { %v328_v36 = vsel %vm316_vm0, %v323_v32, %v327_v29  ;;  %v333_v59 = vshll.u32 %v4350_v45, 16  ;;  %v371_v61 = vor.u32 %v369_v52, %v4303_v19  ;;  %v375_v62 = vrot.slane %v373_v53, 1 }
  0x1b   : > { %3510 = vmatmul.msk.bf16.vlgmr.msra.gmra.mxu1 %vm484_vm1, %v368_v33  ;;  %3515 = vmatmul.msk.bf16.vlgmr.msra.gmra.mxu2 %vm484_vm1, %v408_v34  ;;  %v448_v60 = vsel %vm316_vm0, %v443_v54, %v447_v47  ;;  %v411_v63 = vor.u32 %v409_v56, %v407_v23  ;;  %v415_v0 = vrot.slane %v413_v57, 1  ;;  %v331_v2 = vor.u32 %v329_v58, %v327_v29  ;;  %v4129_v23 = vld [vmem:[%s5396_s1 + $0x88] sm:$0xff]  ;;  %v4416_v34 = vld [vmem:[%s4270_s23 + $0x20] sm:$0xff]  ;;  %v4438_v58 = vld [vmem:[%s4270_s23 + $0x70] sm:$0xff] }
  0x1c   : > { %932 = vmatpush.bf16.msrb.mxu2 %v4088_v21  ;;  %706 = vmatpush.bf16.msrb.mxu1 %v4080_v25  ;;  %v335_v9 = vrot.slane %v333_v59, 1  ;;  %v449_v10 = vshrl.u32 %v4321_v31, 16  ;;  %v453_v11 = vshll.u32 %v4358_v49, 16  ;;  %v376_v12 = vsel %vm316_vm0, %v371_v61, %v375_v62  ;;  %v4085_v25 = vld [vmem:[%s5396_s1 + $0x40] sm:$0xff] }
  0x1d   : > { %1834 = vmatpush.bf16.msrb.mxu0 %v4131_v26  ;;  %1315 = vmatpush.bf16.msrb.mxu3 %v4110_v44  ;;  %v416_v13 = vsel %vm316_vm0, %v411_v63, %v415_v0  ;;  %v389_v14 = vshll.u32 %v4380_v1, 16  ;;  %v393_v26 = vshrl.u32 %v4380_v1, 16  ;;  %v377_v29 = vshrl.u32 %v4339_v39, 16  ;;  %v4077_v57 = vld [vmem:[%s5396_s1] sm:$0xff] }
  0x1e   : > { %3505 = vmatmul.msk.bf16.vlgmr.msra.gmra.mxu0 %vm484_vm1, %v328_v36  ;;  %3520 = vmatmul.msk.bf16.vlgmr.msra.gmra.mxu3 %vm484_vm1, %v448_v60  ;;  %v336_v15 = vsel %vm316_vm0, %v331_v2, %v335_v9  ;;  %v451_v19 = vor.u32 %v449_v10, %v447_v47  ;;  %v455_v21 = vrot.slane %v453_v11, 1  ;;  %v381_v31 = vshll.u32 %v4391_v16, 16  ;;  %v4107_v60 = vld [vmem:[%s5396_s1 + $0x60] sm:$0xff] }
  0x1f   : > { %v391_v22 = vrot.slane %v389_v14, 1  ;;  %v417_v32 = vshrl.u32 %v4344_v43, 16  ;;  %v421_v33 = vshll.u32 %v4394_v17, 16  ;;  %v337_v36 = vshrl.u32 %v4350_v45, 16  ;;  %v4128_v61 = vld [vmem:[%s5396_s1 + $0x80] sm:$0xff] }
  0x20   : > { %933 = vmatpush.bf16.msrb.mxu2 %v4087_v35  ;;  %707 = vmatpush.bf16.msrb.mxu1 %v4079_v37  ;;  %v456_v30 = vsel %vm316_vm0, %v451_v19, %v455_v21  ;;  %v341_v37 = vshll.u32 %v4408_v27, 16  ;;  %v383_v40 = vrot.slane %v381_v31, 1  ;;  %v349_v44 = vshll.u32 %v4416_v34, 16 }
  0x21   : > { %1835 = vmatpush.bf16.msrb.mxu0 %v4130_v38  ;;  %1316 = vmatpush.bf16.msrb.mxu3 %v4109_v55  ;;  %v395_v28 = vor.u32 %v393_v26, %v391_v22  ;;  %v379_v38 = vor.u32 %v377_v29, %v375_v62  ;;  %v419_v41 = vor.u32 %v417_v32, %v415_v0  ;;  %v423_v42 = vrot.slane %v421_v33, 1  ;;  %v4135_v29 = vld [vmem:[%s5396_s1 + $0xb8] sm:$0xff]  ;;  %v1446_v33 = vld [vmem:[%s4270_s23 + $0x8] sm:$0xe] }
  0x22   : > { %v339_v47 = vor.u32 %v337_v36, %v335_v9  ;;  %v351_v52 = vrot.slane %v349_v44, 1  ;;  %v353_v53 = vshrl.u32 %v4416_v34, 16  ;;  %v457_v55 = vshrl.u32 %v4358_v49, 16  ;;  %v4479_v36 = vld [vmem:[%s4270_s23 + $0xc] sm:$0xf]  ;;  %v4111_v44 = vld [vmem:[%s4270_s23 + $0x10] sm:$0xff] }
  0x23   : > { %v4420_v35 = vsel %vm316_vm0, %v395_v28, %v4305_v20  ;;  %v424_v20 = vsel %vm316_vm0, %v419_v41, %v423_v42  ;;  %v385_v63 = vshrl.u32 %v4391_v16, 16  ;;  %v425_v0 = vshrl.u32 %v4394_v17, 16  ;;  %v4156_v28 = vld [vmem:[%s5396_s1 + $0xd8] sm:$0xff] }
  0x24   : > { %934 = vmatpush.bf16.msrb.mxu2 %v4086_v48  ;;  %708 = vmatpush.bf16.msrb.mxu1 %v4078_v51  ;;  %v343_v48 = vrot.slane %v341_v37, 1  ;;  %v384_v51 = vsel %vm316_vm0, %v379_v38, %v383_v40  ;;  %v355_v56 = vor.u32 %v353_v53, %v351_v52  ;;  %v459_v62 = vor.u32 %v457_v55, %v455_v21  ;;  %v4091_v41 = vld [vmem:[%s4270_s23 + $0x18] sm:$0xff] }
  0x25   : > { %1836 = vmatpush.bf16.msrb.mxu0 %v4129_v23  ;;  %1317 = vmatpush.bf16.msrb.mxu3 %v4108_v24  ;;  %v345_v2 = vshrl.u32 %v4408_v27, 16  ;;  %v387_v9 = vor.u32 %v385_v63, %v383_v40  ;;  %v427_v10 = vor.u32 %v425_v0, %v423_v42  ;;  %v433_v32 = vshrl.u32 %v4438_v58, 16 }
  0x26   : > { %v344_v54 = vsel %vm316_vm0, %v339_v47, %v343_v48  ;;  %v360_v59 = vsel %vm316_vm0, %v355_v56, %v4301_v18  ;;  %v429_v18 = vshll.u32 %v4438_v58, 16  ;;  %v1529_v38 = vunpack.c.l.b16 %v1446_v33 }
  0x27   : > { %v347_v14 = vor.u32 %v345_v2, %v343_v48  ;;  %v392_v21 = vsel %vm316_vm0, %v387_v9, %v391_v22  ;;  %v4160_v22 = vld [vmem:[%s5396_s1 + $0xf8] sm:$0xff]  ;;  %v5399_v40 = vunpack.c.l.b16 %v4479_v36  ;;  %v1201_v48 = vrot.slane %v4091_v41, 1 }
  0x28   : > { %935 = vmatpush.bf16.msrb.mxu2 %v4085_v25  ;;  %709 = vmatpush.bf16.msrb.mxu1 %v4077_v57  ;;  %v431_v11 = vrot.slane %v429_v18, 1  ;;  %v1598_v55 = vshll.u32 %v4111_v44, 16  ;;  %v4092_v18 = vld [vmem:[%s4270_s23 + $0x20] sm:$0xff]  ;;  %v820_v33 = vrot.slane %v4408_v27, 1 }
  0x29   : > { %1318 = vmatpush.bf16.msrb.mxu3 %v4107_v60  ;;  %1837 = vmatpush.bf16.msrb.mxu0 %v4128_v61  ;;  %v352_v24 = vsel %vm316_vm0, %v347_v14, %v351_v52  ;;  %v1566_v47 = vpack.c.b16 %v5399_v40, %v1529_v38  ;;  %v4094_v38 = vld [vmem:[%s4270_s23 + $0x30] sm:$0xff] }
  0x2a   : > { %v432_v23 = vsel %vm316_vm0, %v427_v10, %v431_v11  ;;  %v435_v37 = vor.u32 %v433_v32, %v431_v11  ;;  %v4112_v10 = vld [vmem:[%s4270_s23 + $0x18] sm:$0xff]  ;;  %v1203_v11 = vrot.slane %v4092_v18, 1 }
  0x2b   : > { %3511 = vmatmul.msk.bf16.gmra.mxu1 %vm484_vm1, %v376_v12  ;;  %3516 = vmatmul.msk.bf16.gmra.mxu2 %vm484_vm1, %v416_v13  ;;  %v3609_v12 = vld [vmem:[%s4270_s23 + $0x8] sm:$0xe]  ;;  %v4089_v13 = vld [vmem:[%s4270_s23 + $0x8] sm:$0xf0]  ;;  %v1587_v52 = vshrl.u32 %v1566_v47, 16  ;;  %v1590_v53 = vshll.u32 %v1566_v47, 16 }
  0x2c   : > { %v3610_v19 = vor.u32 %v4089_v13, %v3609_v12  ;;  %2487 = vmatpush.bf16.msra.mxu2 %v4156_v28  ;;  %2098 = vmatpush.bf16.msra.mxu1 %v4135_v29  ;;  %v440_v42 = vsel %vm316_vm0, %v435_v37, %v4352_v46  ;;  %v1604_v12 = vshrl.u32 %v4112_v10, 16  ;;  %v1607_v13 = vshll.u32 %v4112_v10, 16 }
  0x2d   : > { %2884 = vmatpush.bf16.msra.mxu3 %v4160_v22  ;;  %v1589_v57 = vrot.slane %v1587_v52, 1  ;;  %v1592_v60 = vrot.slane %v1590_v53, 2  ;;  %v1204_v14 = vsel %vm814_vm2, %v1201_v48, %v1203_v11  ;;  %v4155_v53 = vld [vmem:[%s5396_s1 + $0xd0] sm:$0xff] }
  0x2e   : > { %3506 = vmatmul.msk.bf16.gmra.mxu0 %vm484_vm1, %v336_v15  ;;  %3521 = vmatmul.msk.bf16.gmra.mxu3 %vm484_vm1, %v456_v30  ;;  %v4090_v15 = vld [vmem:[%s4270_s23 + $0x10] sm:$0xff]  ;;  %v1198_v25 = vrot.slane %v3610_v19, 1  ;;  %v4164_v30 = vld [vmem:[%s5396_s1 + $0x118] sm:$0xff]  ;;  %v1609_v19 = vrot.slane %v1607_v13, 2  ;;  %v824_v13 = vrot.slane %v4273_v3, 1 }
  0x2f   : > { %v1199_v26 = vrot.slane %v4090_v15, 1  ;;  %3148 = vmatpush.bf16.msra.mxu0 %v4164_v30  ;;  %v1593_v63 = vor.u32 %v1592_v60, %v1589_v57  ;;  %v1606_v15 = vrot.slane %v1604_v12, 1 }
  0x30   : > { %2488 = vmatpush.bf16.msra.mxu2 %v4155_v53  ;;  %v4117_v53 = vld [vmem:[%s4270_s23 + $0x40] sm:$0xff] }
  0x31   : > { %v1200_v31 = vsel %vm814_vm2, %v1198_v25, %v1199_v26  ;;  %v1202_v46 = vsel %vm814_vm2, %v1199_v26, %v1201_v48  ;;  %v4113_v26 = vld [vmem:[%s4270_s23 + $0x20] sm:$0xff] }
  0x32   : > { %v1613_v22 = vshrl.u32 %v4113_v26, 16  ;;  %v1616_v29 = vshll.u32 %v4113_v26, 16  ;;  %v4116_v26 = vld [vmem:[%s4270_s23 + $0x38] sm:$0xff] }
  0x34   : > { %v1618_v32 = vrot.slane %v1616_v29, 2  ;;  %v1643_v29 = vshll.u32 %v4116_v26, 16 }
  0x3b   : > { %3512 = vmatmul.msk.bf16.gmra.mxu1 %vm484_vm1, %v384_v51  ;;  %3517 = vmatmul.msk.bf16.gmra.mxu2 %vm484_vm1, %v424_v20  ;;  %v4169_v51 = vld [vmem:[%s4270_s23] sm:$0xf0]  ;;  %v4170_v20 = vld [vmem:[%s4270_s23] sm:$0xe] }
  0x3c   : > { %v4171_v56 = vor.u32 %v4170_v20, %v4169_v51 }
  0x3e   : > { %3507 = vmatmul.msk.bf16.gmra.mxu0 %vm484_vm1, %v344_v54  ;;  %3522 = vmatmul.msk.bf16.gmra.mxu3 %vm484_vm1, %v459_v62  ;;  %v1595_v54 = vshrl.u32 %v4111_v44, 16  ;;  %v815_v62 = vrot.slane %v4171_v56, 1  ;;  %v1207_v44 = vrot.slane %v4094_v38, 1  ;;  %v4095_v56 = vld [vmem:[%s4270_s23 + $0x38] sm:$0xff]  ;;  %v1645_v38 = vrot.slane %v1643_v29, 2 }
  0x40   : > { %v1597_v61 = vrot.slane %v1595_v54, 1  ;;  %v822_v54 = vrot.slane %v4416_v34, 1 }
  0x42   : > { %v823_v60 = vsel %vm814_vm2, %v820_v33, %v822_v54 }
  0x4b   : > { %3513 = vmatmul.msk.bf16.gmra.mxu1 %vm484_vm1, %v392_v21  ;;  %3518 = vmatmul.msk.bf16.gmra.mxu2 %vm484_vm1, %v432_v23  ;;  %v818_v21 = vrot.slane %v4350_v45, 1  ;;  %v1610_v23 = vor.u32 %v1609_v19, %v1606_v15 }
  0x4d   : > { %v821_v41 = vsel %vm814_vm2, %v818_v21, %v820_v33 }
  0x4e   : > { %3508 = vmatmul.msk.bf16.gmra.mxu0 %vm484_vm1, %v352_v24  ;;  %3695 = vmatmul.msk.bf16.vlgmr.msrb.gmra.mxu3 %vm484_vm1, %v1200_v31  ;;  %v4093_v24 = vld [vmem:[%s4270_s23 + $0x28] sm:$0xff]  ;;  %v1615_v31 = vrot.slane %v1613_v22, 1  ;;  %v1640_v22 = vshrl.u32 %v4116_v26, 16 }
  0x4f   : > { %v1205_v28 = vrot.slane %v4093_v24, 1  ;;  %v825_v24 = vsel %vm814_vm2, %v822_v54, %v824_v13  ;;  %v1649_v54 = vshrl.u32 %v4117_v53, 16 }
  0x50   : > { %v1619_v37 = vor.u32 %v1618_v32, %v1615_v31 }
  0x51   : > { %v1206_v30 = vsel %vm814_vm2, %v1203_v11, %v1205_v28  ;;  %v1208_v51 = vsel %vm814_vm2, %v1205_v28, %v1207_v44 }
  0x5b   : > { %3514 = vmatmul.msk.bf16.gmra.mxu1 %vm484_vm1, %v4420_v35  ;;  %3519 = vmatmul.msk.bf16.gmra.mxu2 %vm484_vm1, %v440_v42  ;;  %v1600_v35 = vrot.slane %v1598_v55, 2  ;;  %v4114_v42 = vld [vmem:[%s4270_s23 + $0x28] sm:$0xff] }
  0x5c   : > { %v1622_v47 = vshrl.u32 %v4114_v42, 16  ;;  %v1625_v48 = vshll.u32 %v4114_v42, 16 }
  0x5d   : > { %v1601_v0 = vor.u32 %v1600_v35, %v1597_v61 }
  0x5e   : > { %3509 = vmatmul.msk.bf16.gmra.mxu0 %vm484_vm1, %v360_v59  ;;  %3696 = vmatmul.msk.bf16.gmra.mxu3 %vm484_vm1, %v1202_v46  ;;  %v816_v59 = vrot.slane %v4288_v8, 1  ;;  %v1624_v20 = vrot.slane %v1622_v47, 1  ;;  %v1627_v52 = vrot.slane %v1625_v48, 2  ;;  %v4134_v46 = vld [vmem:[%s5396_s1 + $0xb0] sm:$0xff]  ;;  %v4097_v47 = vld [vmem:[%s4270_s23 + $0x48] sm:$0xff] }
  0x5f   : > { %v1602_v9 = vsel %vm1585_vm3, %v1593_v63, %v1601_v0  ;;  %v1611_v25 = vsel %vm1585_vm3, %v1601_v0, %v1610_v23  ;;  %2099 = vmatpush.bf16.msra.mxu1 %v4134_v46  ;;  %v4163_v63 = vld [vmem:[%s5396_s1 + $0x110] sm:$0xff] }
  0x60   : > { %v817_v2 = vsel %vm814_vm2, %v815_v62, %v816_v59  ;;  %v1628_v55 = vor.u32 %v1627_v52, %v1624_v20  ;;  %v4115_v62 = vld [vmem:[%s4270_s23 + $0x30] sm:$0xff]  ;;  %3149 = vmatpush.bf16.msra.mxu0 %v4163_v63  ;;  %v828_v63 = vrot.slane %v4339_v39, 1 }
  0x61   : > { %v1631_v0 = vshrl.u32 %v4115_v62, 16  ;;  %v1634_v18 = vshll.u32 %v4115_v62, 16 }
  0x62   : > { %v1629_v35 = vsel %vm1585_vm3, %v1619_v37, %v1628_v55 }
  0x63   : > { %v1633_v11 = vrot.slane %v1631_v0, 1  ;;  %v1636_v12 = vrot.slane %v1634_v18, 2 }
  0x6b   : > { %3539 = vmatmul.msk.bf16.vlgmr.msrb.gmra.mxu1 %vm484_vm1, %v4285_v7  ;;  %3581 = vmatmul.msk.bf16.vlgmr.msrb.gmra.mxu2 %vm484_vm1, %v817_v2  ;;  %v819_v7 = vsel %vm814_vm2, %v816_v59, %v818_v21  ;;  %v1209_v59 = vrot.slane %v4095_v56, 1  ;;  %v4096_v21 = vld [vmem:[%s4270_s23 + $0x40] sm:$0xff] }
  0x6c   : > { %v1211_v28 = vrot.slane %v4096_v21, 1 }
  0x6e   : > { %3805 = vmatmul.msk.bf16.vlgmr.msrb.gmra.mxu0 %vm484_vm1, %v1602_v9  ;;  %3697 = vmatmul.msk.bf16.gmra.mxu3 %vm484_vm1, %v1204_v14  ;;  %v1210_v9 = vsel %vm814_vm2, %v1207_v44, %v1209_v59  ;;  %v1637_v14 = vor.u32 %v1636_v12, %v1633_v11  ;;  %v1212_v32 = vsel %vm814_vm2, %v1209_v59, %v1211_v28  ;;  %v4098_v11 = vld [vmem:[%s4270_s23 + $0x50] sm:$0xff] }
  0x7b   : > { %3540 = vmatmul.msk.bf16.gmra.mxu1 %vm484_vm1, %v4288_v8  ;;  %3582 = vmatmul.msk.bf16.gmra.mxu2 %vm484_vm1, %v819_v7  ;;  %v1620_v8 = vsel %vm1585_vm3, %v1610_v23, %v1619_v37 }
  0x7e   : > { %3806 = vmatmul.msk.bf16.gmra.mxu0 %vm484_vm1, %v1611_v25  ;;  %3698 = vmatmul.msk.bf16.gmra.mxu3 %vm484_vm1, %v1206_v30  ;;  %v1638_v25 = vsel %vm1585_vm3, %v1628_v55, %v1637_v14  ;;  %v1652_v55 = vshll.u32 %v4117_v53, 16  ;;  %v4099_v53 = vld [vmem:[%s4270_s23 + $0x58] sm:$0xff] }
  0x80   : > { %v1654_v59 = vrot.slane %v1652_v55, 2 }
  0x8b   : > { %3541 = vmatmul.msk.bf16.gmra.mxu1 %vm484_vm1, %v4350_v45  ;;  %3583 = vmatmul.msk.bf16.gmra.mxu2 %vm484_vm1, %v821_v41  ;;  %v4159_v45 = vld [vmem:[%s5396_s1 + $0xf0] sm:$0xff]  ;;  %v826_v41 = vrot.slane %v4276_v4, 1 }
  0x8c   : > { %2885 = vmatpush.bf16.msra.mxu3 %v4159_v45  ;;  %v1213_v45 = vrot.slane %v4097_v47, 1 }
  0x8e   : > { %3807 = vmatmul.msk.bf16.gmra.mxu0 %vm484_vm1, %v1620_v8  ;;  %3699 = vmatmul.msk.bf16.gmra.mxu3 %vm484_vm1, %v1208_v51  ;;  %v827_v51 = vsel %vm814_vm2, %v824_v13, %v826_v41  ;;  %v829_v13 = vsel %vm814_vm2, %v826_v41, %v828_v63 }
  0x98   : > { %v4540_v57 = vpop.f32.mrf.mxu1 }
  0x9b   : > { %v4543_v61 = vpop.f32.mrf.mxu0  ;;  %3542 = vmatmul.msk.bf16.gmra.mxu1 %vm484_vm1, %v4408_v27  ;;  %3584 = vmatmul.msk.bf16.gmra.mxu2 %vm484_vm1, %v823_v60  ;;  %v1214_v60 = vsel %vm814_vm2, %v1211_v28, %v1213_v45 }
  0x9e   : > { %3808 = vmatmul.msk.bf16.gmra.mxu0 %vm484_vm1, %v1629_v35  ;;  %v4554_v2 = vpop.f32.mrf.mxu2  ;;  %3700 = vmatmul.msk.bf16.gmra.mxu3 %vm484_vm1, %v1210_v9 }
  0xa0   : > { %v4557_v10 = vpop.f32.mrf.mxu1 }
  0xa1   : > { %v4563_v15 = vpop.f32.mrf.mxu3 }
  0xa2   : > { %5401 = vst [vmem:[#allocation2_spill] sm:$0xff] %v4563_v15 }
  0xa3   : > { %v4559_v27 = vpop.f32.mrf.mxu0 }
  0xa6   : > { %v4565_v19 = vpop.f32.mrf.mxu2 }
  0xa8   : > { %v4568_v23 = vpop.f32.mrf.mxu1 }
  0xa9   : > { %v4579_v30 = vpop.f32.mrf.mxu3 }
  0xaa   : > { %5402 = vst [vmem:[#allocation3_spill] sm:$0xff] %v4579_v30 }
  0xab   : > { %v4571_v7 = vpop.f32.mrf.mxu0  ;;  %3543 = vmatmul.msk.bf16.gmra.mxu1 %vm484_vm1, %v4416_v34  ;;  %3585 = vmatmul.msk.bf16.gmra.mxu2 %vm484_vm1, %v825_v24  ;;  %v1642_v34 = vrot.slane %v1640_v22, 1  ;;  %v4118_v24 = vld [vmem:[%s4270_s23 + $0x48] sm:$0xff] }
  0xac   : > { %v1658_v26 = vshrl.u32 %v4118_v24, 16  ;;  %v1661_v28 = vshll.u32 %v4118_v24, 16 }
  0xad   : > { %v1646_v8 = vor.u32 %v1645_v38, %v1642_v34 }
  0xae   : > { %3809 = vmatmul.msk.bf16.gmra.mxu0 %vm484_vm1, %v1638_v25  ;;  %v4581_v31 = vpop.f32.mrf.mxu2  ;;  %3701 = vmatmul.msk.bf16.gmra.mxu3 %vm484_vm1, %v1212_v32  ;;  %v1215_v25 = vrot.slane %v4098_v11, 1  ;;  %v1663_v41 = vrot.slane %v1661_v28, 2  ;;  %v4154_v11 = vld [vmem:[%s5396_s1 + $0xc8] sm:$0xff] }
  0xaf   : > { %v1647_v52 = vsel %vm1585_vm3, %v1637_v14, %v1646_v8  ;;  %2489 = vmatpush.bf16.msra.mxu2 %v4154_v11  ;;  %v4100_v11 = vld [vmem:[%s4270_s23 + $0x60] sm:$0xff] }
  0xb0   : > { %v4584_v33 = vpop.f32.mrf.mxu1  ;;  %v1216_v32 = vsel %vm814_vm2, %v1213_v45, %v1215_v25 }
  0xb1   : > { %v4590_v42 = vpop.f32.mrf.mxu3 }
  0xb2   : > { %5403 = vst [vmem:[#allocation4_spill] sm:$0xff] %v4590_v42 }
  0xb3   : > { %v4586_v37 = vpop.f32.mrf.mxu0 }
  0xb6   : > { %v4592_v44 = vpop.f32.mrf.mxu2 }
  0xb8   : > { %v4595_v48 = vpop.f32.mrf.mxu1 }
  0xb9   : > { %v4606_v46 = vpop.f32.mrf.mxu3 }
  0xba   : > { %5404 = vst [vmem:[#allocation5_spill] sm:$0xff] %v4606_v46 }
  0xbb   : > { %v4598_v20 = vpop.f32.mrf.mxu0  ;;  %3544 = vmatmul.msk.bf16.gmra.mxu1 %vm484_vm1, %v4273_v3  ;;  %3586 = vmatmul.msk.bf16.gmra.mxu2 %vm484_vm1, %v827_v51  ;;  %v1651_v3 = vrot.slane %v1649_v54, 1 }
  0xbd   : > { %v1655_v0 = vor.u32 %v1654_v59, %v1651_v3  ;;  %v4119_v3 = vld [vmem:[%s4270_s23 + $0x50] sm:$0xff]  ;;  %v1217_v59 = vrot.slane %v4099_v53, 1  ;;  %v4162_v53 = vld [vmem:[%s5396_s1 + $0x108] sm:$0xff] }
  0xbe   : > { %3810 = vmatmul.msk.bf16.gmra.mxu0 %vm484_vm1, %v1647_v52  ;;  %v4608_v56 = vpop.f32.mrf.mxu2  ;;  %3702 = vmatmul.msk.bf16.gmra.mxu3 %vm484_vm1, %v1214_v60 }
  0xbf   : > { %v1656_v21 = vsel %vm1585_vm3, %v1646_v8, %v1655_v0  ;;  %v830_v8 = vrot.slane %v4391_v16, 1  ;;  %3150 = vmatpush.bf16.msra.mxu0 %v4162_v53 }
  0xc0   : > { %v4611_v35 = vpop.f32.mrf.mxu1 }
  0xc1   : > { %v4617_v18 = vpop.f32.mrf.mxu3  ;;  %v831_v55 = vsel %vm814_vm2, %v828_v63, %v830_v8  ;;  %v4158_v63 = vld [vmem:[%s5396_s1 + $0xe8] sm:$0xff] }
  0xc2   : > { %5405 = vst [vmem:[#allocation6_spill] sm:$0xff] %v4617_v18  ;;  %2886 = vmatpush.bf16.msra.mxu3 %v4158_v63 }
  0xc3   : > { %v4613_v62 = vpop.f32.mrf.mxu0 }
  0xc6   : > { %v4619_v9 = vpop.f32.mrf.mxu2 }
  0xc8   : > { %v4622_v12 = vpop.f32.mrf.mxu1 }
  0xc9   : > { %v4633_v22 = vpop.f32.mrf.mxu3 }
  0xca   : > { %5406 = vst [vmem:[#allocation7_spill] sm:$0xff] %v4633_v22  ;;  %v4120_v22 = vld [vmem:[%s4270_s23 + $0x58] sm:$0xff] }
  0xcb   : > { %v4625_v14 = vpop.f32.mrf.mxu0  ;;  %3545 = vmatmul.msk.bf16.gmra.mxu1 %vm484_vm1, %v4276_v4  ;;  %3587 = vmatmul.msk.bf16.gmra.mxu2 %vm484_vm1, %v829_v13  ;;  %v1660_v4 = vrot.slane %v1658_v26, 1  ;;  %v1667_v13 = vshrl.u32 %v4119_v3, 16 }
  0xcd   : > { %v1664_v47 = vor.u32 %v1663_v41, %v1660_v4  ;;  %v4133_v41 = vld [vmem:[%s5396_s1 + $0xa8] sm:$0xff] }
  0xce   : > { %3811 = vmatmul.msk.bf16.gmra.mxu0 %vm484_vm1, %v1656_v21  ;;  %v4635_v29 = vpop.f32.mrf.mxu2  ;;  %3703 = vmatmul.msk.bf16.gmra.mxu3 %vm484_vm1, %v1216_v32  ;;  %v1670_v21 = vshll.u32 %v4119_v3, 16  ;;  %v1669_v32 = vrot.slane %v1667_v13, 1 }
  0xcf   : > { %v1665_v60 = vsel %vm1585_vm3, %v1655_v0, %v1664_v47  ;;  %2100 = vmatpush.bf16.msra.mxu1 %v4133_v41  ;;  %v1679_v41 = vshll.u32 %v4120_v22, 16 }
  0xd0   : > { %v4638_v34 = vpop.f32.mrf.mxu1  ;;  %v1672_v4 = vrot.slane %v1670_v21, 2 }
  0xd1   : > { %v1320_v51 = vpop.f32.mrf.mxu3 }
  0xd3   : > { %v4640_v38 = vpop.f32.mrf.mxu0 }
  0xd6   : > { %v4644_v52 = vpop.f32.mrf.mxu2 }
  0xd8   : > { %v4647_v54 = vpop.f32.mrf.mxu1 }
  0xd9   : > { %v1322_v0 = vpop.f32.mrf.mxu3 }
  0xdb   : > { %v4650_v45 = vpop.f32.mrf.mxu0  ;;  %3546 = vmatmul.msk.bf16.gmra.mxu1 %vm484_vm1, %v4339_v39  ;;  %3588 = vmatmul.msk.bf16.gmra.mxu2 %vm484_vm1, %v831_v55  ;;  %v1218_v39 = vsel %vm814_vm2, %v1215_v25, %v1217_v59  ;;  %v832_v25 = vrot.slane %v4380_v1, 1  ;;  %v1673_v55 = vor.u32 %v1672_v4, %v1669_v32  ;;  %v1676_v4 = vshrl.u32 %v4120_v22, 16 }
  0xdd   : > { %v833_v13 = vsel %vm814_vm2, %v830_v8, %v832_v25  ;;  %v1674_v40 = vsel %vm1585_vm3, %v1664_v47, %v1673_v55  ;;  %v1678_v15 = vrot.slane %v1676_v4, 1 }
  0xde   : > { %3812 = vmatmul.msk.bf16.gmra.mxu0 %vm484_vm1, %v1665_v60  ;;  %v4664_v24 = vpop.f32.mrf.mxu2  ;;  %3704 = vmatmul.msk.bf16.gmra.mxu3 %vm484_vm1, %v1218_v39  ;;  %v1219_v39 = vrot.slane %v4100_v11, 1 }
  0xe0   : > { %v4667_v26 = vpop.f32.mrf.mxu1  ;;  %v1220_v46 = vsel %vm814_vm2, %v1217_v59, %v1219_v39 }
  0xe1   : > { %v1325_v60 = vpop.f32.mrf.mxu3 }
  0xe3   : > { %v4669_v28 = vpop.f32.mrf.mxu0 }
  0xe6   : > { %v4679_v3 = vpop.f32.mrf.mxu2 }
  0xe7   : > { %5407 = vst [vmem:[#allocation8_spill] sm:$0xff] %v4679_v3  ;;  %v4121_v3 = vld [vmem:[%s4270_s23 + $0x60] sm:$0xff] }
  0xe8   : > { %v711_v63 = vpop.f32.mrf.mxu1 }
  0xe9   : > { %v712_v32 = vadd.f32 %v711_v63, %v4543_v61  ;;  %v1327_v53 = vpop.f32.mrf.mxu3 }
  0xeb   : > { %v1839_v21 = vpop.f32.mrf.mxu0  ;;  %3547 = vmatmul.msk.bf16.gmra.mxu1 %vm484_vm1, %v4391_v16  ;;  %3589 = vmatmul.msk.bf16.gmra.mxu2 %vm484_vm1, %v833_v13  ;;  %v1681_v16 = vrot.slane %v1679_v41, 2 }
  0xed   : > { %v1682_v22 = vor.u32 %v1681_v16, %v1678_v15 }
  0xee   : > { %3813 = vmatmul.msk.bf16.gmra.mxu0 %vm484_vm1, %v1674_v40  ;;  %v937_v18 = vpop.f32.mrf.mxu2  ;;  %3705 = vmatmul.msk.bf16.gmra.mxu3 %vm484_vm1, %v1220_v46  ;;  %v834_v40 = vrot.slane %v4279_v5, 1  ;;  %v1685_v46 = vshrl.u32 %v4121_v3, 16 }
  0xef   : > { %v1027_v8 = vadd.f32 %v937_v18, %v712_v32  ;;  %v4101_v32 = vld [vmem:[%s4270_s23 + $0x68] sm:$0xff]  ;;  %v1683_v41 = vsel %vm1585_vm3, %v1673_v55, %v1682_v22 }
  0xf0   : > { %v713_v47 = vpop.f32.mrf.mxu1 }
  0xf1   : > { %v1410_v42 = vadd.f32 %v1320_v51, %v1027_v8  ;;  %v714_v61 = vadd.f32 %v713_v47, %v4559_v27  ;;  %v1330_v63 = vpop.f32.mrf.mxu3  ;;  %v835_v51 = vsel %vm814_vm2, %v832_v25, %v834_v40 }
  0xf3   : > { %v1841_v30 = vpop.f32.mrf.mxu0  ;;  %v4692_v11 = vadd.f32 %v1839_v21, %v1410_v42  ;;  %v1221_v42 = vrot.slane %v4101_v32, 1  ;;  %v1688_v21 = vshll.u32 %v4121_v3, 16 }
  0xf5   : > { %v1222_v55 = vsel %vm814_vm2, %v1219_v39, %v1221_v42 }
  0xf6   : > { %v939_v13 = vpop.f32.mrf.mxu2 }
  0xf7   : > { %v1028_v18 = vadd.f32 %v939_v13, %v714_v61  ;;  %v1687_v13 = vrot.slane %v1685_v46, 1 }
  0xf8   : > { %v716_v59 = vpop.f32.mrf.mxu1 }
  0xf9   : > { %v1411_v8 = vadd.f32 %v1322_v0, %v1028_v18  ;;  %v717_v15 = vadd.f32 %v716_v59, %v4571_v7  ;;  %v1332_v25 = vpop.f32.mrf.mxu3  ;;  %v1690_v18 = vrot.slane %v1688_v21, 2  ;;  %v836_v7 = vrot.slane %v4282_v6, 1 }
  0xfb   : > { %v1844_v4 = vpop.f32.mrf.mxu0  ;;  %3548 = vmatmul.msk.bf16.gmra.mxu1 %vm484_vm1, %v4380_v1  ;;  %3590 = vmatmul.msk.bf16.gmra.mxu2 %vm484_vm1, %v835_v51  ;;  %v4703_v27 = vadd.f32 %v1841_v30, %v1411_v8  ;;  %v1691_v32 = vor.u32 %v1690_v18, %v1687_v13 }
  0xfd   : > { %v1692_v21 = vsel %vm1585_vm3, %v1682_v22, %v1691_v32 }
  0xfe   : > { %3814 = vmatmul.msk.bf16.gmra.mxu0 %vm484_vm1, %v1683_v41  ;;  %v942_v0 = vpop.f32.mrf.mxu2  ;;  %3706 = vmatmul.msk.bf16.gmra.mxu3 %vm484_vm1, %v1222_v55  ;;  %v4102_v41 = vld [vmem:[%s4270_s23 + $0x70] sm:$0xff] }
  0xff   : > { %v1029_v47 = vadd.f32 %v942_v0, %v717_v15  ;;  %v4122_v0 = vld [vmem:[%s4270_s23 + $0x68] sm:$0xff] }
 0x100   : > { %v718_v16 = vpop.f32.mrf.mxu1  ;;  %v1694_v55 = vshrl.u32 %v4122_v0, 16 }
 0x101   : > { %v1412_v61 = vadd.f32 %v1325_v60, %v1029_v47  ;;  %v719_v3 = vadd.f32 %v718_v16, %v4586_v37  ;;  %v1335_v59 = vpop.f32.mrf.mxu3  ;;  %v837_v60 = vsel %vm814_vm2, %v834_v40, %v836_v7  ;;  %v1697_v16 = vshll.u32 %v4122_v0, 16 }
 0x103   : > { %v1846_v1 = vpop.f32.mrf.mxu0  ;;  %v4709_v30 = vadd.f32 %v1844_v4, %v1412_v61  ;;  %v1223_v4 = vrot.slane %v4102_v41, 1 }
 0x105   : > { %v1224_v22 = vsel %vm814_vm2, %v1221_v42, %v1223_v4  ;;  %v4103_v42 = vld [vmem:[%s4270_s23 + $0x78] sm:$0xff] }
 0x106   : > { %v944_v51 = vpop.f32.mrf.mxu2 }
 0x107   : > { %v1030_v8 = vadd.f32 %v944_v51, %v719_v3  ;;  %v1696_v3 = vrot.slane %v1694_v55, 1  ;;  %v1699_v51 = vrot.slane %v1697_v16, 2  ;;  %v4123_v16 = vld [vmem:[%s4270_s23 + $0x70] sm:$0xff] }
 0x108   : > { %v721_v39 = vpop.f32.mrf.mxu1 }
 0x109   : > { %v1413_v15 = vadd.f32 %v1327_v53, %v1030_v8  ;;  %v722_v47 = vadd.f32 %v721_v39, %v4598_v20  ;;  %v1337_v40 = vpop.f32.mrf.mxu3  ;;  %v838_v20 = vrot.slane %v4344_v43, 1  ;;  %v1700_v41 = vor.u32 %v1699_v51, %v1696_v3 }
 0x10b   : > { %v1849_v46 = vpop.f32.mrf.mxu0  ;;  %3549 = vmatmul.msk.bf16.gmra.mxu1 %vm484_vm1, %v4279_v5  ;;  %3591 = vmatmul.msk.bf16.gmra.mxu2 %vm484_vm1, %v837_v60  ;;  %v4720_v37 = vadd.f32 %v1846_v1, %v1413_v15  ;;  %v1701_v55 = vsel %vm1585_vm3, %v1691_v32, %v1700_v41 }
 0x10e   : > { %3815 = vmatmul.msk.bf16.gmra.mxu0 %vm484_vm1, %v1692_v21  ;;  %v947_v53 = vpop.f32.mrf.mxu2  ;;  %3707 = vmatmul.msk.bf16.gmra.mxu3 %vm484_vm1, %v1224_v22  ;;  %v1706_v22 = vshll.u32 %v4123_v16, 16 }
 0x10f   : > { %v1031_v61 = vadd.f32 %v947_v53, %v722_v47 }
 0x110   : > { %v723_v13 = vpop.f32.mrf.mxu1 }
 0x111   : > { %v1414_v18 = vadd.f32 %v1330_v63, %v1031_v61  ;;  %v724_v8 = vadd.f32 %v723_v13, %v4613_v62  ;;  %v4730_v39 = vpop.f32.mrf.mxu3  ;;  %v839_v63 = vsel %vm814_vm2, %v836_v7, %v838_v20  ;;  %v1225_v62 = vrot.slane %v4103_v42, 1 }
 0x112   : > { %v1703_v61 = vshrl.u32 %v4123_v16, 16 }
 0x113   : > { %v1851_v5 = vpop.f32.mrf.mxu0  ;;  %v4726_v1 = vadd.f32 %v1849_v46, %v1414_v18  ;;  %v1226_v32 = vsel %vm814_vm2, %v1223_v4, %v1225_v62 }
 0x114   : > { %v1705_v51 = vrot.slane %v1703_v61, 1 }
 0x116   : > { %v949_v60 = vpop.f32.mrf.mxu2 }
 0x117   : > { %v1032_v15 = vadd.f32 %v949_v60, %v724_v8  ;;  %v1708_v8 = vrot.slane %v1706_v22, 2 }
 0x118   : > { %v726_v21 = vpop.f32.mrf.mxu1 }
 0x119   : > { %v1415_v0 = vadd.f32 %v1332_v25, %v1032_v15  ;;  %v727_v53 = vadd.f32 %v726_v21, %v4625_v14  ;;  %v1342_v7 = vpop.f32.mrf.mxu3  ;;  %v4157_v14 = vld [vmem:[%s5396_s1 + $0xe0] sm:$0xff]  ;;  %v1709_v15 = vor.u32 %v1708_v8, %v1705_v51 }
 0x11a   : > { %2887 = vmatpush.bf16.msra.mxu3 %v4157_v14 }
 0x11b   : > { %v1854_v47 = vpop.f32.mrf.mxu0  ;;  %3550 = vmatmul.msk.bf16.gmra.mxu1 %vm484_vm1, %v4282_v6  ;;  %3592 = vmatmul.msk.bf16.gmra.mxu2 %vm484_vm1, %v839_v63  ;;  %v4739_v46 = vadd.f32 %v1851_v5, %v1415_v0  ;;  %v4153_v5 = vld [vmem:[%s5396_s1 + $0xc0] sm:$0xff]  ;;  %v1710_v22 = vsel %vm1585_vm3, %v1700_v41, %v1709_v15 }
 0x11c   : > { %2490 = vmatpush.bf16.msra.mxu2 %v4153_v5  ;;  %v4104_v0 = vld [vmem:[%s4270_s23 + $0x80] sm:$0xff] }
 0x11e   : > { %3816 = vmatmul.msk.bf16.gmra.mxu0 %vm484_vm1, %v1701_v55  ;;  %v952_v25 = vpop.f32.mrf.mxu2  ;;  %3708 = vmatmul.msk.bf16.gmra.mxu3 %vm484_vm1, %v1226_v32 }
 0x11f   : > { %v1033_v13 = vadd.f32 %v952_v25, %v727_v53  ;;  %v4124_v25 = vld [vmem:[%s4270_s23 + $0x78] sm:$0xff] }
 0x120   : > { %v728_v18 = vpop.f32.mrf.mxu1  ;;  %v1712_v41 = vshrl.u32 %v4124_v25, 16  ;;  %v1715_v32 = vshll.u32 %v4124_v25, 16 }
 0x121   : > { %v1416_v3 = vadd.f32 %v1335_v59, %v1033_v13  ;;  %v840_v59 = vrot.slane %v4394_v17, 1  ;;  %v729_v60 = vadd.f32 %v728_v18, %v4640_v38  ;;  %v1345_v42 = vpop.f32.mrf.mxu3  ;;  %v1227_v38 = vrot.slane %v4104_v0, 1 }
 0x122   : > { %v1714_v14 = vrot.slane %v1712_v41, 1 }
 0x123   : > { %v1856_v6 = vpop.f32.mrf.mxu0  ;;  %v4751_v4 = vadd.f32 %v1854_v47, %v1416_v3  ;;  %v841_v16 = vsel %vm814_vm2, %v838_v20, %v840_v59  ;;  %v4132_v47 = vld [vmem:[%s5396_s1 + $0xa0] sm:$0xff]  ;;  %v1228_v51 = vsel %vm814_vm2, %v1225_v62, %v1227_v38  ;;  %v4105_v62 = vld [vmem:[%s4270_s23 + $0x88] sm:$0xff] }
 0x124   : > { %2101 = vmatpush.bf16.msra.mxu1 %v4132_v47 }
 0x126   : > { %v954_v21 = vpop.f32.mrf.mxu2 }
 0x127   : > { %v1034_v63 = vadd.f32 %v954_v21, %v729_v60  ;;  %v1717_v60 = vrot.slane %v1715_v32, 2 }
 0x128   : > { %v731_v55 = vpop.f32.mrf.mxu1 }
 0x129   : > { %v1417_v53 = vadd.f32 %v1337_v40, %v1034_v63  ;;  %v4161_v40 = vld [vmem:[%s5396_s1 + $0x100] sm:$0xff]  ;;  %v732_v20 = vadd.f32 %v731_v55, %v4650_v45  ;;  %v1347_v18 = vpop.f32.mrf.mxu3  ;;  %v842_v45 = vrot.slane %v4438_v58, 1  ;;  %v1718_v0 = vor.u32 %v1717_v60, %v1714_v14  ;;  %v4195_v60 = vld [vmem:[%s4270_s23 + $0x78] sm:$0xff] }
 0x12a   : > { %3151 = vmatpush.bf16.msra.mxu0 %v4161_v40 }
 0x12b   : > { %v1859_v61 = vpop.f32.mrf.mxu0  ;;  %3551 = vmatmul.msk.bf16.gmra.mxu1 %vm484_vm1, %v4344_v43  ;;  %3593 = vmatmul.msk.bf16.gmra.mxu2 %vm484_vm1, %v841_v16  ;;  %v4765_v13 = vadd.f32 %v1856_v6, %v1417_v53  ;;  %v1719_v40 = vsel %vm1585_vm3, %v1709_v15, %v1718_v0 }
 0x12e   : > { %3817 = vmatmul.msk.bf16.gmra.mxu0 %vm484_vm1, %v1710_v22  ;;  %v957_v3 = vpop.f32.mrf.mxu2  ;;  %3709 = vmatmul.msk.bf16.gmra.mxu3 %vm484_vm1, %v1228_v51 }
 0x12f   : > { %v1035_v43 = vadd.f32 %v957_v3, %v732_v20  ;;  %v4125_v20 = vld [vmem:[%s4270_s23 + $0x80] sm:$0xff] }
 0x130   : > { %v733_v6 = vpop.f32.mrf.mxu1  ;;  %v1721_v32 = vshrl.u32 %v4125_v20, 16 }
 0x131   : > { %v1418_v8 = vadd.f32 %v4730_v39, %v1035_v43  ;;  %v734_v63 = vadd.f32 %v733_v6, %v4669_v28  ;;  %v1350_v55 = vpop.f32.mrf.mxu3  ;;  %v843_v39 = vsel %vm814_vm2, %v840_v59, %v842_v45  ;;  %v1724_v59 = vshll.u32 %v4125_v20, 16 }
 0x133   : > { %v1861_v5 = vpop.f32.mrf.mxu0  ;;  %v4775_v21 = vadd.f32 %v1859_v61, %v1418_v8  ;;  %v1229_v61 = vrot.slane %v4105_v62, 1  ;;  %v1723_v8 = vrot.slane %v1721_v32, 1  ;;  %v1726_v14 = vrot.slane %v1724_v59, 2 }
 0x135   : > { %v1230_v15 = vsel %vm814_vm2, %v1227_v38, %v1229_v61 }
 0x136   : > { %v959_v16 = vpop.f32.mrf.mxu2 }
 0x137   : > { %v1036_v53 = vadd.f32 %v959_v16, %v734_v63  ;;  %v1727_v16 = vor.u32 %v1726_v14, %v1723_v8 }
 0x138   : > { %v736_v22 = vpop.f32.mrf.mxu1 }
 0x139   : > { %v1419_v25 = vadd.f32 %v1342_v7, %v1036_v53  ;;  %v737_v41 = vadd.f32 %v736_v22, %v4540_v57  ;;  %v1352_v7 = vpop.f32.mrf.mxu3  ;;  %v844_v57 = vrot.slane %v4195_v60, 1  ;;  %v1728_v20 = vsel %vm1585_vm3, %v1718_v0, %v1727_v16 }
 0x13b   : > { %v1864_v47 = vpop.f32.mrf.mxu0  ;;  %3552 = vmatmul.msk.bf16.gmra.mxu1 %vm484_vm1, %v4394_v17  ;;  %3594 = vmatmul.msk.bf16.gmra.mxu2 %vm484_vm1, %v843_v39  ;;  %v4786_v28 = vadd.f32 %v1861_v5, %v1419_v25  ;;  %v4106_v39 = vld [vmem:[%s4270_s23 + $0x90] sm:$0xff] }
 0x13e   : > { %3818 = vmatmul.msk.bf16.gmra.mxu0 %vm484_vm1, %v1719_v40  ;;  %v962_v3 = vpop.f32.mrf.mxu2  ;;  %3710 = vmatmul.msk.bf16.gmra.mxu3 %vm484_vm1, %v1230_v15 }
 0x13f   : > { %v1037_v43 = vadd.f32 %v962_v3, %v737_v41  ;;  %v4126_v41 = vld [vmem:[%s4270_s23 + $0x88] sm:$0xff] }
 0x140   : > { %v738_v51 = vpop.f32.mrf.mxu1  ;;  %v1730_v59 = vshrl.u32 %v4126_v41, 16 }
 0x141   : > { %v1420_v17 = vadd.f32 %v1345_v42, %v1037_v43  ;;  %v739_v63 = vadd.f32 %v738_v51, %v4557_v10  ;;  %v1355_v53 = vpop.f32.mrf.mxu3  ;;  %v845_v42 = vsel %vm814_vm2, %v842_v45, %v844_v57  ;;  %v1733_v45 = vshll.u32 %v4126_v41, 16  ;;  %v4127_v41 = vld [vmem:[%s4270_s23 + $0x90] sm:$0xff] }
 0x143   : > { %v1866_v6 = vpop.f32.mrf.mxu0  ;;  %v4792_v5 = vadd.f32 %v1864_v47, %v1420_v17  ;;  %v1231_v47 = vrot.slane %v4106_v39, 1  ;;  %v1732_v17 = vrot.slane %v1730_v59, 1 }
 0x145   : > { %v1232_v43 = vsel %vm814_vm2, %v1229_v61, %v1231_v47 }
 0x146   : > { %v964_v62 = vpop.f32.mrf.mxu2 }
 0x147   : > { %v1038_v22 = vadd.f32 %v964_v62, %v739_v63 }
 0x148   : > { %v741_v38 = vpop.f32.mrf.mxu1 }
 0x149   : > { %v1421_v25 = vadd.f32 %v1347_v18, %v1038_v22  ;;  %v742_v32 = vadd.f32 %v741_v38, %v4568_v23  ;;  %v4807_v18 = vpop.f32.mrf.mxu3  ;;  %v4196_v23 = vld [vmem:[%s4270_s23 + $0x80] sm:$0xff] }
 0x14a   : > { %v846_v14 = vrot.slane %v4196_v23, 1 }
 0x14b   : > { %v1869_v40 = vpop.f32.mrf.mxu0  ;;  %3553 = vmatmul.msk.bf16.gmra.mxu1 %vm484_vm1, %v4438_v58  ;;  %3595 = vmatmul.msk.bf16.gmra.mxu2 %vm484_vm1, %v845_v42  ;;  %v4803_v10 = vadd.f32 %v1866_v6, %v1421_v25  ;;  %v1735_v6 = vrot.slane %v1733_v45, 2 }
 0x14c   : > { %v847_v38 = vsel %vm814_vm2, %v844_v57, %v846_v14  ;;  %v1739_v57 = vshrl.u32 %v4127_v41, 16 }
 0x14d   : > { %v1736_v62 = vor.u32 %v1735_v6, %v1732_v17 }
 0x14e   : > { %3819 = vmatmul.msk.bf16.gmra.mxu0 %vm484_vm1, %v1728_v20  ;;  %v967_v3 = vpop.f32.mrf.mxu2  ;;  %3711 = vmatmul.msk.bf16.gmra.mxu3 %vm484_vm1, %v1232_v43  ;;  %v1741_v6 = vrot.slane %v1739_v57, 1 }
 0x14f   : > { %v1039_v0 = vadd.f32 %v967_v3, %v742_v32  ;;  %v1737_v20 = vsel %vm1585_vm3, %v1727_v16, %v1736_v62  ;;  %v4822_v32 = vld [vmem:[%s4270_s23 + $0x14] sm:$0xf]  ;;  %v1742_v16 = vshll.u32 %v4127_v41, 16 }
 0x150   : > { %v743_v15 = vpop.f32.mrf.mxu1 }
 0x151   : > { %v1422_v58 = vadd.f32 %v1350_v55, %v1039_v0  ;;  %v744_v63 = vadd.f32 %v743_v15, %v4584_v33  ;;  %v4815_v22 = vpop.f32.mrf.mxu3  ;;  %v5400_v33 = vunpack.c.l.b16 %v4822_v32 }
 0x153   : > { %v1871_v51 = vpop.f32.mrf.mxu0  ;;  %v4811_v8 = vadd.f32 %v1869_v40, %v1422_v58  ;;  %v2229_v40 = vld [vmem:[%s4270_s23 + $0x10] sm:$0xc]  ;;  %v4838_v58 = vld [vmem:[%s4270_s23 + $0x18] sm:$0xff] }
 0x154   : > { %v2312_v59 = vunpack.c.l.b16 %v2229_v40 }
 0x156   : > { %v969_v61 = vpop.f32.mrf.mxu2  ;;  %v4835_v43 = vpack.c.b16 %v5400_v33, %v2312_v59  ;;  %v1482_v59 = vld [vmem:[%s4270_s23 + $0x98] sm:$0x1] }
 0x157   : > { %v1040_v39 = vadd.f32 %v969_v61, %v744_v63  ;;  %v1744_v63 = vrot.slane %v1742_v16, 2 }
 0x158   : > { %v746_v55 = vpop.f32.mrf.mxu1  ;;  %v2636_v61 = vshll.u32 %v4835_v43, 16 }
 0x159   : > { %v1423_v42 = vadd.f32 %v1352_v7, %v1040_v39  ;;  %v747_v7 = vadd.f32 %v746_v55, %v4595_v48  ;;  %v4831_v3 = vpop.f32.mrf.mxu3  ;;  %v2633_v48 = vshrl.u32 %v4835_v43, 16  ;;  %v2641_v39 = vshrl.u32 %v4838_v58, 16 }
 0x15a   : > { %v2644_v55 = vshll.u32 %v4838_v58, 16  ;;  %v2638_v57 = vrot.slane %v2636_v61, 3 }
 0x15b   : > { %v1874_v25 = vpop.f32.mrf.mxu0  ;;  %3554 = vmatmul.msk.bf16.gmra.mxu1 %vm484_vm1, %v4195_v60  ;;  %3596 = vmatmul.msk.bf16.gmra.mxu2 %vm484_vm1, %v847_v38  ;;  %v4827_v45 = vadd.f32 %v1871_v51, %v1423_v42  ;;  %v848_v42 = vrot.slane %v4358_v49, 1  ;;  %v2643_v16 = vrot.slane %v2641_v39, 2 }
 0x15d   : > { %v849_v33 = vsel %vm814_vm2, %v846_v14, %v848_v42 }
 0x15e   : > { %3820 = vmatmul.msk.bf16.gmra.mxu0 %vm484_vm1, %v1737_v20  ;;  %v972_v0 = vpop.f32.mrf.mxu2  ;;  %3712 = vmatmul.msk.bf16.gmra.mxu3 %vm484_vm1, %v1231_v47  ;;  %v2635_v47 = vrot.slane %v2633_v48, 2 }
 0x15f   : > { %v1041_v15 = vadd.f32 %v972_v0, %v747_v7  ;;  %v2646_v0 = vrot.slane %v2644_v55, 3  ;;  %v4222_v55 = vld [vmem:[%s4270_s23 + $0x88] sm:$0x70] }
 0x160   : > { %v748_v60 = vpop.f32.mrf.mxu1 }
 0x161   : > { %v1424_v51 = vadd.f32 %v1355_v53, %v1041_v15  ;;  %v749_v20 = vadd.f32 %v748_v60, %v4611_v35  ;;  %v1745_v53 = vor.u32 %v1744_v63, %v1741_v6  ;;  %v4849_v41 = vpop.f32.mrf.mxu3  ;;  %v1565_v35 = vunpack.c.l.b16 %v1482_v59 }
 0x162   : > { %v2639_v60 = vor.u32 %v2638_v57, %v2635_v47  ;;  %v2647_v6 = vor.u32 %v2646_v0, %v2643_v16 }
 0x163   : > { %v1876_v17 = vpop.f32.mrf.mxu0  ;;  %v4845_v38 = vadd.f32 %v1874_v25, %v1424_v51  ;;  %v1746_v49 = vsel %vm1585_vm3, %v1736_v62, %v1745_v53 }
 0x164   : > { %v2648_v39 = vsel %vm2631_vm4, %v2639_v60, %v2647_v6 }
 0x166   : > { %v974_v40 = vpop.f32.mrf.mxu2 }
 0x167   : > { %v1042_v7 = vadd.f32 %v974_v40, %v749_v20 }
 0x168   : > { %v751_v15 = vpop.f32.mrf.mxu1 }
 0x169   : > { %v1425_v25 = vadd.f32 %v4807_v18, %v1042_v7  ;;  %v752_v14 = vadd.f32 %v751_v15, %v4622_v12  ;;  %v4861_v18 = vpack.c.b16 %v1565_v35, %v1565_v35  ;;  %v4863_v48 = vpop.f32.mrf.mxu3  ;;  %v4217_v15 = vor.u32 %v4222_v55, %v4361_v50 }
 0x16b   : > { %v1879_v51 = vpop.f32.mrf.mxu0  ;;  %3555 = vmatmul.msk.bf16.gmra.mxu1 %vm484_vm1, %v4196_v23  ;;  %3597 = vmatmul.msk.bf16.gmra.mxu2 %vm484_vm1, %v849_v33  ;;  %v4857_v63 = vadd.f32 %v1876_v17, %v1425_v25  ;;  %v4867_v23 = vld [vmem:[%s4270_s23 + $0x20] sm:$0xff]  ;;  %v1748_v40 = vshll.u32 %v4861_v18, 16 }
 0x16c   : > { %v2650_v12 = vshrl.u32 %v4867_v23, 16  ;;  %v2653_v59 = vshll.u32 %v4867_v23, 16 }
 0x16d   : > { %v1750_v57 = vrot.slane %v1748_v40, 2 }
 0x16e   : > { %3821 = vmatmul.msk.bf16.gmra.mxu0 %vm484_vm1, %v1746_v49  ;;  %v977_v62 = vpop.f32.mrf.mxu2  ;;  %3999 = vmatmul.msk.bf16.vlgmr.msra.gmra.mxu3 %vm484_vm1, %v2648_v39  ;;  %v2652_v25 = vrot.slane %v2650_v12, 2  ;;  %v2655_v49 = vrot.slane %v2653_v59, 3  ;;  %v4895_v12 = vld [vmem:[%s4270_s23 + $0x28] sm:$0xff] }
 0x16f   : > { %v1043_v61 = vadd.f32 %v977_v62, %v752_v14  ;;  %v1751_v62 = vsel %vm1585_vm3, %v1745_v53, %v1750_v57 }
 0x170   : > { %v753_v33 = vpop.f32.mrf.mxu1 }
 0x171   : > { %v1426_v17 = vadd.f32 %v4815_v22, %v1043_v61  ;;  %v754_v7 = vadd.f32 %v753_v33, %v4638_v34  ;;  %v4878_v16 = vpop.f32.mrf.mxu3  ;;  %v3015_v61 = vld [vmem:[%s4270_s23 + $0x10] sm:$0x8]  ;;  %v2656_v34 = vor.u32 %v2655_v49, %v2652_v25 }
 0x172   : > { %v3026_v55 = vunpack.c.l.b16 %v3015_v61  ;;  %v4197_v49 = vld [vmem:[%s4270_s23 + $0x10] sm:$0xff] }
 0x173   : > { %v1881_v20 = vpop.f32.mrf.mxu0  ;;  %v4875_v47 = vadd.f32 %v1879_v51, %v1426_v17  ;;  %v1965_v51 = vld [vmem:[%s4270_s23 + $0x8] sm:$0xc]  ;;  %v2657_v40 = vsel %vm2631_vm4, %v2647_v6, %v2656_v34 }
 0x174   : > { %v1976_v50 = vunpack.c.l.b16 %v1965_v51 }
 0x176   : > { %v979_v0 = vpop.f32.mrf.mxu2 }
 0x177   : > { %v1044_v22 = vadd.f32 %v979_v0, %v754_v7  ;;  %v5409_v0 = vunpack.c.l.b16 %v4822_v32 }
 0x178   : > { %v756_v35 = vpop.f32.mrf.mxu1 }
 0x179   : > { %v1427_v60 = vadd.f32 %v4831_v3, %v1044_v22  ;;  %v757_v33 = vadd.f32 %v756_v35, %v4647_v54  ;;  %v4891_v3 = vpop.f32.mrf.mxu3  ;;  %v3027_v54 = vpack.c.b16 %v5409_v0, %v3026_v55  ;;  %v2659_v22 = vshrl.u32 %v4895_v12, 16 }
 0x17a   : > { %v1980_v35 = vrot.slane %v4197_v49, 2 }
 0x17b   : > { %v1884_v14 = vpop.f32.mrf.mxu0  ;;  %3556 = vmatmul.msk.bf16.gmra.mxu1 %vm484_vm1, %v4217_v15  ;;  %3598 = vmatmul.msk.bf16.gmra.mxu2 %vm484_vm1, %v848_v42  ;;  %v4887_v39 = vadd.f32 %v1881_v20, %v1427_v60  ;;  %v5408_v42 = vunpack.c.l.b16 %v4479_v36  ;;  %v2662_v15 = vshll.u32 %v4895_v12, 16  ;;  %v2368_v36 = vrot.slane %v4835_v43, 2 }
 0x17c   : > { %v2369_v60 = vrot.slane %v4838_v58, 2  ;;  %v3029_v32 = vrot.slane %v3027_v54, 3  ;;  %v4924_v54 = vld [vmem:[%s4270_s23 + $0x30] sm:$0xff] }
 0x17d   : > { %v1977_v20 = vpack.c.b16 %v5408_v42, %v1976_v50  ;;  %v2671_v49 = vshll.u32 %v4924_v54, 16 }
 0x17e   : > { %3822 = vmatmul.msk.bf16.gmra.mxu0 %vm484_vm1, %v1751_v62  ;;  %v982_v17 = vpop.f32.mrf.mxu2  ;;  %4000 = vmatmul.msk.bf16.gmra.mxu3 %vm484_vm1, %v2657_v40  ;;  %v3030_v62 = vrot.slane %v4838_v58, 3  ;;  %v2370_v43 = vsel %vm1978_vm5, %v2368_v36, %v2369_v60 }
 0x17f   : > { %v1045_v53 = vadd.f32 %v982_v17, %v757_v33  ;;  %v1979_v6 = vrot.slane %v1977_v20, 2  ;;  %v2661_v33 = vrot.slane %v2659_v22, 2 }
 0x180   : > { %v758_v59 = vpop.f32.mrf.mxu1 }
 0x181   : > { %v1428_v7 = vadd.f32 %v4849_v41, %v1045_v53  ;;  %v759_v41 = vadd.f32 %v758_v59, %v4667_v26  ;;  %v1375_v51 = vpop.f32.mrf.mxu3  ;;  %v1981_v17 = vsel %vm1978_vm5, %v1979_v6, %v1980_v35  ;;  %v3031_v26 = vsel %vm3028_vm6, %v3029_v32, %v3030_v62 }
 0x182   : > { %v2371_v32 = vrot.slane %v4867_v23, 2 }
 0x183   : > { %v1886_v57 = vpop.f32.mrf.mxu0  ;;  %v4905_v25 = vadd.f32 %v1884_v14, %v1428_v7  ;;  %v2664_v14 = vrot.slane %v2662_v15, 3 }
 0x185   : > { %v2665_v58 = vor.u32 %v2664_v14, %v2661_v33 }
 0x186   : > { %v984_v61 = vpop.f32.mrf.mxu2 }
 0x187   : > { %v1046_v50 = vadd.f32 %v984_v61, %v759_v41  ;;  %v3032_v61 = vrot.slane %v4867_v23, 3 }
 0x188   : > { %v761_v55 = vpop.f32.mrf.mxu1 }
 0x189   : > { %v1429_v53 = vadd.f32 %v4863_v48, %v1046_v50  ;;  %v762_v42 = vadd.f32 %v761_v55, %v4554_v2  ;;  %v1377_v20 = vpop.f32.mrf.mxu3  ;;  %v2666_v48 = vsel %vm2631_vm4, %v2656_v34, %v2665_v58  ;;  %v4198_v2 = vld [vmem:[%s4270_s23 + $0x18] sm:$0xff]  ;;  %v2673_v55 = vrot.slane %v2671_v49, 3 }
 0x18a   : > { %v1982_v41 = vrot.slane %v4198_v2, 2  ;;  %v4199_v2 = vld [vmem:[%s4270_s23 + $0x20] sm:$0xff] }
 0x18b   : > { %v1889_v40 = vpop.f32.mrf.mxu0  ;;  %3847 = vmatmul.msk.bf16.vlgmr.msra.gmra.mxu1 %vm484_vm1, %v1981_v17  ;;  %3957 = vmatmul.msk.bf16.vlgmr.msra.gmra.mxu2 %vm484_vm1, %v2370_v43  ;;  %v4918_v59 = vadd.f32 %v1886_v57, %v1429_v53  ;;  %v2668_v57 = vshrl.u32 %v4924_v54, 16  ;;  %v2372_v53 = vsel %vm1978_vm5, %v2369_v60, %v2371_v32 }
 0x18c   : > { %v1983_v43 = vsel %vm1978_vm5, %v1980_v35, %v1982_v41 }
 0x18d   : > { %v2670_v14 = vrot.slane %v2668_v57, 2 }
 0x18e   : > { %4041 = vmatmul.msk.bf16.vlgmr.msra.gmra.mxu0 %vm484_vm1, %v3031_v26  ;;  %v987_v7 = vpop.f32.mrf.mxu2  ;;  %4001 = vmatmul.msk.bf16.gmra.mxu3 %vm484_vm1, %v2666_v48  ;;  %v4948_v48 = vld [vmem:[%s4270_s23 + $0x38] sm:$0xff] }
 0x18f   : > { %v1047_v0 = vadd.f32 %v987_v7, %v762_v42  ;;  %v3033_v42 = vsel %vm3028_vm6, %v3030_v62, %v3032_v61  ;;  %v2677_v57 = vshrl.u32 %v4948_v48, 16 }
 0x190   : > { %v763_v22 = vpop.f32.mrf.mxu1 }
 0x191   : > { %v1430_v15 = vadd.f32 %v4878_v16, %v1047_v0  ;;  %v764_v34 = vadd.f32 %v763_v22, %v4565_v19  ;;  %v1380_v50 = vpop.f32.mrf.mxu3  ;;  %v2674_v19 = vor.u32 %v2673_v55, %v2670_v14  ;;  %v2679_v55 = vrot.slane %v2677_v57, 2 }
 0x193   : > { %v1891_v6 = vpop.f32.mrf.mxu0  ;;  %v4930_v36 = vadd.f32 %v1889_v40, %v1430_v15 }
 0x196   : > { %v989_v33 = vpop.f32.mrf.mxu2 }
 0x197   : > { %v1048_v16 = vadd.f32 %v989_v33, %v764_v34  ;;  %v2373_v34 = vrot.slane %v4895_v12, 2 }
 0x198   : > { %v766_v17 = vpop.f32.mrf.mxu1 }
 0x199   : > { %v1431_v40 = vadd.f32 %v4891_v3, %v1048_v16  ;;  %v767_v7 = vadd.f32 %v766_v17, %v4581_v31  ;;  %v1382_v35 = vpop.f32.mrf.mxu3  ;;  %v2675_v3 = vsel %vm2631_vm4, %v2665_v58, %v2674_v19  ;;  %v1984_v31 = vrot.slane %v4199_v2, 2  ;;  %v4200_v2 = vld [vmem:[%s4270_s23 + $0x28] sm:$0xff] }
 0x19a   : > { %v3034_v58 = vrot.slane %v4895_v12, 3 }
 0x19b   : > { %v1894_v26 = vpop.f32.mrf.mxu0  ;;  %3848 = vmatmul.msk.bf16.gmra.mxu1 %vm484_vm1, %v1983_v43  ;;  %3958 = vmatmul.msk.bf16.gmra.mxu2 %vm484_vm1, %v2372_v53  ;;  %v4942_v23 = vadd.f32 %v1891_v6, %v1431_v40  ;;  %v2680_v6 = vshll.u32 %v4948_v48, 16  ;;  %v1985_v53 = vsel %vm1978_vm5, %v1982_v41, %v1984_v31  ;;  %v2374_v40 = vsel %vm1978_vm5, %v2371_v32, %v2373_v34  ;;  %v4970_v32 = vld [vmem:[%s4270_s23 + $0x40] sm:$0xff] }
 0x19c   : > { %v2686_v57 = vshrl.u32 %v4970_v32, 16 }
 0x19d   : > { %v2682_v17 = vrot.slane %v2680_v6, 3 }
 0x19e   : > { %4042 = vmatmul.msk.bf16.gmra.mxu0 %vm484_vm1, %v3033_v42  ;;  %v992_v0 = vpop.f32.mrf.mxu2  ;;  %4002 = vmatmul.msk.bf16.gmra.mxu3 %vm484_vm1, %v2675_v3 }
 0x19f   : > { %v1049_v60 = vadd.f32 %v992_v0, %v767_v7  ;;  %v3035_v7 = vsel %vm3028_vm6, %v3032_v61, %v3034_v58 }
 0x1a0   : > { %v768_v62 = vpop.f32.mrf.mxu1 }
 0x1a1   : > { %v1432_v22 = vadd.f32 %v1375_v51, %v1049_v60  ;;  %v769_v33 = vadd.f32 %v768_v62, %v4592_v44  ;;  %v1385_v16 = vpop.f32.mrf.mxu3  ;;  %v2683_v44 = vor.u32 %v2682_v17, %v2679_v55  ;;  %v2688_v17 = vrot.slane %v2686_v57, 2 }
 0x1a3   : > { %v1896_v15 = vpop.f32.mrf.mxu0  ;;  %v4953_v49 = vadd.f32 %v1894_v26, %v1432_v22 }
 0x1a6   : > { %v994_v14 = vpop.f32.mrf.mxu2 }
 0x1a7   : > { %v1050_v51 = vadd.f32 %v994_v14, %v769_v33  ;;  %v2375_v33 = vrot.slane %v4924_v54, 2 }
 0x1a8   : > { %v771_v43 = vpop.f32.mrf.mxu1 }
 0x1a9   : > { %v1433_v26 = vadd.f32 %v1377_v20, %v1050_v51  ;;  %v772_v0 = vadd.f32 %v771_v43, %v4608_v56  ;;  %v1387_v60 = vpop.f32.mrf.mxu3  ;;  %v2684_v20 = vsel %vm2631_vm4, %v2674_v19, %v2683_v44  ;;  %v1986_v56 = vrot.slane %v4200_v2, 2  ;;  %v4201_v2 = vld [vmem:[%s4270_s23 + $0x30] sm:$0xff] }
 0x1aa   : > { %v3036_v19 = vrot.slane %v4924_v54, 3 }
 0x1ab   : > { %v1899_v42 = vpop.f32.mrf.mxu0  ;;  %3849 = vmatmul.msk.bf16.gmra.mxu1 %vm484_vm1, %v1985_v53  ;;  %3959 = vmatmul.msk.bf16.gmra.mxu2 %vm484_vm1, %v2374_v40  ;;  %v4964_v12 = vadd.f32 %v1896_v15, %v1433_v26  ;;  %v2689_v15 = vshll.u32 %v4970_v32, 16  ;;  %v1987_v40 = vsel %vm1978_vm5, %v1984_v31, %v1986_v56  ;;  %v2376_v26 = vsel %vm1978_vm5, %v2373_v34, %v2375_v33  ;;  %v4992_v34 = vld [vmem:[%s4270_s23 + $0x48] sm:$0xff] }
 0x1ac   : > { %v2695_v57 = vshrl.u32 %v4992_v34, 16 }
 0x1ad   : > { %v2691_v43 = vrot.slane %v2689_v15, 3 }
 0x1ae   : > { %4043 = vmatmul.msk.bf16.gmra.mxu0 %vm484_vm1, %v3035_v7  ;;  %v997_v41 = vpop.f32.mrf.mxu2  ;;  %4003 = vmatmul.msk.bf16.gmra.mxu3 %vm484_vm1, %v2684_v20 }
 0x1af   : > { %v1051_v3 = vadd.f32 %v997_v41, %v772_v0  ;;  %v3037_v0 = vsel %vm3028_vm6, %v3034_v58, %v3036_v19 }
 0x1b0   : > { %v773_v61 = vpop.f32.mrf.mxu1 }
 0x1b1   : > { %v1434_v62 = vadd.f32 %v1380_v50, %v1051_v3  ;;  %v774_v14 = vadd.f32 %v773_v61, %v4619_v9  ;;  %v1390_v51 = vpop.f32.mrf.mxu3  ;;  %v2692_v9 = vor.u32 %v2691_v43, %v2688_v17  ;;  %v2697_v43 = vrot.slane %v2695_v57, 2 }
 0x1b3   : > { %v1901_v22 = vpop.f32.mrf.mxu0  ;;  %v4975_v6 = vadd.f32 %v1899_v42, %v1434_v62 }
 0x1b6   : > { %v999_v55 = vpop.f32.mrf.mxu2 }
 0x1b7   : > { %v1052_v50 = vadd.f32 %v999_v55, %v774_v14  ;;  %v2377_v14 = vrot.slane %v4948_v48, 2 }
 0x1b8   : > { %v776_v53 = vpop.f32.mrf.mxu1 }
 0x1b9   : > { %v1435_v42 = vadd.f32 %v1382_v35, %v1052_v50  ;;  %v777_v41 = vadd.f32 %v776_v53, %v4635_v29  ;;  %v1392_v3 = vpop.f32.mrf.mxu3  ;;  %v2693_v35 = vsel %vm2631_vm4, %v2683_v44, %v2692_v9  ;;  %v1988_v29 = vrot.slane %v4201_v2, 2  ;;  %v4202_v2 = vld [vmem:[%s4270_s23 + $0x38] sm:$0xff] }
 0x1ba   : > { %v3038_v44 = vrot.slane %v4948_v48, 3 }
 0x1bb   : > { %v1904_v7 = vpop.f32.mrf.mxu0  ;;  %3850 = vmatmul.msk.bf16.gmra.mxu1 %vm484_vm1, %v1987_v40  ;;  %3960 = vmatmul.msk.bf16.gmra.mxu2 %vm484_vm1, %v2376_v26  ;;  %v4986_v54 = vadd.f32 %v1901_v22, %v1435_v42  ;;  %v2698_v22 = vshll.u32 %v4992_v34, 16  ;;  %v1989_v26 = vsel %vm1978_vm5, %v1986_v56, %v1988_v29  ;;  %v2378_v42 = vsel %vm1978_vm5, %v2375_v33, %v2377_v14  ;;  %v5014_v33 = vld [vmem:[%s4270_s23 + $0x50] sm:$0xff] }
 0x1bc   : > { %v2704_v57 = vshrl.u32 %v5014_v33, 16 }
 0x1bd   : > { %v2700_v53 = vrot.slane %v2698_v22, 3 }
 0x1be   : > { %4044 = vmatmul.msk.bf16.gmra.mxu0 %vm484_vm1, %v3037_v0  ;;  %v1002_v31 = vpop.f32.mrf.mxu2  ;;  %4004 = vmatmul.msk.bf16.gmra.mxu3 %vm484_vm1, %v2693_v35 }
 0x1bf   : > { %v1053_v20 = vadd.f32 %v1002_v31, %v777_v41  ;;  %v3039_v41 = vsel %vm3028_vm6, %v3036_v19, %v3038_v44 }
 0x1c0   : > { %v778_v58 = vpop.f32.mrf.mxu1 }
 0x1c1   : > { %v1436_v61 = vadd.f32 %v1385_v16, %v1053_v20  ;;  %v779_v55 = vadd.f32 %v778_v58, %v4644_v52  ;;  %v1395_v50 = vpop.f32.mrf.mxu3  ;;  %v2701_v52 = vor.u32 %v2700_v53, %v2697_v43 }
 0x1c3   : > { %v1906_v62 = vpop.f32.mrf.mxu0  ;;  %v4997_v15 = vadd.f32 %v1904_v7, %v1436_v61 }
 0x1c6   : > { %v1004_v17 = vpop.f32.mrf.mxu2 }
 0x1c7   : > { %v1054_v16 = vadd.f32 %v1004_v17, %v779_v55  ;;  %v2379_v55 = vrot.slane %v4970_v32, 2  ;;  %v5410_v17 = vld [vmem:[#allocation8_spill] sm:$0xff] }
 0x1c8   : > { %v781_v40 = vpop.f32.mrf.mxu1 }
 0x1c9   : > { %v1437_v7 = vadd.f32 %v1387_v60, %v1054_v16  ;;  %v782_v31 = vadd.f32 %v781_v40, %v4664_v24  ;;  %v1397_v20 = vpop.f32.mrf.mxu3  ;;  %v2702_v60 = vsel %vm2631_vm4, %v2692_v9, %v2701_v52  ;;  %v1990_v24 = vrot.slane %v4202_v2, 2 }
 0x1ca   : > { %v3040_v9 = vrot.slane %v4970_v32, 3  ;;  %v2706_v40 = vrot.slane %v2704_v57, 2 }
 0x1cb   : > { %v1909_v0 = vpop.f32.mrf.mxu0  ;;  %3851 = vmatmul.msk.bf16.gmra.mxu1 %vm484_vm1, %v1989_v26  ;;  %3961 = vmatmul.msk.bf16.gmra.mxu2 %vm484_vm1, %v2378_v42  ;;  %v5008_v48 = vadd.f32 %v1906_v62, %v1437_v7  ;;  %v2707_v62 = vshll.u32 %v5014_v33, 16  ;;  %v1991_v7 = vsel %vm1978_vm5, %v1988_v29, %v1990_v24 }
 0x1cd   : > { %v2709_v26 = vrot.slane %v2707_v62, 3 }
 0x1ce   : > { %4045 = vmatmul.msk.bf16.gmra.mxu0 %vm484_vm1, %v3039_v41  ;;  %v1007_v56 = vpop.f32.mrf.mxu2  ;;  %4005 = vmatmul.msk.bf16.gmra.mxu3 %vm484_vm1, %v2702_v60  ;;  %v5411_v60 = vld [vmem:[#allocation2_spill] sm:$0xff] }
 0x1cf   : > { %v1055_v35 = vadd.f32 %v1007_v56, %v782_v31  ;;  %v3041_v56 = vsel %vm3028_vm6, %v3038_v44, %v3040_v9  ;;  %v2710_v32 = vor.u32 %v2709_v26, %v2706_v40  ;;  %v2381_v40 = vrot.slane %v4992_v34, 2  ;;  %v5412_v26 = vld [vmem:[#allocation3_spill] sm:$0xff] }
 0x1d0   : > { %v783_v19 = vpop.f32.mrf.mxu1 }
 0x1d1   : > { %v1438_v58 = vadd.f32 %v1390_v51, %v1055_v35  ;;  %v784_v16 = vadd.f32 %v783_v19, %v5410_v17  ;;  %v1400_v43 = vpop.f32.mrf.mxu3 }
 0x1d3   : > { %v1911_v61 = vpop.f32.mrf.mxu0  ;;  %v5019_v22 = vadd.f32 %v1909_v0, %v1438_v58  ;;  %v2380_v0 = vsel %vm1978_vm5, %v2377_v14, %v2379_v55  ;;  %v5036_v14 = vld [vmem:[%s4270_s23 + $0x58] sm:$0xff] }
 0x1d4   : > { %v2713_v17 = vshrl.u32 %v5036_v14, 16 }
 0x1d6   : > { %v1009_v53 = vpop.f32.mrf.mxu2 }
 0x1d7   : > { %v1056_v51 = vadd.f32 %v1009_v53, %v784_v16  ;;  %v4203_v53 = vld [vmem:[%s4270_s23 + $0x40] sm:$0xff] }
 0x1d8   : > { %v786_v42 = vpop.f32.mrf.mxu1 }
 0x1d9   : > { %v1439_v41 = vadd.f32 %v1392_v3, %v1056_v51  ;;  %v787_v19 = vadd.f32 %v786_v42, %v5411_v60  ;;  %v1402_v58 = vpop.f32.mrf.mxu3  ;;  %v2711_v3 = vsel %vm2631_vm4, %v2701_v52, %v2710_v32  ;;  %v1992_v51 = vrot.slane %v4203_v53, 2 }
 0x1da   : > { %v3042_v52 = vrot.slane %v4992_v34, 3 }
 0x1db   : > { %v1914_v31 = vpop.f32.mrf.mxu0  ;;  %3852 = vmatmul.msk.bf16.gmra.mxu1 %vm484_vm1, %v1991_v7  ;;  %3962 = vmatmul.msk.bf16.gmra.mxu2 %vm484_vm1, %v2380_v0  ;;  %v5030_v35 = vadd.f32 %v1911_v61, %v1439_v41  ;;  %v2716_v61 = vshll.u32 %v5036_v14, 16  ;;  %v2715_v41 = vrot.slane %v2713_v17, 2 }
 0x1de   : > { %4046 = vmatmul.msk.bf16.gmra.mxu0 %vm484_vm1, %v3041_v56  ;;  %v1012_v29 = vpop.f32.mrf.mxu2  ;;  %4006 = vmatmul.msk.bf16.gmra.mxu3 %vm484_vm1, %v2711_v3  ;;  %v2718_v56 = vrot.slane %v2716_v61, 3  ;;  %v3043_v3 = vsel %vm3028_vm6, %v3040_v9, %v3042_v52 }
 0x1df   : > { %v1057_v57 = vadd.f32 %v1012_v29, %v787_v19  ;;  %v1993_v19 = vsel %vm1978_vm5, %v1990_v24, %v1992_v51 }
 0x1e0   : > { %v788_v44 = vpop.f32.mrf.mxu1  ;;  %v2719_v34 = vor.u32 %v2718_v56, %v2715_v41  ;;  %v4204_v41 = vld [vmem:[%s4270_s23 + $0x48] sm:$0xff] }
 0x1e1   : > { %v1440_v62 = vadd.f32 %v1395_v50, %v1057_v57  ;;  %v789_v42 = vadd.f32 %v788_v44, %v5412_v26  ;;  %v1405_v7 = vpop.f32.mrf.mxu3  ;;  %v1994_v56 = vrot.slane %v4204_v41, 2 }
 0x1e3   : > { %v1916_v2 = vpop.f32.mrf.mxu0  ;;  %v5041_v16 = vadd.f32 %v1914_v31, %v1440_v62  ;;  %v2382_v31 = vsel %vm1978_vm5, %v2379_v55, %v2381_v40  ;;  %v5413_v62 = vld [vmem:[#allocation4_spill] sm:$0xff]  ;;  %v5058_v55 = vld [vmem:[%s4270_s23 + $0x60] sm:$0xff] }
 0x1e6   : > { %v1014_v0 = vpop.f32.mrf.mxu2 }
 0x1e7   : > { %v1058_v50 = vadd.f32 %v1014_v0, %v789_v42  ;;  %v2722_v0 = vshrl.u32 %v5058_v55, 16 }
 0x1e8   : > { %v791_v60 = vpop.f32.mrf.mxu1 }
 0x1e9   : > { %v1441_v29 = vadd.f32 %v1397_v20, %v1058_v50  ;;  %v792_v17 = vadd.f32 %v791_v60, %v5413_v62  ;;  %v1407_v61 = vpop.f32.mrf.mxu3  ;;  %v2720_v20 = vsel %vm2631_vm4, %v2710_v32, %v2719_v34  ;;  %v2383_v60 = vrot.slane %v5014_v33, 2 }
 0x1ea   : > { %v3044_v32 = vrot.slane %v5014_v33, 3  ;;  %v2724_v62 = vrot.slane %v2722_v0, 2  ;;  %v5416_v0 = vld [vmem:[#allocation6_spill] sm:$0xff] }
 0x1eb   : > { %v1919_v57 = vpop.f32.mrf.mxu0  ;;  %3853 = vmatmul.msk.bf16.gmra.mxu1 %vm484_vm1, %v1993_v19  ;;  %3963 = vmatmul.msk.bf16.gmra.mxu2 %vm484_vm1, %v2382_v31  ;;  %v5052_v44 = vadd.f32 %v1916_v2, %v1441_v29  ;;  %v2725_v2 = vshll.u32 %v5058_v55, 16  ;;  %v5414_v19 = vld [vmem:[#allocation5_spill] sm:$0xff] }
 0x1ec   : > { %v3045_v41 = vsel %vm3028_vm6, %v3042_v52, %v3044_v32 }
 0x1ee   : > { %4047 = vmatmul.msk.bf16.gmra.mxu0 %vm484_vm1, %v3043_v3  ;;  %v1017_v24 = vpop.f32.mrf.mxu2  ;;  %4007 = vmatmul.msk.bf16.gmra.mxu3 %vm484_vm1, %v2720_v20 }
 0x1ef   : > { %v1059_v53 = vadd.f32 %v1017_v24, %v792_v17  ;;  %v2727_v17 = vrot.slane %v2725_v2, 3 }
 0x1f0   : > { %v793_v9 = vpop.f32.mrf.mxu1 }
 0x1f1   : > { %v1442_v26 = vadd.f32 %v1400_v43, %v1059_v53  ;;  %v794_v31 = vadd.f32 %v793_v9, %v5414_v19  ;;  %v2889_v29 = vpop.f32.mrf.mxu3  ;;  %v1995_v53 = vsel %vm1978_vm5, %v1992_v51, %v1994_v56  ;;  %v2728_v33 = vor.u32 %v2727_v17, %v2724_v62 }
 0x1f3   : > { %v1921_v42 = vpop.f32.mrf.mxu0  ;;  %v5063_v50 = vadd.f32 %v1919_v57, %v1442_v26  ;;  %v2384_v57 = vsel %vm1978_vm5, %v2381_v40, %v2383_v60 }
 0x1f6   : > { %v1019_v3 = vpop.f32.mrf.mxu2 }
 0x1f7   : > { %v1060_v43 = vadd.f32 %v1019_v3, %v794_v31  ;;  %v5082_v31 = vld [vmem:[%s4270_s23 + $0x68] sm:$0xff] }
 0x1f8   : > { %v796_v24 = vpop.f32.mrf.mxu1  ;;  %v2734_v62 = vshll.u32 %v5082_v31, 16 }
 0x1f9   : > { %v1443_v20 = vadd.f32 %v1402_v58, %v1060_v43  ;;  %v797_v2 = vadd.f32 %v796_v24, %v5416_v0  ;;  %v5078_v19 = vpop.f32.mrf.mxu3  ;;  %v2729_v58 = vsel %vm2631_vm4, %v2719_v34, %v2728_v33  ;;  %v4205_v24 = vld [vmem:[%s4270_s23 + $0x50] sm:$0xff]  ;;  %v3046_v34 = vrot.slane %v5036_v14, 3 }
 0x1fb   : > { %v1924_v26 = vpop.f32.mrf.mxu0  ;;  %3854 = vmatmul.msk.bf16.gmra.mxu1 %vm484_vm1, %v1995_v53  ;;  %3964 = vmatmul.msk.bf16.gmra.mxu2 %vm484_vm1, %v2384_v57  ;;  %v5074_v9 = vadd.f32 %v1921_v42, %v1443_v20  ;;  %v2731_v42 = vshrl.u32 %v5082_v31, 16  ;;  %v1996_v53 = vrot.slane %v4205_v24, 2  ;;  %v2385_v57 = vrot.slane %v5036_v14, 2  ;;  %v5418_v20 = vld [vmem:[#allocation7_spill] sm:$0xff] }
 0x1fd   : > { %5415 = vst [vmem:[#allocation8_spill] sm:$0xff] %v5074_v9  ;;  %v1997_v9 = vsel %vm1978_vm5, %v1994_v56, %v1996_v53 }
 0x1fe   : > { %4048 = vmatmul.msk.bf16.gmra.mxu0 %vm484_vm1, %v3045_v41  ;;  %v1022_v51 = vpop.f32.mrf.mxu2  ;;  %4008 = vmatmul.msk.bf16.gmra.mxu3 %vm484_vm1, %v2729_v58 }
 0x1ff   : > { %v1061_v40 = vadd.f32 %v1022_v51, %v797_v2  ;;  %v2733_v51 = vrot.slane %v2731_v42, 2 }
 0x200   : > { %v798_v52 = vpop.f32.mrf.mxu1 }
 0x201   : > { %v1444_v3 = vadd.f32 %v1405_v7, %v1061_v40  ;;  %v799_v41 = vadd.f32 %v798_v52, %v5418_v20  ;;  %v5093_v0 = vpop.f32.mrf.mxu3  ;;  %v2736_v40 = vrot.slane %v2734_v62, 3  ;;  %v5108_v20 = vld [vmem:[%s4270_s23 + $0x70] sm:$0xff] }
 0x203   : > { %v1926_v43 = vpop.f32.mrf.mxu0  ;;  %v5087_v17 = vadd.f32 %v1924_v26, %v1444_v3  ;;  %v2386_v26 = vsel %vm1978_vm5, %v2383_v60, %v2385_v57  ;;  %v2737_v14 = vor.u32 %v2736_v40, %v2733_v51 }
 0x205   : > { %5417 = vst [vmem:[#allocation2_spill] sm:$0xff] %v5087_v17  ;;  %v3047_v17 = vsel %vm3028_vm6, %v3044_v32, %v3046_v34 }
 0x206   : > { %v1024_v7 = vpop.f32.mrf.mxu2 }
 0x207   : > { %v1062_v2 = vadd.f32 %v1024_v7, %v799_v41  ;;  %v2740_v41 = vshrl.u32 %v5108_v20, 16  ;;  %v2743_v7 = vshll.u32 %v5108_v20, 16 }
 0x208   : > { %v2103_v58 = vpop.f32.mrf.mxu1 }
 0x209   : > { %v1445_v3 = vadd.f32 %v1407_v61, %v1062_v2  ;;  %v2193_v42 = vadd.f32 %v2103_v58, %v4692_v11  ;;  %v5104_v56 = vpop.f32.mrf.mxu3  ;;  %v2738_v61 = vsel %vm2631_vm4, %v2728_v33, %v2737_v14  ;;  %v2387_v2 = vrot.slane %v5058_v55, 2 }
 0x20a   : > { %v3048_v58 = vrot.slane %v5058_v55, 3 }
 0x20b   : > { %v3153_v24 = vpop.f32.mrf.mxu0  ;;  %3855 = vmatmul.msk.bf16.gmra.mxu1 %vm484_vm1, %v1997_v9  ;;  %3965 = vmatmul.msk.bf16.gmra.mxu2 %vm484_vm1, %v2386_v26  ;;  %v5100_v52 = vadd.f32 %v1926_v43, %v1445_v3  ;;  %v5114_v43 = vld [vmem:[%s5397_s2] ss:$0 sm:$0xff] }
 0x20e   : > { %4049 = vmatmul.msk.bf16.gmra.mxu0 %vm484_vm1, %v3047_v17  ;;  %v2492_v62 = vpop.f32.mrf.mxu2  ;;  %4009 = vmatmul.msk.bf16.gmra.mxu3 %vm484_vm1, %v2738_v61 }
 0x20f   : > { %v2582_v60 = vadd.f32 %v2492_v62, %v2193_v42  ;;  %v2742_v42 = vrot.slane %v2740_v41, 2  ;;  %v2745_v62 = vrot.slane %v2743_v7, 3 }
 0x210   : > { %v2105_v32 = vpop.f32.mrf.mxu1 }
 0x211   : > { %v2979_v9 = vadd.f32 %v2889_v29, %v2582_v60  ;;  %v4206_v29 = vld [vmem:[%s4270_s23 + $0x58] sm:$0xff]  ;;  %v2194_v40 = vadd.f32 %v2105_v32, %v4703_v27  ;;  %v5129_v26 = vpop.f32.mrf.mxu3  ;;  %v3049_v27 = vsel %vm3028_vm6, %v3046_v34, %v3048_v58  ;;  %v2746_v32 = vor.u32 %v2745_v62, %v2742_v42  ;;  %v4207_v62 = vld [vmem:[%s4270_s23 + $0x60] sm:$0xff] }
 0x212   : > { %v1998_v33 = vrot.slane %v4206_v29, 2 }
 0x213   : > { %v3155_v17 = vpop.f32.mrf.mxu0  ;;  %v3243_v11 = vadd.f32 %v3153_v24, %v2979_v9  ;;  %v2388_v9 = vsel %vm1978_vm5, %v2385_v57, %v2387_v2  ;;  %v2747_v34 = vsel %vm2631_vm4, %v2737_v14, %v2746_v32 }
 0x214   : > { %v1999_v61 = vsel %vm1978_vm5, %v1996_v53, %v1998_v33 }
 0x215   : > { %v3283_v51 = vadd.f32 %v5114_v43, %v3243_v11 }
 0x216   : > { %v2494_v3 = vpop.f32.mrf.mxu2 }
 0x217   : > { %3319 = vst [vmem:[%s5122_s22] sm:$0xff] %v3283_v51  ;;  %v2583_v24 = vadd.f32 %v2494_v3, %v2194_v40 }
 0x218   : > { %v2108_v60 = vpop.f32.mrf.mxu1 }
 0x219   : > { %v2980_v11 = vadd.f32 %v5078_v19, %v2583_v24  ;;  %v2195_v53 = vadd.f32 %v2108_v60, %v4709_v30  ;;  %v5141_v57 = vpop.f32.mrf.mxu3  ;;  %v2000_v60 = vrot.slane %v4207_v62, 2 }
 0x21b   : > { %v3158_v29 = vpop.f32.mrf.mxu0  ;;  %v3244_v55 = vadd.f32 %v3155_v17, %v2980_v11  ;;  %3856 = vmatmul.msk.bf16.gmra.mxu1 %vm484_vm1, %v1999_v61  ;;  %3966 = vmatmul.msk.bf16.gmra.mxu2 %vm484_vm1, %v2388_v9  ;;  %v5146_v17 = vld [vmem:[%s4270_s23 + $0x78] sm:$0xff]  ;;  %v2389_v61 = vrot.slane %v5082_v31, 2  ;;  %v3050_v11 = vrot.slane %v5082_v31, 3 }
 0x21c   : > { %v2749_v42 = vshrl.u32 %v5146_v17, 16  ;;  %v2752_v30 = vshll.u32 %v5146_v17, 16 }
 0x21d   : > { %v3284_v41 = vadd.f32 %v5114_v43, %v3244_v55 }
 0x21e   : > { %4050 = vmatmul.msk.bf16.gmra.mxu0 %vm484_vm1, %v3049_v27  ;;  %v2497_v7 = vpop.f32.mrf.mxu2  ;;  %4010 = vmatmul.msk.bf16.gmra.mxu3 %vm484_vm1, %v2747_v34 }
 0x21f   : > { %3320 = vst [vmem:[%s5122_s22 + $0x8] sm:$0xff] %v3284_v41  ;;  %v2584_v19 = vadd.f32 %v2497_v7, %v2195_v53  ;;  %v2754_v41 = vrot.slane %v2752_v30, 3  ;;  %v2001_v7 = vsel %vm1978_vm5, %v1998_v33, %v2000_v60 }
 0x220   : > { %v2110_v51 = vpop.f32.mrf.mxu1 }
 0x221   : > { %v2981_v40 = vadd.f32 %v5093_v0, %v2584_v19  ;;  %v2196_v9 = vadd.f32 %v2110_v51, %v4720_v37  ;;  %v5157_v27 = vpop.f32.mrf.mxu3  ;;  %v2390_v19 = vsel %vm1978_vm5, %v2387_v2, %v2389_v61  ;;  %v3051_v37 = vsel %vm3028_vm6, %v3048_v58, %v3050_v11 }
 0x223   : > { %v3160_v3 = vpop.f32.mrf.mxu0  ;;  %v3245_v24 = vadd.f32 %v3158_v29, %v2981_v40  ;;  %v2751_v29 = vrot.slane %v2749_v42, 2 }
 0x225   : > { %v3285_v14 = vadd.f32 %v5114_v43, %v3245_v24  ;;  %v2755_v51 = vor.u32 %v2754_v41, %v2751_v29  ;;  %v2391_v41 = vrot.slane %v5108_v20, 2 }
 0x226   : > { %v2499_v0 = vpop.f32.mrf.mxu2 }
 0x227   : > { %3321 = vst [vmem:[%s5122_s22 + $0x10] sm:$0xff] %v3285_v14  ;;  %v2585_v55 = vadd.f32 %v2499_v0, %v2196_v9  ;;  %v2756_v58 = vsel %vm2631_vm4, %v2746_v32, %v2755_v51 }
 0x228   : > { %v2113_v53 = vpop.f32.mrf.mxu1 }
 0x229   : > { %v2982_v34 = vadd.f32 %v5104_v56, %v2585_v55  ;;  %v2197_v33 = vadd.f32 %v2113_v53, %v4726_v1  ;;  %v5169_v2 = vpop.f32.mrf.mxu3  ;;  %v4208_v55 = vld [vmem:[%s4270_s23 + $0x68] sm:$0xff] }
 0x22a   : > { %v2002_v29 = vrot.slane %v4208_v55, 2 }
 0x22b   : > { %v3163_v40 = vpop.f32.mrf.mxu0  ;;  %v3246_v31 = vadd.f32 %v3160_v3, %v2982_v34  ;;  %3857 = vmatmul.msk.bf16.gmra.mxu1 %vm484_vm1, %v2001_v7  ;;  %3967 = vmatmul.msk.bf16.gmra.mxu2 %vm484_vm1, %v2390_v19  ;;  %v5174_v3 = vld [vmem:[%s4270_s23 + $0x80] sm:$0xff]  ;;  %v3052_v7 = vrot.slane %v5108_v20, 3 }
 0x22c   : > { %v2758_v0 = vshrl.u32 %v5174_v3, 16  ;;  %v2761_v1 = vshll.u32 %v5174_v3, 16 }
 0x22d   : > { %v3286_v24 = vadd.f32 %v5114_v43, %v3246_v31 }
 0x22e   : > { %4051 = vmatmul.msk.bf16.gmra.mxu0 %vm484_vm1, %v3051_v37  ;;  %v2502_v42 = vpop.f32.mrf.mxu2  ;;  %4011 = vmatmul.msk.bf16.gmra.mxu3 %vm484_vm1, %v2756_v58  ;;  %v2763_v37 = vrot.slane %v2761_v1, 3 }
 0x22f   : > { %3322 = vst [vmem:[%s5122_s22 + $0x18] sm:$0xff] %v3286_v24  ;;  %v2586_v56 = vadd.f32 %v2502_v42, %v2197_v33  ;;  %v2003_v24 = vsel %vm1978_vm5, %v2000_v60, %v2002_v29  ;;  %v2392_v33 = vsel %vm1978_vm5, %v2389_v61, %v2391_v41 }
 0x230   : > { %v2115_v30 = vpop.f32.mrf.mxu1 }
 0x231   : > { %v2983_v62 = vadd.f32 %v5129_v26, %v2586_v56  ;;  %v2198_v53 = vadd.f32 %v2115_v30, %v4739_v46  ;;  %v5185_v19 = vpop.f32.mrf.mxu3  ;;  %v3053_v46 = vsel %vm3028_vm6, %v3050_v11, %v3052_v7 }
 0x233   : > { %v3165_v14 = vpop.f32.mrf.mxu0  ;;  %v3247_v9 = vadd.f32 %v3163_v40, %v2983_v62  ;;  %v2760_v40 = vrot.slane %v2758_v0, 2 }
 0x235   : > { %v3287_v32 = vadd.f32 %v5114_v43, %v3247_v9  ;;  %v2764_v58 = vor.u32 %v2763_v37, %v2760_v40  ;;  %v3054_v37 = vrot.slane %v5146_v17, 3 }
 0x236   : > { %v2504_v26 = vpop.f32.mrf.mxu2 }
 0x237   : > { %3323 = vst [vmem:[%s5122_s22 + $0x20] sm:$0xff] %v3287_v32  ;;  %v2587_v34 = vadd.f32 %v2504_v26, %v2198_v53  ;;  %v2765_v11 = vsel %vm2631_vm4, %v2755_v51, %v2764_v58  ;;  %v4209_v53 = vld [vmem:[%s4270_s23 + $0x70] sm:$0xff] }
 0x238   : > { %v2118_v31 = vpop.f32.mrf.mxu1  ;;  %v2004_v26 = vrot.slane %v4209_v53, 2  ;;  %v4210_v53 = vld [vmem:[%s4270_s23 + $0x78] sm:$0xff] }
 0x239   : > { %v2984_v42 = vadd.f32 %v5141_v57, %v2587_v34  ;;  %v2199_v60 = vadd.f32 %v2118_v31, %v4751_v4  ;;  %v5197_v61 = vpop.f32.mrf.mxu3  ;;  %v2393_v34 = vrot.slane %v5146_v17, 2 }
 0x23b   : > { %v3168_v56 = vpop.f32.mrf.mxu0  ;;  %v3248_v20 = vadd.f32 %v3165_v14, %v2984_v42  ;;  %3858 = vmatmul.msk.bf16.gmra.mxu1 %vm484_vm1, %v2003_v24  ;;  %3968 = vmatmul.msk.bf16.gmra.mxu2 %vm484_vm1, %v2392_v33  ;;  %v5202_v14 = vld [vmem:[%s4270_s23 + $0x88] sm:$0xff] }
 0x23c   : > { %v2767_v32 = vshrl.u32 %v5202_v14, 16  ;;  %v2770_v4 = vshll.u32 %v5202_v14, 16 }
 0x23d   : > { %v3288_v30 = vadd.f32 %v5114_v43, %v3248_v20  ;;  %v2394_v20 = vsel %vm1978_vm5, %v2391_v41, %v2393_v34 }
 0x23e   : > { %4052 = vmatmul.msk.bf16.gmra.mxu0 %vm484_vm1, %v3053_v46  ;;  %v2507_v62 = vpop.f32.mrf.mxu2  ;;  %4012 = vmatmul.msk.bf16.gmra.mxu3 %vm484_vm1, %v2765_v11  ;;  %v2769_v33 = vrot.slane %v2767_v32, 2  ;;  %v2772_v42 = vrot.slane %v2770_v4, 3  ;;  %v2005_v46 = vsel %vm1978_vm5, %v2002_v29, %v2004_v26 }
 0x23f   : > { %3324 = vst [vmem:[%s5122_s22 + $0x28] sm:$0xff] %v3288_v30  ;;  %v2588_v57 = vadd.f32 %v2507_v62, %v2199_v60 }
 0x240   : > { %v2120_v9 = vpop.f32.mrf.mxu1  ;;  %v2773_v62 = vor.u32 %v2772_v42, %v2769_v33 }
 0x241   : > { %v2985_v0 = vadd.f32 %v5157_v27, %v2588_v57  ;;  %v2200_v40 = vadd.f32 %v2120_v9, %v4765_v13  ;;  %v5213_v31 = vpop.f32.mrf.mxu3  ;;  %v3055_v13 = vsel %vm3028_vm6, %v3052_v7, %v3054_v37  ;;  %v5230_v9 = vld [vmem:[%s4270_s23 + $0x90] sm:$0xff] }
 0x242   : > { %v2774_v7 = vsel %vm2631_vm4, %v2764_v58, %v2773_v62  ;;  %v2776_v4 = vshrl.u32 %v5230_v9, 16 }
 0x243   : > { %v3170_v1 = vpop.f32.mrf.mxu0  ;;  %v3249_v55 = vadd.f32 %v3168_v56, %v2985_v0 }
 0x245   : > { %v3289_v51 = vadd.f32 %v5114_v43, %v3249_v55 }
 0x246   : > { %v2509_v27 = vpop.f32.mrf.mxu2 }
 0x247   : > { %3325 = vst [vmem:[%s5122_s22 + $0x30] sm:$0xff] %v3289_v51  ;;  %v2589_v24 = vadd.f32 %v2509_v27, %v2200_v40  ;;  %v2006_v51 = vrot.slane %v4210_v53, 2  ;;  %v2395_v40 = vrot.slane %v5174_v3, 2  ;;  %v2397_v53 = vrot.slane %v5202_v14, 2 }
 0x248   : > { %v2123_v56 = vpop.f32.mrf.mxu1 }
 0x249   : > { %v2986_v30 = vadd.f32 %v5169_v2, %v2589_v24  ;;  %v2201_v29 = vadd.f32 %v2123_v56, %v4775_v21  ;;  %v5225_v41 = vpop.f32.mrf.mxu3  ;;  %v2779_v21 = vshll.u32 %v5230_v9, 16  ;;  %v3056_v24 = vrot.slane %v5174_v3, 3 }
 0x24a   : > { %v2778_v56 = vrot.slane %v2776_v4, 2  ;;  %v4211_v4 = vld [vmem:[%s4270_s23 + $0x80] sm:$0xff] }
 0x24b   : > { %v3173_v60 = vpop.f32.mrf.mxu0  ;;  %v3250_v17 = vadd.f32 %v3170_v1, %v2986_v30  ;;  %3859 = vmatmul.msk.bf16.gmra.mxu1 %vm484_vm1, %v2005_v46  ;;  %3969 = vmatmul.msk.bf16.gmra.mxu2 %vm484_vm1, %v2394_v20  ;;  %v2781_v46 = vrot.slane %v2779_v21, 3  ;;  %v2007_v30 = vsel %vm1978_vm5, %v2004_v26, %v2006_v51  ;;  %v2008_v21 = vrot.slane %v4211_v4, 2 }
 0x24c   : > { %v2399_v4 = vrot.slane %v5230_v9, 2 }
 0x24d   : > { %v3290_v57 = vadd.f32 %v5114_v43, %v3250_v17 }
 0x24e   : > { %4053 = vmatmul.msk.bf16.gmra.mxu0 %vm484_vm1, %v3055_v13  ;;  %v2512_v11 = vpop.f32.mrf.mxu2  ;;  %4013 = vmatmul.msk.bf16.gmra.mxu3 %vm484_vm1, %v2774_v7 }
 0x24f   : > { %3326 = vst [vmem:[%s5122_s22 + $0x38] sm:$0xff] %v3290_v57  ;;  %v2590_v2 = vadd.f32 %v2512_v11, %v2201_v29  ;;  %v2782_v57 = vor.u32 %v2781_v46, %v2778_v56 }
 0x250   : > { %v2125_v0 = vpop.f32.mrf.mxu1 }
 0x251   : > { %v2987_v1 = vadd.f32 %v5185_v19, %v2590_v2  ;;  %v2202_v27 = vadd.f32 %v2125_v0, %v4786_v28  ;;  %v5241_v33 = vpop.f32.mrf.mxu3  ;;  %v3057_v28 = vsel %vm3028_vm6, %v3054_v37, %v3056_v24  ;;  %v2783_v37 = vsel %vm2631_vm4, %v2773_v62, %v2782_v57  ;;  %v5258_v2 = vld [vmem:[%s4270_s23 + $0x98] sm:$0xff] }
 0x253   : > { %v3175_v55 = vpop.f32.mrf.mxu0  ;;  %v3251_v32 = vadd.f32 %v3173_v60, %v2987_v1  ;;  %v2396_v60 = vsel %vm1978_vm5, %v2393_v34, %v2395_v40 }
 0x255   : > { %v3291_v58 = vadd.f32 %v5114_v43, %v3251_v32  ;;  %v2785_v32 = vshrl.u32 %v5258_v2, 16 }
 0x256   : > { %v2514_v19 = vpop.f32.mrf.mxu2 }
 0x257   : > { %3327 = vst [vmem:[%s5122_s22 + $0x40] sm:$0xff] %v3291_v58  ;;  %v2591_v42 = vadd.f32 %v2514_v19, %v2202_v27  ;;  %v3058_v27 = vrot.slane %v5202_v14, 3  ;;  %v2787_v56 = vrot.slane %v2785_v32, 2  ;;  %v4212_v32 = vld [vmem:[%s4270_s23 + $0x88] sm:$0xff] }
 0x258   : > { %v2128_v20 = vpop.f32.mrf.mxu1 }
 0x259   : > { %v2988_v13 = vadd.f32 %v5197_v61, %v2591_v42  ;;  %v2203_v26 = vadd.f32 %v2128_v20, %v4792_v5  ;;  %v5253_v34 = vpop.f32.mrf.mxu3  ;;  %v2788_v5 = vshll.u32 %v5258_v2, 16 }
 0x25b   : > { %v3178_v17 = vpop.f32.mrf.mxu0  ;;  %v3252_v3 = vadd.f32 %v3175_v55, %v2988_v13  ;;  %3860 = vmatmul.msk.bf16.gmra.mxu1 %vm484_vm1, %v2007_v30  ;;  %3970 = vmatmul.msk.bf16.gmra.mxu2 %vm484_vm1, %v2396_v60  ;;  %v2790_v46 = vrot.slane %v2788_v5, 3  ;;  %v2009_v30 = vsel %vm1978_vm5, %v2006_v51, %v2008_v21  ;;  %v2398_v60 = vsel %vm1978_vm5, %v2395_v40, %v2397_v53 }
 0x25c   : > { %v2010_v5 = vrot.slane %v4212_v32, 2 }
 0x25d   : > { %v3292_v29 = vadd.f32 %v5114_v43, %v3252_v3  ;;  %v2791_v3 = vor.u32 %v2790_v46, %v2787_v56 }
 0x25e   : > { %4054 = vmatmul.msk.bf16.gmra.mxu0 %vm484_vm1, %v3057_v28  ;;  %v2517_v11 = vpop.f32.mrf.mxu2  ;;  %4014 = vmatmul.msk.bf16.gmra.mxu3 %vm484_vm1, %v2783_v37  ;;  %v2618_v28 = vld [vmem:[%s4270_s23 + $0xa0] sm:$0x3] }
 0x25f   : > { %3328 = vst [vmem:[%s5122_s22 + $0x48] sm:$0xff] %v3292_v29  ;;  %v2592_v61 = vadd.f32 %v2517_v11, %v2203_v26  ;;  %v2629_v29 = vunpack.c.l.b16 %v2618_v28 }
 0x260   : > { %v2130_v7 = vpop.f32.mrf.mxu1 }
 0x261   : > { %v2989_v0 = vadd.f32 %v5213_v31, %v2592_v61  ;;  %v2204_v58 = vadd.f32 %v2130_v7, %v4803_v10  ;;  %v5269_v31 = vpop.f32.mrf.mxu3  ;;  %v3059_v10 = vsel %vm3028_vm6, %v3056_v24, %v3058_v27  ;;  %v2792_v24 = vsel %vm2631_vm4, %v2782_v57, %v2791_v3 }
 0x262   : > { %v5284_v61 = vpack.c.b16 %v2629_v29, %v2629_v29 }
 0x263   : > { %v3180_v1 = vpop.f32.mrf.mxu0  ;;  %v3253_v55 = vadd.f32 %v3178_v17, %v2989_v0 }
 0x265   : > { %v3293_v62 = vadd.f32 %v5114_v43, %v3253_v55  ;;  %v2794_v55 = vshrl.u32 %v5284_v61, 16 }
 0x266   : > { %v2519_v19 = vpop.f32.mrf.mxu2 }
 0x267   : > { %3329 = vst [vmem:[%s5122_s22 + $0x50] sm:$0xff] %v3293_v62  ;;  %v2593_v42 = vadd.f32 %v2519_v19, %v2204_v58  ;;  %v3060_v58 = vrot.slane %v5230_v9, 3  ;;  %v2796_v56 = vrot.slane %v2794_v55, 2 }
 0x268   : > { %v2133_v20 = vpop.f32.mrf.mxu1 }
 0x269   : > { %v2990_v13 = vadd.f32 %v5225_v41, %v2593_v42  ;;  %v2205_v40 = vadd.f32 %v2133_v20, %v4811_v8  ;;  %v2926_v26 = vpop.f32.mrf.mxu3  ;;  %v2797_v8 = vshll.u32 %v5284_v61, 16 }
 0x26b   : > { %v3183_v17 = vpop.f32.mrf.mxu0  ;;  %v3254_v14 = vadd.f32 %v3180_v1, %v2990_v13  ;;  %3861 = vmatmul.msk.bf16.gmra.mxu1 %vm484_vm1, %v2009_v30  ;;  %3971 = vmatmul.msk.bf16.gmra.mxu2 %vm484_vm1, %v2398_v60  ;;  %v2799_v46 = vrot.slane %v2797_v8, 3  ;;  %v2011_v30 = vsel %vm1978_vm5, %v2008_v21, %v2010_v5  ;;  %v2400_v60 = vsel %vm1978_vm5, %v2397_v53, %v2399_v4 }
 0x26d   : > { %v3294_v51 = vadd.f32 %v5114_v43, %v3254_v14  ;;  %v2800_v9 = vor.u32 %v2799_v46, %v2796_v56 }
 0x26e   : > { %4055 = vmatmul.msk.bf16.gmra.mxu0 %vm484_vm1, %v3059_v10  ;;  %v2522_v41 = vpop.f32.mrf.mxu2  ;;  %4015 = vmatmul.msk.bf16.gmra.mxu3 %vm484_vm1, %v2792_v24  ;;  %v3061_v10 = vsel %vm3028_vm6, %v3058_v27, %v3060_v58 }
 0x26f   : > { %3330 = vst [vmem:[%s5122_s22 + $0x58] sm:$0xff] %v3294_v51  ;;  %v2594_v11 = vadd.f32 %v2522_v41, %v2205_v40  ;;  %v2801_v27 = vsel %vm2631_vm4, %v2791_v3, %v2800_v9 }
 0x270   : > { %v2135_v37 = vpop.f32.mrf.mxu1 }
 0x271   : > { %v2991_v7 = vadd.f32 %v5241_v33, %v2594_v11  ;;  %v2206_v62 = vadd.f32 %v2135_v37, %v4827_v45  ;;  %v2929_v19 = vpop.f32.mrf.mxu3  ;;  %v4213_v11 = vld [vmem:[%s4270_s23 + $0x90] sm:$0xff]  ;;  %v2401_v37 = vrot.slane %v5258_v2, 2 }
 0x272   : > { %v2012_v24 = vrot.slane %v4213_v11, 2 }
 0x273   : > { %v3185_v0 = vpop.f32.mrf.mxu0  ;;  %v3255_v1 = vadd.f32 %v3183_v17, %v2991_v7  ;;  %v2402_v32 = vsel %vm1978_vm5, %v2399_v4, %v2401_v37 }
 0x274   : > { %v2013_v8 = vsel %vm1978_vm5, %v2010_v5, %v2012_v24 }
 0x275   : > { %v3295_v57 = vadd.f32 %v5114_v43, %v3255_v1 }
 0x276   : > { %v2524_v33 = vpop.f32.mrf.mxu2 }
 0x277   : > { %3331 = vst [vmem:[%s5122_s22 + $0x60] sm:$0xff] %v3295_v57  ;;  %v2595_v42 = vadd.f32 %v2524_v33, %v2206_v62 }
 0x278   : > { %v2138_v20 = vpop.f32.mrf.mxu1 }
 0x279   : > { %v2992_v13 = vadd.f32 %v5253_v34, %v2595_v42  ;;  %v2207_v21 = vadd.f32 %v2138_v20, %v4845_v38  ;;  %v2931_v14 = vpop.f32.mrf.mxu3  ;;  %v2265_v42 = vld [vmem:[%s4270_s23 + $0xa0] sm:$0x1] }
 0x27b   : > { %v3188_v17 = vpop.f32.mrf.mxu0  ;;  %v3256_v45 = vadd.f32 %v3185_v0, %v2992_v13  ;;  %3862 = vmatmul.msk.bf16.gmra.mxu1 %vm484_vm1, %v2011_v30  ;;  %3972 = vmatmul.msk.bf16.gmra.mxu2 %vm484_vm1, %v2400_v60  ;;  %v3062_v0 = vrot.slane %v5258_v2, 3 }
 0x27d   : > { %v3296_v28 = vadd.f32 %v5114_v43, %v3256_v45  ;;  %v3063_v33 = vsel %vm3028_vm6, %v3060_v58, %v3062_v0 }
 0x27e   : > { %4056 = vmatmul.msk.bf16.gmra.mxu0 %vm484_vm1, %v3061_v10  ;;  %v2527_v53 = vpop.f32.mrf.mxu2  ;;  %4016 = vmatmul.msk.bf16.gmra.mxu3 %vm484_vm1, %v2801_v27 }
 0x27f   : > { %3332 = vst [vmem:[%s5122_s22 + $0x68] sm:$0xff] %v3296_v28  ;;  %v2596_v34 = vadd.f32 %v2527_v53, %v2207_v21  ;;  %v3064_v28 = vrot.slane %v5284_v61, 3 }
 0x280   : > { %v2140_v29 = vpop.f32.mrf.mxu1 }
 0x281   : > { %v2993_v51 = vadd.f32 %v5269_v31, %v2596_v34  ;;  %v2208_v7 = vadd.f32 %v2140_v29, %v4857_v63  ;;  %v2934_v1 = vpop.f32.mrf.mxu3  ;;  %v2348_v63 = vunpack.c.l.b16 %v2265_v42 }
 0x283   : > { %v3190_v40 = vpop.f32.mrf.mxu0  ;;  %v3257_v41 = vadd.f32 %v3188_v17, %v2993_v51  ;;  %v2367_v58 = vpack.c.b16 %v2348_v63, %v2348_v63  ;;  %v2014_v17 = vrot.slane %v4861_v18, 2  ;;  %v3065_v18 = vsel %vm3028_vm6, %v3062_v0, %v3064_v28 }
 0x285   : > { %v3297_v38 = vadd.f32 %v5114_v43, %v3257_v41  ;;  %v2403_v10 = vrot.slane %v2367_v58, 2  ;;  %v2015_v27 = vsel %vm1978_vm5, %v2012_v24, %v2014_v17 }
 0x286   : > { %v2529_v3 = vpop.f32.mrf.mxu2 }
 0x287   : > { %3333 = vst [vmem:[%s5122_s22 + $0x70] sm:$0xff] %v3297_v38  ;;  %v2597_v55 = vadd.f32 %v2529_v3, %v2208_v7 }
 0x288   : > { %v2143_v31 = vpop.f32.mrf.mxu1 }
 0x289   : > { %v2994_v57 = vadd.f32 %v2926_v26, %v2597_v55  ;;  %v2209_v46 = vadd.f32 %v2143_v31, %v4875_v47  ;;  %v2936_v5 = vpop.f32.mrf.mxu3 }
 0x28b   : > { %v3193_v62 = vpop.f32.mrf.mxu0  ;;  %v3258_v56 = vadd.f32 %v3190_v40, %v2994_v57  ;;  %3863 = vmatmul.msk.bf16.gmra.mxu1 %vm484_vm1, %v2013_v8  ;;  %3973 = vmatmul.msk.bf16.gmra.mxu2 %vm484_vm1, %v2402_v32 }
 0x28d   : > { %v3298_v2 = vadd.f32 %v5114_v43, %v3258_v56 }
 0x28e   : > { %4057 = vmatmul.msk.bf16.gmra.mxu0 %vm484_vm1, %v3063_v33  ;;  %v2532_v4 = vpop.f32.mrf.mxu2 }
 0x28f   : > { %3334 = vst [vmem:[%s5122_s22 + $0x78] sm:$0xff] %v3298_v2  ;;  %v2598_v26 = vadd.f32 %v2532_v4, %v2209_v46 }
 0x290   : > { %v2145_v20 = vpop.f32.mrf.mxu1 }
 0x291   : > { %v2995_v30 = vadd.f32 %v2929_v19, %v2598_v26  ;;  %v2210_v9 = vadd.f32 %v2145_v20, %v4887_v39  ;;  %v2939_v47 = vpop.f32.mrf.mxu3  ;;  %v2404_v19 = vsel %vm1978_vm5, %v2401_v37, %v2403_v10 }
 0x293   : > { %v3195_v60 = vpop.f32.mrf.mxu0  ;;  %v3259_v13 = vadd.f32 %v3193_v62, %v2995_v30 }
 0x295   : > { %v3299_v45 = vadd.f32 %v5114_v43, %v3259_v13 }
 0x296   : > { %v2534_v21 = vpop.f32.mrf.mxu2 }
 0x297   : > { %3335 = vst [vmem:[%s5122_s22 + $0x80] sm:$0xff] %v3299_v45  ;;  %v2599_v53 = vadd.f32 %v2534_v21, %v2210_v9 }
 0x298   : > { %v2148_v34 = vpop.f32.mrf.mxu1 }
 0x299   : > { %v2996_v29 = vadd.f32 %v2931_v14, %v2599_v53  ;;  %v2211_v61 = vadd.f32 %v2148_v34, %v4905_v25  ;;  %v2941_v41 = vpop.f32.mrf.mxu3 }
 0x29b   : > { %v3198_v51 = vpop.f32.mrf.mxu0  ;;  %v3260_v40 = vadd.f32 %v3195_v60, %v2996_v29  ;;  %3864 = vmatmul.msk.bf16.gmra.mxu1 %vm484_vm1, %v2015_v27  ;;  %3974 = vmatmul.msk.bf16.gmra.mxu2 %vm484_vm1, %v2404_v19 }
 0x29d   : > { %v3300_v39 = vadd.f32 %v5114_v43, %v3260_v40 }
 0x29e   : > { %4058 = vmatmul.msk.bf16.gmra.mxu0 %vm484_vm1, %v3065_v18  ;;  %v2537_v11 = vpop.f32.mrf.mxu2 }
 0x29f   : > { %3336 = vst [vmem:[%s5122_s22 + $0x88] sm:$0xff] %v3300_v39  ;;  %v2600_v24 = vadd.f32 %v2537_v11, %v2211_v61 }
 0x2a0   : > { %v2150_v14 = vpop.f32.mrf.mxu1 }
 0x2a1   : > { %v2997_v37 = vadd.f32 %v2934_v1, %v2600_v24  ;;  %v2212_v3 = vadd.f32 %v2150_v14, %v4918_v59  ;;  %v2944_v31 = vpop.f32.mrf.mxu3 }
 0x2a3   : > { %v3200_v38 = vpop.f32.mrf.mxu0  ;;  %v3261_v7 = vadd.f32 %v3198_v51, %v2997_v37 }
 0x2a5   : > { %v3301_v0 = vadd.f32 %v5114_v43, %v3261_v7 }
 0x2a6   : > { %v2539_v55 = vpop.f32.mrf.mxu2 }
 0x2a7   : > { %3337 = vst [vmem:[%s5122_s22 + $0x90] sm:$0xff] %v3301_v0  ;;  %v2601_v8 = vadd.f32 %v2539_v55, %v2212_v3 }
 0x2a8   : > { %v2153_v32 = vpop.f32.mrf.mxu1 }
 0x2a9   : > { %v2998_v57 = vadd.f32 %v2936_v5, %v2601_v8  ;;  %v2213_v1 = vadd.f32 %v2153_v32, %v4930_v36  ;;  %v2946_v2 = vpop.f32.mrf.mxu3 }
 0x2ab   : > { %v3203_v25 = vpop.f32.mrf.mxu0  ;;  %v3262_v62 = vadd.f32 %v3200_v38, %v2998_v57 }
 0x2ad   : > { %v3302_v33 = vadd.f32 %v5114_v43, %v3262_v62 }
 0x2ae   : > { %v2542_v42 = vpop.f32.mrf.mxu2 }
 0x2af   : > { %3338 = vst [vmem:[%s5122_s22 + $0x98] sm:$0xff] %v3302_v33  ;;  %v2602_v56 = vadd.f32 %v2542_v42, %v2213_v1 }
 0x2b0   : > { %v2155_v63 = vpop.f32.mrf.mxu1 }
 0x2b1   : > { %v2999_v46 = vadd.f32 %v2939_v47, %v2602_v56  ;;  %v2214_v5 = vadd.f32 %v2155_v63, %v4942_v23  ;;  %v2949_v36 = vpop.f32.mrf.mxu3 }
 0x2b3   : > { %v3205_v59 = vpop.f32.mrf.mxu0  ;;  %v3263_v4 = vadd.f32 %v3203_v25, %v2999_v46 }
 0x2b5   : > { %v3303_v26 = vadd.f32 %v5114_v43, %v3263_v4 }
 0x2b6   : > { %v2544_v20 = vpop.f32.mrf.mxu2 }
 0x2b7   : > { %3339 = vst [vmem:[%s5122_s22 + $0xa0] sm:$0xff] %v3303_v26  ;;  %v2603_v58 = vadd.f32 %v2544_v20, %v2214_v5 }
 0x2b8   : > { %v2158_v30 = vpop.f32.mrf.mxu1 }
 0x2b9   : > { %v3000_v60 = vadd.f32 %v2941_v41, %v2603_v58  ;;  %v2215_v45 = vadd.f32 %v2158_v30, %v4953_v49  ;;  %v2951_v34 = vpop.f32.mrf.mxu3 }
 0x2bb   : > { %v3208_v13 = vpop.f32.mrf.mxu0  ;;  %v3264_v17 = vadd.f32 %v3205_v59, %v3000_v60 }
 0x2bd   : > { %v3304_v10 = vadd.f32 %v5114_v43, %v3264_v17 }
 0x2be   : > { %v2547_v9 = vpop.f32.mrf.mxu2 }
 0x2bf   : > { %3340 = vst [vmem:[%s5122_s22 + $0xa8] sm:$0xff] %v3304_v10  ;;  %v2604_v28 = vadd.f32 %v2547_v9, %v2215_v45 }
 0x2c0   : > { %v2160_v47 = vpop.f32.mrf.mxu1 }
 0x2c1   : > { %v3001_v21 = vadd.f32 %v2944_v31, %v2604_v28  ;;  %v2216_v19 = vadd.f32 %v2160_v47, %v4964_v12  ;;  %v2954_v24 = vpop.f32.mrf.mxu3 }
 0x2c3   : > { %v3210_v53 = vpop.f32.mrf.mxu0  ;;  %v3265_v23 = vadd.f32 %v3208_v13, %v3001_v21 }
 0x2c5   : > { %v3305_v27 = vadd.f32 %v5114_v43, %v3265_v23 }
 0x2c6   : > { %v2549_v29 = vpop.f32.mrf.mxu2 }
 0x2c7   : > { %3341 = vst [vmem:[%s5122_s22 + $0xb0] sm:$0xff] %v3305_v27  ;;  %v2605_v51 = vadd.f32 %v2549_v29, %v2216_v19 }
 0x2c8   : > { %v2163_v18 = vpop.f32.mrf.mxu1 }
 0x2c9   : > { %v3002_v40 = vadd.f32 %v2946_v2, %v2605_v51  ;;  %v2217_v41 = vadd.f32 %v2163_v18, %v4975_v6  ;;  %v2956_v32 = vpop.f32.mrf.mxu3 }
 0x2cb   : > { %v3213_v49 = vpop.f32.mrf.mxu0  ;;  %v3266_v39 = vadd.f32 %v3210_v53, %v3002_v40 }
 0x2cd   : > { %v3306_v61 = vadd.f32 %v5114_v43, %v3266_v39 }
 0x2ce   : > { %v2552_v11 = vpop.f32.mrf.mxu2 }
 0x2cf   : > { %3342 = vst [vmem:[%s5122_s22 + $0xb8] sm:$0xff] %v3306_v61  ;;  %v2606_v14 = vadd.f32 %v2552_v11, %v2217_v41 }
 0x2d0   : > { %v2165_v37 = vpop.f32.mrf.mxu1 }
 0x2d1   : > { %v3003_v38 = vadd.f32 %v2949_v36, %v2606_v14  ;;  %v2218_v3 = vadd.f32 %v2165_v37, %v4986_v54  ;;  %v2959_v54 = vpop.f32.mrf.mxu3 }
 0x2d3   : > { %v3215_v12 = vpop.f32.mrf.mxu0  ;;  %v3267_v7 = vadd.f32 %v3213_v49, %v3003_v38 }
 0x2d5   : > { %v3307_v0 = vadd.f32 %v5114_v43, %v3267_v7 }
 0x2d6   : > { %v2554_v55 = vpop.f32.mrf.mxu2 }
 0x2d7   : > { %3343 = vst [vmem:[%s5122_s22 + $0xc0] sm:$0xff] %v3307_v0  ;;  %v2607_v31 = vadd.f32 %v2554_v55, %v2218_v3 }
 0x2d8   : > { %v2168_v8 = vpop.f32.mrf.mxu1 }
 0x2d9   : > { %v3004_v57 = vadd.f32 %v2951_v34, %v2607_v31  ;;  %v2219_v33 = vadd.f32 %v2168_v8, %v4997_v15  ;;  %v2961_v60 = vpop.f32.mrf.mxu3 }
 0x2db   : > { %v3218_v6 = vpop.f32.mrf.mxu0  ;;  %v3268_v25 = vadd.f32 %v3215_v12, %v3004_v57 }
 0x2dd   : > { %v3308_v62 = vadd.f32 %v5114_v43, %v3268_v25 }
 0x2de   : > { %v2557_v1 = vpop.f32.mrf.mxu2 }
 0x2df   : > { %3344 = vst [vmem:[%s5122_s22 + $0xc8] sm:$0xff] %v3308_v62  ;;  %v2608_v42 = vadd.f32 %v2557_v1, %v2219_v33  ;;  %v5419_v33 = vld [vmem:[#allocation8_spill] sm:$0xff] }
 0x2e0   : > { %v2170_v56 = vpop.f32.mrf.mxu1 }
 0x2e1   : > { %v3005_v63 = vadd.f32 %v2954_v24, %v2608_v42  ;;  %v2220_v4 = vadd.f32 %v2170_v56, %v5008_v48  ;;  %v2964_v23 = vpop.f32.mrf.mxu3 }
 0x2e3   : > { %v3220_v2 = vpop.f32.mrf.mxu0  ;;  %v3269_v46 = vadd.f32 %v3218_v6, %v3005_v63 }
 0x2e5   : > { %v3309_v59 = vadd.f32 %v5114_v43, %v3269_v46 }
 0x2e6   : > { %v2559_v26 = vpop.f32.mrf.mxu2 }
 0x2e7   : > { %3345 = vst [vmem:[%s5122_s22 + $0xd0] sm:$0xff] %v3309_v59  ;;  %v2609_v5 = vadd.f32 %v2559_v26, %v2220_v4  ;;  %v5420_v59 = vld [vmem:[#allocation2_spill] sm:$0xff] }
 0x2e8   : > { %v2173_v20 = vpop.f32.mrf.mxu1 }
 0x2e9   : > { %v3006_v58 = vadd.f32 %v2956_v32, %v2609_v5  ;;  %v2221_v36 = vadd.f32 %v2173_v20, %v5019_v22  ;;  %v2966_v61 = vpop.f32.mrf.mxu3 }
 0x2eb   : > { %v3223_v30 = vpop.f32.mrf.mxu0  ;;  %v3270_v15 = vadd.f32 %v3220_v2, %v3006_v58 }
 0x2ed   : > { %v3310_v13 = vadd.f32 %v5114_v43, %v3270_v15 }
 0x2ee   : > { %v2562_v17 = vpop.f32.mrf.mxu2 }
 0x2ef   : > { %3346 = vst [vmem:[%s5122_s22 + $0xd8] sm:$0xff] %v3310_v13  ;;  %v2610_v10 = vadd.f32 %v2562_v17, %v2221_v36 }
 0x2f0   : > { %v2175_v45 = vpop.f32.mrf.mxu1 }
 0x2f1   : > { %v3007_v9 = vadd.f32 %v2959_v54, %v2610_v10  ;;  %v2222_v21 = vadd.f32 %v2175_v45, %v5030_v35  ;;  %v2969_v0 = vpop.f32.mrf.mxu3 }
 0x2f3   : > { %v3225_v48 = vpop.f32.mrf.mxu0  ;;  %v3271_v28 = vadd.f32 %v3223_v30, %v3007_v9 }
 0x2f5   : > { %v3311_v47 = vadd.f32 %v5114_v43, %v3271_v28 }
 0x2f6   : > { %v2564_v53 = vpop.f32.mrf.mxu2 }
 0x2f7   : > { %3347 = vst [vmem:[%s5122_s22 + $0xe0] sm:$0xff] %v3311_v47  ;;  %v2611_v34 = vadd.f32 %v2564_v53, %v2222_v21 }
 0x2f8   : > { %v2178_v27 = vpop.f32.mrf.mxu1 }
 0x2f9   : > { %v3008_v19 = vadd.f32 %v2961_v60, %v2611_v34  ;;  %v2223_v18 = vadd.f32 %v2178_v27, %v5041_v16  ;;  %v2971_v25 = vpop.f32.mrf.mxu3 }
 0x2fb   : > { %v3228_v22 = vpop.f32.mrf.mxu0  ;;  %v3272_v29 = vadd.f32 %v3225_v48, %v3008_v19 }
 0x2fd   : > { %v3312_v51 = vadd.f32 %v5114_v43, %v3272_v29 }
 0x2fe   : > { %v2567_v40 = vpop.f32.mrf.mxu2 }
 0x2ff   : > { %3348 = vst [vmem:[%s5122_s22 + $0xe8] sm:$0xff] %v3312_v51  ;;  %v2612_v49 = vadd.f32 %v2567_v40, %v2223_v18 }
 0x300   : > { %v2180_v39 = vpop.f32.mrf.mxu1 }
 0x301   : > { %v3009_v41 = vadd.f32 %v2964_v23, %v2612_v49  ;;  %v2224_v14 = vadd.f32 %v2180_v39, %v5052_v44  ;;  %v2974_v26 = vpop.f32.mrf.mxu3 }
 0x303   : > { %v3230_v35 = vpop.f32.mrf.mxu0  ;;  %v3273_v11 = vadd.f32 %v3228_v22, %v3009_v41 }
 0x305   : > { %v3313_v24 = vadd.f32 %v5114_v43, %v3273_v11 }
 0x306   : > { %v2569_v37 = vpop.f32.mrf.mxu2 }
 0x307   : > { %3349 = vst [vmem:[%s5122_s22 + $0xf0] sm:$0xff] %v3313_v24  ;;  %v2613_v38 = vadd.f32 %v2569_v37, %v2224_v14 }
 0x308   : > { %v2183_v12 = vpop.f32.mrf.mxu1 }
 0x309   : > { %v3010_v7 = vadd.f32 %v2966_v61, %v2613_v38  ;;  %v2225_v31 = vadd.f32 %v2183_v12, %v5063_v50  ;;  %v2976_v45 = vpop.f32.mrf.mxu3 }
 0x30b   : > { %v3274_v16 = vadd.f32 %v3230_v35, %v3010_v7  ;;  %v3233_v3 = vpop.f32.mrf.mxu0 }
 0x30d   : > { %v3314_v55 = vadd.f32 %v5114_v43, %v3274_v16 }
 0x30e   : > { %v2572_v8 = vpop.f32.mrf.mxu2 }
 0x30f   : > { %3350 = vst [vmem:[%s5122_s22 + $0xf8] sm:$0xff] %v3314_v55  ;;  %v2614_v32 = vadd.f32 %v2572_v8, %v2225_v31 }
 0x310   : > { %v2185_v57 = vpop.f32.mrf.mxu1 }
 0x311   : > { %v3011_v6 = vadd.f32 %v2969_v0, %v2614_v32  ;;  %v2226_v1 = vadd.f32 %v2185_v57, %v5419_v33 }
 0x313   : > { %v3275_v44 = vadd.f32 %v3233_v3, %v3011_v6  ;;  %v3235_v42 = vpop.f32.mrf.mxu0 }
 0x315   : > { %v3315_v62 = vadd.f32 %v5114_v43, %v3275_v44 }
 0x316   : > { %v2574_v56 = vpop.f32.mrf.mxu2 }
 0x317   : > { %3351 = vst [vmem:[%s5122_s22 + $0x100] sm:$0xff] %v3315_v62  ;;  %v2615_v63 = vadd.f32 %v2574_v56, %v2226_v1 }
 0x318   : > { %v2188_v2 = vpop.f32.mrf.mxu1 }
 0x319   : > { %v3012_v54 = vadd.f32 %v2971_v25, %v2615_v63  ;;  %v2227_v4 = vadd.f32 %v2188_v2, %v5420_v59 }
 0x31b   : > { %v3276_v50 = vadd.f32 %v3235_v42, %v3012_v54  ;;  %v3238_v58 = vpop.f32.mrf.mxu0 }
 0x31d   : > { %v3316_v46 = vadd.f32 %v5114_v43, %v3276_v50 }
 0x31e   : > { %v2577_v5 = vpop.f32.mrf.mxu2 }
 0x31f   : > { %3352 = vst [vmem:[%s5122_s22 + $0x108] sm:$0xff] %v3316_v46  ;;  %v2616_v20 = vadd.f32 %v2577_v5, %v2227_v4 }
 0x320   : > { %v2190_v15 = vpop.f32.mrf.mxu1 }
 0x321   : > { %v3013_v30 = vadd.f32 %v2974_v26, %v2616_v20  ;;  %v2228_v36 = vadd.f32 %v2190_v15, %v5100_v52 }
 0x323   : > { %v3277_v60 = vadd.f32 %v3238_v58, %v3013_v30  ;;  %v3240_v48 = vpop.f32.mrf.mxu0 }
 0x325   : > { %v3317_v13 = vadd.f32 %v5114_v43, %v3277_v60 }
 0x326   : > { %v2579_v17 = vpop.f32.mrf.mxu2 }
 0x327   : > { %3353 = vst [vmem:[%s5122_s22 + $0x110] sm:$0xff] %v3317_v13  ;;  %v2617_v10 = vadd.f32 %v2579_v17, %v2228_v36 }
 0x329   : > { %v3014_v9 = vadd.f32 %v2976_v45, %v2617_v10 }
 0x32b   : > { %v3278_v28 = vadd.f32 %v3240_v48, %v3014_v9 }
 0x32d   : > { %v3318_v47 = vadd.f32 %v5114_v43, %v3278_v28 }
 0x32f   : > { %3354 = vst [vmem:[%s5122_s22 + $0x118] sm:$0x3f] %v3318_v47 }
 0x330 PF: > { %s13_s12 = sadd.s32 1, %s4225_s12  }
 0x331   : > { %p10_p4 = scmp.ge.s32.totalorder %s13_s12, 4  }
 0x333   :  { %12 = sbr.rel (!%p10_p4) target bundleno = 1 (0x1), region = 70 }

// kernel: residual_block.7
= control target key start
LH: loop header
LB: loop body
LE: loop exit
PB: predicated region body
PF: predicated region fallthrough
CT: control target
= control target key end

     0   :  { %s4788_s21 = smov 0   ;;  %s5918_s0 = inlined_call_operand.vmem [shape: bf16[2,324,128], index: 0, kind: input, shape index: {}]   ;;  %s5919_s1 = inlined_call_operand.vmem [shape: bf16[9,128,128], index: 1, kind: input, shape index: {}]   ;;  %s5920_s2 = inlined_call_operand.vmem [shape: f32[1,128], index: 2, kind: input, shape index: {}]   ;;  %s5921_s3 = inlined_call_operand.vmem [shape: f32[2,286,64], index: 3, kind: input, shape index: {}]   ;;  %s5922_s4 = inlined_call_operand.vmem [shape: bf16[64,128], index: 4, kind: input, shape index: {}]   ;;  %s5923_s5 = inlined_call_operand.vmem [shape: f32[1,128], index: 5, kind: input, shape index: {}]   ;;  %s5924_s6 = inlined_call_operand.vmem [shape: f32[2,286,128], index: 6, kind: output, shape index: {}]  }
   0x1 LB: > { %s3819_s22 = sadd.s32 4294967295, %s4751_s21   ;;  %p3823_p0 = scmp.ge.s32.totalorder %s4751_s21, 1  ;;  %s4751_s21 = sphi %s4788_s21, %s16_s21  }
   0x2   : > { %p222_p1 = scmp.lt.s32.totalorder %s4751_s21, 3 }
   0x4   : > { %p223_p2 = pnand %p3823_p0, %p222_p1 }
   0x6   : > { %226 = sbr.rel (%p223_p2) target bundleno = 900 (0x384), region = 44 }
   0xb   : > { %v4582_v0 = vld [vmem:[%s5919_s1 + $0x78] sm:$0xff]  ;;  %p257_p3 = scmp.lt.s32.totalorder %s3819_s22, 1  ;;  %v4581_v2 = vld [vmem:[%s5919_s1 + $0x70] sm:$0xff]  ;;  %v4580_v4 = vld [vmem:[%s5919_s1 + $0x68] sm:$0xff]  ;;  %vm433_vm0 = vsmask.f32 7424 }
   0xc   : > { %v4574_v1 = vld [vmem:[%s5919_s1 + $0x38] sm:$0xff]  ;;  %4702 = vmatpush.bf16.msra.mxu2 %v4582_v0  ;;  %v4573_v3 = vld [vmem:[%s5919_s1 + $0x30] sm:$0xff]  ;;  %643 = vmatpush.bf16.msra.mxu0 %v4582_v0  ;;  %v4572_v5 = vld [vmem:[%s5919_s1 + $0x28] sm:$0xff]  ;;  %vm931_vm1 = vcmask 1046528   ;;  %vm1694_vm2 = vsmask.f32 6400 }
   0xd   : > { %4710 = vmatpush.bf16.msra.mxu3 %v4574_v1  ;;  %811 = vmatpush.bf16.msra.mxu1 %v4574_v1  ;;  %s5928_s22 = smov (!%p257_p3, %s3819_s22), 1  ;;  %v4579_v6 = vld [vmem:[%s5919_s1 + $0x60] sm:$0xff]  ;;  %v4578_v8 = vld [vmem:[%s5919_s1 + $0x58] sm:$0xff]  ;;  %v4577_v12 = vld [vmem:[%s5919_s1 + $0x50] sm:$0xff]  ;;  %vm2083_vm3 = vcmask 1045504   ;;  %vm3121_vm5 = vcmask 1044480  }
   0xe   : > { %s4718_s11 = smul.u32 164, %s5928_s22  ;;  %v4571_v7 = vld [vmem:[%s5919_s1 + $0x20] sm:$0xff]  ;;  %v4570_v9 = vld [vmem:[%s5919_s1 + $0x18] sm:$0xff]  ;;  %v4569_v13 = vld [vmem:[%s5919_s1 + $0x10] sm:$0xff]  ;;  %vm2728_vm4 = vsmask.f32 5376 }
   0xf   : > { %v4576_v18 = vld [vmem:[%s5919_s1 + $0x48] sm:$0xff]  ;;  %v4575_v26 = vld [vmem:[%s5919_s1 + $0x40] sm:$0xff]  ;;  %v4590_v32 = vld [vmem:[%s5919_s1 + $0xb8] sm:$0xff]  ;;  %s4719_s7 = smul.u32 288, %s5928_s22  ;;  %vm3486_vm6 = vcmask 523264  }
  0x10   : > { %4703 = vmatpush.bf16.msra.mxu2 %v4581_v2  ;;  %644 = vmatpush.bf16.msra.mxu0 %v4581_v2  ;;  %s4826_s18 = scalar_lea.vmem %s5918_s0, %s4718_s11  ;;  %v4568_v19 = vld [vmem:[%s5919_s1 + $0x8] sm:$0xff]  ;;  %v4567_v27 = vld [vmem:[%s5919_s1] sm:$0xff]  ;;  %v4616_v33 = vld [vmem:[%s5919_s1 + $0xf8] sm:$0xff] }
  0x11   : > { %4711 = vmatpush.bf16.msra.mxu3 %v4573_v3  ;;  %812 = vmatpush.bf16.msra.mxu1 %v4573_v3  ;;  %v4559_v10 = vld [vmem:[%s4826_s18 + $0x48] sm:$0xff]  ;;  %v4696_v11 = vld [vmem:[%s4826_s18] sm:$0xff]   ;;  %v4843_v14 = vld [vmem:[%s4826_s18 + $0x50] sm:$0xff]  ;;  %s5477_s10 = scalar_lea.vmem %s5921_s3, %s4719_s7  ;;  %s5671_s17 = scalar_lea.vmem %s5924_s6, %s4719_s7 }
  0x12   : > { %v506_v15 = vshll.u32 %v4559_v10, 16  ;;  %v4846_v16 = vld [vmem:[%s4826_s18 + $0x8] sm:$0xff]  ;;  %v437_v17 = vshll.u32 %v4696_v11, 16  ;;  %v510_v21 = vshrl.u32 %v4559_v10, 16  ;;  %v514_v22 = vshll.u32 %v4843_v14, 16  ;;  %v4641_v36 = vld [vmem:[%s5919_s1 + $0x138] sm:$0xff] }
  0x13   : > { %v435_v23 = vshrl.u32 %v4696_v11, 16  ;;  %v442_v25 = vshll.u32 %v4846_v16, 16  ;;  %v4649_v37 = vld [vmem:[%s5919_s1 + $0x178] sm:$0xff]  ;;  %v4589_v38 = vld [vmem:[%s5919_s1 + $0xb0] sm:$0xff]  ;;  %v4588_v44 = vld [vmem:[%s5919_s1 + $0xa8] sm:$0xff]  ;;  %v518_v46 = vshrl.u32 %v4843_v14, 16 }
  0x14   : > { %4704 = vmatpush.bf16.msra.mxu2 %v4580_v4  ;;  %645 = vmatpush.bf16.msra.mxu0 %v4580_v4  ;;  %v4854_v20 = vrot.slane %v506_v15, 1  ;;  %v439_v24 = vrot.slane %v437_v17, 1  ;;  %v516_v29 = vrot.slane %v514_v22, 1  ;;  %v4615_v39 = vld [vmem:[%s5919_s1 + $0xf0] sm:$0xff]  ;;  %v4561_v40 = vld [vmem:[%s4826_s18 + $0x58] sm:$0xff]  ;;  %v4614_v45 = vld [vmem:[%s5919_s1 + $0xe8] sm:$0xff] }
  0x15   : > { %4712 = vmatpush.bf16.msra.mxu3 %v4572_v5  ;;  %813 = vmatpush.bf16.msra.mxu1 %v4572_v5  ;;  %v444_v31 = vrot.slane %v442_v25, 1  ;;  %v4887_v41 = vld [vmem:[%s4826_s18 + $0x10] sm:$0xff]  ;;  %v522_v47 = vshll.u32 %v4561_v40, 16  ;;  %v446_v48 = vshrl.u32 %v4846_v16, 16  ;;  %v4639_v50 = vld [vmem:[%s5919_s1 + $0x128] sm:$0xff]  ;;  %v4562_v57 = vld [vmem:[%s4826_s18 + $0x60] sm:$0xff] }
  0x16   : > { %v512_v28 = vor.u32 %v510_v21, %v4854_v20  ;;  %v440_v30 = vor.u32 %v439_v24, %v435_v23  ;;  %v4640_v42 = vld [vmem:[%s5919_s1 + $0x130] sm:$0xff]  ;;  %v450_v49 = vshll.u32 %v4887_v41, 16  ;;  %v520_v51 = vor.u32 %v518_v46, %v516_v29  ;;  %v4647_v58 = vld [vmem:[%s5919_s1 + $0x168] sm:$0xff]  ;;  %v4587_v59 = vld [vmem:[%s5919_s1 + $0xa0] sm:$0xff] }
  0x17   : > { %v4648_v43 = vld [vmem:[%s5919_s1 + $0x170] sm:$0xff]  ;;  %v524_v52 = vrot.slane %v522_v47, 1  ;;  %v448_v53 = vor.u32 %v446_v48, %v444_v31  ;;  %v4613_v60 = vld [vmem:[%s5919_s1 + $0xe0] sm:$0xff]  ;;  %v4922_v61 = vld [vmem:[%s4826_s18 + $0x18] sm:$0xff]  ;;  %v526_v62 = vshrl.u32 %v4561_v40, 16  ;;  %v530_v63 = vshll.u32 %v4562_v57, 16 }
  0x18   : > { %4705 = vmatpush.bf16.msra.mxu2 %v4579_v6  ;;  %646 = vmatpush.bf16.msra.mxu0 %v4579_v6  ;;  %v517_v34 = vsel %vm433_vm0, %v512_v28, %v516_v29  ;;  %v445_v35 = vsel %vm433_vm0, %v440_v30, %v444_v31  ;;  %v452_v54 = vrot.slane %v450_v49, 1  ;;  %v454_v0 = vshrl.u32 %v4887_v41, 16  ;;  %v4645_v28 = vld [vmem:[%s5919_s1 + $0x158] sm:$0xff]  ;;  %v4585_v29 = vld [vmem:[%s5919_s1 + $0x90] sm:$0xff]  ;;  %v4961_v30 = vld [vmem:[%s4826_s18 + $0x28] sm:$0xff] }
  0x19   : > { %4713 = vmatpush.bf16.msra.mxu3 %v4571_v7  ;;  %814 = vmatpush.bf16.msra.mxu1 %v4571_v7  ;;  %v525_v55 = vsel %vm433_vm0, %v520_v51, %v524_v52  ;;  %v458_v1 = vshll.u32 %v4922_v61, 16  ;;  %v528_v2 = vor.u32 %v526_v62, %v524_v52  ;;  %v532_v3 = vrot.slane %v530_v63, 1  ;;  %v4611_v31 = vld [vmem:[%s5919_s1 + $0xd0] sm:$0xff]  ;;  %v4584_v46 = vld [vmem:[%s5919_s1 + $0x88] sm:$0xff]  ;;  %v4583_v63 = vld [vmem:[%s5919_s1 + $0x80] sm:$0xff] }
  0x1a   : > { %v453_v56 = vsel %vm433_vm0, %v448_v53, %v452_v54  ;;  %v456_v4 = vor.u32 %v454_v0, %v452_v54  ;;  %v462_v17 = vshrl.u32 %v4922_v61, 16  ;;  %v4982_v47 = vld [vmem:[%s4826_s18 + $0x30] sm:$0xff]  ;;  %v4610_v48 = vld [vmem:[%s5919_s1 + $0xc8] sm:$0xff]  ;;  %v478_v51 = vshrl.u32 %v4961_v30, 16  ;;  %v5003_v0 = vld [vmem:[%s4826_s18 + $0x38] sm:$0xff] }
  0x1b   : > { %v460_v5 = vrot.slane %v458_v1, 1  ;;  %v533_v6 = vsel %vm433_vm0, %v528_v2, %v532_v3  ;;  %v482_v52 = vshll.u32 %v4982_v47, 16  ;;  %v4643_v62 = vld [vmem:[%s5919_s1 + $0x148] sm:$0xff] }
  0x1c   : > { %4706 = vmatpush.bf16.msra.mxu2 %v4578_v8  ;;  %647 = vmatpush.bf16.msra.mxu0 %v4578_v8  ;;  %v4563_v8 = vld [vmem:[%s4826_s18 + $0x68] sm:$0xff] }
  0x1d   : > { %4714 = vmatpush.bf16.msra.mxu3 %v4570_v9  ;;  %815 = vmatpush.bf16.msra.mxu1 %v4570_v9  ;;  %v461_v7 = vsel %vm433_vm0, %v456_v4, %v460_v5  ;;  %v4638_v9 = vld [vmem:[%s5919_s1 + $0x120] sm:$0xff]  ;;  %v538_v15 = vshll.u32 %v4563_v8, 16  ;;  %v464_v22 = vor.u32 %v462_v17, %v460_v5  ;;  %v490_v4 = vshll.u32 %v5003_v0, 16 }
  0x1f   : > { %v540_v21 = vrot.slane %v538_v15, 1  ;;  %v5018_v15 = vld [vmem:[%s4826_s18 + $0x40] sm:$0xff] }
  0x20   : > { %4707 = vmatpush.bf16.msra.mxu2 %v4577_v12  ;;  %648 = vmatpush.bf16.msra.mxu0 %v4577_v12  ;;  %v4612_v12 = vld [vmem:[%s5919_s1 + $0xd8] sm:$0xff] }
  0x21   : > { %4715 = vmatpush.bf16.msra.mxu3 %v4569_v13  ;;  %816 = vmatpush.bf16.msra.mxu1 %v4569_v13  ;;  %v4943_v13 = vld [vmem:[%s4826_s18 + $0x20] sm:$0xff] }
  0x24   : > { %4708 = vmatpush.bf16.msra.mxu2 %v4576_v18  ;;  %649 = vmatpush.bf16.msra.mxu0 %v4576_v18  ;;  %v466_v18 = vshll.u32 %v4943_v13, 16 }
  0x25   : > { %4716 = vmatpush.bf16.msra.mxu3 %v4568_v19  ;;  %817 = vmatpush.bf16.msra.mxu1 %v4568_v19 }
  0x26   : > { %v468_v23 = vrot.slane %v466_v18, 1 }
  0x28   : > { %4709 = vmatpush.bf16.msra.mxu2 %v4575_v26  ;;  %650 = vmatpush.bf16.msra.mxu0 %v4575_v26  ;;  %v469_v25 = vsel %vm433_vm0, %v464_v22, %v468_v23  ;;  %v4564_v26 = vld [vmem:[%s4826_s18 + $0x70] sm:$0xff]  ;;  %v4634_v22 = vld [vmem:[%s5919_s1 + $0x100] sm:$0xff] }
  0x29   : > { %4717 = vmatpush.bf16.msra.mxu3 %v4567_v27  ;;  %818 = vmatpush.bf16.msra.mxu1 %v4567_v27  ;;  %v4637_v27 = vld [vmem:[%s5919_s1 + $0x118] sm:$0xff]  ;;  %v550_v49 = vshrl.u32 %v4564_v26, 16 }
  0x2b   : > { %696 = vmatmul.bf16.vlgmr.msra.gmra.mxu2 %v517_v34  ;;  %651 = vmatmul.bf16.vlgmr.msra.gmra.mxu0 %v445_v35  ;;  %v470_v34 = vshrl.u32 %v4943_v13, 16  ;;  %v474_v35 = vshll.u32 %v4961_v30, 16 }
  0x2c   : > { %1033 = vmatpush.bf16.msrb.mxu2 %v4590_v32  ;;  %864 = vmatmul.bf16.vlgmr.msra.gmra.mxu3 %v4559_v10  ;;  %v4646_v10 = vld [vmem:[%s5919_s1 + $0x160] sm:$0xff]  ;;  %v542_v32 = vshrl.u32 %v4563_v8, 16 }
  0x2d   : > { %1412 = vmatpush.bf16.msrb.mxu3 %v4616_v33  ;;  %819 = vmatmul.bf16.vlgmr.msra.gmra.mxu1 %v4696_v11  ;;  %v4586_v11 = vld [vmem:[%s5919_s1 + $0x98] sm:$0xff]  ;;  %v546_v33 = vshll.u32 %v4564_v26, 16 }
  0x2e   : > { %1927 = vmatpush.bf16.msrb.mxu0 %v4641_v36  ;;  %2187 = vmatpush.bf16.msrb.mxu1 %v4649_v37  ;;  %v544_v36 = vor.u32 %v542_v32, %v540_v21  ;;  %v4682_v32 = vld [vmem:[%s5919_s1 + $0x1f8] sm:$0xff] }
  0x2f   : > { %v548_v37 = vrot.slane %v546_v33, 1  ;;  %v4748_v33 = vld [vmem:[%s4826_s18 + $0x88] sm:$0x70] }
  0x30   : > { %1034 = vmatpush.bf16.msrb.mxu2 %v4589_v38  ;;  %v472_v38 = vor.u32 %v470_v34, %v468_v23  ;;  %v502_v34 = vshrl.u32 %v5018_v15, 16 }
  0x31   : > { %1413 = vmatpush.bf16.msrb.mxu3 %v4615_v39  ;;  %v476_v39 = vrot.slane %v474_v35, 1  ;;  %v552_v53 = vor.u32 %v550_v49, %v548_v37  ;;  %v1547_v35 = vld [vmem:[%s4826_s18 + $0x8] sm:$0xe] }
  0x32   : > { %1928 = vmatpush.bf16.msrb.mxu0 %v4640_v42  ;;  %2188 = vmatpush.bf16.msrb.mxu1 %v4648_v43  ;;  %v4565_v43 = vld [vmem:[%s4826_s18 + $0x78] sm:$0xff] }
  0x33   : > { %v477_v42 = vsel %vm433_vm0, %v472_v38, %v476_v39  ;;  %v558_v1 = vshrl.u32 %v4565_v43, 16 }
  0x34   : > { %1035 = vmatpush.bf16.msrb.mxu2 %v4588_v44  ;;  %v4636_v44 = vld [vmem:[%s5919_s1 + $0x110] sm:$0xff] }
  0x35   : > { %1414 = vmatpush.bf16.msrb.mxu3 %v4614_v45  ;;  %v4644_v45 = vld [vmem:[%s5919_s1 + $0x150] sm:$0xff] }
  0x36   : > { %1929 = vmatpush.bf16.msrb.mxu0 %v4639_v50  ;;  %2189 = vmatpush.bf16.msrb.mxu1 %v4647_v58  ;;  %v554_v50 = vshll.u32 %v4565_v43, 16 }
  0x38   : > { %1036 = vmatpush.bf16.msrb.mxu2 %v4587_v59  ;;  %v556_v54 = vrot.slane %v554_v50, 1  ;;  %v4566_v59 = vld [vmem:[%s4826_s18 + $0x80] sm:$0xff] }
  0x39   : > { %1415 = vmatpush.bf16.msrb.mxu3 %v4613_v60  ;;  %v4635_v60 = vld [vmem:[%s5919_s1 + $0x108] sm:$0xff]  ;;  %v562_v2 = vshll.u32 %v4566_v59, 16  ;;  %v566_v17 = vshrl.u32 %v4566_v59, 16 }
  0x3a   : > { %1930 = vmatpush.bf16.msrb.mxu0 %v4638_v9  ;;  %2190 = vmatpush.bf16.msrb.mxu1 %v4646_v10  ;;  %v560_v5 = vor.u32 %v558_v1, %v556_v54  ;;  %v5008_v9 = vld [vmem:[%s4826_s18 + $0x88] sm:$0xff]  }
  0x3b   : > { %701 = vmatmul.bf16.gmra.mxu2 %v525_v55  ;;  %656 = vmatmul.bf16.gmra.mxu0 %v453_v56  ;;  %v480_v55 = vor.u32 %v478_v51, %v476_v39  ;;  %v484_v56 = vrot.slane %v482_v52, 1  ;;  %v4742_v10 = vld [vmem:[%s4826_s18 + $0x88] sm:$0xf]   ;;  %v570_v18 = vshll.u32 %v5008_v9, 16  ;;  %v574_v38 = vshrl.u32 %v5008_v9, 16  ;;  %v5052_v51 = vld [vmem:[%s4826_s18 + $0x10] sm:$0xff] }
  0x3c   : > { %869 = vmatmul.bf16.gmra.mxu3 %v4843_v14  ;;  %1037 = vmatpush.bf16.msrb.mxu2 %v4586_v11  ;;  %v534_v14 = vshrl.u32 %v4562_v57, 16  ;;  %v1638_v39 = vunpack.c.l.b16 %v1547_v35 }
  0x3d   : > { %824 = vmatmul.bf16.gmra.mxu1 %v4846_v16  ;;  %1416 = vmatpush.bf16.msrb.mxu3 %v4612_v12  ;;  %v485_v58 = vsel %vm433_vm0, %v480_v55, %v484_v56  ;;  %v4700_v55 = vld [vmem:[%s4826_s18] sm:$0xe] }
  0x3e   : > { %v536_v19 = vor.u32 %v534_v14, %v532_v3  ;;  %1931 = vmatpush.bf16.msrb.mxu0 %v4637_v27  ;;  %2191 = vmatpush.bf16.msrb.mxu1 %v4645_v28  ;;  %v486_v3 = vshrl.u32 %v4982_v47, 16  ;;  %v4609_v14 = vld [vmem:[%s5919_s1 + $0xc0] sm:$0xff] }
  0x3f   : > { %v4642_v27 = vld [vmem:[%s5919_s1 + $0x140] sm:$0xff] }
  0x40   : > { %v541_v24 = vsel %vm433_vm0, %v536_v19, %v540_v21  ;;  %1038 = vmatpush.bf16.msrb.mxu2 %v4585_v29  ;;  %v494_v19 = vshrl.u32 %v5003_v0, 16  ;;  %v498_v21 = vshll.u32 %v5018_v15, 16 }
  0x41   : > { %1417 = vmatpush.bf16.msrb.mxu3 %v4611_v31  ;;  %v4674_v31 = vld [vmem:[%s5919_s1 + $0x1b8] sm:$0xff] }
  0x42   : > { %1932 = vmatpush.bf16.msrb.mxu0 %v4636_v44  ;;  %2192 = vmatpush.bf16.msrb.mxu1 %v4644_v45  ;;  %v4743_v44 = vor.u32 %v4748_v33, %v4742_v10  ;;  %v4694_v45 = vld [vmem:[%s5922_s4 + $0x18] sm:$0xff] }
  0x44   : > { %1039 = vmatpush.bf16.msrb.mxu2 %v4584_v46 }
  0x45   : > { %1418 = vmatpush.bf16.msrb.mxu3 %v4610_v48 }
  0x46   : > { %1933 = vmatpush.bf16.msrb.mxu0 %v4635_v60  ;;  %2193 = vmatpush.bf16.msrb.mxu1 %v4643_v62  ;;  %v1707_v60 = vshll.u32 %v5052_v51, 16 }
  0x48   : > { %1040 = vmatpush.bf16.msrb.mxu2 %v4583_v63 }
  0x49   : > { %1419 = vmatpush.bf16.msrb.mxu3 %v4609_v14 }
  0x4a   : > { %1934 = vmatpush.bf16.msrb.mxu0 %v4634_v22  ;;  %2194 = vmatpush.bf16.msrb.mxu1 %v4642_v27 }
  0x4b   : > { %706 = vmatmul.bf16.gmra.mxu2 %v533_v6  ;;  %661 = vmatmul.bf16.gmra.mxu0 %v461_v7  ;;  %v564_v6 = vrot.slane %v562_v2, 1  ;;  %v488_v7 = vor.u32 %v486_v3, %v484_v56  ;;  %v4037_v56 = vld [vmem:[%s4826_s18 + $0x8] sm:$0xe] }
  0x4c   : > { %874 = vmatmul.bf16.gmra.mxu3 %v4561_v40  ;;  %v549_v40 = vsel %vm433_vm0, %v544_v36, %v548_v37  ;;  %2572 = vmatpush.bf16.msra.mxu2 %v4674_v31  ;;  %v1548_v36 = vld [vmem:[%s4826_s18 + $0xc] sm:$0xf]  ;;  %v4690_v37 = vld [vmem:[%s5919_s1 + $0x238] sm:$0xff] }
  0x4d   : > { %829 = vmatmul.bf16.gmra.mxu1 %v4887_v41  ;;  %v565_v11 = vsel %vm433_vm0, %v560_v5, %v564_v6  ;;  %v568_v23 = vor.u32 %v566_v17, %v564_v6  ;;  %2965 = vmatpush.bf16.msra.mxu3 %v4682_v32 }
  0x4e   : > { %3225 = vmatpush.bf16.msra.mxu0 %v4690_v37  ;;  %3545 = vmatpush.bf16.msra.mxu1 %v4694_v45  ;;  %v4681_v45 = vld [vmem:[%s5919_s1 + $0x1f0] sm:$0xff] }
  0x51   : > { %2966 = vmatpush.bf16.msra.mxu3 %v4681_v45 }
  0x5b   : > { %711 = vmatmul.bf16.gmra.mxu2 %v541_v24  ;;  %666 = vmatmul.bf16.gmra.mxu0 %v469_v25  ;;  %v572_v24 = vrot.slane %v570_v18, 1 }
  0x5c   : > { %879 = vmatmul.bf16.gmra.mxu3 %v4562_v57  ;;  %v557_v57 = vsel %vm433_vm0, %v552_v53, %v556_v54  ;;  %v2062_v53 = vld [vmem:[%s4826_s18 + $0x8] sm:$0xc]  ;;  %v4699_v54 = vld [vmem:[%s4826_s18] sm:$0xf0] }
  0x5d   : > { %834 = vmatmul.bf16.gmra.mxu1 %v4922_v61  ;;  %v573_v28 = vsel %vm433_vm0, %v568_v23, %v572_v24  ;;  %v2081_v62 = vunpack.c.l.b16 %v2062_v53  ;;  %v4701_v3 = vor.u32 %v4700_v55, %v4699_v54  ;;  %v935_v54 = vrot.slane %v4887_v41, 1 }
  0x5f   : > { %v932_v18 = vrot.slane %v4701_v3, 1 }
  0x6b   : > { %716 = vmatmul.bf16.gmra.mxu2 %v549_v40  ;;  %671 = vmatmul.bf16.gmra.mxu0 %v477_v42  ;;  %v1639_v40 = vunpack.c.l.b16 %v1548_v36  ;;  %v5078_v36 = vld [vmem:[%s4826_s18 + $0x18] sm:$0xff] }
  0x6c   : > { %884 = vmatmul.bf16.gmra.mxu3 %v4563_v8  ;;  %v492_v8 = vrot.slane %v490_v4, 1  ;;  %v4592_v4 = vld [vmem:[%s4826_s18 + $0x10] sm:$0xff] }
  0x6d   : > { %839 = vmatmul.bf16.gmra.mxu1 %v4943_v13  ;;  %v1675_v46 = vpack.c.b16 %v1639_v40, %v1638_v39  ;;  %v2082_v14 = vpack.c.b16 %v1639_v40, %v2081_v62  ;;  %v1312_v22 = vrot.slane %v4592_v4, 1  ;;  %v1716_v39 = vshll.u32 %v5078_v36, 16 }
  0x6e   : > { %v493_v12 = vsel %vm433_vm0, %v488_v7, %v492_v8  ;;  %v496_v25 = vor.u32 %v494_v19, %v492_v8  ;;  %v933_v19 = vrot.slane %v4846_v16, 1 }
  0x70   : > { %v934_v31 = vsel %vm931_vm1, %v932_v18, %v933_v19  ;;  %v936_v62 = vsel %vm931_vm1, %v933_v19, %v935_v54 }
  0x7b   : > { %721 = vmatmul.bf16.gmra.mxu2 %v557_v57  ;;  %676 = vmatmul.bf16.gmra.mxu0 %v485_v58  ;;  %v1696_v57 = vshrl.u32 %v1675_v46, 16  ;;  %v4591_v58 = vld [vmem:[%s4826_s18 + $0x8] sm:$0xf0] }
  0x7c   : > { %889 = vmatmul.bf16.gmra.mxu3 %v4564_v26  ;;  %v500_v26 = vrot.slane %v498_v21, 1  ;;  %v4038_v5 = vor.u32 %v4591_v58, %v4037_v56 }
  0x7d   : > { %844 = vmatmul.bf16.gmra.mxu1 %v4961_v30  ;;  %v1698_v6 = vrot.slane %v1696_v57, 1  ;;  %v2087_v57 = vrot.slane %v5078_v36, 2 }
  0x7e   : > { %v501_v29 = vsel %vm433_vm0, %v496_v25, %v500_v26  ;;  %v504_v42 = vor.u32 %v502_v34, %v500_v26  ;;  %v1311_v21 = vrot.slane %v4038_v5, 1  ;;  %v2084_v25 = vrot.slane %v2082_v14, 2  ;;  %v5107_v5 = vld [vmem:[%s4826_s18 + $0x20] sm:$0xff] }
  0x7f   : > { %v2085_v26 = vrot.slane %v5052_v51, 2  ;;  %v4594_v14 = vld [vmem:[%s4826_s18 + $0x20] sm:$0xff] }
  0x80   : > { %v509_v50 = vsel %vm433_vm0, %v504_v42, %v4854_v20  ;;  %v1704_v20 = vshrl.u32 %v5052_v51, 16  ;;  %v1313_v32 = vsel %vm931_vm1, %v1311_v21, %v1312_v22  ;;  %v1718_v51 = vrot.slane %v1716_v39, 2 }
  0x81   : > { %v2086_v35 = vsel %vm2083_vm3, %v2084_v25, %v2085_v26  ;;  %v2088_v4 = vsel %vm2083_vm3, %v2085_v26, %v2087_v57  ;;  %v1316_v25 = vrot.slane %v4594_v14, 1  ;;  %v4688_v14 = vld [vmem:[%s5919_s1 + $0x228] sm:$0xff] }
  0x8b   : > { %726 = vmatmul.bf16.gmra.mxu2 %v565_v11  ;;  %681 = vmatmul.bf16.gmra.mxu0 %v493_v12  ;;  %v1706_v11 = vrot.slane %v1704_v20, 1  ;;  %v1709_v12 = vrot.slane %v1707_v60, 2  ;;  %v4689_v60 = vld [vmem:[%s5919_s1 + $0x230] sm:$0xff] }
  0x8c   : > { %894 = vmatmul.bf16.gmra.mxu3 %v4565_v43  ;;  %v576_v43 = vor.u32 %v574_v38, %v572_v24  ;;  %v1713_v38 = vshrl.u32 %v5078_v36, 16  ;;  %3226 = vmatpush.bf16.msra.mxu0 %v4689_v60 }
  0x8d   : > { %849 = vmatmul.bf16.gmra.mxu1 %v4982_v47  ;;  %v1710_v24 = vor.u32 %v1709_v12, %v1706_v11 }
  0x90   : > { %3227 = vmatpush.bf16.msra.mxu0 %v4688_v14 }
  0x9b   : > { %731 = vmatmul.bf16.gmra.mxu2 %v573_v28  ;;  %686 = vmatmul.bf16.gmra.mxu0 %v501_v29 }
  0x9c   : > { %899 = vmatmul.bf16.gmra.mxu3 %v4566_v59  ;;  %v1699_v59 = vshll.u32 %v1675_v46, 16  ;;  %v4593_v46 = vld [vmem:[%s4826_s18 + $0x18] sm:$0xff] }
  0x9d   : > { %854 = vmatmul.bf16.gmra.mxu1 %v5003_v0  ;;  %v1314_v55 = vrot.slane %v4593_v46, 1 }
  0x9e   : > { %v1701_v10 = vrot.slane %v1699_v59, 2 }
  0xa0   : > { %v1702_v23 = vor.u32 %v1701_v10, %v1698_v6 }
  0xa2   : > { %v1711_v34 = vsel %vm1694_vm2, %v1702_v23, %v1710_v24 }
  0xa8   : > { %v652_v48 = vpop.f32.mrf.mxu0 }
  0xaa   : > { %v820_v49 = vpop.f32.mrf.mxu1 }
  0xab   : > { %v5054_v52 = vadd.f32 %v820_v49, %v652_v48  ;;  %736 = vmatmul.bf16.gmra.mxu2 %v576_v43  ;;  %691 = vmatmul.bf16.gmra.mxu0 %v509_v50  ;;  %v1715_v50 = vrot.slane %v1713_v38, 1 }
  0xac   : > { %904 = vmatmul.bf16.gmra.mxu3 %v4743_v44  ;;  %v4673_v44 = vld [vmem:[%s5919_s1 + $0x1b0] sm:$0xff] }
  0xad   : > { %859 = vmatmul.bf16.gmra.mxu1 %v5018_v15  ;;  %2573 = vmatpush.bf16.msra.mxu2 %v4673_v44  ;;  %v1719_v56 = vor.u32 %v1718_v51, %v1715_v50 }
  0xae   : > { %v697_v63 = vpop.f32.mrf.mxu2 }
  0xaf   : > { %v865_v1 = vpop.f32.mrf.mxu3  ;;  %v1720_v41 = vsel %vm1694_vm2, %v1710_v24, %v1719_v56  ;;  %v937_v24 = vrot.slane %v4922_v61, 1  ;;  %v5127_v61 = vld [vmem:[%s4826_s18 + $0x28] sm:$0xff] }
  0xb0   : > { %v5064_v2 = vadd.f32 %v865_v1, %v697_v63  ;;  %v654_v7 = vpop.f32.mrf.mxu0  ;;  %v1315_v63 = vsel %vm931_vm1, %v1312_v22, %v1314_v55 }
  0xb2   : > { %v822_v8 = vpop.f32.mrf.mxu1 }
  0xb3   : > { %v5067_v17 = vadd.f32 %v822_v8, %v654_v7  ;;  %v1722_v7 = vshrl.u32 %v5107_v5, 16  ;;  %v1725_v8 = vshll.u32 %v5107_v5, 16 }
  0xb5   : > { %v1724_v21 = vrot.slane %v1722_v7, 1  ;;  %v1727_v22 = vrot.slane %v1725_v8, 2 }
  0xb6   : > { %v699_v27 = vpop.f32.mrf.mxu2 }
  0xb7   : > { %v867_v28 = vpop.f32.mrf.mxu3  ;;  %v1728_v26 = vor.u32 %v1727_v22, %v1724_v21 }
  0xb8   : > { %v5071_v29 = vadd.f32 %v867_v28, %v699_v27  ;;  %v657_v33 = vpop.f32.mrf.mxu0  ;;  %v2089_v27 = vrot.slane %v5107_v5, 2 }
  0xb9   : > { %v1729_v36 = vsel %vm1694_vm2, %v1719_v56, %v1728_v26  ;;  %v4672_v56 = vld [vmem:[%s5919_s1 + $0x1a8] sm:$0xff] }
  0xba   : > { %v825_v16 = vpop.f32.mrf.mxu1  ;;  %v2090_v38 = vsel %vm2083_vm3, %v2087_v57, %v2089_v27  ;;  %v4680_v57 = vld [vmem:[%s5919_s1 + $0x1e8] sm:$0xff]  ;;  %2574 = vmatpush.bf16.msra.mxu2 %v4672_v56 }
  0xbb   : > { %v5080_v37 = vadd.f32 %v825_v16, %v657_v33  ;;  %1041 = vmatmul.bf16.vlgmr.msrb.gmra.mxu2 %v934_v31  ;;  %1935 = vmatmul.bf16.vlgmr.msrb.gmra.mxu0 %v1711_v34  ;;  %v938_v33 = vsel %vm931_vm1, %v935_v54, %v937_v24  ;;  %v1317_v16 = vsel %vm931_vm1, %v1314_v55, %v1316_v25 }
  0xbc   : > { %1420 = vmatmul.bf16.vlgmr.msrb.gmra.mxu3 %v1313_v32 }
  0xbd   : > { %2195 = vmatmul.bf16.vlgmr.msrb.gmra.mxu1 %v2086_v35  ;;  %2967 = vmatpush.bf16.msra.mxu3 %v4680_v57 }
  0xbe   : > { %v702_v40 = vpop.f32.mrf.mxu2 }
  0xbf   : > { %v870_v42 = vpop.f32.mrf.mxu3 }
  0xc0   : > { %v5084_v43 = vadd.f32 %v870_v42, %v702_v40  ;;  %v659_v48 = vpop.f32.mrf.mxu0  ;;  %v1731_v40 = vshrl.u32 %v5127_v61, 16  ;;  %v1734_v42 = vshll.u32 %v5127_v61, 16 }
  0xc2   : > { %v827_v49 = vpop.f32.mrf.mxu1  ;;  %v1733_v51 = vrot.slane %v1731_v40, 1  ;;  %v1736_v54 = vrot.slane %v1734_v42, 2 }
  0xc3   : > { %v5093_v53 = vadd.f32 %v827_v49, %v659_v48  ;;  %v4595_v48 = vld [vmem:[%s4826_s18 + $0x28] sm:$0xff] }
  0xc4   : > { %v1737_v60 = vor.u32 %v1736_v54, %v1733_v51 }
  0xc6   : > { %v704_v58 = vpop.f32.mrf.mxu2  ;;  %v1738_v8 = vsel %vm1694_vm2, %v1728_v26, %v1737_v60  ;;  %v4596_v26 = vld [vmem:[%s4826_s18 + $0x30] sm:$0xff] }
  0xc7   : > { %v872_v59 = vpop.f32.mrf.mxu3 }
  0xc8   : > { %v5097_v20 = vadd.f32 %v872_v59, %v704_v58  ;;  %v662_v1 = vpop.f32.mrf.mxu0  ;;  %v939_v58 = vrot.slane %v4943_v13, 1  ;;  %v1318_v59 = vrot.slane %v4595_v48, 1 }
  0xca   : > { %v830_v3 = vpop.f32.mrf.mxu1 }
  0xcb   : > { %v5109_v6 = vadd.f32 %v830_v3, %v662_v1  ;;  %1046 = vmatmul.bf16.gmra.mxu2 %v936_v62  ;;  %1940 = vmatmul.bf16.gmra.mxu0 %v1720_v41  ;;  %v2091_v62 = vrot.slane %v5127_v61, 2  ;;  %v940_v41 = vsel %vm931_vm1, %v937_v24, %v939_v58 }
  0xcc   : > { %1425 = vmatmul.bf16.gmra.mxu3 %v1315_v63 }
  0xcd   : > { %2200 = vmatmul.bf16.gmra.mxu1 %v2088_v4  ;;  %v1319_v4 = vsel %vm931_vm1, %v1316_v25, %v1318_v59  ;;  %v2092_v13 = vsel %vm2083_vm3, %v2089_v27, %v2091_v62  ;;  %v4693_v25 = vld [vmem:[%s5922_s4 + $0x10] sm:$0xff] }
  0xce   : > { %v707_v10 = vpop.f32.mrf.mxu2  ;;  %3546 = vmatpush.bf16.msra.mxu1 %v4693_v25 }
  0xcf   : > { %v875_v11 = vpop.f32.mrf.mxu3 }
  0xd0   : > { %v5113_v12 = vadd.f32 %v875_v11, %v707_v10  ;;  %v664_v18 = vpop.f32.mrf.mxu0  ;;  %v5153_v10 = vld [vmem:[%s4826_s18 + $0x30] sm:$0xff] }
  0xd2   : > { %v832_v19 = vpop.f32.mrf.mxu1 }
  0xd3   : > { %v5116_v23 = vadd.f32 %v832_v19, %v664_v18  ;;  %v1740_v18 = vshrl.u32 %v5153_v10, 16  ;;  %v1743_v19 = vshll.u32 %v5153_v10, 16 }
  0xd6   : > { %v709_v28 = vpop.f32.mrf.mxu2 }
  0xd7   : > { %v877_v31 = vpop.f32.mrf.mxu3 }
  0xd8   : > { %v5120_v32 = vadd.f32 %v877_v31, %v709_v28  ;;  %v667_v34 = vpop.f32.mrf.mxu0  ;;  %v1742_v31 = vrot.slane %v1740_v18, 1 }
  0xda   : > { %v835_v35 = vpop.f32.mrf.mxu1 }
  0xdb   : > { %v5129_v39 = vadd.f32 %v835_v35, %v667_v34  ;;  %1051 = vmatmul.bf16.gmra.mxu2 %v938_v33  ;;  %1945 = vmatmul.bf16.gmra.mxu0 %v1729_v36  ;;  %v1745_v33 = vrot.slane %v1743_v19, 2  ;;  %v941_v34 = vrot.slane %v4961_v30, 1  ;;  %v1320_v35 = vrot.slane %v4596_v26, 1  ;;  %v5179_v30 = vld [vmem:[%s4826_s18 + $0x38] sm:$0xff] }
  0xdc   : > { %1430 = vmatmul.bf16.gmra.mxu3 %v1317_v16  ;;  %v1749_v56 = vshrl.u32 %v5179_v30, 16  ;;  %v1752_v57 = vshll.u32 %v5179_v30, 16 }
  0xdd   : > { %2205 = vmatmul.bf16.gmra.mxu1 %v2090_v38  ;;  %v1746_v36 = vor.u32 %v1745_v33, %v1742_v31  ;;  %v2093_v38 = vrot.slane %v5153_v10, 2  ;;  %v2095_v10 = vrot.slane %v5179_v30, 2  ;;  %v5205_v33 = vld [vmem:[%s4826_s18 + $0x40] sm:$0xff] }
  0xde   : > { %v712_v44 = vpop.f32.mrf.mxu2 }
  0xdf   : > { %v880_v45 = vpop.f32.mrf.mxu3  ;;  %v2094_v51 = vsel %vm2083_vm3, %v2091_v62, %v2093_v38  ;;  %v1751_v62 = vrot.slane %v1749_v56, 1  ;;  %v2096_v31 = vsel %vm2083_vm3, %v2093_v38, %v2095_v10  ;;  %v4687_v38 = vld [vmem:[%s5919_s1 + $0x220] sm:$0xff]  ;;  %v945_v56 = vrot.slane %v5003_v0, 1  ;;  %v5228_v0 = vld [vmem:[%s4826_s18 + $0x48] sm:$0xff] }
  0xe0   : > { %v5133_v46 = vadd.f32 %v880_v45, %v712_v44  ;;  %v669_v49 = vpop.f32.mrf.mxu0  ;;  %v942_v44 = vsel %vm931_vm1, %v939_v58, %v941_v34  ;;  %v1321_v45 = vsel %vm931_vm1, %v1318_v59, %v1320_v35  ;;  %3228 = vmatpush.bf16.msra.mxu0 %v4687_v38  ;;  %v2099_v38 = vrot.slane %v5228_v0, 2 }
  0xe2   : > { %v837_v50 = vpop.f32.mrf.mxu1 }
  0xe3   : > { %v5136_v55 = vadd.f32 %v837_v50, %v669_v49  ;;  %v1747_v50 = vsel %vm1694_vm2, %v1737_v60, %v1746_v36 }
  0xe6   : > { %v714_v63 = vpop.f32.mrf.mxu2 }
  0xe7   : > { %v882_v1 = vpop.f32.mrf.mxu3 }
  0xe8   : > { %v5146_v3 = vadd.f32 %v882_v1, %v714_v63  ;;  %v672_v5 = vpop.f32.mrf.mxu0  ;;  %v4597_v1 = vld [vmem:[%s4826_s18 + $0x38] sm:$0xff] }
  0xea   : > { %v840_v7 = vpop.f32.mrf.mxu1 }
  0xeb   : > { %v5155_v11 = vadd.f32 %v840_v7, %v672_v5  ;;  %1056 = vmatmul.bf16.gmra.mxu2 %v940_v41  ;;  %1950 = vmatmul.bf16.gmra.mxu0 %v1738_v8  ;;  %v943_v7 = vrot.slane %v4982_v47, 1  ;;  %v1322_v8 = vrot.slane %v4597_v1, 1 }
  0xec   : > { %1435 = vmatmul.bf16.gmra.mxu3 %v1319_v4  ;;  %v1754_v4 = vrot.slane %v1752_v57, 2 }
  0xed   : > { %2210 = vmatmul.bf16.gmra.mxu1 %v2092_v13  ;;  %v944_v25 = vsel %vm931_vm1, %v941_v34, %v943_v7  ;;  %v1323_v47 = vsel %vm931_vm1, %v1320_v35, %v1322_v8  ;;  %v1758_v34 = vshrl.u32 %v5205_v33, 16  ;;  %v1761_v35 = vshll.u32 %v5205_v33, 16 }
  0xee   : > { %v717_v21 = vpop.f32.mrf.mxu2  ;;  %v1755_v13 = vor.u32 %v1754_v4, %v1751_v62  ;;  %v946_v62 = vsel %vm931_vm1, %v943_v7, %v945_v56  ;;  %v1770_v7 = vshll.u32 %v5228_v0, 16 }
  0xef   : > { %v885_v22 = vpop.f32.mrf.mxu3 }
  0xf0   : > { %v5162_v24 = vadd.f32 %v885_v22, %v717_v21  ;;  %v674_v27 = vpop.f32.mrf.mxu0  ;;  %v4671_v21 = vld [vmem:[%s5919_s1 + $0x1a0] sm:$0xff] }
  0xf1   : > { %v4679_v22 = vld [vmem:[%s5919_s1 + $0x1e0] sm:$0xff]  ;;  %2575 = vmatpush.bf16.msra.mxu2 %v4671_v21 }
  0xf2   : > { %v842_v28 = vpop.f32.mrf.mxu1  ;;  %2968 = vmatpush.bf16.msra.mxu3 %v4679_v22 }
  0xf3   : > { %v5168_v16 = vadd.f32 %v842_v28, %v674_v27  ;;  %v1756_v28 = vsel %vm1694_vm2, %v1746_v36, %v1755_v13 }
  0xf6   : > { %v719_v61 = vpop.f32.mrf.mxu2 }
  0xf7   : > { %v887_v40 = vpop.f32.mrf.mxu3 }
  0xf8   : > { %v5172_v42 = vadd.f32 %v887_v40, %v719_v61  ;;  %v677_v48 = vpop.f32.mrf.mxu0 }
  0xfa   : > { %v845_v49 = vpop.f32.mrf.mxu1 }
  0xfb   : > { %v5181_v54 = vadd.f32 %v845_v49, %v677_v48  ;;  %1061 = vmatmul.bf16.gmra.mxu2 %v942_v44  ;;  %1955 = vmatmul.bf16.gmra.mxu0 %v1747_v50  ;;  %v1760_v50 = vrot.slane %v1758_v34, 1 }
  0xfc   : > { %1440 = vmatmul.bf16.gmra.mxu3 %v1321_v45  ;;  %v4598_v45 = vld [vmem:[%s4826_s18 + $0x40] sm:$0xff] }
  0xfd   : > { %2215 = vmatmul.bf16.gmra.mxu1 %v2094_v51  ;;  %v1763_v51 = vrot.slane %v1761_v35, 2  ;;  %v1324_v57 = vrot.slane %v4598_v45, 1  ;;  %v947_v35 = vrot.slane %v5018_v15, 1  ;;  %v5248_v15 = vld [vmem:[%s4826_s18 + $0x50] sm:$0xff] }
  0xfe   : > { %v722_v58 = vpop.f32.mrf.mxu2 }
  0xff   : > { %v890_v59 = vpop.f32.mrf.mxu3  ;;  %v1325_v4 = vsel %vm931_vm1, %v1322_v8, %v1324_v57 }
 0x100   : > { %v5185_v63 = vadd.f32 %v890_v59, %v722_v58  ;;  %v679_v60 = vpop.f32.mrf.mxu0  ;;  %v1764_v58 = vor.u32 %v1763_v51, %v1760_v50  ;;  %v2097_v59 = vrot.slane %v5205_v33, 2  ;;  %v1772_v33 = vrot.slane %v1770_v7, 2 }
 0x101   : > { %v948_v50 = vsel %vm931_vm1, %v945_v56, %v947_v35  ;;  %v1776_v56 = vshrl.u32 %v5248_v15, 16 }
 0x102   : > { %v847_v41 = vpop.f32.mrf.mxu1  ;;  %v1765_v21 = vsel %vm1694_vm2, %v1755_v13, %v1764_v58  ;;  %v2098_v22 = vsel %vm2083_vm3, %v2095_v10, %v2097_v59 }
 0x103   : > { %v5188_v5 = vadd.f32 %v847_v41, %v679_v60 }
 0x106   : > { %v724_v14 = vpop.f32.mrf.mxu2 }
 0x107   : > { %v892_v18 = vpop.f32.mrf.mxu3 }
 0x108   : > { %v5192_v19 = vadd.f32 %v892_v18, %v724_v14  ;;  %v682_v26 = vpop.f32.mrf.mxu0 }
 0x10a   : > { %v850_v27 = vpop.f32.mrf.mxu1 }
 0x10b   : > { %v5207_v61 = vadd.f32 %v850_v27, %v682_v26  ;;  %1066 = vmatmul.bf16.gmra.mxu2 %v944_v25  ;;  %1960 = vmatmul.bf16.gmra.mxu0 %v1756_v28  ;;  %v4599_v28 = vld [vmem:[%s4826_s18 + $0x48] sm:$0xff] }
 0x10c   : > { %1445 = vmatmul.bf16.gmra.mxu3 %v1323_v47  ;;  %v1767_v47 = vshrl.u32 %v5228_v0, 16  ;;  %v4600_v0 = vld [vmem:[%s4826_s18 + $0x50] sm:$0xff] }
 0x10d   : > { %2220 = vmatmul.bf16.gmra.mxu1 %v2096_v31 }
 0x10e   : > { %v727_v40 = vpop.f32.mrf.mxu2  ;;  %v1769_v10 = vrot.slane %v1767_v47, 1 }
 0x10f   : > { %v895_v44 = vpop.f32.mrf.mxu3 }
 0x110   : > { %v5211_v36 = vadd.f32 %v895_v44, %v727_v40  ;;  %v684_v48 = vpop.f32.mrf.mxu0  ;;  %v1326_v40 = vrot.slane %v4599_v28, 1  ;;  %v1773_v44 = vor.u32 %v1772_v33, %v1769_v10  ;;  %v1328_v10 = vrot.slane %v4600_v0, 1 }
 0x112   : > { %v852_v49 = vpop.f32.mrf.mxu1  ;;  %v1327_v51 = vsel %vm931_vm1, %v1324_v57, %v1326_v40  ;;  %v1779_v57 = vshll.u32 %v5248_v15, 16 }
 0x113   : > { %v5217_v30 = vadd.f32 %v852_v49, %v684_v48 }
 0x116   : > { %v729_v1 = vpop.f32.mrf.mxu2 }
 0x117   : > { %v897_v60 = vpop.f32.mrf.mxu3 }
 0x118   : > { %v5221_v41 = vadd.f32 %v897_v60, %v729_v1  ;;  %v687_v14 = vpop.f32.mrf.mxu0 }
 0x11a   : > { %v855_v18 = vpop.f32.mrf.mxu1 }
 0x11b   : > { %v5230_v25 = vadd.f32 %v855_v18, %v687_v14  ;;  %1071 = vmatmul.bf16.gmra.mxu2 %v946_v62  ;;  %1965 = vmatmul.bf16.gmra.mxu0 %v1765_v21  ;;  %v1774_v62 = vsel %vm1694_vm2, %v1764_v58, %v1773_v44  ;;  %v4670_v58 = vld [vmem:[%s5919_s1 + $0x198] sm:$0xff] }
 0x11c   : > { %1450 = vmatmul.bf16.gmra.mxu3 %v1325_v4  ;;  %v2100_v4 = vsel %vm2083_vm3, %v2097_v59, %v2099_v38  ;;  %v4678_v59 = vld [vmem:[%s5919_s1 + $0x1d8] sm:$0xff]  ;;  %2576 = vmatpush.bf16.msra.mxu2 %v4670_v58 }
 0x11d   : > { %2225 = vmatmul.bf16.gmra.mxu1 %v2098_v22  ;;  %2969 = vmatpush.bf16.msra.mxu3 %v4678_v59  ;;  %v5277_v58 = vld [vmem:[%s4826_s18 + $0x58] sm:$0xff] }
 0x11e   : > { %v732_v8 = vpop.f32.mrf.mxu2  ;;  %v1785_v59 = vshrl.u32 %v5277_v58, 16 }
 0x11f   : > { %v900_v26 = vpop.f32.mrf.mxu3 }
 0x120   : > { %v5234_v27 = vadd.f32 %v900_v26, %v732_v8  ;;  %v689_v13 = vpop.f32.mrf.mxu0  ;;  %v1778_v8 = vrot.slane %v1776_v56, 1  ;;  %v1781_v26 = vrot.slane %v1779_v57, 2 }
 0x122   : > { %v857_v31 = vpop.f32.mrf.mxu1  ;;  %v1782_v33 = vor.u32 %v1781_v26, %v1778_v8  ;;  %v1787_v8 = vrot.slane %v1785_v59, 1 }
 0x123   : > { %v5237_v34 = vadd.f32 %v857_v31, %v689_v13  ;;  %v4730_v13 = vld [vmem:[%s4826_s18 + $0x48] sm:$0xff] }
 0x124   : > { %v949_v31 = vrot.slane %v4730_v13, 1  ;;  %v1783_v56 = vsel %vm1694_vm2, %v1773_v44, %v1782_v33 }
 0x126   : > { %v734_v45 = vpop.f32.mrf.mxu2 }
 0x127   : > { %v902_v48 = vpop.f32.mrf.mxu3 }
 0x128   : > { %v5241_v49 = vadd.f32 %v902_v48, %v734_v45  ;;  %v692_v1 = vpop.f32.mrf.mxu0  ;;  %v2101_v45 = vrot.slane %v5248_v15, 2  ;;  %v4686_v48 = vld [vmem:[%s5919_s1 + $0x218] sm:$0xff] }
 0x129   : > { %3229 = vmatpush.bf16.msra.mxu0 %v4686_v48  ;;  %v4731_v48 = vld [vmem:[%s4826_s18 + $0x50] sm:$0xff] }
 0x12a   : > { %v860_v60 = vpop.f32.mrf.mxu1  ;;  %v2102_v15 = vsel %vm2083_vm3, %v2099_v38, %v2101_v45  ;;  %v4601_v38 = vld [vmem:[%s4826_s18 + $0x58] sm:$0xff] }
 0x12b   : > { %v5250_v14 = vadd.f32 %v860_v60, %v692_v1  ;;  %1076 = vmatmul.bf16.gmra.mxu2 %v948_v50  ;;  %1970 = vmatmul.bf16.gmra.mxu0 %v1774_v62  ;;  %v950_v60 = vsel %vm931_vm1, %v947_v35, %v949_v31  ;;  %v1329_v62 = vsel %vm931_vm1, %v1326_v40, %v1328_v10  ;;  %v1788_v35 = vshll.u32 %v5277_v58, 16  ;;  %v4692_v40 = vld [vmem:[%s5922_s4 + $0x8] sm:$0xff] }
 0x12c   : > { %1455 = vmatmul.bf16.gmra.mxu3 %v1327_v51  ;;  %3547 = vmatpush.bf16.msra.mxu1 %v4692_v40 }
 0x12d   : > { %2230 = vmatmul.bf16.gmra.mxu1 %v2100_v4  ;;  %v1790_v26 = vrot.slane %v1788_v35, 2 }
 0x12e   : > { %v737_v18 = vpop.f32.mrf.mxu2 }
 0x12f   : > { %v905_v21 = vpop.f32.mrf.mxu3 }
 0x130   : > { %v5260_v22 = vadd.f32 %v905_v21, %v737_v18  ;;  %v694_v47 = vpop.f32.mrf.mxu0 }
 0x132   : > { %v862_v7 = vpop.f32.mrf.mxu1 }
 0x133   : > { %v5263_v28 = vadd.f32 %v862_v7, %v694_v47 }
 0x136   : > { %v739_v50 = vpop.f32.mrf.mxu2 }
 0x137   : > { %v907_v51 = vpop.f32.mrf.mxu3 }
 0x138   : > { %v5270_v1 = vadd.f32 %v907_v51, %v739_v50  ;;  %v1936_v4 = vpop.f32.mrf.mxu0  ;;  %v951_v50 = vrot.slane %v4731_v48, 1  ;;  %v1330_v51 = vrot.slane %v4601_v38, 1 }
 0x13a   : > { %5925 = vst [vmem:[#allocation2_spill] sm:$0xff] %v5270_v1  ;;  %v2196_v57 = vpop.f32.mrf.mxu1  ;;  %v952_v40 = vsel %vm931_vm1, %v949_v31, %v951_v50 }
 0x13b   : > { %1081 = vmatmul.bf16.gmra.mxu2 %v950_v60  ;;  %1975 = vmatmul.bf16.gmra.mxu0 %v1783_v56  ;;  %v2103_v56 = vrot.slane %v5277_v58, 2 }
 0x13c   : > { %1460 = vmatmul.bf16.gmra.mxu3 %v1329_v62  ;;  %v1791_v62 = vor.u32 %v1790_v26, %v1787_v8 }
 0x13d   : > { %2235 = vmatmul.bf16.gmra.mxu1 %v2102_v15 }
 0x13e   : > { %v1042_v18 = vpop.f32.mrf.mxu2 }
 0x13f   : > { %v1421_v44 = vpop.f32.mrf.mxu3  ;;  %v1132_v21 = vadd.f32 %v1042_v18, %v5054_v52  ;;  %v1331_v18 = vsel %vm931_vm1, %v1328_v10, %v1330_v51 }
 0x140   : > { %v1938_v47 = vpop.f32.mrf.mxu0 }
 0x141   : > { %v1511_v0 = vadd.f32 %v1421_v44, %v1132_v21  ;;  %v5296_v21 = vld [vmem:[%s4826_s18 + $0x60] sm:$0xff] }
 0x142   : > { %v2198_v7 = vpop.f32.mrf.mxu1  ;;  %v1794_v31 = vshrl.u32 %v5296_v21, 16  ;;  %v1797_v10 = vshll.u32 %v5296_v21, 16 }
 0x143   : > { %v2026_v13 = vadd.f32 %v1936_v4, %v1511_v0  ;;  %v1792_v4 = vsel %vm1694_vm2, %v1782_v33, %v1791_v62  ;;  %v4602_v0 = vld [vmem:[%s4826_s18 + $0x60] sm:$0xff] }
 0x145   : > { %v5287_v60 = vadd.f32 %v2196_v57, %v2026_v13  ;;  %v2104_v57 = vsel %vm2083_vm3, %v2101_v45, %v2103_v56  ;;  %v1799_v13 = vrot.slane %v1797_v10, 2 }
 0x146   : > { %v1044_v15 = vpop.f32.mrf.mxu2 }
 0x147   : > { %v1423_v1 = vpop.f32.mrf.mxu3  ;;  %v1133_v52 = vadd.f32 %v1044_v15, %v5067_v17  ;;  %v4732_v15 = vld [vmem:[%s4826_s18 + $0x58] sm:$0xff] }
 0x148   : > { %v1941_v35 = vpop.f32.mrf.mxu0 }
 0x149   : > { %v1512_v59 = vadd.f32 %v1423_v1, %v1133_v52  ;;  %v953_v52 = vrot.slane %v4732_v15, 1 }
 0x14a   : > { %v2201_v44 = vpop.f32.mrf.mxu1 }
 0x14b   : > { %v2027_v38 = vadd.f32 %v1938_v47, %v1512_v59  ;;  %1086 = vmatmul.bf16.gmra.mxu2 %v952_v40  ;;  %1980 = vmatmul.bf16.gmra.mxu0 %v1792_v4  ;;  %v1796_v47 = vrot.slane %v1794_v31, 1  ;;  %v1332_v40 = vrot.slane %v4602_v0, 1  ;;  %v2105_v59 = vrot.slane %v5296_v21, 2  ;;  %v4677_v4 = vld [vmem:[%s5919_s1 + $0x1d0] sm:$0xff]  ;;  %v5320_v0 = vld [vmem:[%s4826_s18 + $0x68] sm:$0xff] }
 0x14c   : > { %1465 = vmatmul.bf16.gmra.mxu3 %v1331_v18 }
 0x14d   : > { %2240 = vmatmul.bf16.gmra.mxu1 %v2104_v57  ;;  %v5298_v17 = vadd.f32 %v2198_v7, %v2027_v38  ;;  %v1800_v18 = vor.u32 %v1799_v13, %v1796_v47  ;;  %2970 = vmatpush.bf16.msra.mxu3 %v4677_v4  ;;  %v1333_v31 = vsel %vm931_vm1, %v1330_v51, %v1332_v40  ;;  %v1806_v51 = vshll.u32 %v5320_v0, 16 }
 0x14e   : > { %v1047_v1 = vpop.f32.mrf.mxu2 }
 0x14f   : > { %v1426_v58 = vpop.f32.mrf.mxu3  ;;  %v1134_v33 = vadd.f32 %v1047_v1, %v5080_v37  ;;  %v4669_v37 = vld [vmem:[%s5919_s1 + $0x190] sm:$0xff]  ;;  %v1801_v1 = vsel %vm1694_vm2, %v1791_v62, %v1800_v18 }
 0x150   : > { %v1943_v8 = vpop.f32.mrf.mxu0  ;;  %2577 = vmatpush.bf16.msra.mxu2 %v4669_v37  ;;  %v4685_v62 = vld [vmem:[%s5919_s1 + $0x210] sm:$0xff] }
 0x151   : > { %v1513_v45 = vadd.f32 %v1426_v58, %v1134_v33  ;;  %v2106_v33 = vsel %vm2083_vm3, %v2103_v56, %v2105_v59  ;;  %3230 = vmatpush.bf16.msra.mxu0 %v4685_v62 }
 0x152   : > { %v2203_v26 = vpop.f32.mrf.mxu1 }
 0x153   : > { %v2028_v48 = vadd.f32 %v1941_v35, %v1513_v45 }
 0x155   : > { %v5305_v7 = vadd.f32 %v2201_v44, %v2028_v48  ;;  %v954_v44 = vsel %vm931_vm1, %v951_v50, %v953_v52  ;;  %v1803_v50 = vshrl.u32 %v5320_v0, 16 }
 0x156   : > { %v1049_v57 = vpop.f32.mrf.mxu2 }
 0x157   : > { %v1428_v38 = vpop.f32.mrf.mxu3  ;;  %v1135_v35 = vadd.f32 %v1049_v57, %v5093_v53  ;;  %v1805_v4 = vrot.slane %v1803_v50, 1 }
 0x158   : > { %v1946_v21 = vpop.f32.mrf.mxu0 }
 0x159   : > { %v1514_v10 = vadd.f32 %v1428_v38, %v1135_v35  ;;  %v4733_v38 = vld [vmem:[%s4826_s18 + $0x60] sm:$0xff] }
 0x15a   : > { %v2206_v58 = vpop.f32.mrf.mxu1  ;;  %v955_v35 = vrot.slane %v4733_v38, 1 }
 0x15b   : > { %v2029_v45 = vadd.f32 %v1943_v8, %v1514_v10  ;;  %1091 = vmatmul.bf16.gmra.mxu2 %v954_v44  ;;  %1985 = vmatmul.bf16.gmra.mxu0 %v1801_v1  ;;  %v4603_v8 = vld [vmem:[%s4826_s18 + $0x68] sm:$0xff]  ;;  %v2107_v1 = vrot.slane %v5320_v0, 2 }
 0x15c   : > { %1470 = vmatmul.bf16.gmra.mxu3 %v1333_v31  ;;  %v1334_v44 = vrot.slane %v4603_v8, 1  ;;  %v956_v62 = vsel %vm931_vm1, %v953_v52, %v955_v35 }
 0x15d   : > { %2245 = vmatmul.bf16.gmra.mxu1 %v2106_v33  ;;  %v5322_v53 = vadd.f32 %v2203_v26, %v2029_v45  ;;  %v1808_v26 = vrot.slane %v1806_v51, 2 }
 0x15e   : > { %v1052_v47 = vpop.f32.mrf.mxu2 }
 0x15f   : > { %v1431_v56 = vpop.f32.mrf.mxu3  ;;  %v1136_v13 = vadd.f32 %v1052_v47, %v5109_v6  ;;  %v1809_v10 = vor.u32 %v1808_v26, %v1805_v4  ;;  %v1335_v47 = vsel %vm931_vm1, %v1332_v40, %v1334_v44  ;;  %v4604_v4 = vld [vmem:[%s4826_s18 + $0x70] sm:$0xff] }
 0x160   : > { %v1948_v15 = vpop.f32.mrf.mxu0 }
 0x161   : > { %v1515_v48 = vadd.f32 %v1431_v56, %v1136_v13  ;;  %v5341_v13 = vld [vmem:[%s4826_s18 + $0x70] sm:$0xff] }
 0x162   : > { %v2208_v37 = vpop.f32.mrf.mxu1  ;;  %v1812_v52 = vshrl.u32 %v5341_v13, 16  ;;  %v1815_v40 = vshll.u32 %v5341_v13, 16 }
 0x163   : > { %v2030_v57 = vadd.f32 %v1946_v21, %v1515_v48  ;;  %v1810_v21 = vsel %vm1694_vm2, %v1800_v18, %v1809_v10 }
 0x164   : > { %v1817_v38 = vrot.slane %v1815_v40, 2 }
 0x165   : > { %v5332_v31 = vadd.f32 %v2206_v58, %v2030_v57  ;;  %v2108_v58 = vsel %vm2083_vm3, %v2105_v59, %v2107_v1 }
 0x166   : > { %v1054_v33 = vpop.f32.mrf.mxu2 }
 0x167   : > { %v1433_v45 = vpop.f32.mrf.mxu3  ;;  %v1137_v6 = vadd.f32 %v1054_v33, %v5116_v23 }
 0x168   : > { %v1951_v51 = vpop.f32.mrf.mxu0 }
 0x169   : > { %v1516_v50 = vadd.f32 %v1433_v45, %v1137_v6  ;;  %v4734_v45 = vld [vmem:[%s4826_s18 + $0x68] sm:$0xff] }
 0x16a   : > { %v2211_v56 = vpop.f32.mrf.mxu1  ;;  %v957_v6 = vrot.slane %v4734_v45, 1 }
 0x16b   : > { %v2031_v8 = vadd.f32 %v1948_v15, %v1516_v50  ;;  %1096 = vmatmul.bf16.gmra.mxu2 %v956_v62  ;;  %1990 = vmatmul.bf16.gmra.mxu0 %v1810_v21  ;;  %v1814_v15 = vrot.slane %v1812_v52, 1  ;;  %v1336_v62 = vrot.slane %v4604_v4, 1  ;;  %v2109_v50 = vrot.slane %v5341_v13, 2  ;;  %v4676_v21 = vld [vmem:[%s5919_s1 + $0x1c8] sm:$0xff]  ;;  %v5365_v4 = vld [vmem:[%s4826_s18 + $0x78] sm:$0xff] }
 0x16c   : > { %1475 = vmatmul.bf16.gmra.mxu3 %v1335_v47 }
 0x16d   : > { %2250 = vmatmul.bf16.gmra.mxu1 %v2108_v58  ;;  %v5343_v23 = vadd.f32 %v2208_v37, %v2031_v8  ;;  %v1818_v47 = vor.u32 %v1817_v38, %v1814_v15  ;;  %2971 = vmatpush.bf16.msra.mxu3 %v4676_v21  ;;  %v1337_v52 = vsel %vm931_vm1, %v1334_v44, %v1336_v62  ;;  %v1824_v44 = vshll.u32 %v5365_v4, 16 }
 0x16e   : > { %v1057_v0 = vpop.f32.mrf.mxu2 }
 0x16f   : > { %v1436_v48 = vpop.f32.mrf.mxu3  ;;  %v1138_v18 = vadd.f32 %v1057_v0, %v5129_v39  ;;  %v4668_v39 = vld [vmem:[%s5919_s1 + $0x188] sm:$0xff]  ;;  %v1819_v0 = vsel %vm1694_vm2, %v1809_v10, %v1818_v47 }
 0x170   : > { %v1953_v26 = vpop.f32.mrf.mxu0  ;;  %2578 = vmatpush.bf16.msra.mxu2 %v4668_v39  ;;  %v4684_v10 = vld [vmem:[%s5919_s1 + $0x208] sm:$0xff] }
 0x171   : > { %v1517_v59 = vadd.f32 %v1436_v48, %v1138_v18  ;;  %v2110_v18 = vsel %vm2083_vm3, %v2107_v1, %v2109_v50  ;;  %3231 = vmatpush.bf16.msra.mxu0 %v4684_v10 }
 0x172   : > { %v2213_v57 = vpop.f32.mrf.mxu1 }
 0x173   : > { %v2032_v33 = vadd.f32 %v1951_v51, %v1517_v59 }
 0x175   : > { %v5350_v37 = vadd.f32 %v2211_v56, %v2032_v33  ;;  %v958_v56 = vsel %vm931_vm1, %v955_v35, %v957_v6  ;;  %v1821_v35 = vshrl.u32 %v5365_v4, 16 }
 0x176   : > { %v1059_v58 = vpop.f32.mrf.mxu2 }
 0x177   : > { %v1438_v8 = vpop.f32.mrf.mxu3  ;;  %v1139_v51 = vadd.f32 %v1059_v58, %v5136_v55  ;;  %v1823_v21 = vrot.slane %v1821_v35, 1 }
 0x178   : > { %v1956_v13 = vpop.f32.mrf.mxu0 }
 0x179   : > { %v1518_v40 = vadd.f32 %v1438_v8, %v1139_v51  ;;  %v4735_v8 = vld [vmem:[%s4826_s18 + $0x70] sm:$0xff] }
 0x17a   : > { %v2216_v48 = vpop.f32.mrf.mxu1  ;;  %v959_v51 = vrot.slane %v4735_v8, 1 }
 0x17b   : > { %v2033_v59 = vadd.f32 %v1953_v26, %v1518_v40  ;;  %1101 = vmatmul.bf16.gmra.mxu2 %v958_v56  ;;  %1995 = vmatmul.bf16.gmra.mxu0 %v1819_v0  ;;  %v4605_v26 = vld [vmem:[%s4826_s18 + $0x78] sm:$0xff]  ;;  %v2111_v0 = vrot.slane %v5365_v4, 2 }
 0x17c   : > { %1480 = vmatmul.bf16.gmra.mxu3 %v1337_v52  ;;  %v1338_v56 = vrot.slane %v4605_v26, 1 }
 0x17d   : > { %2255 = vmatmul.bf16.gmra.mxu1 %v2110_v18  ;;  %v5367_v55 = vadd.f32 %v2213_v57, %v2033_v59  ;;  %v1826_v57 = vrot.slane %v1824_v44, 2  ;;  %v2112_v4 = vsel %vm2083_vm3, %v2109_v50, %v2111_v0 }
 0x17e   : > { %v1062_v15 = vpop.f32.mrf.mxu2  ;;  %v1339_v35 = vsel %vm931_vm1, %v1336_v62, %v1338_v56 }
 0x17f   : > { %v1441_v1 = vpop.f32.mrf.mxu3  ;;  %v1140_v38 = vadd.f32 %v1062_v15, %v5155_v11  ;;  %v1827_v40 = vor.u32 %v1826_v57, %v1823_v21  ;;  %v4691_v11 = vld [vmem:[%s5922_s4] sm:$0xff] }
 0x180   : > { %v1958_v45 = vpop.f32.mrf.mxu0  ;;  %3548 = vmatpush.bf16.msra.mxu1 %v4691_v11  ;;  %v4606_v57 = vld [vmem:[%s4826_s18 + $0x80] sm:$0xff] }
 0x181   : > { %v1519_v33 = vadd.f32 %v1441_v1, %v1140_v38  ;;  %v5389_v38 = vld [vmem:[%s4826_s18 + $0x80] sm:$0xff] }
 0x182   : > { %v2218_v39 = vpop.f32.mrf.mxu1  ;;  %v1833_v62 = vshll.u32 %v5389_v38, 16 }
 0x183   : > { %v2034_v58 = vadd.f32 %v1956_v13, %v1519_v33  ;;  %v960_v13 = vsel %vm931_vm1, %v957_v6, %v959_v51  ;;  %v1830_v6 = vshrl.u32 %v5389_v38, 16 }
 0x184   : > { %v1835_v11 = vrot.slane %v1833_v62, 2 }
 0x185   : > { %v5377_v52 = vadd.f32 %v2216_v48, %v2034_v58  ;;  %v1828_v48 = vsel %vm1694_vm2, %v1818_v47, %v1827_v40 }
 0x186   : > { %v1064_v18 = vpop.f32.mrf.mxu2 }
 0x187   : > { %v1443_v59 = vpop.f32.mrf.mxu3  ;;  %v1141_v10 = vadd.f32 %v1064_v18, %v5168_v16 }
 0x188   : > { %v1961_v15 = vpop.f32.mrf.mxu0 }
 0x189   : > { %v1520_v44 = vadd.f32 %v1443_v59, %v1141_v10  ;;  %v4736_v59 = vld [vmem:[%s4826_s18 + $0x78] sm:$0xff] }
 0x18a   : > { %v2221_v1 = vpop.f32.mrf.mxu1  ;;  %v961_v10 = vrot.slane %v4736_v59, 1 }
 0x18b   : > { %v2035_v26 = vadd.f32 %v1958_v45, %v1520_v44  ;;  %1106 = vmatmul.bf16.gmra.mxu2 %v960_v13  ;;  %2000 = vmatmul.bf16.gmra.mxu0 %v1828_v48  ;;  %v1832_v45 = vrot.slane %v1830_v6, 1  ;;  %v2113_v44 = vrot.slane %v5389_v38, 2 }
 0x18c   : > { %1485 = vmatmul.bf16.gmra.mxu3 %v1339_v35 }
 0x18d   : > { %2260 = vmatmul.bf16.gmra.mxu1 %v2112_v4  ;;  %v5391_v16 = vadd.f32 %v2218_v39, %v2035_v26  ;;  %v1340_v39 = vrot.slane %v4606_v57, 1  ;;  %v1836_v35 = vor.u32 %v1835_v11, %v1832_v45  ;;  %v962_v26 = vsel %vm931_vm1, %v959_v51, %v961_v10 }
 0x18e   : > { %v1067_v33 = vpop.f32.mrf.mxu2 }
 0x18f   : > { %v1446_v21 = vpop.f32.mrf.mxu3  ;;  %v1142_v47 = vadd.f32 %v1067_v33, %v5181_v54  ;;  %v1341_v33 = vsel %vm931_vm1, %v1338_v56, %v1340_v39 }
 0x190   : > { %v1963_v58 = vpop.f32.mrf.mxu0 }
 0x191   : > { %v1521_v50 = vadd.f32 %v1446_v21, %v1142_v47  ;;  %v2114_v47 = vsel %vm2083_vm3, %v2111_v0, %v2113_v44  ;;  %v4675_v0 = vld [vmem:[%s5919_s1 + $0x1c0] sm:$0xff] }
 0x192   : > { %v2223_v8 = vpop.f32.mrf.mxu1  ;;  %2972 = vmatpush.bf16.msra.mxu3 %v4675_v0 }
 0x193   : > { %v2036_v18 = vadd.f32 %v1961_v15, %v1521_v50  ;;  %v1837_v15 = vsel %vm1694_vm2, %v1827_v40, %v1836_v35  ;;  %v4667_v40 = vld [vmem:[%s5919_s1 + $0x180] sm:$0xff] }
 0x194   : > { %2579 = vmatpush.bf16.msra.mxu2 %v4667_v40 }
 0x195   : > { %v5398_v13 = vadd.f32 %v2221_v1, %v2036_v18  ;;  %v5407_v1 = vld [vmem:[%s4826_s18 + $0x88] sm:$0xff] }
 0x196   : > { %v1069_v48 = vpop.f32.mrf.mxu2  ;;  %v1839_v51 = vshrl.u32 %v5407_v1, 16  ;;  %v1842_v56 = vshll.u32 %v5407_v1, 16 }
 0x197   : > { %v1448_v4 = vpop.f32.mrf.mxu3  ;;  %v1143_v54 = vadd.f32 %v1069_v48, %v5188_v5 }
 0x198   : > { %v1966_v62 = vpop.f32.mrf.mxu0  ;;  %v1841_v59 = vrot.slane %v1839_v51, 1  ;;  %v1844_v48 = vrot.slane %v1842_v56, 2 }
 0x199   : > { %v1522_v6 = vadd.f32 %v1448_v4, %v1143_v54  ;;  %v4737_v54 = vld [vmem:[%s4826_s18 + $0x80] sm:$0xff] }
 0x19a   : > { %v2226_v21 = vpop.f32.mrf.mxu1 }
 0x19b   : > { %v2037_v57 = vadd.f32 %v1963_v58, %v1522_v6  ;;  %1111 = vmatmul.bf16.gmra.mxu2 %v962_v26  ;;  %2005 = vmatmul.bf16.gmra.mxu0 %v1837_v15  ;;  %v963_v26 = vrot.slane %v4737_v54, 1  ;;  %v1845_v15 = vor.u32 %v1844_v48, %v1841_v59  ;;  %v4608_v48 = vld [vmem:[%s4826_s18 + $0x90] sm:$0xff] }
 0x19c   : > { %1490 = vmatmul.bf16.gmra.mxu3 %v1341_v33 }
 0x19d   : > { %2265 = vmatmul.bf16.gmra.mxu1 %v2114_v47  ;;  %v5409_v5 = vadd.f32 %v2223_v8, %v2037_v57  ;;  %v4607_v8 = vld [vmem:[%s4826_s18 + $0x88] sm:$0xff]  ;;  %v2115_v47 = vrot.slane %v5407_v1, 2 }
 0x19e   : > { %v1072_v38 = vpop.f32.mrf.mxu2  ;;  %v1342_v33 = vrot.slane %v4607_v8, 1 }
 0x19f   : > { %v1451_v50 = vpop.f32.mrf.mxu3  ;;  %v1144_v58 = vadd.f32 %v1072_v38, %v5207_v61  ;;  %v4683_v61 = vld [vmem:[%s5919_s1 + $0x200] sm:$0xff]  ;;  %v2116_v1 = vsel %vm2083_vm3, %v2113_v44, %v2115_v47 }
 0x1a0   : > { %v1968_v11 = vpop.f32.mrf.mxu0  ;;  %3232 = vmatpush.bf16.msra.mxu0 %v4683_v61  ;;  %v1343_v51 = vsel %vm931_vm1, %v1340_v39, %v1342_v33 }
 0x1a1   : > { %v1523_v45 = vadd.f32 %v1451_v50, %v1144_v58  ;;  %v5434_v58 = vld [vmem:[%s4826_s18 + $0x90] sm:$0xff] }
 0x1a2   : > { %v2228_v18 = vpop.f32.mrf.mxu1  ;;  %v1851_v39 = vshll.u32 %v5434_v58, 16 }
 0x1a3   : > { %v2038_v4 = vadd.f32 %v1966_v62, %v1523_v45  ;;  %v964_v62 = vsel %vm931_vm1, %v961_v10, %v963_v26  ;;  %v1848_v10 = vshrl.u32 %v5434_v58, 16 }
 0x1a4   : > { %v1853_v61 = vrot.slane %v1851_v39, 2 }
 0x1a5   : > { %v5422_v6 = vadd.f32 %v2226_v21, %v2038_v4  ;;  %v1846_v21 = vsel %vm1694_vm2, %v1836_v35, %v1845_v15 }
 0x1a6   : > { %v1074_v57 = vpop.f32.mrf.mxu2 }
 0x1a7   : > { %v1453_v40 = vpop.f32.mrf.mxu3  ;;  %v1145_v0 = vadd.f32 %v1074_v57, %v5217_v30 }
 0x1a8   : > { %v1971_v38 = vpop.f32.mrf.mxu0 }
 0x1a9   : > { %v1524_v56 = vadd.f32 %v1453_v40, %v1145_v0  ;;  %v965_v40 = vrot.slane %v5008_v9, 1 }
 0x1aa   : > { %v2231_v50 = vpop.f32.mrf.mxu1 }
 0x1ab   : > { %v2039_v8 = vadd.f32 %v1968_v11, %v1524_v56  ;;  %1116 = vmatmul.bf16.gmra.mxu2 %v964_v62  ;;  %2010 = vmatmul.bf16.gmra.mxu0 %v1846_v21  ;;  %v1850_v11 = vrot.slane %v1848_v10, 1 }
 0x1ac   : > { %1495 = vmatmul.bf16.gmra.mxu3 %v1343_v51  ;;  %v2117_v51 = vrot.slane %v5434_v58, 2 }
 0x1ad   : > { %2270 = vmatmul.bf16.gmra.mxu1 %v2116_v1  ;;  %v5436_v30 = vadd.f32 %v2228_v18, %v2039_v8  ;;  %v1344_v18 = vrot.slane %v4608_v48, 1  ;;  %v1854_v62 = vor.u32 %v1853_v61, %v1850_v11  ;;  %v1583_v1 = vld [vmem:[%s4826_s18 + $0x98] sm:$0x1]  ;;  %v966_v8 = vsel %vm931_vm1, %v963_v26, %v965_v40  ;;  %v2322_v61 = vld [vmem:[%s4826_s18 + $0x10] sm:$0xc] }
 0x1ae   : > { %v1077_v45 = vpop.f32.mrf.mxu2 }
 0x1af   : > { %v1456_v59 = vpop.f32.mrf.mxu3  ;;  %v1146_v35 = vadd.f32 %v1077_v45, %v5230_v25  ;;  %v1345_v45 = vsel %vm931_vm1, %v1342_v33, %v1344_v18 }
 0x1b0   : > { %v1973_v4 = vpop.f32.mrf.mxu0 }
 0x1b1   : > { %v1525_v44 = vadd.f32 %v1456_v59, %v1146_v35  ;;  %v1674_v59 = vunpack.c.l.b16 %v1583_v1 }
 0x1b2   : > { %v2233_v54 = vpop.f32.mrf.mxu1 }
 0x1b3   : > { %v2040_v57 = vadd.f32 %v1971_v38, %v1525_v44  ;;  %v1855_v38 = vsel %vm1694_vm2, %v1845_v15, %v1854_v62  ;;  %v1693_v26 = vpack.c.b16 %v1674_v59, %v1674_v59 }
 0x1b5   : > { %v5443_v0 = vadd.f32 %v2231_v50, %v2040_v57  ;;  %v2118_v50 = vsel %vm2083_vm3, %v2115_v47, %v2117_v51  ;;  %v1857_v47 = vshll.u32 %v1693_v26, 16  ;;  %v2323_v57 = vld [vmem:[%s4826_s18 + $0x14] sm:$0xf] }
 0x1b6   : > { %v1079_v56 = vpop.f32.mrf.mxu2 }
 0x1b7   : > { %v1458_v21 = vpop.f32.mrf.mxu3  ;;  %v1147_v25 = vadd.f32 %v1079_v56, %v5237_v34 }
 0x1b8   : > { %v1976_v39 = vpop.f32.mrf.mxu0 }
 0x1b9   : > { %v1526_v10 = vadd.f32 %v1458_v21, %v1147_v25  ;;  %v2414_v21 = vunpack.c.l.b16 %v2323_v57  ;;  %v2119_v25 = vrot.slane %v1693_v26, 2 }
 0x1ba   : > { %v2236_v9 = vpop.f32.mrf.mxu1 }
 0x1bb   : > { %v2041_v58 = vadd.f32 %v1973_v4, %v1526_v10  ;;  %1121 = vmatmul.bf16.gmra.mxu2 %v966_v8  ;;  %2015 = vmatmul.bf16.gmra.mxu0 %v1855_v38  ;;  %v2413_v4 = vunpack.c.l.b16 %v2322_v61 }
 0x1bc   : > { %1500 = vmatmul.bf16.gmra.mxu3 %v1345_v45 }
 0x1bd   : > { %2275 = vmatmul.bf16.gmra.mxu1 %v2118_v50  ;;  %v5452_v34 = vadd.f32 %v2233_v54, %v2041_v58  ;;  %v1859_v54 = vrot.slane %v1857_v47, 2  ;;  %v2450_v38 = vpack.c.b16 %v2414_v21, %v2413_v4 }
 0x1be   : > { %v1082_v35 = vpop.f32.mrf.mxu2 }
 0x1bf   : > { %v1461_v33 = vpop.f32.mrf.mxu3  ;;  %v1148_v48 = vadd.f32 %v1082_v35, %v5250_v14  ;;  %v5461_v14 = vld [vmem:[%s4826_s18 + $0x18] sm:$0xff]  ;;  %v1860_v58 = vsel %vm1694_vm2, %v1854_v62, %v1859_v54  ;;  %v2730_v26 = vshrl.u32 %v2450_v38, 16 }
 0x1c0   : > { %v1978_v44 = vpop.f32.mrf.mxu0 }
 0x1c1   : > { %v1527_v15 = vadd.f32 %v1461_v33, %v1148_v48  ;;  %v3100_v33 = vld [vmem:[%s4826_s18 + $0x10] sm:$0x8]  ;;  %v2733_v48 = vshll.u32 %v2450_v38, 16 }
 0x1c2   : > { %v2238_v11 = vpop.f32.mrf.mxu1  ;;  %v3119_v62 = vunpack.c.l.b16 %v3100_v33  ;;  %v3400_v33 = vld [vmem:[%s5477_s10] sm:$0xff] }
 0x1c3   : > { %v2042_v56 = vadd.f32 %v1976_v39, %v1527_v15  ;;  %v2120_v39 = vsel %vm2083_vm3, %v2117_v51, %v2119_v25  ;;  %v2741_v15 = vshll.u32 %v5461_v14, 16 }
 0x1c5   : > { %v5457_v1 = vadd.f32 %v2236_v9, %v2042_v56  ;;  %v2743_v56 = vrot.slane %v2741_v15, 3 }
 0x1c6   : > { %v1084_v8 = vpop.f32.mrf.mxu2 }
 0x1c7   : > { %v1463_v45 = vpop.f32.mrf.mxu3  ;;  %v1149_v10 = vadd.f32 %v1084_v8, %v5263_v28  ;;  %v2738_v28 = vshrl.u32 %v5461_v14, 16  ;;  %v3120_v8 = vpack.c.b16 %v2414_v21, %v3119_v62  ;;  %v3123_v21 = vrot.slane %v5461_v14, 3  ;;  %v5489_v62 = vld [vmem:[%s4826_s18 + $0x20] sm:$0xff] }
 0x1c8   : > { %v1981_v59 = vpop.f32.mrf.mxu0 }
 0x1c9   : > { %v1528_v50 = vadd.f32 %v1463_v45, %v1149_v10  ;;  %v2469_v45 = vrot.slane %v2450_v38, 2 }
 0x1ca   : > { %v2241_v35 = vpop.f32.mrf.mxu1 }
 0x1cb   : > { %v2043_v9 = vadd.f32 %v1978_v44, %v1528_v50  ;;  %1126 = vmatmul.bf16.gmra.mxu2 %v965_v40  ;;  %2020 = vmatmul.bf16.gmra.mxu0 %v1860_v58  ;;  %v2732_v44 = vrot.slane %v2730_v26, 2  ;;  %v2735_v40 = vrot.slane %v2733_v48, 3 }
 0x1cc   : > { %1505 = vmatmul.bf16.gmra.mxu3 %v1344_v18  ;;  %v2740_v18 = vrot.slane %v2738_v28, 2 }
 0x1cd   : > { %2280 = vmatmul.bf16.gmra.mxu1 %v2120_v39  ;;  %v5468_v47 = vadd.f32 %v2238_v11, %v2043_v9  ;;  %v2736_v10 = vor.u32 %v2735_v40, %v2732_v44  ;;  %v3122_v39 = vrot.slane %v3120_v8, 3  ;;  %v3401_v9 = vld [vmem:[%s5477_s10 + $0x8] sm:$0xff]  ;;  %v2750_v44 = vshll.u32 %v5489_v62, 16 }
 0x1ce   : > { %v1087_v61 = vpop.f32.mrf.mxu2  ;;  %v2744_v50 = vor.u32 %v2743_v56, %v2740_v18  ;;  %v3436_v15 = vpack.c.bf16 %v3401_v9, %v3400_v33  ;;  %v2472_v33 = vrot.slane %v5489_v62, 2 }
 0x1cf   : > { %v1466_v57 = vpop.f32.mrf.mxu3  ;;  %v1150_v51 = vadd.f32 %v1087_v61, %v5064_v2  ;;  %v2470_v2 = vrot.slane %v5461_v14, 2 }
 0x1d0   : > { %v1983_v54 = vpop.f32.mrf.mxu0 }
 0x1d1   : > { %v1529_v4 = vadd.f32 %v1466_v57, %v1150_v51  ;;  %v2471_v38 = vsel %vm2083_vm3, %v2469_v45, %v2470_v2  ;;  %v3124_v57 = vsel %vm3121_vm5, %v3122_v39, %v3123_v21 }
 0x1d2   : > { %v2243_v25 = vpop.f32.mrf.mxu1 }
 0x1d3   : > { %v2044_v11 = vadd.f32 %v1981_v59, %v1529_v4  ;;  %v2745_v59 = vsel %vm2728_vm4, %v2736_v10, %v2744_v50 }
 0x1d5   : > { %v5480_v58 = vadd.f32 %v2241_v35, %v2044_v11  ;;  %v2752_v11 = vrot.slane %v2750_v44, 3 }
 0x1d6   : > { %v1089_v26 = vpop.f32.mrf.mxu2 }
 0x1d7   : > { %v1468_v48 = vpop.f32.mrf.mxu3  ;;  %v1151_v28 = vadd.f32 %v1089_v26, %v5071_v29  ;;  %v2747_v29 = vshrl.u32 %v5489_v62, 16 }
 0x1d8   : > { %v1986_v61 = vpop.f32.mrf.mxu0 }
 0x1d9   : > { %v1530_v35 = vadd.f32 %v1468_v48, %v1151_v28  ;;  %v2749_v8 = vrot.slane %v2747_v29, 2  ;;  %v3125_v48 = vrot.slane %v5489_v62, 3  ;;  %v3403_v28 = vld [vmem:[%s5477_s10 + $0x18] sm:$0xff] }
 0x1da   : > { %v2246_v51 = vpop.f32.mrf.mxu1 }
 0x1db   : > { %v2045_v14 = vadd.f32 %v1983_v54, %v1530_v35  ;;  %2580 = vmatmul.bf16.vlgmr.msra.gmra.mxu2 %v2471_v38  ;;  %3233 = vmatmul.bf16.vlgmr.msra.gmra.mxu0 %v3124_v57  ;;  %v2753_v9 = vor.u32 %v2752_v11, %v2749_v8 }
 0x1dc   : > { %2973 = vmatmul.bf16.vlgmr.msra.gmra.mxu3 %v2745_v59 }
 0x1dd   : > { %4531 = vmatmul.msk.bf16.vlgmr.msra.gmra.mxu1 %vm3486_vm6, %v3436_v15  ;;  %v5495_v40 = vadd.f32 %v2243_v25, %v2045_v14  ;;  %v3402_v25 = vld [vmem:[%s5477_s10 + $0x10] sm:$0xff]  ;;  %v2473_v15 = vsel %vm2083_vm3, %v2470_v2, %v2472_v33  ;;  %v2754_v35 = vsel %vm2728_vm4, %v2744_v50, %v2753_v9  ;;  %v5508_v14 = vld [vmem:[%s4826_s18 + $0x28] sm:$0xff] }
 0x1de   : > { %v1092_v18 = vpop.f32.mrf.mxu2  ;;  %v3437_v57 = vpack.c.bf16 %v3403_v28, %v3402_v25  ;;  %v2759_v2 = vshll.u32 %v5508_v14, 16  ;;  %v2474_v25 = vrot.slane %v5508_v14, 2 }
 0x1df   : > { %v1471_v56 = vpop.f32.mrf.mxu3  ;;  %v1152_v4 = vadd.f32 %v1092_v18, %v5084_v43 }
 0x1e0   : > { %v1988_v45 = vpop.f32.mrf.mxu0  ;;  %v2761_v8 = vrot.slane %v2759_v2, 3 }
 0x1e1   : > { %v1531_v54 = vadd.f32 %v1471_v56, %v1152_v4 }
 0x1e2   : > { %v2248_v10 = vpop.f32.mrf.mxu1 }
 0x1e3   : > { %v2046_v39 = vadd.f32 %v1986_v61, %v1531_v54 }
 0x1e5   : > { %v5499_v26 = vadd.f32 %v2246_v51, %v2046_v39  ;;  %v3126_v51 = vsel %vm3121_vm5, %v3123_v21, %v3125_v48 }
 0x1e6   : > { %v1094_v38 = vpop.f32.mrf.mxu2 }
 0x1e7   : > { %v1473_v59 = vpop.f32.mrf.mxu3  ;;  %v1153_v43 = vadd.f32 %v1094_v38, %v5097_v20  ;;  %v2756_v20 = vshrl.u32 %v5508_v14, 16 }
 0x1e8   : > { %v1991_v29 = vpop.f32.mrf.mxu0 }
 0x1e9   : > { %v1532_v61 = vadd.f32 %v1473_v59, %v1153_v43  ;;  %v2758_v21 = vrot.slane %v2756_v20, 2  ;;  %v3127_v59 = vrot.slane %v5508_v14, 3  ;;  %v3405_v43 = vld [vmem:[%s5477_s10 + $0x28] sm:$0xff] }
 0x1ea   : > { %v2251_v44 = vpop.f32.mrf.mxu1 }
 0x1eb   : > { %v2047_v18 = vadd.f32 %v1988_v45, %v1532_v61  ;;  %2585 = vmatmul.bf16.gmra.mxu2 %v2473_v15  ;;  %3238 = vmatmul.bf16.gmra.mxu0 %v3126_v51  ;;  %v2762_v28 = vor.u32 %v2761_v8, %v2758_v21 }
 0x1ec   : > { %2978 = vmatmul.bf16.gmra.mxu3 %v2754_v35 }
 0x1ed   : > { %4532 = vmatmul.msk.bf16.gmra.mxu1 %vm3486_vm6, %v3437_v57  ;;  %v5514_v50 = vadd.f32 %v2248_v10, %v2047_v18  ;;  %v3404_v10 = vld [vmem:[%s5477_s10 + $0x20] sm:$0xff]  ;;  %v2475_v57 = vsel %vm2083_vm3, %v2472_v33, %v2474_v25  ;;  %v2763_v61 = vsel %vm2728_vm4, %v2753_v9, %v2762_v28  ;;  %v5527_v18 = vld [vmem:[%s4826_s18 + $0x30] sm:$0xff] }
 0x1ee   : > { %v1097_v62 = vpop.f32.mrf.mxu2  ;;  %v3438_v51 = vpack.c.bf16 %v3405_v43, %v3404_v10  ;;  %v2768_v33 = vshll.u32 %v5527_v18, 16  ;;  %v2476_v10 = vrot.slane %v5527_v18, 2 }
 0x1ef   : > { %v1476_v56 = vpop.f32.mrf.mxu3  ;;  %v1154_v4 = vadd.f32 %v1097_v62, %v5113_v12 }
 0x1f0   : > { %v1993_v54 = vpop.f32.mrf.mxu0  ;;  %v2770_v21 = vrot.slane %v2768_v33, 3 }
 0x1f1   : > { %v1533_v11 = vadd.f32 %v1476_v56, %v1154_v4 }
 0x1f2   : > { %v2253_v45 = vpop.f32.mrf.mxu1 }
 0x1f3   : > { %v2048_v39 = vadd.f32 %v1991_v29, %v1533_v11 }
 0x1f5   : > { %v5518_v38 = vadd.f32 %v2251_v44, %v2048_v39  ;;  %v3128_v44 = vsel %vm3121_vm5, %v3125_v48, %v3127_v59 }
 0x1f6   : > { %v1099_v15 = vpop.f32.mrf.mxu2 }
 0x1f7   : > { %v1478_v35 = vpop.f32.mrf.mxu3  ;;  %v1155_v12 = vadd.f32 %v1099_v15, %v5120_v32  ;;  %v2765_v32 = vshrl.u32 %v5527_v18, 16 }
 0x1f8   : > { %v1996_v20 = vpop.f32.mrf.mxu0 }
 0x1f9   : > { %v1534_v29 = vadd.f32 %v1478_v35, %v1155_v12  ;;  %v2767_v48 = vrot.slane %v2765_v32, 2  ;;  %v3129_v35 = vrot.slane %v5527_v18, 3  ;;  %v3407_v12 = vld [vmem:[%s5477_s10 + $0x38] sm:$0xff] }
 0x1fa   : > { %v2256_v2 = vpop.f32.mrf.mxu1 }
 0x1fb   : > { %v2049_v62 = vadd.f32 %v1993_v54, %v1534_v29  ;;  %2590 = vmatmul.bf16.gmra.mxu2 %v2475_v57  ;;  %3243 = vmatmul.bf16.gmra.mxu0 %v3128_v44  ;;  %v2771_v43 = vor.u32 %v2770_v21, %v2767_v48 }
 0x1fc   : > { %2983 = vmatmul.bf16.gmra.mxu3 %v2763_v61 }
 0x1fd   : > { %4533 = vmatmul.msk.bf16.gmra.mxu1 %vm3486_vm6, %v3438_v51  ;;  %v5533_v9 = vadd.f32 %v2253_v45, %v2049_v62  ;;  %v3406_v45 = vld [vmem:[%s5477_s10 + $0x30] sm:$0xff]  ;;  %v2477_v51 = vsel %vm2083_vm3, %v2474_v25, %v2476_v10  ;;  %v2772_v29 = vsel %vm2728_vm4, %v2762_v28, %v2771_v43  ;;  %v5546_v62 = vld [vmem:[%s4826_s18 + $0x38] sm:$0xff] }
 0x1fe   : > { %v1102_v14 = vpop.f32.mrf.mxu2  ;;  %v3439_v44 = vpack.c.bf16 %v3407_v12, %v3406_v45  ;;  %v2777_v25 = vshll.u32 %v5546_v62, 16  ;;  %v2478_v45 = vrot.slane %v5546_v62, 2 }
 0x1ff   : > { %v1481_v56 = vpop.f32.mrf.mxu3  ;;  %v1156_v4 = vadd.f32 %v1102_v14, %v5133_v46 }
 0x200   : > { %v1998_v11 = vpop.f32.mrf.mxu0  ;;  %v2779_v48 = vrot.slane %v2777_v25, 3 }
 0x201   : > { %v1535_v8 = vadd.f32 %v1481_v56, %v1156_v4 }
 0x202   : > { %v2258_v54 = vpop.f32.mrf.mxu1 }
 0x203   : > { %v2050_v39 = vadd.f32 %v1996_v20, %v1535_v8 }
 0x205   : > { %v5537_v15 = vadd.f32 %v2256_v2, %v2050_v39  ;;  %v3130_v2 = vsel %vm3121_vm5, %v3127_v59, %v3129_v35 }
 0x206   : > { %v1104_v57 = vpop.f32.mrf.mxu2 }
 0x207   : > { %v1483_v61 = vpop.f32.mrf.mxu3  ;;  %v1157_v46 = vadd.f32 %v1104_v57, %v5146_v3  ;;  %v2774_v3 = vshrl.u32 %v5546_v62, 16 }
 0x208   : > { %v2001_v32 = vpop.f32.mrf.mxu0 }
 0x209   : > { %v1536_v20 = vadd.f32 %v1483_v61, %v1157_v46  ;;  %v2776_v59 = vrot.slane %v2774_v3, 2  ;;  %v3131_v61 = vrot.slane %v5546_v62, 3  ;;  %v3409_v46 = vld [vmem:[%s5477_s10 + $0x48] sm:$0xff] }
 0x20a   : > { %v2261_v33 = vpop.f32.mrf.mxu1 }
 0x20b   : > { %v2051_v14 = vadd.f32 %v1998_v11, %v1536_v20  ;;  %2595 = vmatmul.bf16.gmra.mxu2 %v2477_v51  ;;  %3248 = vmatmul.bf16.gmra.mxu0 %v3130_v2  ;;  %v2780_v12 = vor.u32 %v2779_v48, %v2776_v59 }
 0x20c   : > { %2988 = vmatmul.bf16.gmra.mxu3 %v2772_v29 }
 0x20d   : > { %4534 = vmatmul.msk.bf16.gmra.mxu1 %vm3486_vm6, %v3439_v44  ;;  %v5552_v28 = vadd.f32 %v2258_v54, %v2051_v14  ;;  %v3408_v54 = vld [vmem:[%s5477_s10 + $0x40] sm:$0xff]  ;;  %v2479_v44 = vsel %vm2083_vm3, %v2476_v10, %v2478_v45  ;;  %v2781_v20 = vsel %vm2728_vm4, %v2771_v43, %v2780_v12 }
 0x20e   : > { %v1107_v18 = vpop.f32.mrf.mxu2  ;;  %v3440_v2 = vpack.c.bf16 %v3409_v46, %v3408_v54  ;;  %v5565_v14 = vld [vmem:[%s4826_s18 + $0x40] sm:$0xff] }
 0x20f   : > { %v1486_v56 = vpop.f32.mrf.mxu3  ;;  %v1158_v4 = vadd.f32 %v1107_v18, %v5162_v24  ;;  %v2786_v10 = vshll.u32 %v5565_v14, 16  ;;  %v2480_v54 = vrot.slane %v5565_v14, 2 }
 0x210   : > { %v2003_v8 = vpop.f32.mrf.mxu0 }
 0x211   : > { %v1537_v21 = vadd.f32 %v1486_v56, %v1158_v4  ;;  %v2788_v59 = vrot.slane %v2786_v10, 3 }
 0x212   : > { %v2263_v11 = vpop.f32.mrf.mxu1 }
 0x213   : > { %v2052_v39 = vadd.f32 %v2001_v32, %v1537_v21 }
 0x215   : > { %v5556_v57 = vadd.f32 %v2261_v33, %v2052_v39  ;;  %v3132_v33 = vsel %vm3121_vm5, %v3129_v35, %v3131_v61 }
 0x216   : > { %v1109_v51 = vpop.f32.mrf.mxu2 }
 0x217   : > { %v1488_v29 = vpop.f32.mrf.mxu3  ;;  %v1159_v24 = vadd.f32 %v1109_v51, %v5172_v42  ;;  %v2783_v42 = vshrl.u32 %v5565_v14, 16 }
 0x218   : > { %v2006_v3 = vpop.f32.mrf.mxu0 }
 0x219   : > { %v1538_v32 = vadd.f32 %v1488_v29, %v1159_v24  ;;  %v2785_v35 = vrot.slane %v2783_v42, 2  ;;  %v3133_v29 = vrot.slane %v5565_v14, 3  ;;  %v3411_v24 = vld [vmem:[%s5477_s10 + $0x58] sm:$0xff] }
 0x21a   : > { %v2266_v25 = vpop.f32.mrf.mxu1 }
 0x21b   : > { %v2053_v18 = vadd.f32 %v2003_v8, %v1538_v32  ;;  %2600 = vmatmul.bf16.gmra.mxu2 %v2479_v44  ;;  %3253 = vmatmul.bf16.gmra.mxu0 %v3132_v33  ;;  %v2789_v46 = vor.u32 %v2788_v59, %v2785_v35 }
 0x21c   : > { %2993 = vmatmul.bf16.gmra.mxu3 %v2781_v20 }
 0x21d   : > { %4535 = vmatmul.msk.bf16.gmra.mxu1 %vm3486_vm6, %v3440_v2  ;;  %v5571_v43 = vadd.f32 %v2263_v11, %v2053_v18  ;;  %v3410_v11 = vld [vmem:[%s5477_s10 + $0x50] sm:$0xff]  ;;  %v2481_v2 = vsel %vm2083_vm3, %v2478_v45, %v2480_v54  ;;  %v2790_v32 = vsel %vm2728_vm4, %v2780_v12, %v2789_v46  ;;  %v5584_v18 = vld [vmem:[%s4826_s18 + $0x48] sm:$0xff] }
 0x21e   : > { %v1112_v62 = vpop.f32.mrf.mxu2  ;;  %v3441_v33 = vpack.c.bf16 %v3411_v24, %v3410_v11  ;;  %v2795_v45 = vshll.u32 %v5584_v18, 16  ;;  %v2482_v11 = vrot.slane %v5584_v18, 2 }
 0x21f   : > { %v1491_v56 = vpop.f32.mrf.mxu3  ;;  %v1160_v4 = vadd.f32 %v1112_v62, %v5185_v63 }
 0x220   : > { %v2008_v21 = vpop.f32.mrf.mxu0  ;;  %v2797_v35 = vrot.slane %v2795_v45, 3 }
 0x221   : > { %v1539_v48 = vadd.f32 %v1491_v56, %v1160_v4 }
 0x222   : > { %v2268_v8 = vpop.f32.mrf.mxu1 }
 0x223   : > { %v2054_v39 = vadd.f32 %v2006_v3, %v1539_v48 }
 0x225   : > { %v5575_v51 = vadd.f32 %v2266_v25, %v2054_v39  ;;  %v3134_v25 = vsel %vm3121_vm5, %v3131_v61, %v3133_v29 }
 0x226   : > { %v1114_v44 = vpop.f32.mrf.mxu2 }
 0x227   : > { %v1493_v20 = vpop.f32.mrf.mxu3  ;;  %v1161_v63 = vadd.f32 %v1114_v44, %v5192_v19  ;;  %v2792_v19 = vshrl.u32 %v5584_v18, 16 }
 0x228   : > { %v2011_v42 = vpop.f32.mrf.mxu0 }
 0x229   : > { %v1540_v3 = vadd.f32 %v1493_v20, %v1161_v63  ;;  %v2794_v61 = vrot.slane %v2792_v19, 2  ;;  %v3135_v20 = vrot.slane %v5584_v18, 3  ;;  %v3413_v63 = vld [vmem:[%s5477_s10 + $0x68] sm:$0xff] }
 0x22a   : > { %v2271_v10 = vpop.f32.mrf.mxu1 }
 0x22b   : > { %v2055_v62 = vadd.f32 %v2008_v21, %v1540_v3  ;;  %2605 = vmatmul.bf16.gmra.mxu2 %v2481_v2  ;;  %3258 = vmatmul.bf16.gmra.mxu0 %v3134_v25  ;;  %v2798_v24 = vor.u32 %v2797_v35, %v2794_v61 }
 0x22c   : > { %2998 = vmatmul.bf16.gmra.mxu3 %v2790_v32 }
 0x22d   : > { %4536 = vmatmul.msk.bf16.gmra.mxu1 %vm3486_vm6, %v3441_v33  ;;  %v5590_v12 = vadd.f32 %v2268_v8, %v2055_v62  ;;  %v3412_v8 = vld [vmem:[%s5477_s10 + $0x60] sm:$0xff]  ;;  %v2483_v33 = vsel %vm2083_vm3, %v2480_v54, %v2482_v11  ;;  %v2799_v3 = vsel %vm2728_vm4, %v2789_v46, %v2798_v24  ;;  %v5603_v62 = vld [vmem:[%s4826_s18 + $0x50] sm:$0xff] }
 0x22e   : > { %v1117_v14 = vpop.f32.mrf.mxu2  ;;  %v3442_v25 = vpack.c.bf16 %v3413_v63, %v3412_v8  ;;  %v2804_v54 = vshll.u32 %v5603_v62, 16  ;;  %v2484_v8 = vrot.slane %v5603_v62, 2 }
 0x22f   : > { %v1496_v56 = vpop.f32.mrf.mxu3  ;;  %v1162_v4 = vadd.f32 %v1117_v14, %v5211_v36 }
 0x230   : > { %v2013_v48 = vpop.f32.mrf.mxu0  ;;  %v2806_v61 = vrot.slane %v2804_v54, 3 }
 0x231   : > { %v1541_v59 = vadd.f32 %v1496_v56, %v1162_v4 }
 0x232   : > { %v2273_v21 = vpop.f32.mrf.mxu1 }
 0x233   : > { %v2056_v39 = vadd.f32 %v2011_v42, %v1541_v59 }
 0x235   : > { %v5594_v44 = vadd.f32 %v2271_v10, %v2056_v39  ;;  %v3136_v10 = vsel %vm3121_vm5, %v3133_v29, %v3135_v20 }
 0x236   : > { %v1119_v2 = vpop.f32.mrf.mxu2 }
 0x237   : > { %v1498_v32 = vpop.f32.mrf.mxu3  ;;  %v1163_v36 = vadd.f32 %v1119_v2, %v5221_v41  ;;  %v2801_v41 = vshrl.u32 %v5603_v62, 16 }
 0x238   : > { %v2016_v19 = vpop.f32.mrf.mxu0 }
 0x239   : > { %v1542_v42 = vadd.f32 %v1498_v32, %v1163_v36  ;;  %v2803_v29 = vrot.slane %v2801_v41, 2  ;;  %v3137_v32 = vrot.slane %v5603_v62, 3  ;;  %v3415_v36 = vld [vmem:[%s5477_s10 + $0x78] sm:$0xff] }
 0x23a   : > { %v2276_v45 = vpop.f32.mrf.mxu1 }
 0x23b   : > { %v2057_v14 = vadd.f32 %v2013_v48, %v1542_v42  ;;  %2610 = vmatmul.bf16.gmra.mxu2 %v2483_v33  ;;  %3263 = vmatmul.bf16.gmra.mxu0 %v3136_v10  ;;  %v2807_v63 = vor.u32 %v2806_v61, %v2803_v29 }
 0x23c   : > { %3003 = vmatmul.bf16.gmra.mxu3 %v2799_v3 }
 0x23d   : > { %4537 = vmatmul.msk.bf16.gmra.mxu1 %vm3486_vm6, %v3442_v25  ;;  %v5609_v46 = vadd.f32 %v2273_v21, %v2057_v14  ;;  %v3414_v21 = vld [vmem:[%s5477_s10 + $0x70] sm:$0xff]  ;;  %v2485_v25 = vsel %vm2083_vm3, %v2482_v11, %v2484_v8  ;;  %v2808_v42 = vsel %vm2728_vm4, %v2798_v24, %v2807_v63  ;;  %v5622_v14 = vld [vmem:[%s4826_s18 + $0x58] sm:$0xff] }
 0x23e   : > { %v1122_v18 = vpop.f32.mrf.mxu2  ;;  %v3443_v10 = vpack.c.bf16 %v3415_v36, %v3414_v21  ;;  %v2813_v11 = vshll.u32 %v5622_v14, 16  ;;  %v2486_v21 = vrot.slane %v5622_v14, 2 }
 0x23f   : > { %v1501_v56 = vpop.f32.mrf.mxu3  ;;  %v1164_v4 = vadd.f32 %v1122_v18, %v5234_v27 }
 0x240   : > { %v2018_v59 = vpop.f32.mrf.mxu0  ;;  %v2815_v29 = vrot.slane %v2813_v11, 3 }
 0x241   : > { %v1543_v35 = vadd.f32 %v1501_v56, %v1164_v4 }
 0x242   : > { %v2278_v48 = vpop.f32.mrf.mxu1 }
 0x243   : > { %v2058_v39 = vadd.f32 %v2016_v19, %v1543_v35 }
 0x245   : > { %v5613_v2 = vadd.f32 %v2276_v45, %v2058_v39  ;;  %v3138_v45 = vsel %vm3121_vm5, %v3135_v20, %v3137_v32 }
 0x246   : > { %v1124_v33 = vpop.f32.mrf.mxu2 }
 0x247   : > { %v1503_v3 = vpop.f32.mrf.mxu3  ;;  %v1165_v27 = vadd.f32 %v1124_v33, %v5241_v49  ;;  %v2810_v49 = vshrl.u32 %v5622_v14, 16 }
 0x248   : > { %v2021_v41 = vpop.f32.mrf.mxu0 }
 0x249   : > { %v1544_v19 = vadd.f32 %v1503_v3, %v1165_v27  ;;  %v2812_v20 = vrot.slane %v2810_v49, 2  ;;  %v3139_v3 = vrot.slane %v5622_v14, 3  ;;  %v3417_v27 = vld [vmem:[%s5477_s10 + $0x88] sm:$0xff]  ;;  %v5641_v49 = vld [vmem:[%s4826_s18 + $0x60] sm:$0xff] }
 0x24a   : > { %v2281_v54 = vpop.f32.mrf.mxu1  ;;  %v2819_v14 = vshrl.u32 %v5641_v49, 16 }
 0x24b   : > { %v2059_v18 = vadd.f32 %v2018_v59, %v1544_v19  ;;  %2615 = vmatmul.bf16.gmra.mxu2 %v2485_v25  ;;  %3268 = vmatmul.bf16.gmra.mxu0 %v3138_v45  ;;  %v2816_v36 = vor.u32 %v2815_v29, %v2812_v20  ;;  %v2487_v19 = vsel %vm2083_vm3, %v2484_v8, %v2486_v21  ;;  %v2822_v8 = vshll.u32 %v5641_v49, 16 }
 0x24c   : > { %3008 = vmatmul.bf16.gmra.mxu3 %v2808_v42 }
 0x24d   : > { %4538 = vmatmul.msk.bf16.gmra.mxu1 %vm3486_vm6, %v3443_v10  ;;  %v5628_v24 = vadd.f32 %v2278_v48, %v2059_v18  ;;  %v3416_v48 = vld [vmem:[%s5477_s10 + $0x80] sm:$0xff]  ;;  %v2817_v45 = vsel %vm2728_vm4, %v2807_v63, %v2816_v36 }
 0x24e   : > { %v1127_v62 = vpop.f32.mrf.mxu2  ;;  %v5926_v10 = vld [vmem:[#allocation2_spill] sm:$0xff]  ;;  %v3444_v18 = vpack.c.bf16 %v3417_v27, %v3416_v48 }
 0x24f   : > { %v1506_v56 = vpop.f32.mrf.mxu3  ;;  %v1166_v4 = vadd.f32 %v1127_v62, %v5260_v22 }
 0x250   : > { %v2023_v35 = vpop.f32.mrf.mxu0 }
 0x251   : > { %v1545_v61 = vadd.f32 %v1506_v56, %v1166_v4 }
 0x252   : > { %v2283_v59 = vpop.f32.mrf.mxu1 }
 0x253   : > { %v2060_v39 = vadd.f32 %v2021_v41, %v1545_v61  ;;  %v2824_v61 = vrot.slane %v2822_v8, 3 }
 0x255   : > { %v5632_v33 = vadd.f32 %v2281_v54, %v2060_v39  ;;  %v3140_v54 = vsel %vm3121_vm5, %v3137_v32, %v3139_v3  ;;  %v2821_v32 = vrot.slane %v2819_v14, 2  ;;  %v5653_v39 = vld [vmem:[%s5920_s2] ss:$0 sm:$0xff] }
 0x256   : > { %v1129_v25 = vpop.f32.mrf.mxu2 }
 0x257   : > { %v1508_v42 = vpop.f32.mrf.mxu3  ;;  %v1167_v22 = vadd.f32 %v1129_v25, %v5926_v10 }
 0x258   : > { %v3234_v11 = vpop.f32.mrf.mxu0 }
 0x259   : > { %v1546_v41 = vadd.f32 %v1508_v42, %v1167_v22  ;;  %v2825_v42 = vor.u32 %v2824_v61, %v2821_v32  ;;  %v3141_v22 = vrot.slane %v5641_v49, 3 }
 0x25a   : > { %v3550_v62 = vpop.f32.mrf.mxu1 }
 0x25b   : > { %v2061_v56 = vadd.f32 %v2023_v35, %v1546_v41  ;;  %2620 = vmatmul.bf16.gmra.mxu2 %v2487_v19  ;;  %3273 = vmatmul.bf16.gmra.mxu0 %v3140_v54  ;;  %v3418_v19 = vld [vmem:[%s5477_s10 + $0x90] sm:$0xff]  ;;  %v2826_v14 = vsel %vm2728_vm4, %v2816_v36, %v2825_v42 }
 0x25c   : > { %3013 = vmatmul.bf16.gmra.mxu3 %v2817_v45  ;;  %v3419_v45 = vld [vmem:[%s5477_s10 + $0x98] sm:$0xff] }
 0x25d   : > { %4539 = vmatmul.msk.bf16.gmra.mxu1 %vm3486_vm6, %v3444_v18  ;;  %v5647_v4 = vadd.f32 %v2283_v59, %v2061_v56  ;;  %v2488_v59 = vrot.slane %v5641_v49, 2  ;;  %v3445_v8 = vpack.c.bf16 %v3419_v45, %v3418_v19  ;;  %v5676_v49 = vld [vmem:[%s4826_s18 + $0x68] sm:$0xff] }
 0x25e   : > { %v2581_v63 = vpop.f32.mrf.mxu2  ;;  %v2831_v36 = vshll.u32 %v5676_v49, 16 }
 0x25f   : > { %v2974_v20 = vpop.f32.mrf.mxu3  ;;  %v2671_v29 = vadd.f32 %v2581_v63, %v5287_v60  ;;  %v5660_v60 = vld [vmem:[%s5923_s5] ss:$0 sm:$0xff]  ;;  %v2489_v56 = vsel %vm2083_vm3, %v2486_v21, %v2488_v59  ;;  %v2828_v21 = vshrl.u32 %v5676_v49, 16 }
 0x260   : > { %v3236_v48 = vpop.f32.mrf.mxu0  ;;  %v2833_v19 = vrot.slane %v2831_v36, 3 }
 0x261   : > { %v3064_v35 = vadd.f32 %v2974_v20, %v2671_v29 }
 0x262   : > { %v3552_v27 = vpop.f32.mrf.mxu1 }
 0x263   : > { %v3324_v25 = vadd.f32 %v3234_v11, %v3064_v35 }
 0x265   : > { %v3364_v10 = vadd.f32 %v5653_v39, %v3324_v25 }
 0x266   : > { %v2583_v18 = vpop.f32.mrf.mxu2 }
 0x267   : > { %v2976_v41 = vpop.f32.mrf.mxu3  ;;  %v3640_v54 = vadd.f32 %v3550_v62, %v3364_v10  ;;  %v2672_v11 = vadd.f32 %v2583_v18, %v5298_v17  ;;  %v3142_v17 = vsel %vm3121_vm5, %v3139_v3, %v3141_v22 }
 0x268   : > { %v3239_v62 = vpop.f32.mrf.mxu0 }
 0x269   : > { %v3680_v63 = vadd.f32 %v5660_v60, %v3640_v54  ;;  %v3065_v20 = vadd.f32 %v2976_v41, %v2672_v11 }
 0x26a   : > { %v3555_v29 = vpop.f32.mrf.mxu1 }
 0x26b   : > { %3716 = vst [vmem:[%s5671_s17] sm:$0xff] %v3680_v63  ;;  %v3325_v32 = vadd.f32 %v3236_v48, %v3065_v20  ;;  %2625 = vmatmul.bf16.gmra.mxu2 %v2489_v56  ;;  %3278 = vmatmul.bf16.gmra.mxu0 %v3142_v17  ;;  %v2830_v48 = vrot.slane %v2828_v21, 2  ;;  %v2490_v56 = vrot.slane %v5676_v49, 2  ;;  %v3143_v63 = vrot.slane %v5676_v49, 3 }
 0x26c   : > { %3018 = vmatmul.bf16.gmra.mxu3 %v2826_v14 }
 0x26d   : > { %4540 = vmatmul.msk.bf16.gmra.mxu1 %vm3486_vm6, %v3445_v8  ;;  %v3365_v61 = vadd.f32 %v5653_v39, %v3325_v32  ;;  %v2834_v14 = vor.u32 %v2833_v19, %v2830_v48  ;;  %v2491_v36 = vsel %vm2083_vm3, %v2488_v59, %v2490_v56  ;;  %v3144_v49 = vsel %vm3121_vm5, %v3141_v22, %v3143_v63 }
 0x26e   : > { %v2586_v35 = vpop.f32.mrf.mxu2 }
 0x26f   : > { %v2979_v25 = vpop.f32.mrf.mxu3  ;;  %v3641_v3 = vadd.f32 %v3552_v27, %v3365_v61  ;;  %v2673_v10 = vadd.f32 %v2586_v35, %v5305_v7  ;;  %v3420_v27 = vld [vmem:[%s5477_s10 + $0xa0] sm:$0xff]  ;;  %v3421_v7 = vld [vmem:[%s5477_s10 + $0xa8] sm:$0xff]  ;;  %v2835_v61 = vsel %vm2728_vm4, %v2825_v42, %v2834_v14  ;;  %v5697_v35 = vld [vmem:[%s4826_s18 + $0x70] sm:$0xff] }
 0x270   : > { %v3241_v41 = vpop.f32.mrf.mxu0  ;;  %v2840_v59 = vshll.u32 %v5697_v35, 16 }
 0x271   : > { %v3681_v45 = vadd.f32 %v5660_v60, %v3641_v3  ;;  %v3066_v18 = vadd.f32 %v2979_v25, %v2673_v10 }
 0x272   : > { %v3557_v54 = vpop.f32.mrf.mxu1 }
 0x273   : > { %3717 = vst [vmem:[%s5671_s17 + $0x8] sm:$0xff] %v3681_v45  ;;  %v3326_v11 = vadd.f32 %v3239_v62, %v3066_v18  ;;  %v3446_v62 = vpack.c.bf16 %v3421_v7, %v3420_v27 }
 0x275   : > { %v3366_v8 = vadd.f32 %v5653_v39, %v3326_v11  ;;  %v2842_v11 = vrot.slane %v2840_v59, 3  ;;  %v5718_v59 = vld [vmem:[%s4826_s18 + $0x78] sm:$0xff] }
 0x276   : > { %v2588_v20 = vpop.f32.mrf.mxu2 }
 0x277   : > { %v2981_v17 = vpop.f32.mrf.mxu3  ;;  %v3642_v32 = vadd.f32 %v3555_v29, %v3366_v8  ;;  %v2674_v21 = vadd.f32 %v2588_v20, %v5322_v53  ;;  %v2837_v53 = vshrl.u32 %v5697_v35, 16 }
 0x278   : > { %v3244_v10 = vpop.f32.mrf.mxu0 }
 0x279   : > { %v3682_v25 = vadd.f32 %v5660_v60, %v3642_v32  ;;  %v3067_v3 = vadd.f32 %v2981_v17, %v2674_v21  ;;  %v2492_v32 = vrot.slane %v5697_v35, 2 }
 0x27a   : > { %v3560_v48 = vpop.f32.mrf.mxu1 }
 0x27b   : > { %3718 = vst [vmem:[%s5671_s17 + $0x10] sm:$0xff] %v3682_v25  ;;  %v3327_v19 = vadd.f32 %v3241_v41, %v3067_v3  ;;  %2630 = vmatmul.bf16.gmra.mxu2 %v2491_v36  ;;  %3283 = vmatmul.bf16.gmra.mxu0 %v3144_v49  ;;  %v2839_v41 = vrot.slane %v2837_v53, 2 }
 0x27c   : > { %3023 = vmatmul.bf16.gmra.mxu3 %v2835_v61  ;;  %v3145_v61 = vrot.slane %v5697_v35, 3 }
 0x27d   : > { %4541 = vmatmul.msk.bf16.gmra.mxu1 %vm3486_vm6, %v3446_v62  ;;  %v3367_v42 = vadd.f32 %v5653_v39, %v3327_v19  ;;  %v2843_v21 = vor.u32 %v2842_v11, %v2839_v41  ;;  %v2493_v19 = vsel %vm2083_vm3, %v2490_v56, %v2492_v32  ;;  %v2849_v56 = vshll.u32 %v5718_v59, 16 }
 0x27e   : > { %v2591_v29 = vpop.f32.mrf.mxu2  ;;  %v3146_v35 = vsel %vm3121_vm5, %v3143_v63, %v3145_v61 }
 0x27f   : > { %v2984_v45 = vpop.f32.mrf.mxu3  ;;  %v3643_v22 = vadd.f32 %v3557_v54, %v3367_v42  ;;  %v2675_v18 = vadd.f32 %v2591_v29, %v5332_v31  ;;  %v3422_v54 = vld [vmem:[%s5477_s10 + $0xb0] sm:$0xff]  ;;  %v3423_v31 = vld [vmem:[%s5477_s10 + $0xb8] sm:$0xff]  ;;  %v2844_v53 = vsel %vm2728_vm4, %v2834_v14, %v2843_v21 }
 0x280   : > { %v3246_v7 = vpop.f32.mrf.mxu0 }
 0x281   : > { %v3683_v8 = vadd.f32 %v5660_v60, %v3643_v22  ;;  %v3068_v27 = vadd.f32 %v2984_v45, %v2675_v18 }
 0x282   : > { %v3562_v20 = vpop.f32.mrf.mxu1 }
 0x283   : > { %3719 = vst [vmem:[%s5671_s17 + $0x18] sm:$0xff] %v3683_v8  ;;  %v3328_v17 = vadd.f32 %v3244_v10, %v3068_v27  ;;  %v3447_v10 = vpack.c.bf16 %v3423_v31, %v3422_v54  ;;  %v2851_v27 = vrot.slane %v2849_v56, 3 }
 0x285   : > { %v3368_v36 = vadd.f32 %v5653_v39, %v3328_v17 }
 0x286   : > { %v2593_v62 = vpop.f32.mrf.mxu2 }
 0x287   : > { %v2986_v25 = vpop.f32.mrf.mxu3  ;;  %v3644_v3 = vadd.f32 %v3560_v48, %v3368_v36  ;;  %v2676_v49 = vadd.f32 %v2593_v62, %v5343_v23  ;;  %v2846_v23 = vshrl.u32 %v5718_v59, 16  ;;  %v2494_v62 = vrot.slane %v5718_v59, 2 }
 0x288   : > { %v3249_v45 = vpop.f32.mrf.mxu0 }
 0x289   : > { %v3684_v42 = vadd.f32 %v5660_v60, %v3644_v3  ;;  %v3069_v29 = vadd.f32 %v2986_v25, %v2676_v49  ;;  %v2848_v8 = vrot.slane %v2846_v23, 2  ;;  %v3147_v49 = vrot.slane %v5718_v59, 3 }
 0x28a   : > { %v3565_v22 = vpop.f32.mrf.mxu1 }
 0x28b   : > { %3720 = vst [vmem:[%s5671_s17 + $0x20] sm:$0xff] %v3684_v42  ;;  %v3329_v18 = vadd.f32 %v3246_v7, %v3069_v29  ;;  %2635 = vmatmul.bf16.gmra.mxu2 %v2493_v19  ;;  %3288 = vmatmul.bf16.gmra.mxu0 %v3146_v35  ;;  %v2852_v25 = vor.u32 %v2851_v27, %v2848_v8 }
 0x28c   : > { %3028 = vmatmul.bf16.gmra.mxu3 %v2844_v53  ;;  %v2495_v29 = vsel %vm2083_vm3, %v2492_v32, %v2494_v62  ;;  %v3148_v59 = vsel %vm3121_vm5, %v3145_v61, %v3147_v49 }
 0x28d   : > { %4542 = vmatmul.msk.bf16.gmra.mxu1 %vm3486_vm6, %v3447_v10  ;;  %v3369_v14 = vadd.f32 %v5653_v39, %v3329_v18  ;;  %v2853_v35 = vsel %vm2728_vm4, %v2843_v21, %v2852_v25  ;;  %v5739_v18 = vld [vmem:[%s4826_s18 + $0x80] sm:$0xff] }
 0x28e   : > { %v2596_v48 = vpop.f32.mrf.mxu2  ;;  %v2858_v32 = vshll.u32 %v5739_v18, 16 }
 0x28f   : > { %v2989_v41 = vpop.f32.mrf.mxu3  ;;  %v3645_v63 = vadd.f32 %v3562_v20, %v3369_v14  ;;  %v2677_v11 = vadd.f32 %v2596_v48, %v5350_v37  ;;  %v3424_v20 = vld [vmem:[%s5477_s10 + $0xc0] sm:$0xff]  ;;  %v3425_v37 = vld [vmem:[%s5477_s10 + $0xc8] sm:$0xff] }
 0x290   : > { %v3251_v36 = vpop.f32.mrf.mxu0  ;;  %v2860_v27 = vrot.slane %v2858_v32, 3 }
 0x291   : > { %v3685_v7 = vadd.f32 %v5660_v60, %v3645_v63  ;;  %v3070_v17 = vadd.f32 %v2989_v41, %v2677_v11 }
 0x292   : > { %v3567_v54 = vpop.f32.mrf.mxu1 }
 0x293   : > { %3721 = vst [vmem:[%s5671_s17 + $0x28] sm:$0xff] %v3685_v7  ;;  %v3330_v31 = vadd.f32 %v3249_v45, %v3070_v17  ;;  %v3448_v45 = vpack.c.bf16 %v3425_v37, %v3424_v20  ;;  %v2496_v20 = vrot.slane %v5739_v18, 2 }
 0x295   : > { %v3370_v3 = vadd.f32 %v5653_v39, %v3330_v31 }
 0x296   : > { %v2598_v19 = vpop.f32.mrf.mxu2 }
 0x297   : > { %v2991_v53 = vpop.f32.mrf.mxu3  ;;  %v3646_v10 = vadd.f32 %v3565_v22, %v3370_v3  ;;  %v2678_v42 = vadd.f32 %v2598_v19, %v5367_v55  ;;  %v2855_v55 = vshrl.u32 %v5739_v18, 16 }
 0x298   : > { %v3254_v14 = vpop.f32.mrf.mxu0 }
 0x299   : > { %v3686_v23 = vadd.f32 %v5660_v60, %v3646_v10  ;;  %v3071_v56 = vadd.f32 %v2991_v53, %v2678_v42  ;;  %v2857_v8 = vrot.slane %v2855_v55, 2  ;;  %v3149_v53 = vrot.slane %v5739_v18, 3 }
 0x29a   : > { %v3570_v48 = vpop.f32.mrf.mxu1 }
 0x29b   : > { %3722 = vst [vmem:[%s5671_s17 + $0x30] sm:$0xff] %v3686_v23  ;;  %v3331_v41 = vadd.f32 %v3251_v36, %v3071_v56  ;;  %2640 = vmatmul.bf16.gmra.mxu2 %v2495_v29  ;;  %3293 = vmatmul.bf16.gmra.mxu0 %v3148_v59  ;;  %v2861_v37 = vor.u32 %v2860_v27, %v2857_v8 }
 0x29c   : > { %3033 = vmatmul.bf16.gmra.mxu3 %v2853_v35  ;;  %v3150_v18 = vsel %vm3121_vm5, %v3147_v49, %v3149_v53 }
 0x29d   : > { %4543 = vmatmul.msk.bf16.gmra.mxu1 %vm3486_vm6, %v3448_v45  ;;  %v3371_v21 = vadd.f32 %v5653_v39, %v3331_v41  ;;  %v2497_v45 = vsel %vm2083_vm3, %v2494_v62, %v2496_v20  ;;  %v2862_v23 = vsel %vm2728_vm4, %v2852_v25, %v2861_v37 }
 0x29e   : > { %v2601_v22 = vpop.f32.mrf.mxu2 }
 0x29f   : > { %v2994_v63 = vpop.f32.mrf.mxu3  ;;  %v3647_v61 = vadd.f32 %v3567_v54, %v3371_v21  ;;  %v2679_v11 = vadd.f32 %v2601_v22, %v5377_v52  ;;  %v3426_v54 = vld [vmem:[%s5477_s10 + $0xd0] sm:$0xff]  ;;  %v3427_v52 = vld [vmem:[%s5477_s10 + $0xd8] sm:$0xff] }
 0x2a0   : > { %v3256_v36 = vpop.f32.mrf.mxu0  ;;  %v3449_v56 = vpack.c.bf16 %v3427_v52, %v3426_v54 }
 0x2a1   : > { %v3687_v7 = vadd.f32 %v5660_v60, %v3647_v61  ;;  %v3072_v17 = vadd.f32 %v2994_v63, %v2679_v11 }
 0x2a2   : > { %v3572_v31 = vpop.f32.mrf.mxu1 }
 0x2a3   : > { %3723 = vst [vmem:[%s5671_s17 + $0x38] sm:$0xff] %v3687_v7  ;;  %v3332_v3 = vadd.f32 %v3254_v14, %v3072_v17  ;;  %v5760_v14 = vld [vmem:[%s4826_s18 + $0x88] sm:$0xff] }
 0x2a4   : > { %v2867_v62 = vshll.u32 %v5760_v14, 16  ;;  %v3151_v52 = vrot.slane %v5760_v14, 3 }
 0x2a5   : > { %v3372_v19 = vadd.f32 %v5653_v39, %v3332_v3  ;;  %v2498_v3 = vrot.slane %v5760_v14, 2 }
 0x2a6   : > { %v2603_v10 = vpop.f32.mrf.mxu2  ;;  %v2869_v11 = vrot.slane %v2867_v62, 3 }
 0x2a7   : > { %v2996_v42 = vpop.f32.mrf.mxu3  ;;  %v3648_v29 = vadd.f32 %v3570_v48, %v3372_v19  ;;  %v2680_v35 = vadd.f32 %v2603_v10, %v5391_v16  ;;  %v2864_v16 = vshrl.u32 %v5760_v14, 16  ;;  %v3152_v14 = vsel %vm3121_vm5, %v3149_v53, %v3151_v52 }
 0x2a8   : > { %v3259_v55 = vpop.f32.mrf.mxu0 }
 0x2a9   : > { %v3688_v59 = vadd.f32 %v5660_v60, %v3648_v29  ;;  %v3073_v41 = vadd.f32 %v2996_v42, %v2680_v35  ;;  %v2866_v61 = vrot.slane %v2864_v16, 2 }
 0x2aa   : > { %v3575_v32 = vpop.f32.mrf.mxu1 }
 0x2ab   : > { %3724 = vst [vmem:[%s5671_s17 + $0x40] sm:$0xff] %v3688_v59  ;;  %v3333_v21 = vadd.f32 %v3256_v36, %v3073_v41  ;;  %2645 = vmatmul.bf16.gmra.mxu2 %v2497_v45  ;;  %3298 = vmatmul.bf16.gmra.mxu0 %v3150_v18  ;;  %v2870_v19 = vor.u32 %v2869_v11, %v2866_v61  ;;  %v5781_v59 = vld [vmem:[%s4826_s18 + $0x90] sm:$0xff] }
 0x2ac   : > { %3038 = vmatmul.bf16.gmra.mxu3 %v2862_v23  ;;  %v2499_v45 = vsel %vm2083_vm3, %v2496_v20, %v2498_v3  ;;  %v2876_v20 = vshll.u32 %v5781_v59, 16 }
 0x2ad   : > { %4544 = vmatmul.msk.bf16.gmra.mxu1 %vm3486_vm6, %v3449_v56  ;;  %v3373_v25 = vadd.f32 %v5653_v39, %v3333_v21  ;;  %v2871_v23 = vsel %vm2728_vm4, %v2861_v37, %v2870_v19 }
 0x2ae   : > { %v2606_v48 = vpop.f32.mrf.mxu2 }
 0x2af   : > { %v2999_v22 = vpop.f32.mrf.mxu3  ;;  %v3649_v49 = vadd.f32 %v3572_v31, %v3373_v25  ;;  %v2681_v63 = vadd.f32 %v2606_v48, %v5398_v13  ;;  %v3428_v31 = vld [vmem:[%s5477_s10 + $0xe0] sm:$0xff]  ;;  %v3429_v13 = vld [vmem:[%s5477_s10 + $0xe8] sm:$0xff] }
 0x2b0   : > { %v3261_v7 = vpop.f32.mrf.mxu0  ;;  %v3450_v56 = vpack.c.bf16 %v3429_v13, %v3428_v31 }
 0x2b1   : > { %v3689_v8 = vadd.f32 %v5660_v60, %v3649_v49  ;;  %v3074_v27 = vadd.f32 %v2999_v22, %v2681_v63  ;;  %v2878_v22 = vrot.slane %v2876_v20, 3 }
 0x2b2   : > { %v3577_v17 = vpop.f32.mrf.mxu1 }
 0x2b3   : > { %3725 = vst [vmem:[%s5671_s17 + $0x48] sm:$0xff] %v3689_v8  ;;  %v3334_v36 = vadd.f32 %v3259_v55, %v3074_v27  ;;  %v2500_v27 = vrot.slane %v5781_v59, 2 }
 0x2b5   : > { %v3374_v54 = vadd.f32 %v5653_v39, %v3334_v36 }
 0x2b6   : > { %v2608_v10 = vpop.f32.mrf.mxu2 }
 0x2b7   : > { %v3001_v42 = vpop.f32.mrf.mxu3  ;;  %v3650_v29 = vadd.f32 %v3575_v32, %v3374_v54  ;;  %v2682_v35 = vadd.f32 %v2608_v10, %v5409_v5  ;;  %v2873_v5 = vshrl.u32 %v5781_v59, 16  ;;  %v3153_v54 = vrot.slane %v5781_v59, 3 }
 0x2b8   : > { %v3264_v18 = vpop.f32.mrf.mxu0 }
 0x2b9   : > { %v3690_v41 = vadd.f32 %v5660_v60, %v3650_v29  ;;  %v3075_v55 = vadd.f32 %v3001_v42, %v2682_v35  ;;  %v2875_v48 = vrot.slane %v2873_v5, 2  ;;  %v2501_v29 = vsel %vm2083_vm3, %v2498_v3, %v2500_v27 }
 0x2ba   : > { %v3580_v21 = vpop.f32.mrf.mxu1  ;;  %v3154_v59 = vsel %vm3121_vm5, %v3151_v52, %v3153_v54 }
 0x2bb   : > { %3726 = vst [vmem:[%s5671_s17 + $0x50] sm:$0xff] %v3690_v41  ;;  %v3335_v16 = vadd.f32 %v3261_v7, %v3075_v55  ;;  %2650 = vmatmul.bf16.gmra.mxu2 %v2499_v45  ;;  %3303 = vmatmul.bf16.gmra.mxu0 %v3152_v14  ;;  %v2879_v7 = vor.u32 %v2878_v22, %v2875_v48  ;;  %v2707_v48 = vld [vmem:[%s4826_s18 + $0xa0] sm:$0x3] }
 0x2bc   : > { %3043 = vmatmul.bf16.gmra.mxu3 %v2871_v23  ;;  %v5802_v23 = vld [vmem:[%s4826_s18 + $0x98] sm:$0xff] }
 0x2bd   : > { %4545 = vmatmul.msk.bf16.gmra.mxu1 %vm3486_vm6, %v3450_v56  ;;  %v3375_v37 = vadd.f32 %v5653_v39, %v3335_v16  ;;  %v2880_v35 = vsel %vm2728_vm4, %v2870_v19, %v2879_v7  ;;  %v2885_v3 = vshll.u32 %v5802_v23, 16 }
 0x2be   : > { %v2611_v32 = vpop.f32.mrf.mxu2 }
 0x2bf   : > { %v3004_v62 = vpop.f32.mrf.mxu3  ;;  %v3651_v53 = vadd.f32 %v3577_v17, %v3375_v37  ;;  %v2683_v25 = vadd.f32 %v2611_v32, %v5422_v6  ;;  %v3430_v17 = vld [vmem:[%s5477_s10 + $0xf0] sm:$0xff]  ;;  %v3431_v6 = vld [vmem:[%s5477_s10 + $0xf8] sm:$0xff]  ;;  %v2887_v37 = vrot.slane %v2885_v3, 3 }
 0x2c0   : > { %v3266_v61 = vpop.f32.mrf.mxu0  ;;  %v3451_v45 = vpack.c.bf16 %v3431_v6, %v3430_v17 }
 0x2c1   : > { %v3691_v49 = vadd.f32 %v5660_v60, %v3651_v53  ;;  %v3076_v63 = vadd.f32 %v3004_v62, %v2683_v25 }
 0x2c2   : > { %v3582_v11 = vpop.f32.mrf.mxu1 }
 0x2c3   : > { %3727 = vst [vmem:[%s5671_s17 + $0x58] sm:$0xff] %v3691_v49  ;;  %v3336_v8 = vadd.f32 %v3264_v18, %v3076_v63  ;;  %v2502_v49 = vrot.slane %v5802_v23, 2 }
 0x2c5   : > { %v3376_v36 = vadd.f32 %v5653_v39, %v3336_v8  ;;  %v3155_v8 = vrot.slane %v5802_v23, 3 }
 0x2c6   : > { %v2613_v31 = vpop.f32.mrf.mxu2 }
 0x2c7   : > { %v3006_v13 = vpop.f32.mrf.mxu3  ;;  %v3652_v10 = vadd.f32 %v3580_v21, %v3376_v36  ;;  %v2684_v42 = vadd.f32 %v2613_v31, %v5436_v30  ;;  %v2882_v30 = vshrl.u32 %v5802_v23, 16  ;;  %v3433_v36 = vld [vmem:[%s5477_s10 + $0x108] sm:$0xff]  ;;  %v3156_v23 = vsel %vm3121_vm5, %v3153_v54, %v3155_v8 }
 0x2c8   : > { %v3269_v55 = vpop.f32.mrf.mxu0 }
 0x2c9   : > { %v3692_v56 = vadd.f32 %v5660_v60, %v3652_v10  ;;  %v3077_v41 = vadd.f32 %v3006_v13, %v2684_v42  ;;  %v2884_v20 = vrot.slane %v2882_v30, 2  ;;  %v2503_v10 = vsel %vm2083_vm3, %v2500_v27, %v2502_v49 }
 0x2ca   : > { %v3585_v18 = vpop.f32.mrf.mxu1 }
 0x2cb   : > { %3728 = vst [vmem:[%s5671_s17 + $0x60] sm:$0xff] %v3692_v56  ;;  %v3337_v14 = vadd.f32 %v3266_v61, %v3077_v41  ;;  %2655 = vmatmul.bf16.gmra.mxu2 %v2501_v29  ;;  %3308 = vmatmul.bf16.gmra.mxu0 %v3154_v59  ;;  %v2888_v63 = vor.u32 %v2887_v37, %v2884_v20  ;;  %v2726_v61 = vunpack.c.l.b16 %v2707_v48  ;;  %v2358_v59 = vld [vmem:[%s4826_s18 + $0xa0] sm:$0x1] }
 0x2cc   : > { %3048 = vmatmul.bf16.gmra.mxu3 %v2880_v35 }
 0x2cd   : > { %4546 = vmatmul.msk.bf16.gmra.mxu1 %vm3486_vm6, %v3451_v45  ;;  %v3377_v19 = vadd.f32 %v5653_v39, %v3337_v14  ;;  %v2889_v42 = vsel %vm2728_vm4, %v2879_v7, %v2888_v63  ;;  %v2727_v35 = vpack.c.b16 %v2726_v61, %v2726_v61 }
 0x2ce   : > { %v2616_v21 = vpop.f32.mrf.mxu2 }
 0x2cf   : > { %v3009_v16 = vpop.f32.mrf.mxu3  ;;  %v3653_v5 = vadd.f32 %v3582_v11, %v3377_v19  ;;  %v2685_v52 = vadd.f32 %v2616_v21, %v5443_v0  ;;  %v3432_v0 = vld [vmem:[%s5477_s10 + $0x100] sm:$0xff]  ;;  %v2891_v27 = vshrl.u32 %v2727_v35, 16  ;;  %v2894_v7 = vshll.u32 %v2727_v35, 16 }
 0x2d0   : > { %v3271_v53 = vpop.f32.mrf.mxu0  ;;  %v3452_v29 = vpack.c.bf16 %v3433_v36, %v3432_v0  ;;  %v3157_v61 = vrot.slane %v2727_v35, 3 }
 0x2d1   : > { %v3693_v32 = vadd.f32 %v5660_v60, %v3653_v5  ;;  %v3078_v62 = vadd.f32 %v3009_v16, %v2685_v52  ;;  %v2893_v16 = vrot.slane %v2891_v27, 2  ;;  %v2896_v5 = vrot.slane %v2894_v7, 3 }
 0x2d2   : > { %v3587_v25 = vpop.f32.mrf.mxu1 }
 0x2d3   : > { %3729 = vst [vmem:[%s5671_s17 + $0x68] sm:$0xff] %v3693_v32  ;;  %v3338_v22 = vadd.f32 %v3269_v55, %v3078_v62  ;;  %v2897_v48 = vor.u32 %v2896_v5, %v2893_v16 }
 0x2d5   : > { %v3378_v11 = vadd.f32 %v5653_v39, %v3338_v22 }
 0x2d6   : > { %v2618_v17 = vpop.f32.mrf.mxu2 }
 0x2d7   : > { %v3011_v6 = vpop.f32.mrf.mxu3  ;;  %v3654_v31 = vadd.f32 %v3585_v18, %v3378_v11  ;;  %v2686_v13 = vadd.f32 %v2618_v17, %v5452_v34  ;;  %v2449_v34 = vunpack.c.l.b16 %v2358_v59  ;;  %v3435_v11 = vld [vmem:[%s5477_s10 + $0x118] sm:$0x3f] }
 0x2d8   : > { %v3274_v41 = vpop.f32.mrf.mxu0 }
 0x2d9   : > { %v3694_v45 = vadd.f32 %v5660_v60, %v3654_v31  ;;  %v3079_v56 = vadd.f32 %v3011_v6, %v2686_v13  ;;  %v2468_v21 = vpack.c.b16 %v2449_v34, %v2449_v34  ;;  %v2898_v31 = vsel %vm2728_vm4, %v2888_v63, %v2897_v48 }
 0x2da   : > { %v3590_v55 = vpop.f32.mrf.mxu1 }
 0x2db   : > { %3730 = vst [vmem:[%s5671_s17 + $0x70] sm:$0xff] %v3694_v45  ;;  %v3339_v14 = vadd.f32 %v3271_v53, %v3079_v56  ;;  %2660 = vmatmul.bf16.gmra.mxu2 %v2503_v10  ;;  %3313 = vmatmul.bf16.gmra.mxu0 %v3156_v23  ;;  %v2504_v53 = vrot.slane %v2468_v21, 2  ;;  %v3158_v45 = vsel %vm3121_vm5, %v3155_v8, %v3157_v61 }
 0x2dc   : > { %3053 = vmatmul.bf16.gmra.mxu3 %v2889_v42 }
 0x2dd   : > { %4547 = vmatmul.msk.bf16.gmra.mxu1 %vm3486_vm6, %v3452_v29  ;;  %v3379_v18 = vadd.f32 %v5653_v39, %v3339_v14  ;;  %v2505_v6 = vsel %vm2083_vm3, %v2502_v49, %v2504_v53 }
 0x2de   : > { %v2621_v30 = vpop.f32.mrf.mxu2 }
 0x2df   : > { %v3014_v3 = vpop.f32.mrf.mxu3  ;;  %v3655_v19 = vadd.f32 %v3587_v25, %v3379_v18  ;;  %v2687_v54 = vadd.f32 %v2621_v30, %v5457_v1  ;;  %v3434_v25 = vld [vmem:[%s5477_s10 + $0x110] sm:$0xff] }
 0x2e0   : > { %v3276_v37 = vpop.f32.mrf.mxu0  ;;  %v3453_v13 = vpack.c.bf16 %v3435_v11, %v3434_v25 }
 0x2e1   : > { %v3695_v52 = vadd.f32 %v5660_v60, %v3655_v19  ;;  %v3080_v20 = vadd.f32 %v3014_v3, %v2687_v54 }
 0x2e2   : > { %v3592_v32 = vpop.f32.mrf.mxu1 }
 0x2e3   : > { %3731 = vst [vmem:[%s5671_s17 + $0x78] sm:$0xff] %v3695_v52  ;;  %v3340_v62 = vadd.f32 %v3274_v41, %v3080_v20 }
 0x2e5   : > { %v3380_v22 = vadd.f32 %v5653_v39, %v3340_v62 }
 0x2e6   : > { %v2623_v0 = vpop.f32.mrf.mxu2 }
 0x2e7   : > { %v3016_v1 = vpop.f32.mrf.mxu3  ;;  %v3656_v36 = vadd.f32 %v3590_v55, %v3380_v22  ;;  %v2688_v17 = vadd.f32 %v2623_v0, %v5468_v47 }
 0x2e8   : > { %v3279_v29 = vpop.f32.mrf.mxu0 }
 0x2e9   : > { %v3696_v10 = vadd.f32 %v5660_v60, %v3656_v36  ;;  %v3081_v42 = vadd.f32 %v3016_v1, %v2688_v17 }
 0x2ea   : > { %v3595_v56 = vpop.f32.mrf.mxu1 }
 0x2eb   : > { %3732 = vst [vmem:[%s5671_s17 + $0x80] sm:$0xff] %v3696_v10  ;;  %v3341_v35 = vadd.f32 %v3276_v37, %v3081_v42  ;;  %2665 = vmatmul.bf16.gmra.mxu2 %v2505_v6  ;;  %3318 = vmatmul.bf16.gmra.mxu0 %v3158_v45 }
 0x2ec   : > { %3058 = vmatmul.bf16.gmra.mxu3 %v2898_v31 }
 0x2ed   : > { %4548 = vmatmul.msk.bf16.gmra.mxu1 %vm3486_vm6, %v3453_v13  ;;  %v3381_v47 = vadd.f32 %v5653_v39, %v3341_v35 }
 0x2ee   : > { %v2626_v49 = vpop.f32.mrf.mxu2 }
 0x2ef   : > { %v3019_v63 = vpop.f32.mrf.mxu3  ;;  %v3657_v41 = vadd.f32 %v3592_v32, %v3381_v47  ;;  %v2689_v23 = vadd.f32 %v2626_v49, %v5480_v58 }
 0x2f0   : > { %v3281_v59 = vpop.f32.mrf.mxu0 }
 0x2f1   : > { %v3697_v55 = vadd.f32 %v5660_v60, %v3657_v41  ;;  %v3082_v8 = vadd.f32 %v3019_v63, %v2689_v23 }
 0x2f2   : > { %v3597_v14 = vpop.f32.mrf.mxu1 }
 0x2f3   : > { %3733 = vst [vmem:[%s5671_s17 + $0x88] sm:$0xff] %v3697_v55  ;;  %v3342_v34 = vadd.f32 %v3279_v29, %v3082_v8 }
 0x2f5   : > { %v3382_v27 = vadd.f32 %v5653_v39, %v3342_v34 }
 0x2f6   : > { %v2628_v7 = vpop.f32.mrf.mxu2 }
 0x2f7   : > { %v3021_v18 = vpop.f32.mrf.mxu3  ;;  %v3658_v30 = vadd.f32 %v3595_v56, %v3382_v27  ;;  %v2690_v3 = vadd.f32 %v2628_v7, %v5495_v40 }
 0x2f8   : > { %v3284_v58 = vpop.f32.mrf.mxu0 }
 0x2f9   : > { %v3698_v19 = vadd.f32 %v5660_v60, %v3658_v30  ;;  %v3083_v54 = vadd.f32 %v3021_v18, %v2690_v3 }
 0x2fa   : > { %v3600_v21 = vpop.f32.mrf.mxu1 }
 0x2fb   : > { %3734 = vst [vmem:[%s5671_s17 + $0x90] sm:$0xff] %v3698_v19  ;;  %v3343_v16 = vadd.f32 %v3281_v59, %v3083_v54 }
 0x2fd   : > { %v3383_v5 = vadd.f32 %v5653_v39, %v3343_v16 }
 0x2fe   : > { %v2631_v52 = vpop.f32.mrf.mxu2 }
 0x2ff   : > { %v3024_v20 = vpop.f32.mrf.mxu3  ;;  %v3659_v37 = vadd.f32 %v3597_v14, %v3383_v5  ;;  %v2691_v32 = vadd.f32 %v2631_v52, %v5499_v26 }
 0x300   : > { %v3286_v40 = vpop.f32.mrf.mxu0 }
 0x301   : > { %v3699_v62 = vadd.f32 %v5660_v60, %v3659_v37  ;;  %v3084_v53 = vadd.f32 %v3024_v20, %v2691_v32 }
 0x302   : > { %v3602_v48 = vpop.f32.mrf.mxu1 }
 0x303   : > { %3735 = vst [vmem:[%s5671_s17 + $0x98] sm:$0xff] %v3699_v62  ;;  %v3344_v22 = vadd.f32 %v3284_v58, %v3084_v53 }
 0x305   : > { %v3384_v61 = vadd.f32 %v5653_v39, %v3344_v22 }
 0x306   : > { %v2633_v25 = vpop.f32.mrf.mxu2 }
 0x307   : > { %v3026_v11 = vpop.f32.mrf.mxu3  ;;  %v3660_v0 = vadd.f32 %v3600_v21, %v3384_v61  ;;  %v2692_v1 = vadd.f32 %v2633_v25, %v5514_v50 }
 0x308   : > { %v3289_v26 = vpop.f32.mrf.mxu0 }
 0x309   : > { %v3700_v36 = vadd.f32 %v5660_v60, %v3660_v0  ;;  %v3085_v17 = vadd.f32 %v3026_v11, %v2692_v1 }
 0x30a   : > { %v3605_v6 = vpop.f32.mrf.mxu1 }
 0x30b   : > { %3736 = vst [vmem:[%s5671_s17 + $0xa0] sm:$0xff] %v3700_v36  ;;  %v3345_v31 = vadd.f32 %v3286_v40, %v3085_v17 }
 0x30d   : > { %v3385_v13 = vadd.f32 %v5653_v39, %v3345_v31 }
 0x30e   : > { %v2636_v10 = vpop.f32.mrf.mxu2 }
 0x30f   : > { %v3029_v42 = vpop.f32.mrf.mxu3  ;;  %v3661_v29 = vadd.f32 %v3602_v48, %v3385_v13  ;;  %v2693_v45 = vadd.f32 %v2636_v10, %v5518_v38 }
 0x310   : > { %v3291_v50 = vpop.f32.mrf.mxu0 }
 0x311   : > { %v3701_v56 = vadd.f32 %v5660_v60, %v3661_v29  ;;  %v3086_v35 = vadd.f32 %v3029_v42, %v2693_v45 }
 0x312   : > { %v3607_v47 = vpop.f32.mrf.mxu1 }
 0x313   : > { %3737 = vst [vmem:[%s5671_s17 + $0xa8] sm:$0xff] %v3701_v56  ;;  %v3346_v49 = vadd.f32 %v3289_v26, %v3086_v35 }
 0x315   : > { %v3386_v63 = vadd.f32 %v5653_v39, %v3346_v49 }
 0x316   : > { %v2638_v41 = vpop.f32.mrf.mxu2 }
 0x317   : > { %v3031_v23 = vpop.f32.mrf.mxu3  ;;  %v3662_v55 = vadd.f32 %v3605_v6, %v3386_v63  ;;  %v2694_v8 = vadd.f32 %v2638_v41, %v5533_v9 }
 0x318   : > { %v3294_v38 = vpop.f32.mrf.mxu0 }
 0x319   : > { %v3702_v59 = vadd.f32 %v5660_v60, %v3662_v55  ;;  %v3087_v14 = vadd.f32 %v3031_v23, %v2694_v8 }
 0x31a   : > { %v3610_v34 = vpop.f32.mrf.mxu1 }
 0x31b   : > { %3738 = vst [vmem:[%s5671_s17 + $0xb0] sm:$0xff] %v3702_v59  ;;  %v3347_v27 = vadd.f32 %v3291_v50, %v3087_v14 }
 0x31d   : > { %v3387_v7 = vadd.f32 %v5653_v39, %v3347_v27 }
 0x31e   : > { %v2641_v18 = vpop.f32.mrf.mxu2 }
 0x31f   : > { %v3034_v30 = vpop.f32.mrf.mxu3  ;;  %v3663_v3 = vadd.f32 %v3607_v47, %v3387_v7  ;;  %v2695_v19 = vadd.f32 %v2641_v18, %v5537_v15 }
 0x320   : > { %v3296_v9 = vpop.f32.mrf.mxu0 }
 0x321   : > { %v3703_v54 = vadd.f32 %v5660_v60, %v3663_v3  ;;  %v3088_v58 = vadd.f32 %v3034_v30, %v2695_v19 }
 0x322   : > { %v3612_v21 = vpop.f32.mrf.mxu1 }
 0x323   : > { %3739 = vst [vmem:[%s5671_s17 + $0xb8] sm:$0xff] %v3703_v54  ;;  %v3348_v16 = vadd.f32 %v3294_v38, %v3088_v58 }
 0x325   : > { %v3388_v5 = vadd.f32 %v5653_v39, %v3348_v16 }
 0x326   : > { %v2643_v52 = vpop.f32.mrf.mxu2 }
 0x327   : > { %v3036_v20 = vpop.f32.mrf.mxu3  ;;  %v3664_v37 = vadd.f32 %v3610_v34, %v3388_v5  ;;  %v2696_v32 = vadd.f32 %v2643_v52, %v5552_v28 }
 0x328   : > { %v3299_v15 = vpop.f32.mrf.mxu0 }
 0x329   : > { %v3704_v62 = vadd.f32 %v5660_v60, %v3664_v37  ;;  %v3089_v53 = vadd.f32 %v3036_v20, %v2696_v32 }
 0x32a   : > { %v3615_v40 = vpop.f32.mrf.mxu1 }
 0x32b   : > { %3740 = vst [vmem:[%s5671_s17 + $0xc0] sm:$0xff] %v3704_v62  ;;  %v3349_v48 = vadd.f32 %v3296_v9, %v3089_v53 }
 0x32d   : > { %v3389_v22 = vadd.f32 %v5653_v39, %v3349_v48 }
 0x32e   : > { %v2646_v61 = vpop.f32.mrf.mxu2 }
 0x32f   : > { %v3039_v25 = vpop.f32.mrf.mxu3  ;;  %v3665_v11 = vadd.f32 %v3612_v21, %v3389_v22  ;;  %v2697_v0 = vadd.f32 %v2646_v61, %v5556_v57 }
 0x330   : > { %v3301_v28 = vpop.f32.mrf.mxu0 }
 0x331   : > { %v3705_v1 = vadd.f32 %v5660_v60, %v3665_v11  ;;  %v3090_v36 = vadd.f32 %v3039_v25, %v2697_v0 }
 0x332   : > { %v3617_v17 = vpop.f32.mrf.mxu1 }
 0x333   : > { %3741 = vst [vmem:[%s5671_s17 + $0xc8] sm:$0xff] %v3705_v1  ;;  %v3350_v26 = vadd.f32 %v3299_v15, %v3090_v36 }
 0x335   : > { %v3390_v6 = vadd.f32 %v5653_v39, %v3350_v26 }
 0x336   : > { %v2648_v31 = vpop.f32.mrf.mxu2 }
 0x337   : > { %v3041_v13 = vpop.f32.mrf.mxu3  ;;  %v3666_v10 = vadd.f32 %v3615_v40, %v3390_v6  ;;  %v2698_v42 = vadd.f32 %v2648_v31, %v5571_v43  ;;  %v4738_v6 = vld [vmem:[%s5920_s2] ss:$0 sm:$0xff] }
 0x338   : > { %v3304_v57 = vpop.f32.mrf.mxu0 }
 0x339   : > { %v3706_v29 = vadd.f32 %v5660_v60, %v3666_v10  ;;  %v3091_v45 = vadd.f32 %v3041_v13, %v2698_v42 }
 0x33a   : > { %v3620_v56 = vpop.f32.mrf.mxu1 }
 0x33b   : > { %3742 = vst [vmem:[%s5671_s17 + $0xd0] sm:$0xff] %v3706_v29  ;;  %v3351_v35 = vadd.f32 %v3301_v28, %v3091_v45 }
 0x33d   : > { %v3391_v50 = vadd.f32 %v5653_v39, %v3351_v35 }
 0x33e   : > { %v2651_v47 = vpop.f32.mrf.mxu2 }
 0x33f   : > { %v3044_v49 = vpop.f32.mrf.mxu3  ;;  %v3667_v63 = vadd.f32 %v3617_v17, %v3391_v50  ;;  %v2699_v41 = vadd.f32 %v2651_v47, %v5575_v51 }
 0x340   : > { %v3306_v43 = vpop.f32.mrf.mxu0 }
 0x341   : > { %v3707_v23 = vadd.f32 %v5660_v60, %v3667_v63  ;;  %v3092_v55 = vadd.f32 %v3044_v49, %v2699_v41 }
 0x342   : > { %v3622_v8 = vpop.f32.mrf.mxu1 }
 0x343   : > { %3743 = vst [vmem:[%s5671_s17 + $0xd8] sm:$0xff] %v3707_v23  ;;  %v3352_v59 = vadd.f32 %v3304_v57, %v3092_v55 }
 0x345   : > { %v3392_v14 = vadd.f32 %v5653_v39, %v3352_v59 }
 0x346   : > { %v2653_v38 = vpop.f32.mrf.mxu2 }
 0x347   : > { %v3046_v34 = vpop.f32.mrf.mxu3  ;;  %v3668_v27 = vadd.f32 %v3620_v56, %v3392_v14  ;;  %v2700_v7 = vadd.f32 %v2653_v38, %v5590_v12 }
 0x348   : > { %v3309_v3 = vpop.f32.mrf.mxu0 }
 0x349   : > { %v3708_v18 = vadd.f32 %v5660_v60, %v3668_v27  ;;  %v3093_v30 = vadd.f32 %v3046_v34, %v2700_v7 }
 0x34a   : > { %v3625_v19 = vpop.f32.mrf.mxu1 }
 0x34b   : > { %3744 = vst [vmem:[%s5671_s17 + $0xe0] sm:$0xff] %v3708_v18  ;;  %v3353_v51 = vadd.f32 %v3306_v43, %v3093_v30 }
 0x34d   : > { %v3393_v54 = vadd.f32 %v5653_v39, %v3353_v51 }
 0x34e   : > { %v2656_v58 = vpop.f32.mrf.mxu2 }
 0x34f   : > { %v3049_v9 = vpop.f32.mrf.mxu3  ;;  %v3669_v21 = vadd.f32 %v3622_v8, %v3393_v54  ;;  %v2701_v16 = vadd.f32 %v2656_v58, %v5594_v44 }
 0x350   : > { %v3311_v20 = vpop.f32.mrf.mxu0 }
 0x351   : > { %v3709_v5 = vadd.f32 %v5660_v60, %v3669_v21  ;;  %v3094_v52 = vadd.f32 %v3049_v9, %v2701_v16 }
 0x352   : > { %v3627_v32 = vpop.f32.mrf.mxu1 }
 0x353   : > { %3745 = vst [vmem:[%s5671_s17 + $0xe8] sm:$0xff] %v3709_v5  ;;  %v3354_v12 = vadd.f32 %v3309_v3, %v3094_v52 }
 0x355   : > { %v3394_v37 = vadd.f32 %v5653_v39, %v3354_v12 }
 0x356   : > { %v2658_v62 = vpop.f32.mrf.mxu2 }
 0x357   : > { %v3051_v53 = vpop.f32.mrf.mxu3  ;;  %v3670_v15 = vadd.f32 %v3625_v19, %v3394_v37  ;;  %v2702_v40 = vadd.f32 %v2658_v62, %v5609_v46 }
 0x358   : > { %v3314_v61 = vpop.f32.mrf.mxu0 }
 0x359   : > { %v3710_v48 = vadd.f32 %v5660_v60, %v3670_v15  ;;  %v3095_v22 = vadd.f32 %v3051_v53, %v2702_v40 }
 0x35a   : > { %v3630_v28 = vpop.f32.mrf.mxu1 }
 0x35b   : > { %3746 = vst [vmem:[%s5671_s17 + $0xf0] sm:$0xff] %v3710_v48  ;;  %v3355_v44 = vadd.f32 %v3311_v20, %v3095_v22 }
 0x35d   : > { %v3395_v25 = vadd.f32 %v5653_v39, %v3355_v44 }
 0x35e   : > { %v2661_v11 = vpop.f32.mrf.mxu2 }
 0x35f   : > { %v3054_v0 = vpop.f32.mrf.mxu3  ;;  %v3671_v1 = vadd.f32 %v3627_v32, %v3395_v25  ;;  %v2703_v36 = vadd.f32 %v2661_v11, %v5613_v2  ;;  %v4739_v2 = vld [vmem:[%s5923_s5] ss:$0 sm:$0xff] }
 0x360   : > { %v3316_v13 = vpop.f32.mrf.mxu0 }
 0x361   : > { %v3711_v17 = vadd.f32 %v5660_v60, %v3671_v1  ;;  %v3096_v26 = vadd.f32 %v3054_v0, %v2703_v36 }
 0x362   : > { %v3632_v57 = vpop.f32.mrf.mxu1 }
 0x363   : > { %3747 = vst [vmem:[%s5671_s17 + $0xf8] sm:$0xff] %v3711_v17  ;;  %v3356_v46 = vadd.f32 %v3314_v61, %v3096_v26 }
 0x365   : > { %v3396_v31 = vadd.f32 %v4738_v6, %v3356_v46 }
 0x366   : > { %v2663_v10 = vpop.f32.mrf.mxu2 }
 0x367   : > { %v3056_v39 = vpop.f32.mrf.mxu3  ;;  %v3672_v42 = vadd.f32 %v3630_v28, %v3396_v31  ;;  %v2704_v29 = vadd.f32 %v2663_v10, %v5628_v24 }
 0x368   : > { %v3319_v41 = vpop.f32.mrf.mxu0 }
 0x369   : > { %v3712_v60 = vadd.f32 %v4739_v2, %v3672_v42  ;;  %v3097_v45 = vadd.f32 %v3056_v39, %v2704_v29 }
 0x36a   : > { %v3635_v43 = vpop.f32.mrf.mxu1 }
 0x36b   : > { %3748 = vst [vmem:[%s5671_s17 + $0x100] sm:$0xff] %v3712_v60  ;;  %v3357_v56 = vadd.f32 %v3316_v13, %v3097_v45 }
 0x36d   : > { %v3397_v35 = vadd.f32 %v4738_v6, %v3357_v56 }
 0x36e   : > { %v2666_v50 = vpop.f32.mrf.mxu2 }
 0x36f   : > { %v3059_v47 = vpop.f32.mrf.mxu3  ;;  %v3673_v49 = vadd.f32 %v3632_v57, %v3397_v35  ;;  %v2705_v63 = vadd.f32 %v2666_v50, %v5632_v33 }
 0x370   : > { %v3321_v18 = vpop.f32.mrf.mxu0 }
 0x371   : > { %v3713_v23 = vadd.f32 %v4739_v2, %v3673_v49  ;;  %v3098_v55 = vadd.f32 %v3059_v47, %v2705_v63 }
 0x372   : > { %v3637_v33 = vpop.f32.mrf.mxu1 }
 0x373   : > { %3749 = vst [vmem:[%s5671_s17 + $0x108] sm:$0xff] %v3713_v23  ;;  %v3358_v24 = vadd.f32 %v3319_v41, %v3098_v55 }
 0x375   : > { %v3398_v8 = vadd.f32 %v4738_v6, %v3358_v24 }
 0x376   : > { %v2668_v59 = vpop.f32.mrf.mxu2 }
 0x377   : > { %v3674_v14 = vadd.f32 %v3635_v43, %v3398_v8  ;;  %v2706_v38 = vadd.f32 %v2668_v59, %v5647_v4  ;;  %v3061_v34 = vpop.f32.mrf.mxu3 }
 0x379   : > { %v3714_v27 = vadd.f32 %v4739_v2, %v3674_v14  ;;  %v3099_v7 = vadd.f32 %v3061_v34, %v2706_v38 }
 0x37b   : > { %3750 = vst [vmem:[%s5671_s17 + $0x110] sm:$0xff] %v3714_v27  ;;  %v3359_v30 = vadd.f32 %v3321_v18, %v3099_v7 }
 0x37d   : > { %v3399_v3 = vadd.f32 %v4738_v6, %v3359_v30 }
 0x37f   : > { %v3675_v51 = vadd.f32 %v3637_v33, %v3399_v3 }
 0x381   : > { %v3715_v19 = vadd.f32 %v4739_v2, %v3675_v51 }
 0x383   : > { %3751 = vst [vmem:[%s5671_s17 + $0x118] sm:$0x3f] %v3715_v19 }
 0x384 PF: > { %s16_s21 = sadd.s32 1, %s4751_s21  }
 0x385   : > { %p13_p4 = scmp.ge.s32.totalorder %s16_s21, 4  }
 0x387   :  { %15 = sbr.rel (!%p13_p4) target bundleno = 1 (0x1), region = 85 }

</bundles_post_ra>
